<compile_context>
chip_gen: v6e
topology: v6e:2x2x1
jax: 0.10.0
libtpu: 0.0.40
codegen_flags: <defaults>
</compile_context>

<pallas_src>
import math
import functools

import jax
import jax.numpy as jnp
from jax.experimental import pallas as pl
from jax.experimental.pallas import tpu as pltpu

CONFIG = {"n_embd": 1024, "n_head": 8, "n_layer": 8, "dropout": 0.0,
          "vocab_size": 50257, "ctx_len": 1024, "bias": True}


def _gelu_tanh(x):
    # GELU with tanh approximation (matches torch.nn.GELU(approximate='tanh')).
    # Keep in f32: tanh runs on the EUP (its own bundle slot), and on v5e the
    # VPU/EUP have no bf16 path anyway.
    c = math.sqrt(2.0 / math.pi)
    return 0.5 * x * (1.0 + jnp.tanh(c * (x + 0.044715 * x * x * x)))


def _round_up(n, m):
    return ((n + m - 1) // m) * m


def _mlp_kernel(x_ref, w1_ref, b1_ref, w2_ref, b2_ref, o_ref, *scratch):
    # Grid = (M tiles ['parallel'], hidden chunks ['arbitrary' reduction]).
    # If no scratch is passed, accumulate directly into the resident f32 output
    # block (its index_map ignores the reduction axis, so it stays in VMEM).
    acc_ref = scratch[0] if scratch else o_ref
    j = pl.program_id(1)

    @pl.when(j == 0)
    def _():
        # Initialize the accumulator with the output-projection bias.
        acc_ref[...] = jnp.broadcast_to(
            b2_ref[...].astype(jnp.float32), acc_ref.shape
        ).astype(acc_ref.dtype)

    # First linear (this hidden chunk) + bias; bf16 operands, f32 accumulate.
    h = jnp.dot(x_ref[...], w1_ref[...], preferred_element_type=jnp.float32)
    h = h + b1_ref[...].astype(jnp.float32)

    # GELU (tanh approximation), f32.
    g = _gelu_tanh(h)

    # Second linear: accumulate this chunk's contribution (bf16 on the MXU).
    acc_ref[...] += jnp.dot(
        g.astype(w2_ref.dtype), w2_ref[...], preferred_element_type=jnp.float32
    ).astype(acc_ref.dtype)

    if scratch:
        @pl.when(j == pl.num_programs(1) - 1)
        def _():
            o_ref[...] = acc_ref[...].astype(o_ref.dtype)


@functools.partial(jax.jit, static_argnames=("tm", "th"))
def mlp_pallas(x, w_fc, b_fc, w_proj, b_proj, *, tm=512, th=1024):
    """x: [B, T, D]; w_fc: [D, H]; b_fc: [H]; w_proj: [H, D]; b_proj: [D]."""
    B, T, D = x.shape
    H = w_fc.shape[1]
    th = min(th, H)
    assert H % th == 0, (H, th)
    assert D % 128 == 0, D

    M = B * T
    out_dtype = x.dtype

    # Row tiling: tile M with tm (padded to a multiple of 8 / tm as needed).
    tm_eff = min(tm, _round_up(M, 8))
    M_pad = _round_up(M, tm_eff)

    # Cast MXU operands to bf16 (halves weight-streaming HBM bytes);
    # biases and all accumulation stay f32.
    compute_dtype = jnp.bfloat16
    x2 = x.reshape(M, D).astype(compute_dtype)
    if M_pad != M:
        x2 = jnp.pad(x2, ((0, M_pad - M), (0, 0)))
    w1 = w_fc.astype(compute_dtype)
    w2 = w_proj.astype(compute_dtype)
    b1 = b_fc.reshape(1, H).astype(jnp.float32)
    b2 = b_proj.reshape(1, D).astype(jnp.float32)

    # Only keep a separate f32 accumulator scratch when the output dtype can't
    # hold the partial sums itself.
    use_scratch = out_dtype != jnp.float32
    scratch_shapes = [pltpu.VMEM((tm_eff, D), jnp.float32)] if use_scratch else []

    grid = (M_pad // tm_eff, H // th)

    bytes_in = (x2.size * x2.dtype.itemsize + w1.size * w1.dtype.itemsize
                + w2.size * w2.dtype.itemsize + b1.size * 4 + b2.size * 4)
    cost = pl.CostEstimate(
        flops=4 * M_pad * D * H,
        transcendentals=M_pad * H,
        bytes_accessed=bytes_in + M_pad * D * jnp.dtype(out_dtype).itemsize,
    )

    out = pl.pallas_call(
        _mlp_kernel,
        out_shape=jax.ShapeDtypeStruct((M_pad, D), out_dtype),
        grid_spec=pltpu.PrefetchScalarGridSpec(
            num_scalar_prefetch=0,
            grid=grid,
            in_specs=[
                pl.BlockSpec((tm_eff, D), lambda i, j: (i, 0)),  # x row tile
                pl.BlockSpec((D, th), lambda i, j: (0, j)),      # W_fc chunk
                pl.BlockSpec((1, th), lambda i, j: (0, j)),      # b_fc chunk
                pl.BlockSpec((th, D), lambda i, j: (j, 0)),      # W_proj chunk
                pl.BlockSpec((1, D), lambda i, j: (0, 0)),       # b_proj
            ],
            out_specs=pl.BlockSpec((tm_eff, D), lambda i, j: (i, 0)),
            scratch_shapes=scratch_shapes,
        ),
        compiler_params=pltpu.CompilerParams(
            # Row tiles shard across TensorCores (v7x megacore); the hidden
            # axis is the reduction and must stay 'arbitrary' (innermost).
            dimension_semantics=("parallel", "arbitrary"),
            vmem_limit_bytes=32 * 1024 * 1024,
        ),
        cost_estimate=cost,
    )(x2, w1, b1, w2, b2)

    if M_pad != M:
        out = out[:M]
    return out.reshape(B, T, D)

# TODO(synk): optional fp8 weight streaming on v7x (MXU fp8 path) left out; it
# needs per-channel scales and accuracy validation.


def mlp_reference(x, w_fc, b_fc, w_proj, b_proj, compute_dtype=jnp.float32):
    B, T, D = x.shape
    xc = x.reshape(-1, D).astype(compute_dtype)
    h = jnp.dot(xc, w_fc.astype(compute_dtype),
                preferred_element_type=jnp.float32) + b_fc.astype(jnp.float32)
    g = _gelu_tanh(h)
    y = jnp.dot(g.astype(compute_dtype), w_proj.astype(compute_dtype),
                preferred_element_type=jnp.float32) + b_proj.astype(jnp.float32)
    return y.reshape(B, T, D).astype(x.dtype)


if __name__ == "__main__":
    D = CONFIG["n_embd"]        # 1024
    H = 4 * D                   # 4096
    B, T = 2, 8                 # small batch / seq

    key = jax.random.PRNGKey(0)
    kx, k1, k2, k3, k4 = jax.random.split(key, 5)

    # Deterministic parameter init (PyTorch Linear weights are [out, in];
    # we materialize them directly transposed as [in, out]).
    w_fc = jax.random.normal(k1, (D, H), dtype=jnp.float32) * (1.0 / math.sqrt(D))
    b_fc = jax.random.normal(k2, (H,), dtype=jnp.float32) * 0.01
    w_proj = jax.random.normal(k3, (H, D), dtype=jnp.float32) * (1.0 / math.sqrt(H))
    b_proj = jax.random.normal(k4, (D,), dtype=jnp.float32) * 0.01

    x = jax.random.normal(kx, (B, T, D), dtype=jnp.float32)

    y = mlp_pallas(x, w_fc, b_fc, w_proj, b_proj)
    y = jax.block_until_ready(y)
    assert y.shape == (B, T, D)
    assert y.dtype == x.dtype

    # Tight check against a reference using the same bf16 MXU operands.
    y_bf16_ref = mlp_reference(x, w_fc, b_fc, w_proj, b_proj,
                               compute_dtype=jnp.bfloat16)
    err_bf16 = float(jnp.max(jnp.abs(y - y_bf16_ref)))
    assert jnp.allclose(y, y_bf16_ref, atol=1e-2, rtol=1e-2), err_bf16

    # Loose sanity check against the pure-f32 reference (bf16 cast error only).
    y_f32_ref = mlp_reference(x, w_fc, b_fc, w_proj, b_proj,
                              compute_dtype=jnp.float32)
    err_f32 = float(jnp.max(jnp.abs(y - y_f32_ref)))
    assert jnp.allclose(y, y_f32_ref, atol=1e-1, rtol=1e-1), err_f32

    print("KERNEL_OK")
</pallas_src>

<mosaic_0001>
module attributes {stable_mosaic.version = 11 : i64} {
  func.func @_mlp_kernel(%arg0: i32, %arg1: i32, %arg2: memref<16x1024xbf16, #tpu.memory_space<vmem>>, %arg3: memref<1024x1024xbf16, #tpu.memory_space<vmem>>, %arg4: memref<1x1024xf32, #tpu.memory_space<vmem>>, %arg5: memref<1024x1024xbf16, #tpu.memory_space<vmem>>, %arg6: memref<1x1024xf32, #tpu.memory_space<vmem>>, %arg7: memref<16x1024xf32, #tpu.memory_space<vmem>>) attributes {dimension_semantics = [#tpu.dimension_semantics<parallel>, #tpu.dimension_semantics<arbitrary>], iteration_bounds = array<i64: 1, 4>, scalar_prefetch = 0 : i64, scratch_operands = 0 : i64, tpu.core_type = #tpu.core_type<tc>, window_params = [{transform_indices = @transform_0, window_bounds = array<i64: 16, 1024>}, {transform_indices = @transform_1, window_bounds = array<i64: 1024, 1024>}, {transform_indices = @transform_2, window_bounds = array<i64: 1, 1024>}, {transform_indices = @transform_3, window_bounds = array<i64: 1024, 1024>}, {pipeline_mode = #tpu.pipeline_mode<synchronous>, transform_indices = @transform_4, window_bounds = array<i64: 1, 1024>}, {transform_indices = @transform_5, window_bounds = array<i64: 16, 1024>}]} {
    %c0_i32 = arith.constant 0 : i32
    %0 = arith.cmpi eq, %arg1, %c0_i32 : i32
    %1 = arith.extui %0 : i1 to i32
    %c0_i32_0 = arith.constant 0 : i32
    %2 = arith.cmpi ne, %1, %c0_i32_0 : i32
    scf.if %2 {
      %c0_17 = arith.constant 0 : index
      %c0_18 = arith.constant 0 : index
      %28 = vector.load %arg6[%c0_17, %c0_18] : memref<1x1024xf32, #tpu.memory_space<vmem>>, vector<1x1024xf32>
      %29 = vector.shape_cast %28 : vector<1x1024xf32> to vector<1x1024xf32>
      %30 = vector.broadcast %29 : vector<1x1024xf32> to vector<16x1024xf32>
      %c0_19 = arith.constant 0 : index
      %c0_20 = arith.constant 0 : index
      %31 = vector.load %arg7[%c0_19, %c0_20] : memref<16x1024xf32, #tpu.memory_space<vmem>>, vector<16x1024xf32>
      tpu.vector_store %arg7[%c0_19, %c0_20], %30 {strides = array<i32>} : memref<16x1024xf32, #tpu.memory_space<vmem>>, vector<16x1024xf32>,
    } else {
    }
    %c0 = arith.constant 0 : index
    %c0_1 = arith.constant 0 : index
    %3 = vector.load %arg2[%c0, %c0_1] : memref<16x1024xbf16, #tpu.memory_space<vmem>>, vector<16x1024xbf16>
    %c0_2 = arith.constant 0 : index
    %c0_3 = arith.constant 0 : index
    %4 = vector.load %arg3[%c0_2, %c0_3] : memref<1024x1024xbf16, #tpu.memory_space<vmem>>, vector<1024x1024xbf16>
    %cst = arith.constant dense<0.000000e+00> : vector<16x1024xf32>
    %5 = tpu.matmul %3, %4, %cst {dimension_numbers = #tpu.dot_dimension_numbers<[1], [0], [0], [1], [0, 0, 1, 1], [], []>} : vector<16x1024xbf16>, vector<1024x1024xbf16>, vector<16x1024xf32> -> vector<16x1024xf32>
    %c0_4 = arith.constant 0 : index
    %c0_5 = arith.constant 0 : index
    %6 = vector.load %arg4[%c0_4, %c0_5] : memref<1x1024xf32, #tpu.memory_space<vmem>>, vector<1x1024xf32>
    %7 = vector.broadcast %6 : vector<1x1024xf32> to vector<16x1024xf32>
    %8 = arith.addf %5, %7 : vector<16x1024xf32>
    %cst_6 = arith.constant 5.000000e-01 : f32
    %9 = vector.broadcast %cst_6 : f32 to vector<16x1024xf32>
    %10 = arith.mulf %9, %8 : vector<16x1024xf32>
    %cst_7 = arith.constant 4.471500e-02 : f32
    %11 = vector.broadcast %cst_7 : f32 to vector<16x1024xf32>
    %12 = arith.mulf %11, %8 : vector<16x1024xf32>
    %13 = arith.mulf %12, %8 : vector<16x1024xf32>
    %14 = arith.mulf %13, %8 : vector<16x1024xf32>
    %15 = arith.addf %8, %14 : vector<16x1024xf32>
    %cst_8 = arith.constant 0.797884583 : f32
    %16 = vector.broadcast %cst_8 : f32 to vector<16x1024xf32>
    %17 = arith.mulf %16, %15 : vector<16x1024xf32>
    %18 = math.tanh %17 : vector<16x1024xf32>
    %cst_9 = arith.constant 1.000000e+00 : f32
    %19 = vector.broadcast %cst_9 : f32 to vector<16x1024xf32>
    %20 = arith.addf %19, %18 : vector<16x1024xf32>
    %21 = arith.mulf %10, %20 : vector<16x1024xf32>
    %c0_10 = arith.constant 0 : index
    %c0_11 = arith.constant 0 : index
    %22 = vector.load %arg7[%c0_10, %c0_11] : memref<16x1024xf32, #tpu.memory_space<vmem>>, vector<16x1024xf32>
    %23 = arith.truncf %21 : vector<16x1024xf32> to vector<16x1024xbf16>
    %c0_12 = arith.constant 0 : index
    %c0_13 = arith.constant 0 : index
    %24 = vector.load %arg5[%c0_12, %c0_13] : memref<1024x1024xbf16, #tpu.memory_space<vmem>>, vector<1024x1024xbf16>
    %cst_14 = arith.constant dense<0.000000e+00> : vector<16x1024xf32>
    %25 = tpu.matmul %23, %24, %cst_14 {dimension_numbers = #tpu.dot_dimension_numbers<[1], [0], [0], [1], [0, 0, 1, 1], [], []>} : vector<16x1024xbf16>, vector<1024x1024xbf16>, vector<16x1024xf32> -> vector<16x1024xf32>
    %26 = arith.addf %22, %25 : vector<16x1024xf32>
    %c0_15 = arith.constant 0 : index
    %c0_16 = arith.constant 0 : index
    %27 = vector.load %arg7[%c0_15, %c0_16] : memref<16x1024xf32, #tpu.memory_space<vmem>>, vector<16x1024xf32>
    tpu.vector_store %arg7[%c0_15, %c0_16], %26 {strides = array<i32>} : memref<16x1024xf32, #tpu.memory_space<vmem>>, vector<16x1024xf32>,
    return
  }
  func.func @transform_0(%arg0: i32, %arg1: i32) -> (i32, i32) {
    %c0_i32 = arith.constant 0 : i32
    %c0_i32_0 = arith.constant 0 : i32
    return %arg0, %c0_i32 : i32, i32
  }
  func.func @transform_1(%arg0: i32, %arg1: i32) -> (i32, i32) {
    %c0_i32 = arith.constant 0 : i32
    %c0_i32_0 = arith.constant 0 : i32
    return %c0_i32, %arg1 : i32, i32
  }
  func.func @transform_2(%arg0: i32, %arg1: i32) -> (i32, i32) {
    %c0_i32 = arith.constant 0 : i32
    %c0_i32_0 = arith.constant 0 : i32
    return %c0_i32, %arg1 : i32, i32
  }
  func.func @transform_3(%arg0: i32, %arg1: i32) -> (i32, i32) {
    %c0_i32 = arith.constant 0 : i32
    %c0_i32_0 = arith.constant 0 : i32
    return %arg1, %c0_i32 : i32, i32
  }
  func.func @transform_4(%arg0: i32, %arg1: i32) -> (i32, i32) {
    %c0_i32 = arith.constant 0 : i32
    %c0_i32_0 = arith.constant 0 : i32
    %c0_i32_1 = arith.constant 0 : i32
    return %c0_i32, %c0_i32_0 : i32, i32
  }
  func.func @transform_5(%arg0: i32, %arg1: i32) -> (i32, i32) {
    %c0_i32 = arith.constant 0 : i32
    %c0_i32_0 = arith.constant 0 : i32
    return %arg0, %c0_i32 : i32, i32
  }
}

</mosaic_0001>

<bundles_post_ra>
// kernel: mlp_pallas.1
= control target key start
LH: loop header
LB: loop body
LE: loop exit
PB: predicated region body
PF: predicated region fallthrough
CT: control target
= control target key end

     0   :  { %10 = vsyncpa [#allocation4], 0  ;;  %s10554_s18 = smov 0   ;;  %s10556_s19 = smov 0   ;;  %s13073_s0 = inlined_call_operand.vmem [shape: bf16[16,1024], index: 0, kind: input, shape index: {}]   ;;  %s13074_s1 = inlined_call_operand.vmem [shape: bf16[1024,4096], index: 1, kind: input, shape index: {}]   ;;  %s13075_s2 = inlined_call_operand.vmem [shape: f32[1,4096], index: 2, kind: input, shape index: {}]   ;;  %s13076_s3 = inlined_call_operand.vmem [shape: bf16[4096,1024], index: 3, kind: input, shape index: {}]   ;;  %s13077_s4 = inlined_call_operand.vmem [shape: f32[1,1024], index: 4, kind: input, shape index: {}]   ;;  %s13078_s5 = inlined_call_operand.hbm [shape: f32[16,1024], index: 5, kind: output, shape index: {}]  }
   0x1   :  { %s10558_s20 = smov 0   ;;  %s10560_s21 = smov 0  }
   0x2   :  { %s10562_s22 = smov 0  }
   0x3 LB: > { %s9318_s23 = sadd.s32 4294967295, %s10519_s22   ;;  %s25_s24 = sadd.s32 1, %s10515_s21  ;;  %s10519_s22 = sphi %s10562_s22, %s16_s22   ;;  %s10515_s21 = sphi %s10560_s21, %s13083_s21   ;;  %s10511_s20 = sphi %s10558_s20, %s13082_s20   ;;  %s10507_s19 = sphi %s10556_s19, %s13081_s19   ;;  %s10503_s18 = sphi %s10554_s18, %s13080_s18  }
   0x4   : > { %p26_p0 = scmp.ge.s32.totalorder %s25_s24, 4  ;;  %p68_p1 = scmp.ne.s32.totalorder %s10507_s19, %s10503_s18 }
   0x5   : > { %p69_p2 = scmp.eq.s32.totalorder %s10519_s22, 0  ;;  %s61_s26 = sadd.s32 1, %s10507_s19 }
   0x6   : > { %s13085_s24 = smov (%p26_p0, %s25_s24), 0  ;;  %p9321_p5 = scmp.ge.s32.totalorder %s10519_s22, 4 }
   0x7   : > { %p70_p3 = por %p69_p2, %p68_p1  ;;  %s58_s25 = ssub.s32 %s10515_s21, %s13085_s24 }
   0x8   : > { %p59_p4 = scmp.eq.s32.totalorder %s58_s25, 0  ;;  %206 = sbr.rel (%p9321_p5) target bundleno = 273 (0x111), region = 24 }
   0xa   : > { %s10590_s27 = scalar_select %p59_p4, %s10507_s19, %s61_s26  }
   0xd   : > { %209 = sbr.rel (!%p70_p3) target bundleno = 273 (0x111), region = 28  ;;  %s211_s28 = sand.u32 (%p70_p3), 1, %s10507_s19  }
   0xe   : > { %s10368_s29 = sshll.u32 (%p70_p3), %s10515_s21, 5  ;;  %s9322_s30 = sshll.u32 (%p70_p3), %s211_s28, 12 }
   0xf   : > { %s10598_s8 = scalar_lea.vmem (%p70_p3), %s13074_s1, %s10368_s29  ;;  %s10603_s9 = scalar_lea.vmem (%p70_p3), [#allocation2], %s9322_s30 }
  0x10   : > { %v229_v0 = vld [vmem:[%s10598_s8] sm:$0xff] (%p70_p3)  ;;  %v231_v1 = vld [vmem:[%s10598_s8 + $0x8] sm:$0xff] (%p70_p3)  ;;  %v233_v2 = vld [vmem:[%s10598_s8 + $0x10] sm:$0xff] (%p70_p3) }
  0x11   : > { %230 = vst [vmem:[%s10603_s9] sm:$0xff] (%p70_p3), %v229_v0  ;;  %232 = vst [vmem:[%s10603_s9 + $0x8] sm:$0xff] (%p70_p3), %v231_v1  ;;  %v235_v3 = vld [vmem:[%s10598_s8 + $0x18] sm:$0xff] (%p70_p3)  ;;  %v237_v4 = vld [vmem:[%s10598_s8 + $0x80] sm:$0xff] (%p70_p3) }
  0x12   : > { %234 = vst [vmem:[%s10603_s9 + $0x10] sm:$0xff] %v233_v2  ;;  %v239_v5 = vld [vmem:[%s10598_s8 + $0x88] sm:$0xff]  ;;  %236 = vst [vmem:[%s10603_s9 + $0x18] sm:$0xff] %v235_v3  ;;  %v241_v6 = vld [vmem:[%s10598_s8 + $0x90] sm:$0xff] }
  0x13   : > { %238 = vst [vmem:[%s10603_s9 + $0x20] sm:$0xff] %v237_v4  ;;  %240 = vst [vmem:[%s10603_s9 + $0x28] sm:$0xff] %v239_v5  ;;  %v243_v7 = vld [vmem:[%s10598_s8 + $0x98] sm:$0xff]  ;;  %v245_v8 = vld [vmem:[%s10598_s8 + $0x100] sm:$0xff] }
  0x14   : > { %242 = vst [vmem:[%s10603_s9 + $0x30] sm:$0xff] %v241_v6  ;;  %244 = vst [vmem:[%s10603_s9 + $0x38] sm:$0xff] %v243_v7  ;;  %v247_v9 = vld [vmem:[%s10598_s8 + $0x108] sm:$0xff]  ;;  %v249_v10 = vld [vmem:[%s10598_s8 + $0x110] sm:$0xff] }
  0x15   : > { %246 = vst [vmem:[%s10603_s9 + $0x40] sm:$0xff] %v245_v8  ;;  %v251_v11 = vld [vmem:[%s10598_s8 + $0x118] sm:$0xff]  ;;  %248 = vst [vmem:[%s10603_s9 + $0x48] sm:$0xff] %v247_v9  ;;  %v253_v12 = vld [vmem:[%s10598_s8 + $0x180] sm:$0xff] }
  0x16   : > { %250 = vst [vmem:[%s10603_s9 + $0x50] sm:$0xff] %v249_v10  ;;  %252 = vst [vmem:[%s10603_s9 + $0x58] sm:$0xff] %v251_v11  ;;  %v255_v13 = vld [vmem:[%s10598_s8 + $0x188] sm:$0xff]  ;;  %v257_v14 = vld [vmem:[%s10598_s8 + $0x190] sm:$0xff] }
  0x17   : > { %254 = vst [vmem:[%s10603_s9 + $0x60] sm:$0xff] %v253_v12  ;;  %256 = vst [vmem:[%s10603_s9 + $0x68] sm:$0xff] %v255_v13  ;;  %v259_v15 = vld [vmem:[%s10598_s8 + $0x198] sm:$0xff]  ;;  %v261_v16 = vld [vmem:[%s10598_s8 + $0x200] sm:$0xff] }
  0x18   : > { %258 = vst [vmem:[%s10603_s9 + $0x70] sm:$0xff] %v257_v14  ;;  %v263_v17 = vld [vmem:[%s10598_s8 + $0x208] sm:$0xff]  ;;  %260 = vst [vmem:[%s10603_s9 + $0x78] sm:$0xff] %v259_v15  ;;  %v265_v18 = vld [vmem:[%s10598_s8 + $0x210] sm:$0xff] }
  0x19   : > { %262 = vst [vmem:[%s10603_s9 + $0x80] sm:$0xff] %v261_v16  ;;  %264 = vst [vmem:[%s10603_s9 + $0x88] sm:$0xff] %v263_v17  ;;  %v267_v19 = vld [vmem:[%s10598_s8 + $0x218] sm:$0xff]  ;;  %v269_v20 = vld [vmem:[%s10598_s8 + $0x280] sm:$0xff] }
  0x1a   : > { %266 = vst [vmem:[%s10603_s9 + $0x90] sm:$0xff] %v265_v18  ;;  %268 = vst [vmem:[%s10603_s9 + $0x98] sm:$0xff] %v267_v19  ;;  %v271_v21 = vld [vmem:[%s10598_s8 + $0x288] sm:$0xff]  ;;  %v273_v22 = vld [vmem:[%s10598_s8 + $0x290] sm:$0xff] }
  0x1b   : > { %270 = vst [vmem:[%s10603_s9 + $0xa0] sm:$0xff] %v269_v20  ;;  %v275_v23 = vld [vmem:[%s10598_s8 + $0x298] sm:$0xff]  ;;  %272 = vst [vmem:[%s10603_s9 + $0xa8] sm:$0xff] %v271_v21  ;;  %v277_v24 = vld [vmem:[%s10598_s8 + $0x300] sm:$0xff] }
  0x1c   : > { %274 = vst [vmem:[%s10603_s9 + $0xb0] sm:$0xff] %v273_v22  ;;  %276 = vst [vmem:[%s10603_s9 + $0xb8] sm:$0xff] %v275_v23  ;;  %v279_v25 = vld [vmem:[%s10598_s8 + $0x308] sm:$0xff]  ;;  %v281_v26 = vld [vmem:[%s10598_s8 + $0x310] sm:$0xff] }
  0x1d   : > { %278 = vst [vmem:[%s10603_s9 + $0xc0] sm:$0xff] %v277_v24  ;;  %280 = vst [vmem:[%s10603_s9 + $0xc8] sm:$0xff] %v279_v25  ;;  %v283_v27 = vld [vmem:[%s10598_s8 + $0x318] sm:$0xff]  ;;  %v285_v28 = vld [vmem:[%s10598_s8 + $0x380] sm:$0xff] }
  0x1e   : > { %282 = vst [vmem:[%s10603_s9 + $0xd0] sm:$0xff] %v281_v26  ;;  %v287_v29 = vld [vmem:[%s10598_s8 + $0x388] sm:$0xff]  ;;  %284 = vst [vmem:[%s10603_s9 + $0xd8] sm:$0xff] %v283_v27  ;;  %v289_v30 = vld [vmem:[%s10598_s8 + $0x390] sm:$0xff] }
  0x1f   : > { %286 = vst [vmem:[%s10603_s9 + $0xe0] sm:$0xff] %v285_v28  ;;  %288 = vst [vmem:[%s10603_s9 + $0xe8] sm:$0xff] %v287_v29  ;;  %v291_v31 = vld [vmem:[%s10598_s8 + $0x398] sm:$0xff]  ;;  %v293_v32 = vld [vmem:[%s10598_s8 + $0x400] sm:$0xff] }
  0x20   : > { %290 = vst [vmem:[%s10603_s9 + $0xf0] sm:$0xff] %v289_v30  ;;  %292 = vst [vmem:[%s10603_s9 + $0xf8] sm:$0xff] %v291_v31  ;;  %v295_v33 = vld [vmem:[%s10598_s8 + $0x408] sm:$0xff]  ;;  %v297_v34 = vld [vmem:[%s10598_s8 + $0x410] sm:$0xff] }
  0x21   : > { %294 = vst [vmem:[%s10603_s9 + $0x100] sm:$0xff] %v293_v32  ;;  %v299_v35 = vld [vmem:[%s10598_s8 + $0x418] sm:$0xff]  ;;  %296 = vst [vmem:[%s10603_s9 + $0x108] sm:$0xff] %v295_v33  ;;  %v301_v36 = vld [vmem:[%s10598_s8 + $0x480] sm:$0xff] }
  0x22   : > { %298 = vst [vmem:[%s10603_s9 + $0x110] sm:$0xff] %v297_v34  ;;  %300 = vst [vmem:[%s10603_s9 + $0x118] sm:$0xff] %v299_v35  ;;  %v303_v37 = vld [vmem:[%s10598_s8 + $0x488] sm:$0xff]  ;;  %v305_v38 = vld [vmem:[%s10598_s8 + $0x490] sm:$0xff] }
  0x23   : > { %302 = vst [vmem:[%s10603_s9 + $0x120] sm:$0xff] %v301_v36  ;;  %304 = vst [vmem:[%s10603_s9 + $0x128] sm:$0xff] %v303_v37  ;;  %v307_v39 = vld [vmem:[%s10598_s8 + $0x498] sm:$0xff]  ;;  %v309_v40 = vld [vmem:[%s10598_s8 + $0x500] sm:$0xff] }
  0x24   : > { %306 = vst [vmem:[%s10603_s9 + $0x130] sm:$0xff] %v305_v38  ;;  %v311_v41 = vld [vmem:[%s10598_s8 + $0x508] sm:$0xff]  ;;  %308 = vst [vmem:[%s10603_s9 + $0x138] sm:$0xff] %v307_v39  ;;  %v313_v42 = vld [vmem:[%s10598_s8 + $0x510] sm:$0xff] }
  0x25   : > { %310 = vst [vmem:[%s10603_s9 + $0x140] sm:$0xff] %v309_v40  ;;  %312 = vst [vmem:[%s10603_s9 + $0x148] sm:$0xff] %v311_v41  ;;  %v315_v43 = vld [vmem:[%s10598_s8 + $0x518] sm:$0xff]  ;;  %v317_v44 = vld [vmem:[%s10598_s8 + $0x580] sm:$0xff] }
  0x26   : > { %314 = vst [vmem:[%s10603_s9 + $0x150] sm:$0xff] %v313_v42  ;;  %316 = vst [vmem:[%s10603_s9 + $0x158] sm:$0xff] %v315_v43  ;;  %v319_v45 = vld [vmem:[%s10598_s8 + $0x588] sm:$0xff]  ;;  %v321_v46 = vld [vmem:[%s10598_s8 + $0x590] sm:$0xff] }
  0x27   : > { %318 = vst [vmem:[%s10603_s9 + $0x160] sm:$0xff] %v317_v44  ;;  %v323_v47 = vld [vmem:[%s10598_s8 + $0x598] sm:$0xff]  ;;  %320 = vst [vmem:[%s10603_s9 + $0x168] sm:$0xff] %v319_v45  ;;  %v325_v48 = vld [vmem:[%s10598_s8 + $0x600] sm:$0xff] }
  0x28   : > { %322 = vst [vmem:[%s10603_s9 + $0x170] sm:$0xff] %v321_v46  ;;  %324 = vst [vmem:[%s10603_s9 + $0x178] sm:$0xff] %v323_v47  ;;  %v327_v49 = vld [vmem:[%s10598_s8 + $0x608] sm:$0xff]  ;;  %v329_v50 = vld [vmem:[%s10598_s8 + $0x610] sm:$0xff] }
  0x29   : > { %326 = vst [vmem:[%s10603_s9 + $0x180] sm:$0xff] %v325_v48  ;;  %328 = vst [vmem:[%s10603_s9 + $0x188] sm:$0xff] %v327_v49  ;;  %v331_v51 = vld [vmem:[%s10598_s8 + $0x618] sm:$0xff]  ;;  %v333_v52 = vld [vmem:[%s10598_s8 + $0x680] sm:$0xff] }
  0x2a   : > { %330 = vst [vmem:[%s10603_s9 + $0x190] sm:$0xff] %v329_v50  ;;  %v335_v53 = vld [vmem:[%s10598_s8 + $0x688] sm:$0xff]  ;;  %332 = vst [vmem:[%s10603_s9 + $0x198] sm:$0xff] %v331_v51  ;;  %v337_v54 = vld [vmem:[%s10598_s8 + $0x690] sm:$0xff] }
  0x2b   : > { %334 = vst [vmem:[%s10603_s9 + $0x1a0] sm:$0xff] %v333_v52  ;;  %336 = vst [vmem:[%s10603_s9 + $0x1a8] sm:$0xff] %v335_v53  ;;  %v339_v55 = vld [vmem:[%s10598_s8 + $0x698] sm:$0xff]  ;;  %v341_v56 = vld [vmem:[%s10598_s8 + $0x700] sm:$0xff] }
  0x2c   : > { %338 = vst [vmem:[%s10603_s9 + $0x1b0] sm:$0xff] %v337_v54  ;;  %340 = vst [vmem:[%s10603_s9 + $0x1b8] sm:$0xff] %v339_v55  ;;  %v343_v57 = vld [vmem:[%s10598_s8 + $0x708] sm:$0xff]  ;;  %v345_v58 = vld [vmem:[%s10598_s8 + $0x710] sm:$0xff] }
  0x2d   : > { %342 = vst [vmem:[%s10603_s9 + $0x1c0] sm:$0xff] %v341_v56  ;;  %v347_v59 = vld [vmem:[%s10598_s8 + $0x718] sm:$0xff]  ;;  %344 = vst [vmem:[%s10603_s9 + $0x1c8] sm:$0xff] %v343_v57  ;;  %v349_v60 = vld [vmem:[%s10598_s8 + $0x780] sm:$0xff] }
  0x2e   : > { %346 = vst [vmem:[%s10603_s9 + $0x1d0] sm:$0xff] %v345_v58  ;;  %348 = vst [vmem:[%s10603_s9 + $0x1d8] sm:$0xff] %v347_v59  ;;  %v351_v61 = vld [vmem:[%s10598_s8 + $0x788] sm:$0xff]  ;;  %v353_v62 = vld [vmem:[%s10598_s8 + $0x790] sm:$0xff] }
  0x2f   : > { %350 = vst [vmem:[%s10603_s9 + $0x1e0] sm:$0xff] %v349_v60  ;;  %352 = vst [vmem:[%s10603_s9 + $0x1e8] sm:$0xff] %v351_v61  ;;  %v355_v63 = vld [vmem:[%s10598_s8 + $0x798] sm:$0xff]  ;;  %v357_v0 = vld [vmem:[%s10598_s8 + $0x800] sm:$0xff] }
  0x30   : > { %354 = vst [vmem:[%s10603_s9 + $0x1f0] sm:$0xff] %v353_v62  ;;  %v359_v1 = vld [vmem:[%s10598_s8 + $0x808] sm:$0xff]  ;;  %356 = vst [vmem:[%s10603_s9 + $0x1f8] sm:$0xff] %v355_v63  ;;  %v361_v2 = vld [vmem:[%s10598_s8 + $0x810] sm:$0xff] }
  0x31   : > { %358 = vst [vmem:[%s10603_s9 + $0x200] sm:$0xff] %v357_v0  ;;  %360 = vst [vmem:[%s10603_s9 + $0x208] sm:$0xff] %v359_v1  ;;  %v363_v3 = vld [vmem:[%s10598_s8 + $0x818] sm:$0xff]  ;;  %v365_v4 = vld [vmem:[%s10598_s8 + $0x880] sm:$0xff] }
  0x32   : > { %362 = vst [vmem:[%s10603_s9 + $0x210] sm:$0xff] %v361_v2  ;;  %364 = vst [vmem:[%s10603_s9 + $0x218] sm:$0xff] %v363_v3  ;;  %v367_v5 = vld [vmem:[%s10598_s8 + $0x888] sm:$0xff]  ;;  %v369_v6 = vld [vmem:[%s10598_s8 + $0x890] sm:$0xff] }
  0x33   : > { %366 = vst [vmem:[%s10603_s9 + $0x220] sm:$0xff] %v365_v4  ;;  %v371_v7 = vld [vmem:[%s10598_s8 + $0x898] sm:$0xff]  ;;  %368 = vst [vmem:[%s10603_s9 + $0x228] sm:$0xff] %v367_v5  ;;  %v373_v8 = vld [vmem:[%s10598_s8 + $0x900] sm:$0xff] }
  0x34   : > { %370 = vst [vmem:[%s10603_s9 + $0x230] sm:$0xff] %v369_v6  ;;  %372 = vst [vmem:[%s10603_s9 + $0x238] sm:$0xff] %v371_v7  ;;  %v375_v9 = vld [vmem:[%s10598_s8 + $0x908] sm:$0xff]  ;;  %v377_v10 = vld [vmem:[%s10598_s8 + $0x910] sm:$0xff] }
  0x35   : > { %374 = vst [vmem:[%s10603_s9 + $0x240] sm:$0xff] %v373_v8  ;;  %376 = vst [vmem:[%s10603_s9 + $0x248] sm:$0xff] %v375_v9  ;;  %v379_v11 = vld [vmem:[%s10598_s8 + $0x918] sm:$0xff]  ;;  %v381_v12 = vld [vmem:[%s10598_s8 + $0x980] sm:$0xff] }
  0x36   : > { %378 = vst [vmem:[%s10603_s9 + $0x250] sm:$0xff] %v377_v10  ;;  %v383_v13 = vld [vmem:[%s10598_s8 + $0x988] sm:$0xff]  ;;  %380 = vst [vmem:[%s10603_s9 + $0x258] sm:$0xff] %v379_v11  ;;  %v385_v14 = vld [vmem:[%s10598_s8 + $0x990] sm:$0xff] }
  0x37   : > { %382 = vst [vmem:[%s10603_s9 + $0x260] sm:$0xff] %v381_v12  ;;  %384 = vst [vmem:[%s10603_s9 + $0x268] sm:$0xff] %v383_v13  ;;  %v387_v15 = vld [vmem:[%s10598_s8 + $0x998] sm:$0xff]  ;;  %v389_v16 = vld [vmem:[%s10598_s8 + $0xa00] sm:$0xff] }
  0x38   : > { %386 = vst [vmem:[%s10603_s9 + $0x270] sm:$0xff] %v385_v14  ;;  %388 = vst [vmem:[%s10603_s9 + $0x278] sm:$0xff] %v387_v15  ;;  %v391_v17 = vld [vmem:[%s10598_s8 + $0xa08] sm:$0xff]  ;;  %v393_v18 = vld [vmem:[%s10598_s8 + $0xa10] sm:$0xff] }
  0x39   : > { %390 = vst [vmem:[%s10603_s9 + $0x280] sm:$0xff] %v389_v16  ;;  %v395_v19 = vld [vmem:[%s10598_s8 + $0xa18] sm:$0xff]  ;;  %392 = vst [vmem:[%s10603_s9 + $0x288] sm:$0xff] %v391_v17  ;;  %v397_v20 = vld [vmem:[%s10598_s8 + $0xa80] sm:$0xff] }
  0x3a   : > { %394 = vst [vmem:[%s10603_s9 + $0x290] sm:$0xff] %v393_v18  ;;  %396 = vst [vmem:[%s10603_s9 + $0x298] sm:$0xff] %v395_v19  ;;  %v399_v21 = vld [vmem:[%s10598_s8 + $0xa88] sm:$0xff]  ;;  %v401_v22 = vld [vmem:[%s10598_s8 + $0xa90] sm:$0xff] }
  0x3b   : > { %398 = vst [vmem:[%s10603_s9 + $0x2a0] sm:$0xff] %v397_v20  ;;  %400 = vst [vmem:[%s10603_s9 + $0x2a8] sm:$0xff] %v399_v21  ;;  %v403_v23 = vld [vmem:[%s10598_s8 + $0xa98] sm:$0xff]  ;;  %v405_v24 = vld [vmem:[%s10598_s8 + $0xb00] sm:$0xff] }
  0x3c   : > { %402 = vst [vmem:[%s10603_s9 + $0x2b0] sm:$0xff] %v401_v22  ;;  %v407_v25 = vld [vmem:[%s10598_s8 + $0xb08] sm:$0xff]  ;;  %404 = vst [vmem:[%s10603_s9 + $0x2b8] sm:$0xff] %v403_v23  ;;  %v409_v26 = vld [vmem:[%s10598_s8 + $0xb10] sm:$0xff] }
  0x3d   : > { %406 = vst [vmem:[%s10603_s9 + $0x2c0] sm:$0xff] %v405_v24  ;;  %408 = vst [vmem:[%s10603_s9 + $0x2c8] sm:$0xff] %v407_v25  ;;  %v411_v27 = vld [vmem:[%s10598_s8 + $0xb18] sm:$0xff]  ;;  %v413_v28 = vld [vmem:[%s10598_s8 + $0xb80] sm:$0xff] }
  0x3e   : > { %410 = vst [vmem:[%s10603_s9 + $0x2d0] sm:$0xff] %v409_v26  ;;  %412 = vst [vmem:[%s10603_s9 + $0x2d8] sm:$0xff] %v411_v27  ;;  %v415_v29 = vld [vmem:[%s10598_s8 + $0xb88] sm:$0xff]  ;;  %v417_v30 = vld [vmem:[%s10598_s8 + $0xb90] sm:$0xff] }
  0x3f   : > { %414 = vst [vmem:[%s10603_s9 + $0x2e0] sm:$0xff] %v413_v28  ;;  %v419_v31 = vld [vmem:[%s10598_s8 + $0xb98] sm:$0xff]  ;;  %416 = vst [vmem:[%s10603_s9 + $0x2e8] sm:$0xff] %v415_v29  ;;  %v421_v32 = vld [vmem:[%s10598_s8 + $0xc00] sm:$0xff] }
  0x40   : > { %418 = vst [vmem:[%s10603_s9 + $0x2f0] sm:$0xff] %v417_v30  ;;  %420 = vst [vmem:[%s10603_s9 + $0x2f8] sm:$0xff] %v419_v31  ;;  %v423_v33 = vld [vmem:[%s10598_s8 + $0xc08] sm:$0xff]  ;;  %v425_v34 = vld [vmem:[%s10598_s8 + $0xc10] sm:$0xff] }
  0x41   : > { %422 = vst [vmem:[%s10603_s9 + $0x300] sm:$0xff] %v421_v32  ;;  %424 = vst [vmem:[%s10603_s9 + $0x308] sm:$0xff] %v423_v33  ;;  %v427_v35 = vld [vmem:[%s10598_s8 + $0xc18] sm:$0xff]  ;;  %v429_v36 = vld [vmem:[%s10598_s8 + $0xc80] sm:$0xff] }
  0x42   : > { %426 = vst [vmem:[%s10603_s9 + $0x310] sm:$0xff] %v425_v34  ;;  %v431_v37 = vld [vmem:[%s10598_s8 + $0xc88] sm:$0xff]  ;;  %428 = vst [vmem:[%s10603_s9 + $0x318] sm:$0xff] %v427_v35  ;;  %v433_v38 = vld [vmem:[%s10598_s8 + $0xc90] sm:$0xff] }
  0x43   : > { %430 = vst [vmem:[%s10603_s9 + $0x320] sm:$0xff] %v429_v36  ;;  %432 = vst [vmem:[%s10603_s9 + $0x328] sm:$0xff] %v431_v37  ;;  %v435_v39 = vld [vmem:[%s10598_s8 + $0xc98] sm:$0xff]  ;;  %v437_v40 = vld [vmem:[%s10598_s8 + $0xd00] sm:$0xff] }
  0x44   : > { %434 = vst [vmem:[%s10603_s9 + $0x330] sm:$0xff] %v433_v38  ;;  %436 = vst [vmem:[%s10603_s9 + $0x338] sm:$0xff] %v435_v39  ;;  %v439_v41 = vld [vmem:[%s10598_s8 + $0xd08] sm:$0xff]  ;;  %v441_v42 = vld [vmem:[%s10598_s8 + $0xd10] sm:$0xff] }
  0x45   : > { %438 = vst [vmem:[%s10603_s9 + $0x340] sm:$0xff] %v437_v40  ;;  %v443_v43 = vld [vmem:[%s10598_s8 + $0xd18] sm:$0xff]  ;;  %440 = vst [vmem:[%s10603_s9 + $0x348] sm:$0xff] %v439_v41  ;;  %v445_v44 = vld [vmem:[%s10598_s8 + $0xd80] sm:$0xff] }
  0x46   : > { %442 = vst [vmem:[%s10603_s9 + $0x350] sm:$0xff] %v441_v42  ;;  %444 = vst [vmem:[%s10603_s9 + $0x358] sm:$0xff] %v443_v43  ;;  %v447_v45 = vld [vmem:[%s10598_s8 + $0xd88] sm:$0xff]  ;;  %v449_v46 = vld [vmem:[%s10598_s8 + $0xd90] sm:$0xff] }
  0x47   : > { %446 = vst [vmem:[%s10603_s9 + $0x360] sm:$0xff] %v445_v44  ;;  %448 = vst [vmem:[%s10603_s9 + $0x368] sm:$0xff] %v447_v45  ;;  %v451_v47 = vld [vmem:[%s10598_s8 + $0xd98] sm:$0xff]  ;;  %v453_v48 = vld [vmem:[%s10598_s8 + $0xe00] sm:$0xff] }
  0x48   : > { %450 = vst [vmem:[%s10603_s9 + $0x370] sm:$0xff] %v449_v46  ;;  %v455_v49 = vld [vmem:[%s10598_s8 + $0xe08] sm:$0xff]  ;;  %452 = vst [vmem:[%s10603_s9 + $0x378] sm:$0xff] %v451_v47  ;;  %v457_v50 = vld [vmem:[%s10598_s8 + $0xe10] sm:$0xff] }
  0x49   : > { %454 = vst [vmem:[%s10603_s9 + $0x380] sm:$0xff] %v453_v48  ;;  %456 = vst [vmem:[%s10603_s9 + $0x388] sm:$0xff] %v455_v49  ;;  %v459_v51 = vld [vmem:[%s10598_s8 + $0xe18] sm:$0xff]  ;;  %v461_v52 = vld [vmem:[%s10598_s8 + $0xe80] sm:$0xff] }
  0x4a   : > { %458 = vst [vmem:[%s10603_s9 + $0x390] sm:$0xff] %v457_v50  ;;  %460 = vst [vmem:[%s10603_s9 + $0x398] sm:$0xff] %v459_v51  ;;  %v463_v53 = vld [vmem:[%s10598_s8 + $0xe88] sm:$0xff]  ;;  %v465_v54 = vld [vmem:[%s10598_s8 + $0xe90] sm:$0xff] }
  0x4b   : > { %462 = vst [vmem:[%s10603_s9 + $0x3a0] sm:$0xff] %v461_v52  ;;  %v467_v55 = vld [vmem:[%s10598_s8 + $0xe98] sm:$0xff]  ;;  %464 = vst [vmem:[%s10603_s9 + $0x3a8] sm:$0xff] %v463_v53  ;;  %v469_v56 = vld [vmem:[%s10598_s8 + $0xf00] sm:$0xff] }
  0x4c   : > { %466 = vst [vmem:[%s10603_s9 + $0x3b0] sm:$0xff] %v465_v54  ;;  %468 = vst [vmem:[%s10603_s9 + $0x3b8] sm:$0xff] %v467_v55  ;;  %v471_v57 = vld [vmem:[%s10598_s8 + $0xf08] sm:$0xff]  ;;  %v473_v58 = vld [vmem:[%s10598_s8 + $0xf10] sm:$0xff] }
  0x4d   : > { %470 = vst [vmem:[%s10603_s9 + $0x3c0] sm:$0xff] %v469_v56  ;;  %472 = vst [vmem:[%s10603_s9 + $0x3c8] sm:$0xff] %v471_v57  ;;  %v475_v59 = vld [vmem:[%s10598_s8 + $0xf18] sm:$0xff]  ;;  %v477_v60 = vld [vmem:[%s10598_s8 + $0xf80] sm:$0xff] }
  0x4e   : > { %474 = vst [vmem:[%s10603_s9 + $0x3d0] sm:$0xff] %v473_v58  ;;  %v479_v61 = vld [vmem:[%s10598_s8 + $0xf88] sm:$0xff]  ;;  %476 = vst [vmem:[%s10603_s9 + $0x3d8] sm:$0xff] %v475_v59  ;;  %v481_v62 = vld [vmem:[%s10598_s8 + $0xf90] sm:$0xff] }
  0x4f   : > { %478 = vst [vmem:[%s10603_s9 + $0x3e0] sm:$0xff] %v477_v60  ;;  %480 = vst [vmem:[%s10603_s9 + $0x3e8] sm:$0xff] %v479_v61  ;;  %v483_v63 = vld [vmem:[%s10598_s8 + $0xf98] sm:$0xff]  ;;  %v485_v0 = vld [vmem:[%s10598_s8 + $0x1000] sm:$0xff] }
  0x50   : > { %482 = vst [vmem:[%s10603_s9 + $0x3f0] sm:$0xff] %v481_v62  ;;  %484 = vst [vmem:[%s10603_s9 + $0x3f8] sm:$0xff] %v483_v63  ;;  %v487_v1 = vld [vmem:[%s10598_s8 + $0x1008] sm:$0xff]  ;;  %v489_v2 = vld [vmem:[%s10598_s8 + $0x1010] sm:$0xff] }
  0x51   : > { %486 = vst [vmem:[%s10603_s9 + $0x400] sm:$0xff] %v485_v0  ;;  %v491_v3 = vld [vmem:[%s10598_s8 + $0x1018] sm:$0xff]  ;;  %488 = vst [vmem:[%s10603_s9 + $0x408] sm:$0xff] %v487_v1  ;;  %v493_v4 = vld [vmem:[%s10598_s8 + $0x1080] sm:$0xff] }
  0x52   : > { %490 = vst [vmem:[%s10603_s9 + $0x410] sm:$0xff] %v489_v2  ;;  %492 = vst [vmem:[%s10603_s9 + $0x418] sm:$0xff] %v491_v3  ;;  %v495_v5 = vld [vmem:[%s10598_s8 + $0x1088] sm:$0xff]  ;;  %v497_v6 = vld [vmem:[%s10598_s8 + $0x1090] sm:$0xff] }
  0x53   : > { %494 = vst [vmem:[%s10603_s9 + $0x420] sm:$0xff] %v493_v4  ;;  %496 = vst [vmem:[%s10603_s9 + $0x428] sm:$0xff] %v495_v5  ;;  %v499_v7 = vld [vmem:[%s10598_s8 + $0x1098] sm:$0xff]  ;;  %v501_v8 = vld [vmem:[%s10598_s8 + $0x1100] sm:$0xff] }
  0x54   : > { %498 = vst [vmem:[%s10603_s9 + $0x430] sm:$0xff] %v497_v6  ;;  %v503_v9 = vld [vmem:[%s10598_s8 + $0x1108] sm:$0xff]  ;;  %500 = vst [vmem:[%s10603_s9 + $0x438] sm:$0xff] %v499_v7  ;;  %v505_v10 = vld [vmem:[%s10598_s8 + $0x1110] sm:$0xff] }
  0x55   : > { %502 = vst [vmem:[%s10603_s9 + $0x440] sm:$0xff] %v501_v8  ;;  %504 = vst [vmem:[%s10603_s9 + $0x448] sm:$0xff] %v503_v9  ;;  %v507_v11 = vld [vmem:[%s10598_s8 + $0x1118] sm:$0xff]  ;;  %v509_v12 = vld [vmem:[%s10598_s8 + $0x1180] sm:$0xff] }
  0x56   : > { %506 = vst [vmem:[%s10603_s9 + $0x450] sm:$0xff] %v505_v10  ;;  %508 = vst [vmem:[%s10603_s9 + $0x458] sm:$0xff] %v507_v11  ;;  %v511_v13 = vld [vmem:[%s10598_s8 + $0x1188] sm:$0xff]  ;;  %v513_v14 = vld [vmem:[%s10598_s8 + $0x1190] sm:$0xff] }
  0x57   : > { %510 = vst [vmem:[%s10603_s9 + $0x460] sm:$0xff] %v509_v12  ;;  %v515_v15 = vld [vmem:[%s10598_s8 + $0x1198] sm:$0xff]  ;;  %512 = vst [vmem:[%s10603_s9 + $0x468] sm:$0xff] %v511_v13  ;;  %v517_v16 = vld [vmem:[%s10598_s8 + $0x1200] sm:$0xff] }
  0x58   : > { %514 = vst [vmem:[%s10603_s9 + $0x470] sm:$0xff] %v513_v14  ;;  %516 = vst [vmem:[%s10603_s9 + $0x478] sm:$0xff] %v515_v15  ;;  %v519_v17 = vld [vmem:[%s10598_s8 + $0x1208] sm:$0xff]  ;;  %v521_v18 = vld [vmem:[%s10598_s8 + $0x1210] sm:$0xff] }
  0x59   : > { %518 = vst [vmem:[%s10603_s9 + $0x480] sm:$0xff] %v517_v16  ;;  %520 = vst [vmem:[%s10603_s9 + $0x488] sm:$0xff] %v519_v17  ;;  %v523_v19 = vld [vmem:[%s10598_s8 + $0x1218] sm:$0xff]  ;;  %v525_v20 = vld [vmem:[%s10598_s8 + $0x1280] sm:$0xff] }
  0x5a   : > { %522 = vst [vmem:[%s10603_s9 + $0x490] sm:$0xff] %v521_v18  ;;  %v527_v21 = vld [vmem:[%s10598_s8 + $0x1288] sm:$0xff]  ;;  %524 = vst [vmem:[%s10603_s9 + $0x498] sm:$0xff] %v523_v19  ;;  %v529_v22 = vld [vmem:[%s10598_s8 + $0x1290] sm:$0xff] }
  0x5b   : > { %526 = vst [vmem:[%s10603_s9 + $0x4a0] sm:$0xff] %v525_v20  ;;  %528 = vst [vmem:[%s10603_s9 + $0x4a8] sm:$0xff] %v527_v21  ;;  %v531_v23 = vld [vmem:[%s10598_s8 + $0x1298] sm:$0xff]  ;;  %v533_v24 = vld [vmem:[%s10598_s8 + $0x1300] sm:$0xff] }
  0x5c   : > { %530 = vst [vmem:[%s10603_s9 + $0x4b0] sm:$0xff] %v529_v22  ;;  %532 = vst [vmem:[%s10603_s9 + $0x4b8] sm:$0xff] %v531_v23  ;;  %v535_v25 = vld [vmem:[%s10598_s8 + $0x1308] sm:$0xff]  ;;  %v537_v26 = vld [vmem:[%s10598_s8 + $0x1310] sm:$0xff] }
  0x5d   : > { %534 = vst [vmem:[%s10603_s9 + $0x4c0] sm:$0xff] %v533_v24  ;;  %v539_v27 = vld [vmem:[%s10598_s8 + $0x1318] sm:$0xff]  ;;  %536 = vst [vmem:[%s10603_s9 + $0x4c8] sm:$0xff] %v535_v25  ;;  %v541_v28 = vld [vmem:[%s10598_s8 + $0x1380] sm:$0xff] }
  0x5e   : > { %538 = vst [vmem:[%s10603_s9 + $0x4d0] sm:$0xff] %v537_v26  ;;  %540 = vst [vmem:[%s10603_s9 + $0x4d8] sm:$0xff] %v539_v27  ;;  %v543_v29 = vld [vmem:[%s10598_s8 + $0x1388] sm:$0xff]  ;;  %v545_v30 = vld [vmem:[%s10598_s8 + $0x1390] sm:$0xff] }
  0x5f   : > { %542 = vst [vmem:[%s10603_s9 + $0x4e0] sm:$0xff] %v541_v28  ;;  %544 = vst [vmem:[%s10603_s9 + $0x4e8] sm:$0xff] %v543_v29  ;;  %v547_v31 = vld [vmem:[%s10598_s8 + $0x1398] sm:$0xff]  ;;  %v549_v32 = vld [vmem:[%s10598_s8 + $0x1400] sm:$0xff] }
  0x60   : > { %546 = vst [vmem:[%s10603_s9 + $0x4f0] sm:$0xff] %v545_v30  ;;  %v551_v33 = vld [vmem:[%s10598_s8 + $0x1408] sm:$0xff]  ;;  %548 = vst [vmem:[%s10603_s9 + $0x4f8] sm:$0xff] %v547_v31  ;;  %v553_v34 = vld [vmem:[%s10598_s8 + $0x1410] sm:$0xff] }
  0x61   : > { %550 = vst [vmem:[%s10603_s9 + $0x500] sm:$0xff] %v549_v32  ;;  %552 = vst [vmem:[%s10603_s9 + $0x508] sm:$0xff] %v551_v33  ;;  %v555_v35 = vld [vmem:[%s10598_s8 + $0x1418] sm:$0xff]  ;;  %v557_v36 = vld [vmem:[%s10598_s8 + $0x1480] sm:$0xff] }
  0x62   : > { %554 = vst [vmem:[%s10603_s9 + $0x510] sm:$0xff] %v553_v34  ;;  %556 = vst [vmem:[%s10603_s9 + $0x518] sm:$0xff] %v555_v35  ;;  %v559_v37 = vld [vmem:[%s10598_s8 + $0x1488] sm:$0xff]  ;;  %v561_v38 = vld [vmem:[%s10598_s8 + $0x1490] sm:$0xff] }
  0x63   : > { %558 = vst [vmem:[%s10603_s9 + $0x520] sm:$0xff] %v557_v36  ;;  %v563_v39 = vld [vmem:[%s10598_s8 + $0x1498] sm:$0xff]  ;;  %560 = vst [vmem:[%s10603_s9 + $0x528] sm:$0xff] %v559_v37  ;;  %v565_v40 = vld [vmem:[%s10598_s8 + $0x1500] sm:$0xff] }
  0x64   : > { %562 = vst [vmem:[%s10603_s9 + $0x530] sm:$0xff] %v561_v38  ;;  %564 = vst [vmem:[%s10603_s9 + $0x538] sm:$0xff] %v563_v39  ;;  %v567_v41 = vld [vmem:[%s10598_s8 + $0x1508] sm:$0xff]  ;;  %v569_v42 = vld [vmem:[%s10598_s8 + $0x1510] sm:$0xff] }
  0x65   : > { %566 = vst [vmem:[%s10603_s9 + $0x540] sm:$0xff] %v565_v40  ;;  %568 = vst [vmem:[%s10603_s9 + $0x548] sm:$0xff] %v567_v41  ;;  %v571_v43 = vld [vmem:[%s10598_s8 + $0x1518] sm:$0xff]  ;;  %v573_v44 = vld [vmem:[%s10598_s8 + $0x1580] sm:$0xff] }
  0x66   : > { %570 = vst [vmem:[%s10603_s9 + $0x550] sm:$0xff] %v569_v42  ;;  %v575_v45 = vld [vmem:[%s10598_s8 + $0x1588] sm:$0xff]  ;;  %572 = vst [vmem:[%s10603_s9 + $0x558] sm:$0xff] %v571_v43  ;;  %v577_v46 = vld [vmem:[%s10598_s8 + $0x1590] sm:$0xff] }
  0x67   : > { %574 = vst [vmem:[%s10603_s9 + $0x560] sm:$0xff] %v573_v44  ;;  %576 = vst [vmem:[%s10603_s9 + $0x568] sm:$0xff] %v575_v45  ;;  %v579_v47 = vld [vmem:[%s10598_s8 + $0x1598] sm:$0xff]  ;;  %v581_v48 = vld [vmem:[%s10598_s8 + $0x1600] sm:$0xff] }
  0x68   : > { %578 = vst [vmem:[%s10603_s9 + $0x570] sm:$0xff] %v577_v46  ;;  %580 = vst [vmem:[%s10603_s9 + $0x578] sm:$0xff] %v579_v47  ;;  %v583_v49 = vld [vmem:[%s10598_s8 + $0x1608] sm:$0xff]  ;;  %v585_v50 = vld [vmem:[%s10598_s8 + $0x1610] sm:$0xff] }
  0x69   : > { %582 = vst [vmem:[%s10603_s9 + $0x580] sm:$0xff] %v581_v48  ;;  %v587_v51 = vld [vmem:[%s10598_s8 + $0x1618] sm:$0xff]  ;;  %584 = vst [vmem:[%s10603_s9 + $0x588] sm:$0xff] %v583_v49  ;;  %v589_v52 = vld [vmem:[%s10598_s8 + $0x1680] sm:$0xff] }
  0x6a   : > { %586 = vst [vmem:[%s10603_s9 + $0x590] sm:$0xff] %v585_v50  ;;  %588 = vst [vmem:[%s10603_s9 + $0x598] sm:$0xff] %v587_v51  ;;  %v591_v53 = vld [vmem:[%s10598_s8 + $0x1688] sm:$0xff]  ;;  %v593_v54 = vld [vmem:[%s10598_s8 + $0x1690] sm:$0xff] }
  0x6b   : > { %590 = vst [vmem:[%s10603_s9 + $0x5a0] sm:$0xff] %v589_v52  ;;  %592 = vst [vmem:[%s10603_s9 + $0x5a8] sm:$0xff] %v591_v53  ;;  %v595_v55 = vld [vmem:[%s10598_s8 + $0x1698] sm:$0xff]  ;;  %v597_v56 = vld [vmem:[%s10598_s8 + $0x1700] sm:$0xff] }
  0x6c   : > { %594 = vst [vmem:[%s10603_s9 + $0x5b0] sm:$0xff] %v593_v54  ;;  %v599_v57 = vld [vmem:[%s10598_s8 + $0x1708] sm:$0xff]  ;;  %596 = vst [vmem:[%s10603_s9 + $0x5b8] sm:$0xff] %v595_v55  ;;  %v601_v58 = vld [vmem:[%s10598_s8 + $0x1710] sm:$0xff] }
  0x6d   : > { %598 = vst [vmem:[%s10603_s9 + $0x5c0] sm:$0xff] %v597_v56  ;;  %600 = vst [vmem:[%s10603_s9 + $0x5c8] sm:$0xff] %v599_v57  ;;  %v603_v59 = vld [vmem:[%s10598_s8 + $0x1718] sm:$0xff]  ;;  %v605_v60 = vld [vmem:[%s10598_s8 + $0x1780] sm:$0xff] }
  0x6e   : > { %602 = vst [vmem:[%s10603_s9 + $0x5d0] sm:$0xff] %v601_v58  ;;  %604 = vst [vmem:[%s10603_s9 + $0x5d8] sm:$0xff] %v603_v59  ;;  %v607_v61 = vld [vmem:[%s10598_s8 + $0x1788] sm:$0xff]  ;;  %v609_v62 = vld [vmem:[%s10598_s8 + $0x1790] sm:$0xff] }
  0x6f   : > { %606 = vst [vmem:[%s10603_s9 + $0x5e0] sm:$0xff] %v605_v60  ;;  %v611_v63 = vld [vmem:[%s10598_s8 + $0x1798] sm:$0xff]  ;;  %608 = vst [vmem:[%s10603_s9 + $0x5e8] sm:$0xff] %v607_v61  ;;  %v613_v0 = vld [vmem:[%s10598_s8 + $0x1800] sm:$0xff] }
  0x70   : > { %610 = vst [vmem:[%s10603_s9 + $0x5f0] sm:$0xff] %v609_v62  ;;  %612 = vst [vmem:[%s10603_s9 + $0x5f8] sm:$0xff] %v611_v63  ;;  %v615_v1 = vld [vmem:[%s10598_s8 + $0x1808] sm:$0xff]  ;;  %v617_v2 = vld [vmem:[%s10598_s8 + $0x1810] sm:$0xff] }
  0x71   : > { %614 = vst [vmem:[%s10603_s9 + $0x600] sm:$0xff] %v613_v0  ;;  %616 = vst [vmem:[%s10603_s9 + $0x608] sm:$0xff] %v615_v1  ;;  %v619_v3 = vld [vmem:[%s10598_s8 + $0x1818] sm:$0xff]  ;;  %v621_v4 = vld [vmem:[%s10598_s8 + $0x1880] sm:$0xff] }
  0x72   : > { %618 = vst [vmem:[%s10603_s9 + $0x610] sm:$0xff] %v617_v2  ;;  %v623_v5 = vld [vmem:[%s10598_s8 + $0x1888] sm:$0xff]  ;;  %620 = vst [vmem:[%s10603_s9 + $0x618] sm:$0xff] %v619_v3  ;;  %v625_v6 = vld [vmem:[%s10598_s8 + $0x1890] sm:$0xff] }
  0x73   : > { %622 = vst [vmem:[%s10603_s9 + $0x620] sm:$0xff] %v621_v4  ;;  %624 = vst [vmem:[%s10603_s9 + $0x628] sm:$0xff] %v623_v5  ;;  %v627_v7 = vld [vmem:[%s10598_s8 + $0x1898] sm:$0xff]  ;;  %v629_v8 = vld [vmem:[%s10598_s8 + $0x1900] sm:$0xff] }
  0x74   : > { %626 = vst [vmem:[%s10603_s9 + $0x630] sm:$0xff] %v625_v6  ;;  %628 = vst [vmem:[%s10603_s9 + $0x638] sm:$0xff] %v627_v7  ;;  %v631_v9 = vld [vmem:[%s10598_s8 + $0x1908] sm:$0xff]  ;;  %v633_v10 = vld [vmem:[%s10598_s8 + $0x1910] sm:$0xff] }
  0x75   : > { %630 = vst [vmem:[%s10603_s9 + $0x640] sm:$0xff] %v629_v8  ;;  %v635_v11 = vld [vmem:[%s10598_s8 + $0x1918] sm:$0xff]  ;;  %632 = vst [vmem:[%s10603_s9 + $0x648] sm:$0xff] %v631_v9  ;;  %v637_v12 = vld [vmem:[%s10598_s8 + $0x1980] sm:$0xff] }
  0x76   : > { %634 = vst [vmem:[%s10603_s9 + $0x650] sm:$0xff] %v633_v10  ;;  %636 = vst [vmem:[%s10603_s9 + $0x658] sm:$0xff] %v635_v11  ;;  %v639_v13 = vld [vmem:[%s10598_s8 + $0x1988] sm:$0xff]  ;;  %v641_v14 = vld [vmem:[%s10598_s8 + $0x1990] sm:$0xff] }
  0x77   : > { %638 = vst [vmem:[%s10603_s9 + $0x660] sm:$0xff] %v637_v12  ;;  %640 = vst [vmem:[%s10603_s9 + $0x668] sm:$0xff] %v639_v13  ;;  %v643_v15 = vld [vmem:[%s10598_s8 + $0x1998] sm:$0xff]  ;;  %v645_v16 = vld [vmem:[%s10598_s8 + $0x1a00] sm:$0xff] }
  0x78   : > { %642 = vst [vmem:[%s10603_s9 + $0x670] sm:$0xff] %v641_v14  ;;  %v647_v17 = vld [vmem:[%s10598_s8 + $0x1a08] sm:$0xff]  ;;  %644 = vst [vmem:[%s10603_s9 + $0x678] sm:$0xff] %v643_v15  ;;  %v649_v18 = vld [vmem:[%s10598_s8 + $0x1a10] sm:$0xff] }
  0x79   : > { %646 = vst [vmem:[%s10603_s9 + $0x680] sm:$0xff] %v645_v16  ;;  %648 = vst [vmem:[%s10603_s9 + $0x688] sm:$0xff] %v647_v17  ;;  %v651_v19 = vld [vmem:[%s10598_s8 + $0x1a18] sm:$0xff]  ;;  %v653_v20 = vld [vmem:[%s10598_s8 + $0x1a80] sm:$0xff] }
  0x7a   : > { %650 = vst [vmem:[%s10603_s9 + $0x690] sm:$0xff] %v649_v18  ;;  %652 = vst [vmem:[%s10603_s9 + $0x698] sm:$0xff] %v651_v19  ;;  %v655_v21 = vld [vmem:[%s10598_s8 + $0x1a88] sm:$0xff]  ;;  %v657_v22 = vld [vmem:[%s10598_s8 + $0x1a90] sm:$0xff] }
  0x7b   : > { %654 = vst [vmem:[%s10603_s9 + $0x6a0] sm:$0xff] %v653_v20  ;;  %v659_v23 = vld [vmem:[%s10598_s8 + $0x1a98] sm:$0xff]  ;;  %656 = vst [vmem:[%s10603_s9 + $0x6a8] sm:$0xff] %v655_v21  ;;  %v661_v24 = vld [vmem:[%s10598_s8 + $0x1b00] sm:$0xff] }
  0x7c   : > { %658 = vst [vmem:[%s10603_s9 + $0x6b0] sm:$0xff] %v657_v22  ;;  %660 = vst [vmem:[%s10603_s9 + $0x6b8] sm:$0xff] %v659_v23  ;;  %v663_v25 = vld [vmem:[%s10598_s8 + $0x1b08] sm:$0xff]  ;;  %v665_v26 = vld [vmem:[%s10598_s8 + $0x1b10] sm:$0xff] }
  0x7d   : > { %662 = vst [vmem:[%s10603_s9 + $0x6c0] sm:$0xff] %v661_v24  ;;  %664 = vst [vmem:[%s10603_s9 + $0x6c8] sm:$0xff] %v663_v25  ;;  %v667_v27 = vld [vmem:[%s10598_s8 + $0x1b18] sm:$0xff]  ;;  %v669_v28 = vld [vmem:[%s10598_s8 + $0x1b80] sm:$0xff] }
  0x7e   : > { %666 = vst [vmem:[%s10603_s9 + $0x6d0] sm:$0xff] %v665_v26  ;;  %v671_v29 = vld [vmem:[%s10598_s8 + $0x1b88] sm:$0xff]  ;;  %668 = vst [vmem:[%s10603_s9 + $0x6d8] sm:$0xff] %v667_v27  ;;  %v673_v30 = vld [vmem:[%s10598_s8 + $0x1b90] sm:$0xff] }
  0x7f   : > { %670 = vst [vmem:[%s10603_s9 + $0x6e0] sm:$0xff] %v669_v28  ;;  %672 = vst [vmem:[%s10603_s9 + $0x6e8] sm:$0xff] %v671_v29  ;;  %v675_v31 = vld [vmem:[%s10598_s8 + $0x1b98] sm:$0xff]  ;;  %v677_v32 = vld [vmem:[%s10598_s8 + $0x1c00] sm:$0xff] }
  0x80   : > { %674 = vst [vmem:[%s10603_s9 + $0x6f0] sm:$0xff] %v673_v30  ;;  %676 = vst [vmem:[%s10603_s9 + $0x6f8] sm:$0xff] %v675_v31  ;;  %v679_v33 = vld [vmem:[%s10598_s8 + $0x1c08] sm:$0xff]  ;;  %v681_v34 = vld [vmem:[%s10598_s8 + $0x1c10] sm:$0xff] }
  0x81   : > { %678 = vst [vmem:[%s10603_s9 + $0x700] sm:$0xff] %v677_v32  ;;  %v683_v35 = vld [vmem:[%s10598_s8 + $0x1c18] sm:$0xff]  ;;  %680 = vst [vmem:[%s10603_s9 + $0x708] sm:$0xff] %v679_v33  ;;  %v685_v36 = vld [vmem:[%s10598_s8 + $0x1c80] sm:$0xff] }
  0x82   : > { %682 = vst [vmem:[%s10603_s9 + $0x710] sm:$0xff] %v681_v34  ;;  %684 = vst [vmem:[%s10603_s9 + $0x718] sm:$0xff] %v683_v35  ;;  %v687_v37 = vld [vmem:[%s10598_s8 + $0x1c88] sm:$0xff]  ;;  %v689_v38 = vld [vmem:[%s10598_s8 + $0x1c90] sm:$0xff] }
  0x83   : > { %686 = vst [vmem:[%s10603_s9 + $0x720] sm:$0xff] %v685_v36  ;;  %688 = vst [vmem:[%s10603_s9 + $0x728] sm:$0xff] %v687_v37  ;;  %v691_v39 = vld [vmem:[%s10598_s8 + $0x1c98] sm:$0xff]  ;;  %v693_v40 = vld [vmem:[%s10598_s8 + $0x1d00] sm:$0xff] }
  0x84   : > { %690 = vst [vmem:[%s10603_s9 + $0x730] sm:$0xff] %v689_v38  ;;  %v695_v41 = vld [vmem:[%s10598_s8 + $0x1d08] sm:$0xff]  ;;  %692 = vst [vmem:[%s10603_s9 + $0x738] sm:$0xff] %v691_v39  ;;  %v697_v42 = vld [vmem:[%s10598_s8 + $0x1d10] sm:$0xff] }
  0x85   : > { %694 = vst [vmem:[%s10603_s9 + $0x740] sm:$0xff] %v693_v40  ;;  %696 = vst [vmem:[%s10603_s9 + $0x748] sm:$0xff] %v695_v41  ;;  %v699_v43 = vld [vmem:[%s10598_s8 + $0x1d18] sm:$0xff]  ;;  %v701_v44 = vld [vmem:[%s10598_s8 + $0x1d80] sm:$0xff] }
  0x86   : > { %698 = vst [vmem:[%s10603_s9 + $0x750] sm:$0xff] %v697_v42  ;;  %700 = vst [vmem:[%s10603_s9 + $0x758] sm:$0xff] %v699_v43  ;;  %v703_v45 = vld [vmem:[%s10598_s8 + $0x1d88] sm:$0xff]  ;;  %v705_v46 = vld [vmem:[%s10598_s8 + $0x1d90] sm:$0xff] }
  0x87   : > { %702 = vst [vmem:[%s10603_s9 + $0x760] sm:$0xff] %v701_v44  ;;  %v707_v47 = vld [vmem:[%s10598_s8 + $0x1d98] sm:$0xff]  ;;  %704 = vst [vmem:[%s10603_s9 + $0x768] sm:$0xff] %v703_v45  ;;  %v709_v48 = vld [vmem:[%s10598_s8 + $0x1e00] sm:$0xff] }
  0x88   : > { %706 = vst [vmem:[%s10603_s9 + $0x770] sm:$0xff] %v705_v46  ;;  %708 = vst [vmem:[%s10603_s9 + $0x778] sm:$0xff] %v707_v47  ;;  %v711_v49 = vld [vmem:[%s10598_s8 + $0x1e08] sm:$0xff]  ;;  %v713_v50 = vld [vmem:[%s10598_s8 + $0x1e10] sm:$0xff] }
  0x89   : > { %710 = vst [vmem:[%s10603_s9 + $0x780] sm:$0xff] %v709_v48  ;;  %712 = vst [vmem:[%s10603_s9 + $0x788] sm:$0xff] %v711_v49  ;;  %v715_v51 = vld [vmem:[%s10598_s8 + $0x1e18] sm:$0xff]  ;;  %v717_v52 = vld [vmem:[%s10598_s8 + $0x1e80] sm:$0xff] }
  0x8a   : > { %714 = vst [vmem:[%s10603_s9 + $0x790] sm:$0xff] %v713_v50  ;;  %v719_v53 = vld [vmem:[%s10598_s8 + $0x1e88] sm:$0xff]  ;;  %716 = vst [vmem:[%s10603_s9 + $0x798] sm:$0xff] %v715_v51  ;;  %v721_v54 = vld [vmem:[%s10598_s8 + $0x1e90] sm:$0xff] }
  0x8b   : > { %718 = vst [vmem:[%s10603_s9 + $0x7a0] sm:$0xff] %v717_v52  ;;  %720 = vst [vmem:[%s10603_s9 + $0x7a8] sm:$0xff] %v719_v53  ;;  %v723_v55 = vld [vmem:[%s10598_s8 + $0x1e98] sm:$0xff]  ;;  %v725_v56 = vld [vmem:[%s10598_s8 + $0x1f00] sm:$0xff] }
  0x8c   : > { %722 = vst [vmem:[%s10603_s9 + $0x7b0] sm:$0xff] %v721_v54  ;;  %724 = vst [vmem:[%s10603_s9 + $0x7b8] sm:$0xff] %v723_v55  ;;  %v727_v57 = vld [vmem:[%s10598_s8 + $0x1f08] sm:$0xff]  ;;  %v729_v58 = vld [vmem:[%s10598_s8 + $0x1f10] sm:$0xff] }
  0x8d   : > { %726 = vst [vmem:[%s10603_s9 + $0x7c0] sm:$0xff] %v725_v56  ;;  %v731_v59 = vld [vmem:[%s10598_s8 + $0x1f18] sm:$0xff]  ;;  %728 = vst [vmem:[%s10603_s9 + $0x7c8] sm:$0xff] %v727_v57  ;;  %v733_v60 = vld [vmem:[%s10598_s8 + $0x1f80] sm:$0xff] }
  0x8e   : > { %730 = vst [vmem:[%s10603_s9 + $0x7d0] sm:$0xff] %v729_v58  ;;  %732 = vst [vmem:[%s10603_s9 + $0x7d8] sm:$0xff] %v731_v59  ;;  %v735_v61 = vld [vmem:[%s10598_s8 + $0x1f88] sm:$0xff]  ;;  %v737_v62 = vld [vmem:[%s10598_s8 + $0x1f90] sm:$0xff] }
  0x8f   : > { %734 = vst [vmem:[%s10603_s9 + $0x7e0] sm:$0xff] %v733_v60  ;;  %736 = vst [vmem:[%s10603_s9 + $0x7e8] sm:$0xff] %v735_v61  ;;  %v739_v63 = vld [vmem:[%s10598_s8 + $0x1f98] sm:$0xff]  ;;  %v741_v0 = vld [vmem:[%s10598_s8 + $0x2000] sm:$0xff] }
  0x90   : > { %738 = vst [vmem:[%s10603_s9 + $0x7f0] sm:$0xff] %v737_v62  ;;  %v743_v1 = vld [vmem:[%s10598_s8 + $0x2008] sm:$0xff]  ;;  %740 = vst [vmem:[%s10603_s9 + $0x7f8] sm:$0xff] %v739_v63  ;;  %v745_v2 = vld [vmem:[%s10598_s8 + $0x2010] sm:$0xff] }
  0x91   : > { %742 = vst [vmem:[%s10603_s9 + $0x800] sm:$0xff] %v741_v0  ;;  %744 = vst [vmem:[%s10603_s9 + $0x808] sm:$0xff] %v743_v1  ;;  %v747_v3 = vld [vmem:[%s10598_s8 + $0x2018] sm:$0xff]  ;;  %v749_v4 = vld [vmem:[%s10598_s8 + $0x2080] sm:$0xff] }
  0x92   : > { %746 = vst [vmem:[%s10603_s9 + $0x810] sm:$0xff] %v745_v2  ;;  %748 = vst [vmem:[%s10603_s9 + $0x818] sm:$0xff] %v747_v3  ;;  %v751_v5 = vld [vmem:[%s10598_s8 + $0x2088] sm:$0xff]  ;;  %v753_v6 = vld [vmem:[%s10598_s8 + $0x2090] sm:$0xff] }
  0x93   : > { %750 = vst [vmem:[%s10603_s9 + $0x820] sm:$0xff] %v749_v4  ;;  %v755_v7 = vld [vmem:[%s10598_s8 + $0x2098] sm:$0xff]  ;;  %752 = vst [vmem:[%s10603_s9 + $0x828] sm:$0xff] %v751_v5  ;;  %v757_v8 = vld [vmem:[%s10598_s8 + $0x2100] sm:$0xff] }
  0x94   : > { %754 = vst [vmem:[%s10603_s9 + $0x830] sm:$0xff] %v753_v6  ;;  %756 = vst [vmem:[%s10603_s9 + $0x838] sm:$0xff] %v755_v7  ;;  %v759_v9 = vld [vmem:[%s10598_s8 + $0x2108] sm:$0xff]  ;;  %v761_v10 = vld [vmem:[%s10598_s8 + $0x2110] sm:$0xff] }
  0x95   : > { %758 = vst [vmem:[%s10603_s9 + $0x840] sm:$0xff] %v757_v8  ;;  %760 = vst [vmem:[%s10603_s9 + $0x848] sm:$0xff] %v759_v9  ;;  %v763_v11 = vld [vmem:[%s10598_s8 + $0x2118] sm:$0xff]  ;;  %v765_v12 = vld [vmem:[%s10598_s8 + $0x2180] sm:$0xff] }
  0x96   : > { %762 = vst [vmem:[%s10603_s9 + $0x850] sm:$0xff] %v761_v10  ;;  %v767_v13 = vld [vmem:[%s10598_s8 + $0x2188] sm:$0xff]  ;;  %764 = vst [vmem:[%s10603_s9 + $0x858] sm:$0xff] %v763_v11  ;;  %v769_v14 = vld [vmem:[%s10598_s8 + $0x2190] sm:$0xff] }
  0x97   : > { %766 = vst [vmem:[%s10603_s9 + $0x860] sm:$0xff] %v765_v12  ;;  %768 = vst [vmem:[%s10603_s9 + $0x868] sm:$0xff] %v767_v13  ;;  %v771_v15 = vld [vmem:[%s10598_s8 + $0x2198] sm:$0xff]  ;;  %v773_v16 = vld [vmem:[%s10598_s8 + $0x2200] sm:$0xff] }
  0x98   : > { %770 = vst [vmem:[%s10603_s9 + $0x870] sm:$0xff] %v769_v14  ;;  %772 = vst [vmem:[%s10603_s9 + $0x878] sm:$0xff] %v771_v15  ;;  %v775_v17 = vld [vmem:[%s10598_s8 + $0x2208] sm:$0xff]  ;;  %v777_v18 = vld [vmem:[%s10598_s8 + $0x2210] sm:$0xff] }
  0x99   : > { %774 = vst [vmem:[%s10603_s9 + $0x880] sm:$0xff] %v773_v16  ;;  %v779_v19 = vld [vmem:[%s10598_s8 + $0x2218] sm:$0xff]  ;;  %776 = vst [vmem:[%s10603_s9 + $0x888] sm:$0xff] %v775_v17  ;;  %v781_v20 = vld [vmem:[%s10598_s8 + $0x2280] sm:$0xff] }
  0x9a   : > { %778 = vst [vmem:[%s10603_s9 + $0x890] sm:$0xff] %v777_v18  ;;  %780 = vst [vmem:[%s10603_s9 + $0x898] sm:$0xff] %v779_v19  ;;  %v783_v21 = vld [vmem:[%s10598_s8 + $0x2288] sm:$0xff]  ;;  %v785_v22 = vld [vmem:[%s10598_s8 + $0x2290] sm:$0xff] }
  0x9b   : > { %782 = vst [vmem:[%s10603_s9 + $0x8a0] sm:$0xff] %v781_v20  ;;  %784 = vst [vmem:[%s10603_s9 + $0x8a8] sm:$0xff] %v783_v21  ;;  %v787_v23 = vld [vmem:[%s10598_s8 + $0x2298] sm:$0xff]  ;;  %v789_v24 = vld [vmem:[%s10598_s8 + $0x2300] sm:$0xff] }
  0x9c   : > { %786 = vst [vmem:[%s10603_s9 + $0x8b0] sm:$0xff] %v785_v22  ;;  %v791_v25 = vld [vmem:[%s10598_s8 + $0x2308] sm:$0xff]  ;;  %788 = vst [vmem:[%s10603_s9 + $0x8b8] sm:$0xff] %v787_v23  ;;  %v793_v26 = vld [vmem:[%s10598_s8 + $0x2310] sm:$0xff] }
  0x9d   : > { %790 = vst [vmem:[%s10603_s9 + $0x8c0] sm:$0xff] %v789_v24  ;;  %792 = vst [vmem:[%s10603_s9 + $0x8c8] sm:$0xff] %v791_v25  ;;  %v795_v27 = vld [vmem:[%s10598_s8 + $0x2318] sm:$0xff]  ;;  %v797_v28 = vld [vmem:[%s10598_s8 + $0x2380] sm:$0xff] }
  0x9e   : > { %794 = vst [vmem:[%s10603_s9 + $0x8d0] sm:$0xff] %v793_v26  ;;  %796 = vst [vmem:[%s10603_s9 + $0x8d8] sm:$0xff] %v795_v27  ;;  %v799_v29 = vld [vmem:[%s10598_s8 + $0x2388] sm:$0xff]  ;;  %v801_v30 = vld [vmem:[%s10598_s8 + $0x2390] sm:$0xff] }
  0x9f   : > { %798 = vst [vmem:[%s10603_s9 + $0x8e0] sm:$0xff] %v797_v28  ;;  %v803_v31 = vld [vmem:[%s10598_s8 + $0x2398] sm:$0xff]  ;;  %800 = vst [vmem:[%s10603_s9 + $0x8e8] sm:$0xff] %v799_v29  ;;  %v805_v32 = vld [vmem:[%s10598_s8 + $0x2400] sm:$0xff] }
  0xa0   : > { %802 = vst [vmem:[%s10603_s9 + $0x8f0] sm:$0xff] %v801_v30  ;;  %804 = vst [vmem:[%s10603_s9 + $0x8f8] sm:$0xff] %v803_v31  ;;  %v807_v33 = vld [vmem:[%s10598_s8 + $0x2408] sm:$0xff]  ;;  %v809_v34 = vld [vmem:[%s10598_s8 + $0x2410] sm:$0xff] }
  0xa1   : > { %806 = vst [vmem:[%s10603_s9 + $0x900] sm:$0xff] %v805_v32  ;;  %808 = vst [vmem:[%s10603_s9 + $0x908] sm:$0xff] %v807_v33  ;;  %v811_v35 = vld [vmem:[%s10598_s8 + $0x2418] sm:$0xff]  ;;  %v813_v36 = vld [vmem:[%s10598_s8 + $0x2480] sm:$0xff] }
  0xa2   : > { %810 = vst [vmem:[%s10603_s9 + $0x910] sm:$0xff] %v809_v34  ;;  %v815_v37 = vld [vmem:[%s10598_s8 + $0x2488] sm:$0xff]  ;;  %812 = vst [vmem:[%s10603_s9 + $0x918] sm:$0xff] %v811_v35  ;;  %v817_v38 = vld [vmem:[%s10598_s8 + $0x2490] sm:$0xff] }
  0xa3   : > { %814 = vst [vmem:[%s10603_s9 + $0x920] sm:$0xff] %v813_v36  ;;  %816 = vst [vmem:[%s10603_s9 + $0x928] sm:$0xff] %v815_v37  ;;  %v819_v39 = vld [vmem:[%s10598_s8 + $0x2498] sm:$0xff]  ;;  %v821_v40 = vld [vmem:[%s10598_s8 + $0x2500] sm:$0xff] }
  0xa4   : > { %818 = vst [vmem:[%s10603_s9 + $0x930] sm:$0xff] %v817_v38  ;;  %820 = vst [vmem:[%s10603_s9 + $0x938] sm:$0xff] %v819_v39  ;;  %v823_v41 = vld [vmem:[%s10598_s8 + $0x2508] sm:$0xff]  ;;  %v825_v42 = vld [vmem:[%s10598_s8 + $0x2510] sm:$0xff] }
  0xa5   : > { %822 = vst [vmem:[%s10603_s9 + $0x940] sm:$0xff] %v821_v40  ;;  %v827_v43 = vld [vmem:[%s10598_s8 + $0x2518] sm:$0xff]  ;;  %824 = vst [vmem:[%s10603_s9 + $0x948] sm:$0xff] %v823_v41  ;;  %v829_v44 = vld [vmem:[%s10598_s8 + $0x2580] sm:$0xff] }
  0xa6   : > { %826 = vst [vmem:[%s10603_s9 + $0x950] sm:$0xff] %v825_v42  ;;  %828 = vst [vmem:[%s10603_s9 + $0x958] sm:$0xff] %v827_v43  ;;  %v831_v45 = vld [vmem:[%s10598_s8 + $0x2588] sm:$0xff]  ;;  %v833_v46 = vld [vmem:[%s10598_s8 + $0x2590] sm:$0xff] }
  0xa7   : > { %830 = vst [vmem:[%s10603_s9 + $0x960] sm:$0xff] %v829_v44  ;;  %832 = vst [vmem:[%s10603_s9 + $0x968] sm:$0xff] %v831_v45  ;;  %v835_v47 = vld [vmem:[%s10598_s8 + $0x2598] sm:$0xff]  ;;  %v837_v48 = vld [vmem:[%s10598_s8 + $0x2600] sm:$0xff] }
  0xa8   : > { %834 = vst [vmem:[%s10603_s9 + $0x970] sm:$0xff] %v833_v46  ;;  %v839_v49 = vld [vmem:[%s10598_s8 + $0x2608] sm:$0xff]  ;;  %836 = vst [vmem:[%s10603_s9 + $0x978] sm:$0xff] %v835_v47  ;;  %v841_v50 = vld [vmem:[%s10598_s8 + $0x2610] sm:$0xff] }
  0xa9   : > { %838 = vst [vmem:[%s10603_s9 + $0x980] sm:$0xff] %v837_v48  ;;  %840 = vst [vmem:[%s10603_s9 + $0x988] sm:$0xff] %v839_v49  ;;  %v843_v51 = vld [vmem:[%s10598_s8 + $0x2618] sm:$0xff]  ;;  %v845_v52 = vld [vmem:[%s10598_s8 + $0x2680] sm:$0xff] }
  0xaa   : > { %842 = vst [vmem:[%s10603_s9 + $0x990] sm:$0xff] %v841_v50  ;;  %844 = vst [vmem:[%s10603_s9 + $0x998] sm:$0xff] %v843_v51  ;;  %v847_v53 = vld [vmem:[%s10598_s8 + $0x2688] sm:$0xff]  ;;  %v849_v54 = vld [vmem:[%s10598_s8 + $0x2690] sm:$0xff] }
  0xab   : > { %846 = vst [vmem:[%s10603_s9 + $0x9a0] sm:$0xff] %v845_v52  ;;  %v851_v55 = vld [vmem:[%s10598_s8 + $0x2698] sm:$0xff]  ;;  %848 = vst [vmem:[%s10603_s9 + $0x9a8] sm:$0xff] %v847_v53  ;;  %v853_v56 = vld [vmem:[%s10598_s8 + $0x2700] sm:$0xff] }
  0xac   : > { %850 = vst [vmem:[%s10603_s9 + $0x9b0] sm:$0xff] %v849_v54  ;;  %852 = vst [vmem:[%s10603_s9 + $0x9b8] sm:$0xff] %v851_v55  ;;  %v855_v57 = vld [vmem:[%s10598_s8 + $0x2708] sm:$0xff]  ;;  %v857_v58 = vld [vmem:[%s10598_s8 + $0x2710] sm:$0xff] }
  0xad   : > { %854 = vst [vmem:[%s10603_s9 + $0x9c0] sm:$0xff] %v853_v56  ;;  %856 = vst [vmem:[%s10603_s9 + $0x9c8] sm:$0xff] %v855_v57  ;;  %v859_v59 = vld [vmem:[%s10598_s8 + $0x2718] sm:$0xff]  ;;  %v861_v60 = vld [vmem:[%s10598_s8 + $0x2780] sm:$0xff] }
  0xae   : > { %858 = vst [vmem:[%s10603_s9 + $0x9d0] sm:$0xff] %v857_v58  ;;  %v863_v61 = vld [vmem:[%s10598_s8 + $0x2788] sm:$0xff]  ;;  %860 = vst [vmem:[%s10603_s9 + $0x9d8] sm:$0xff] %v859_v59  ;;  %v865_v62 = vld [vmem:[%s10598_s8 + $0x2790] sm:$0xff] }
  0xaf   : > { %862 = vst [vmem:[%s10603_s9 + $0x9e0] sm:$0xff] %v861_v60  ;;  %864 = vst [vmem:[%s10603_s9 + $0x9e8] sm:$0xff] %v863_v61  ;;  %v867_v63 = vld [vmem:[%s10598_s8 + $0x2798] sm:$0xff]  ;;  %v869_v0 = vld [vmem:[%s10598_s8 + $0x2800] sm:$0xff] }
  0xb0   : > { %866 = vst [vmem:[%s10603_s9 + $0x9f0] sm:$0xff] %v865_v62  ;;  %868 = vst [vmem:[%s10603_s9 + $0x9f8] sm:$0xff] %v867_v63  ;;  %v871_v1 = vld [vmem:[%s10598_s8 + $0x2808] sm:$0xff]  ;;  %v873_v2 = vld [vmem:[%s10598_s8 + $0x2810] sm:$0xff] }
  0xb1   : > { %870 = vst [vmem:[%s10603_s9 + $0xa00] sm:$0xff] %v869_v0  ;;  %v875_v3 = vld [vmem:[%s10598_s8 + $0x2818] sm:$0xff]  ;;  %872 = vst [vmem:[%s10603_s9 + $0xa08] sm:$0xff] %v871_v1  ;;  %v877_v4 = vld [vmem:[%s10598_s8 + $0x2880] sm:$0xff] }
  0xb2   : > { %874 = vst [vmem:[%s10603_s9 + $0xa10] sm:$0xff] %v873_v2  ;;  %876 = vst [vmem:[%s10603_s9 + $0xa18] sm:$0xff] %v875_v3  ;;  %v879_v5 = vld [vmem:[%s10598_s8 + $0x2888] sm:$0xff]  ;;  %v881_v6 = vld [vmem:[%s10598_s8 + $0x2890] sm:$0xff] }
  0xb3   : > { %878 = vst [vmem:[%s10603_s9 + $0xa20] sm:$0xff] %v877_v4  ;;  %880 = vst [vmem:[%s10603_s9 + $0xa28] sm:$0xff] %v879_v5  ;;  %v883_v7 = vld [vmem:[%s10598_s8 + $0x2898] sm:$0xff]  ;;  %v885_v8 = vld [vmem:[%s10598_s8 + $0x2900] sm:$0xff] }
  0xb4   : > { %882 = vst [vmem:[%s10603_s9 + $0xa30] sm:$0xff] %v881_v6  ;;  %v887_v9 = vld [vmem:[%s10598_s8 + $0x2908] sm:$0xff]  ;;  %884 = vst [vmem:[%s10603_s9 + $0xa38] sm:$0xff] %v883_v7  ;;  %v889_v10 = vld [vmem:[%s10598_s8 + $0x2910] sm:$0xff] }
  0xb5   : > { %886 = vst [vmem:[%s10603_s9 + $0xa40] sm:$0xff] %v885_v8  ;;  %888 = vst [vmem:[%s10603_s9 + $0xa48] sm:$0xff] %v887_v9  ;;  %v891_v11 = vld [vmem:[%s10598_s8 + $0x2918] sm:$0xff]  ;;  %v893_v12 = vld [vmem:[%s10598_s8 + $0x2980] sm:$0xff] }
  0xb6   : > { %890 = vst [vmem:[%s10603_s9 + $0xa50] sm:$0xff] %v889_v10  ;;  %892 = vst [vmem:[%s10603_s9 + $0xa58] sm:$0xff] %v891_v11  ;;  %v895_v13 = vld [vmem:[%s10598_s8 + $0x2988] sm:$0xff]  ;;  %v897_v14 = vld [vmem:[%s10598_s8 + $0x2990] sm:$0xff] }
  0xb7   : > { %894 = vst [vmem:[%s10603_s9 + $0xa60] sm:$0xff] %v893_v12  ;;  %v899_v15 = vld [vmem:[%s10598_s8 + $0x2998] sm:$0xff]  ;;  %896 = vst [vmem:[%s10603_s9 + $0xa68] sm:$0xff] %v895_v13  ;;  %v901_v16 = vld [vmem:[%s10598_s8 + $0x2a00] sm:$0xff] }
  0xb8   : > { %898 = vst [vmem:[%s10603_s9 + $0xa70] sm:$0xff] %v897_v14  ;;  %900 = vst [vmem:[%s10603_s9 + $0xa78] sm:$0xff] %v899_v15  ;;  %v903_v17 = vld [vmem:[%s10598_s8 + $0x2a08] sm:$0xff]  ;;  %v905_v18 = vld [vmem:[%s10598_s8 + $0x2a10] sm:$0xff] }
  0xb9   : > { %902 = vst [vmem:[%s10603_s9 + $0xa80] sm:$0xff] %v901_v16  ;;  %904 = vst [vmem:[%s10603_s9 + $0xa88] sm:$0xff] %v903_v17  ;;  %v907_v19 = vld [vmem:[%s10598_s8 + $0x2a18] sm:$0xff]  ;;  %v909_v20 = vld [vmem:[%s10598_s8 + $0x2a80] sm:$0xff] }
  0xba   : > { %906 = vst [vmem:[%s10603_s9 + $0xa90] sm:$0xff] %v905_v18  ;;  %v911_v21 = vld [vmem:[%s10598_s8 + $0x2a88] sm:$0xff]  ;;  %908 = vst [vmem:[%s10603_s9 + $0xa98] sm:$0xff] %v907_v19  ;;  %v913_v22 = vld [vmem:[%s10598_s8 + $0x2a90] sm:$0xff] }
  0xbb   : > { %910 = vst [vmem:[%s10603_s9 + $0xaa0] sm:$0xff] %v909_v20  ;;  %912 = vst [vmem:[%s10603_s9 + $0xaa8] sm:$0xff] %v911_v21  ;;  %v915_v23 = vld [vmem:[%s10598_s8 + $0x2a98] sm:$0xff]  ;;  %v917_v24 = vld [vmem:[%s10598_s8 + $0x2b00] sm:$0xff] }
  0xbc   : > { %914 = vst [vmem:[%s10603_s9 + $0xab0] sm:$0xff] %v913_v22  ;;  %916 = vst [vmem:[%s10603_s9 + $0xab8] sm:$0xff] %v915_v23  ;;  %v919_v25 = vld [vmem:[%s10598_s8 + $0x2b08] sm:$0xff]  ;;  %v921_v26 = vld [vmem:[%s10598_s8 + $0x2b10] sm:$0xff] }
  0xbd   : > { %918 = vst [vmem:[%s10603_s9 + $0xac0] sm:$0xff] %v917_v24  ;;  %v923_v27 = vld [vmem:[%s10598_s8 + $0x2b18] sm:$0xff]  ;;  %920 = vst [vmem:[%s10603_s9 + $0xac8] sm:$0xff] %v919_v25  ;;  %v925_v28 = vld [vmem:[%s10598_s8 + $0x2b80] sm:$0xff] }
  0xbe   : > { %922 = vst [vmem:[%s10603_s9 + $0xad0] sm:$0xff] %v921_v26  ;;  %924 = vst [vmem:[%s10603_s9 + $0xad8] sm:$0xff] %v923_v27  ;;  %v927_v29 = vld [vmem:[%s10598_s8 + $0x2b88] sm:$0xff]  ;;  %v929_v30 = vld [vmem:[%s10598_s8 + $0x2b90] sm:$0xff] }
  0xbf   : > { %926 = vst [vmem:[%s10603_s9 + $0xae0] sm:$0xff] %v925_v28  ;;  %928 = vst [vmem:[%s10603_s9 + $0xae8] sm:$0xff] %v927_v29  ;;  %v931_v31 = vld [vmem:[%s10598_s8 + $0x2b98] sm:$0xff]  ;;  %v933_v32 = vld [vmem:[%s10598_s8 + $0x2c00] sm:$0xff] }
  0xc0   : > { %930 = vst [vmem:[%s10603_s9 + $0xaf0] sm:$0xff] %v929_v30  ;;  %v935_v33 = vld [vmem:[%s10598_s8 + $0x2c08] sm:$0xff]  ;;  %932 = vst [vmem:[%s10603_s9 + $0xaf8] sm:$0xff] %v931_v31  ;;  %v937_v34 = vld [vmem:[%s10598_s8 + $0x2c10] sm:$0xff] }
  0xc1   : > { %934 = vst [vmem:[%s10603_s9 + $0xb00] sm:$0xff] %v933_v32  ;;  %936 = vst [vmem:[%s10603_s9 + $0xb08] sm:$0xff] %v935_v33  ;;  %v939_v35 = vld [vmem:[%s10598_s8 + $0x2c18] sm:$0xff]  ;;  %v941_v36 = vld [vmem:[%s10598_s8 + $0x2c80] sm:$0xff] }
  0xc2   : > { %938 = vst [vmem:[%s10603_s9 + $0xb10] sm:$0xff] %v937_v34  ;;  %940 = vst [vmem:[%s10603_s9 + $0xb18] sm:$0xff] %v939_v35  ;;  %v943_v37 = vld [vmem:[%s10598_s8 + $0x2c88] sm:$0xff]  ;;  %v945_v38 = vld [vmem:[%s10598_s8 + $0x2c90] sm:$0xff] }
  0xc3   : > { %942 = vst [vmem:[%s10603_s9 + $0xb20] sm:$0xff] %v941_v36  ;;  %v947_v39 = vld [vmem:[%s10598_s8 + $0x2c98] sm:$0xff]  ;;  %944 = vst [vmem:[%s10603_s9 + $0xb28] sm:$0xff] %v943_v37  ;;  %v949_v40 = vld [vmem:[%s10598_s8 + $0x2d00] sm:$0xff] }
  0xc4   : > { %946 = vst [vmem:[%s10603_s9 + $0xb30] sm:$0xff] %v945_v38  ;;  %948 = vst [vmem:[%s10603_s9 + $0xb38] sm:$0xff] %v947_v39  ;;  %v951_v41 = vld [vmem:[%s10598_s8 + $0x2d08] sm:$0xff]  ;;  %v953_v42 = vld [vmem:[%s10598_s8 + $0x2d10] sm:$0xff] }
  0xc5   : > { %950 = vst [vmem:[%s10603_s9 + $0xb40] sm:$0xff] %v949_v40  ;;  %952 = vst [vmem:[%s10603_s9 + $0xb48] sm:$0xff] %v951_v41  ;;  %v955_v43 = vld [vmem:[%s10598_s8 + $0x2d18] sm:$0xff]  ;;  %v957_v44 = vld [vmem:[%s10598_s8 + $0x2d80] sm:$0xff] }
  0xc6   : > { %954 = vst [vmem:[%s10603_s9 + $0xb50] sm:$0xff] %v953_v42  ;;  %v959_v45 = vld [vmem:[%s10598_s8 + $0x2d88] sm:$0xff]  ;;  %956 = vst [vmem:[%s10603_s9 + $0xb58] sm:$0xff] %v955_v43  ;;  %v961_v46 = vld [vmem:[%s10598_s8 + $0x2d90] sm:$0xff] }
  0xc7   : > { %958 = vst [vmem:[%s10603_s9 + $0xb60] sm:$0xff] %v957_v44  ;;  %960 = vst [vmem:[%s10603_s9 + $0xb68] sm:$0xff] %v959_v45  ;;  %v963_v47 = vld [vmem:[%s10598_s8 + $0x2d98] sm:$0xff]  ;;  %v965_v48 = vld [vmem:[%s10598_s8 + $0x2e00] sm:$0xff] }
  0xc8   : > { %962 = vst [vmem:[%s10603_s9 + $0xb70] sm:$0xff] %v961_v46  ;;  %964 = vst [vmem:[%s10603_s9 + $0xb78] sm:$0xff] %v963_v47  ;;  %v967_v49 = vld [vmem:[%s10598_s8 + $0x2e08] sm:$0xff]  ;;  %v969_v50 = vld [vmem:[%s10598_s8 + $0x2e10] sm:$0xff] }
  0xc9   : > { %966 = vst [vmem:[%s10603_s9 + $0xb80] sm:$0xff] %v965_v48  ;;  %v971_v51 = vld [vmem:[%s10598_s8 + $0x2e18] sm:$0xff]  ;;  %968 = vst [vmem:[%s10603_s9 + $0xb88] sm:$0xff] %v967_v49  ;;  %v973_v52 = vld [vmem:[%s10598_s8 + $0x2e80] sm:$0xff] }
  0xca   : > { %970 = vst [vmem:[%s10603_s9 + $0xb90] sm:$0xff] %v969_v50  ;;  %972 = vst [vmem:[%s10603_s9 + $0xb98] sm:$0xff] %v971_v51  ;;  %v975_v53 = vld [vmem:[%s10598_s8 + $0x2e88] sm:$0xff]  ;;  %v977_v54 = vld [vmem:[%s10598_s8 + $0x2e90] sm:$0xff] }
  0xcb   : > { %974 = vst [vmem:[%s10603_s9 + $0xba0] sm:$0xff] %v973_v52  ;;  %976 = vst [vmem:[%s10603_s9 + $0xba8] sm:$0xff] %v975_v53  ;;  %v979_v55 = vld [vmem:[%s10598_s8 + $0x2e98] sm:$0xff]  ;;  %v981_v56 = vld [vmem:[%s10598_s8 + $0x2f00] sm:$0xff] }
  0xcc   : > { %978 = vst [vmem:[%s10603_s9 + $0xbb0] sm:$0xff] %v977_v54  ;;  %v983_v57 = vld [vmem:[%s10598_s8 + $0x2f08] sm:$0xff]  ;;  %980 = vst [vmem:[%s10603_s9 + $0xbb8] sm:$0xff] %v979_v55  ;;  %v985_v58 = vld [vmem:[%s10598_s8 + $0x2f10] sm:$0xff] }
  0xcd   : > { %982 = vst [vmem:[%s10603_s9 + $0xbc0] sm:$0xff] %v981_v56  ;;  %984 = vst [vmem:[%s10603_s9 + $0xbc8] sm:$0xff] %v983_v57  ;;  %v987_v59 = vld [vmem:[%s10598_s8 + $0x2f18] sm:$0xff]  ;;  %v989_v60 = vld [vmem:[%s10598_s8 + $0x2f80] sm:$0xff] }
  0xce   : > { %986 = vst [vmem:[%s10603_s9 + $0xbd0] sm:$0xff] %v985_v58  ;;  %988 = vst [vmem:[%s10603_s9 + $0xbd8] sm:$0xff] %v987_v59  ;;  %v991_v61 = vld [vmem:[%s10598_s8 + $0x2f88] sm:$0xff]  ;;  %v993_v62 = vld [vmem:[%s10598_s8 + $0x2f90] sm:$0xff] }
  0xcf   : > { %990 = vst [vmem:[%s10603_s9 + $0xbe0] sm:$0xff] %v989_v60  ;;  %v995_v63 = vld [vmem:[%s10598_s8 + $0x2f98] sm:$0xff]  ;;  %992 = vst [vmem:[%s10603_s9 + $0xbe8] sm:$0xff] %v991_v61  ;;  %v997_v0 = vld [vmem:[%s10598_s8 + $0x3000] sm:$0xff] }
  0xd0   : > { %994 = vst [vmem:[%s10603_s9 + $0xbf0] sm:$0xff] %v993_v62  ;;  %996 = vst [vmem:[%s10603_s9 + $0xbf8] sm:$0xff] %v995_v63  ;;  %v999_v1 = vld [vmem:[%s10598_s8 + $0x3008] sm:$0xff]  ;;  %v1001_v2 = vld [vmem:[%s10598_s8 + $0x3010] sm:$0xff] }
  0xd1   : > { %998 = vst [vmem:[%s10603_s9 + $0xc00] sm:$0xff] %v997_v0  ;;  %1000 = vst [vmem:[%s10603_s9 + $0xc08] sm:$0xff] %v999_v1  ;;  %v1003_v3 = vld [vmem:[%s10598_s8 + $0x3018] sm:$0xff]  ;;  %v1005_v4 = vld [vmem:[%s10598_s8 + $0x3080] sm:$0xff] }
  0xd2   : > { %1002 = vst [vmem:[%s10603_s9 + $0xc10] sm:$0xff] %v1001_v2  ;;  %v1007_v5 = vld [vmem:[%s10598_s8 + $0x3088] sm:$0xff]  ;;  %1004 = vst [vmem:[%s10603_s9 + $0xc18] sm:$0xff] %v1003_v3  ;;  %v1009_v6 = vld [vmem:[%s10598_s8 + $0x3090] sm:$0xff] }
  0xd3   : > { %1006 = vst [vmem:[%s10603_s9 + $0xc20] sm:$0xff] %v1005_v4  ;;  %1008 = vst [vmem:[%s10603_s9 + $0xc28] sm:$0xff] %v1007_v5  ;;  %v1011_v7 = vld [vmem:[%s10598_s8 + $0x3098] sm:$0xff]  ;;  %v1013_v8 = vld [vmem:[%s10598_s8 + $0x3100] sm:$0xff] }
  0xd4   : > { %1010 = vst [vmem:[%s10603_s9 + $0xc30] sm:$0xff] %v1009_v6  ;;  %1012 = vst [vmem:[%s10603_s9 + $0xc38] sm:$0xff] %v1011_v7  ;;  %v1015_v9 = vld [vmem:[%s10598_s8 + $0x3108] sm:$0xff]  ;;  %v1017_v10 = vld [vmem:[%s10598_s8 + $0x3110] sm:$0xff] }
  0xd5   : > { %1014 = vst [vmem:[%s10603_s9 + $0xc40] sm:$0xff] %v1013_v8  ;;  %v1019_v11 = vld [vmem:[%s10598_s8 + $0x3118] sm:$0xff]  ;;  %1016 = vst [vmem:[%s10603_s9 + $0xc48] sm:$0xff] %v1015_v9  ;;  %v1021_v12 = vld [vmem:[%s10598_s8 + $0x3180] sm:$0xff] }
  0xd6   : > { %1018 = vst [vmem:[%s10603_s9 + $0xc50] sm:$0xff] %v1017_v10  ;;  %1020 = vst [vmem:[%s10603_s9 + $0xc58] sm:$0xff] %v1019_v11  ;;  %v1023_v13 = vld [vmem:[%s10598_s8 + $0x3188] sm:$0xff]  ;;  %v1025_v14 = vld [vmem:[%s10598_s8 + $0x3190] sm:$0xff] }
  0xd7   : > { %1022 = vst [vmem:[%s10603_s9 + $0xc60] sm:$0xff] %v1021_v12  ;;  %1024 = vst [vmem:[%s10603_s9 + $0xc68] sm:$0xff] %v1023_v13  ;;  %v1027_v15 = vld [vmem:[%s10598_s8 + $0x3198] sm:$0xff]  ;;  %v1029_v16 = vld [vmem:[%s10598_s8 + $0x3200] sm:$0xff] }
  0xd8   : > { %1026 = vst [vmem:[%s10603_s9 + $0xc70] sm:$0xff] %v1025_v14  ;;  %v1031_v17 = vld [vmem:[%s10598_s8 + $0x3208] sm:$0xff]  ;;  %1028 = vst [vmem:[%s10603_s9 + $0xc78] sm:$0xff] %v1027_v15  ;;  %v1033_v18 = vld [vmem:[%s10598_s8 + $0x3210] sm:$0xff] }
  0xd9   : > { %1030 = vst [vmem:[%s10603_s9 + $0xc80] sm:$0xff] %v1029_v16  ;;  %1032 = vst [vmem:[%s10603_s9 + $0xc88] sm:$0xff] %v1031_v17  ;;  %v1035_v19 = vld [vmem:[%s10598_s8 + $0x3218] sm:$0xff]  ;;  %v1037_v20 = vld [vmem:[%s10598_s8 + $0x3280] sm:$0xff] }
  0xda   : > { %1034 = vst [vmem:[%s10603_s9 + $0xc90] sm:$0xff] %v1033_v18  ;;  %1036 = vst [vmem:[%s10603_s9 + $0xc98] sm:$0xff] %v1035_v19  ;;  %v1039_v21 = vld [vmem:[%s10598_s8 + $0x3288] sm:$0xff]  ;;  %v1041_v22 = vld [vmem:[%s10598_s8 + $0x3290] sm:$0xff] }
  0xdb   : > { %1038 = vst [vmem:[%s10603_s9 + $0xca0] sm:$0xff] %v1037_v20  ;;  %v1043_v23 = vld [vmem:[%s10598_s8 + $0x3298] sm:$0xff]  ;;  %1040 = vst [vmem:[%s10603_s9 + $0xca8] sm:$0xff] %v1039_v21  ;;  %v1045_v24 = vld [vmem:[%s10598_s8 + $0x3300] sm:$0xff] }
  0xdc   : > { %1042 = vst [vmem:[%s10603_s9 + $0xcb0] sm:$0xff] %v1041_v22  ;;  %1044 = vst [vmem:[%s10603_s9 + $0xcb8] sm:$0xff] %v1043_v23  ;;  %v1047_v25 = vld [vmem:[%s10598_s8 + $0x3308] sm:$0xff]  ;;  %v1049_v26 = vld [vmem:[%s10598_s8 + $0x3310] sm:$0xff] }
  0xdd   : > { %1046 = vst [vmem:[%s10603_s9 + $0xcc0] sm:$0xff] %v1045_v24  ;;  %1048 = vst [vmem:[%s10603_s9 + $0xcc8] sm:$0xff] %v1047_v25  ;;  %v1051_v27 = vld [vmem:[%s10598_s8 + $0x3318] sm:$0xff]  ;;  %v1053_v28 = vld [vmem:[%s10598_s8 + $0x3380] sm:$0xff] }
  0xde   : > { %1050 = vst [vmem:[%s10603_s9 + $0xcd0] sm:$0xff] %v1049_v26  ;;  %v1055_v29 = vld [vmem:[%s10598_s8 + $0x3388] sm:$0xff]  ;;  %1052 = vst [vmem:[%s10603_s9 + $0xcd8] sm:$0xff] %v1051_v27  ;;  %v1057_v30 = vld [vmem:[%s10598_s8 + $0x3390] sm:$0xff] }
  0xdf   : > { %1054 = vst [vmem:[%s10603_s9 + $0xce0] sm:$0xff] %v1053_v28  ;;  %1056 = vst [vmem:[%s10603_s9 + $0xce8] sm:$0xff] %v1055_v29  ;;  %v1059_v31 = vld [vmem:[%s10598_s8 + $0x3398] sm:$0xff]  ;;  %v1061_v32 = vld [vmem:[%s10598_s8 + $0x3400] sm:$0xff] }
  0xe0   : > { %1058 = vst [vmem:[%s10603_s9 + $0xcf0] sm:$0xff] %v1057_v30  ;;  %1060 = vst [vmem:[%s10603_s9 + $0xcf8] sm:$0xff] %v1059_v31  ;;  %v1063_v33 = vld [vmem:[%s10598_s8 + $0x3408] sm:$0xff]  ;;  %v1065_v34 = vld [vmem:[%s10598_s8 + $0x3410] sm:$0xff] }
  0xe1   : > { %1062 = vst [vmem:[%s10603_s9 + $0xd00] sm:$0xff] %v1061_v32  ;;  %v1067_v35 = vld [vmem:[%s10598_s8 + $0x3418] sm:$0xff]  ;;  %1064 = vst [vmem:[%s10603_s9 + $0xd08] sm:$0xff] %v1063_v33  ;;  %v1069_v36 = vld [vmem:[%s10598_s8 + $0x3480] sm:$0xff] }
  0xe2   : > { %1066 = vst [vmem:[%s10603_s9 + $0xd10] sm:$0xff] %v1065_v34  ;;  %1068 = vst [vmem:[%s10603_s9 + $0xd18] sm:$0xff] %v1067_v35  ;;  %v1071_v37 = vld [vmem:[%s10598_s8 + $0x3488] sm:$0xff]  ;;  %v1073_v38 = vld [vmem:[%s10598_s8 + $0x3490] sm:$0xff] }
  0xe3   : > { %1070 = vst [vmem:[%s10603_s9 + $0xd20] sm:$0xff] %v1069_v36  ;;  %1072 = vst [vmem:[%s10603_s9 + $0xd28] sm:$0xff] %v1071_v37  ;;  %v1075_v39 = vld [vmem:[%s10598_s8 + $0x3498] sm:$0xff]  ;;  %v1077_v40 = vld [vmem:[%s10598_s8 + $0x3500] sm:$0xff] }
  0xe4   : > { %1074 = vst [vmem:[%s10603_s9 + $0xd30] sm:$0xff] %v1073_v38  ;;  %v1079_v41 = vld [vmem:[%s10598_s8 + $0x3508] sm:$0xff]  ;;  %1076 = vst [vmem:[%s10603_s9 + $0xd38] sm:$0xff] %v1075_v39  ;;  %v1081_v42 = vld [vmem:[%s10598_s8 + $0x3510] sm:$0xff] }
  0xe5   : > { %1078 = vst [vmem:[%s10603_s9 + $0xd40] sm:$0xff] %v1077_v40  ;;  %1080 = vst [vmem:[%s10603_s9 + $0xd48] sm:$0xff] %v1079_v41  ;;  %v1083_v43 = vld [vmem:[%s10598_s8 + $0x3518] sm:$0xff]  ;;  %v1085_v44 = vld [vmem:[%s10598_s8 + $0x3580] sm:$0xff] }
  0xe6   : > { %1082 = vst [vmem:[%s10603_s9 + $0xd50] sm:$0xff] %v1081_v42  ;;  %1084 = vst [vmem:[%s10603_s9 + $0xd58] sm:$0xff] %v1083_v43  ;;  %v1087_v45 = vld [vmem:[%s10598_s8 + $0x3588] sm:$0xff]  ;;  %v1089_v46 = vld [vmem:[%s10598_s8 + $0x3590] sm:$0xff] }
  0xe7   : > { %1086 = vst [vmem:[%s10603_s9 + $0xd60] sm:$0xff] %v1085_v44  ;;  %v1091_v47 = vld [vmem:[%s10598_s8 + $0x3598] sm:$0xff]  ;;  %1088 = vst [vmem:[%s10603_s9 + $0xd68] sm:$0xff] %v1087_v45  ;;  %v1093_v48 = vld [vmem:[%s10598_s8 + $0x3600] sm:$0xff] }
  0xe8   : > { %1090 = vst [vmem:[%s10603_s9 + $0xd70] sm:$0xff] %v1089_v46  ;;  %1092 = vst [vmem:[%s10603_s9 + $0xd78] sm:$0xff] %v1091_v47  ;;  %v1095_v49 = vld [vmem:[%s10598_s8 + $0x3608] sm:$0xff]  ;;  %v1097_v50 = vld [vmem:[%s10598_s8 + $0x3610] sm:$0xff] }
  0xe9   : > { %1094 = vst [vmem:[%s10603_s9 + $0xd80] sm:$0xff] %v1093_v48  ;;  %1096 = vst [vmem:[%s10603_s9 + $0xd88] sm:$0xff] %v1095_v49  ;;  %v1099_v51 = vld [vmem:[%s10598_s8 + $0x3618] sm:$0xff]  ;;  %v1101_v52 = vld [vmem:[%s10598_s8 + $0x3680] sm:$0xff] }
  0xea   : > { %1098 = vst [vmem:[%s10603_s9 + $0xd90] sm:$0xff] %v1097_v50  ;;  %v1103_v53 = vld [vmem:[%s10598_s8 + $0x3688] sm:$0xff]  ;;  %1100 = vst [vmem:[%s10603_s9 + $0xd98] sm:$0xff] %v1099_v51  ;;  %v1105_v54 = vld [vmem:[%s10598_s8 + $0x3690] sm:$0xff] }
  0xeb   : > { %1102 = vst [vmem:[%s10603_s9 + $0xda0] sm:$0xff] %v1101_v52  ;;  %1104 = vst [vmem:[%s10603_s9 + $0xda8] sm:$0xff] %v1103_v53  ;;  %v1107_v55 = vld [vmem:[%s10598_s8 + $0x3698] sm:$0xff]  ;;  %v1109_v56 = vld [vmem:[%s10598_s8 + $0x3700] sm:$0xff] }
  0xec   : > { %1106 = vst [vmem:[%s10603_s9 + $0xdb0] sm:$0xff] %v1105_v54  ;;  %1108 = vst [vmem:[%s10603_s9 + $0xdb8] sm:$0xff] %v1107_v55  ;;  %v1111_v57 = vld [vmem:[%s10598_s8 + $0x3708] sm:$0xff]  ;;  %v1113_v58 = vld [vmem:[%s10598_s8 + $0x3710] sm:$0xff] }
  0xed   : > { %1110 = vst [vmem:[%s10603_s9 + $0xdc0] sm:$0xff] %v1109_v56  ;;  %v1115_v59 = vld [vmem:[%s10598_s8 + $0x3718] sm:$0xff]  ;;  %1112 = vst [vmem:[%s10603_s9 + $0xdc8] sm:$0xff] %v1111_v57  ;;  %v1117_v60 = vld [vmem:[%s10598_s8 + $0x3780] sm:$0xff] }
  0xee   : > { %1114 = vst [vmem:[%s10603_s9 + $0xdd0] sm:$0xff] %v1113_v58  ;;  %1116 = vst [vmem:[%s10603_s9 + $0xdd8] sm:$0xff] %v1115_v59  ;;  %v1119_v61 = vld [vmem:[%s10598_s8 + $0x3788] sm:$0xff]  ;;  %v1121_v62 = vld [vmem:[%s10598_s8 + $0x3790] sm:$0xff] }
  0xef   : > { %1118 = vst [vmem:[%s10603_s9 + $0xde0] sm:$0xff] %v1117_v60  ;;  %1120 = vst [vmem:[%s10603_s9 + $0xde8] sm:$0xff] %v1119_v61  ;;  %v1123_v63 = vld [vmem:[%s10598_s8 + $0x3798] sm:$0xff]  ;;  %v1125_v0 = vld [vmem:[%s10598_s8 + $0x3800] sm:$0xff] }
  0xf0   : > { %1122 = vst [vmem:[%s10603_s9 + $0xdf0] sm:$0xff] %v1121_v62  ;;  %v1127_v1 = vld [vmem:[%s10598_s8 + $0x3808] sm:$0xff]  ;;  %1124 = vst [vmem:[%s10603_s9 + $0xdf8] sm:$0xff] %v1123_v63  ;;  %v1129_v2 = vld [vmem:[%s10598_s8 + $0x3810] sm:$0xff] }
  0xf1   : > { %1126 = vst [vmem:[%s10603_s9 + $0xe00] sm:$0xff] %v1125_v0  ;;  %1128 = vst [vmem:[%s10603_s9 + $0xe08] sm:$0xff] %v1127_v1  ;;  %v1131_v3 = vld [vmem:[%s10598_s8 + $0x3818] sm:$0xff]  ;;  %v1133_v4 = vld [vmem:[%s10598_s8 + $0x3880] sm:$0xff] }
  0xf2   : > { %1130 = vst [vmem:[%s10603_s9 + $0xe10] sm:$0xff] %v1129_v2  ;;  %1132 = vst [vmem:[%s10603_s9 + $0xe18] sm:$0xff] %v1131_v3  ;;  %v1135_v5 = vld [vmem:[%s10598_s8 + $0x3888] sm:$0xff]  ;;  %v1137_v6 = vld [vmem:[%s10598_s8 + $0x3890] sm:$0xff] }
  0xf3   : > { %1134 = vst [vmem:[%s10603_s9 + $0xe20] sm:$0xff] %v1133_v4  ;;  %v1139_v7 = vld [vmem:[%s10598_s8 + $0x3898] sm:$0xff]  ;;  %1136 = vst [vmem:[%s10603_s9 + $0xe28] sm:$0xff] %v1135_v5  ;;  %v1141_v8 = vld [vmem:[%s10598_s8 + $0x3900] sm:$0xff] }
  0xf4   : > { %1138 = vst [vmem:[%s10603_s9 + $0xe30] sm:$0xff] %v1137_v6  ;;  %1140 = vst [vmem:[%s10603_s9 + $0xe38] sm:$0xff] %v1139_v7  ;;  %v1143_v9 = vld [vmem:[%s10598_s8 + $0x3908] sm:$0xff]  ;;  %v1145_v10 = vld [vmem:[%s10598_s8 + $0x3910] sm:$0xff] }
  0xf5   : > { %1142 = vst [vmem:[%s10603_s9 + $0xe40] sm:$0xff] %v1141_v8  ;;  %1144 = vst [vmem:[%s10603_s9 + $0xe48] sm:$0xff] %v1143_v9  ;;  %v1147_v11 = vld [vmem:[%s10598_s8 + $0x3918] sm:$0xff]  ;;  %v1149_v12 = vld [vmem:[%s10598_s8 + $0x3980] sm:$0xff] }
  0xf6   : > { %1146 = vst [vmem:[%s10603_s9 + $0xe50] sm:$0xff] %v1145_v10  ;;  %v1151_v13 = vld [vmem:[%s10598_s8 + $0x3988] sm:$0xff]  ;;  %1148 = vst [vmem:[%s10603_s9 + $0xe58] sm:$0xff] %v1147_v11  ;;  %v1153_v14 = vld [vmem:[%s10598_s8 + $0x3990] sm:$0xff] }
  0xf7   : > { %1150 = vst [vmem:[%s10603_s9 + $0xe60] sm:$0xff] %v1149_v12  ;;  %1152 = vst [vmem:[%s10603_s9 + $0xe68] sm:$0xff] %v1151_v13  ;;  %v1155_v15 = vld [vmem:[%s10598_s8 + $0x3998] sm:$0xff]  ;;  %v1157_v16 = vld [vmem:[%s10598_s8 + $0x3a00] sm:$0xff] }
  0xf8   : > { %1154 = vst [vmem:[%s10603_s9 + $0xe70] sm:$0xff] %v1153_v14  ;;  %1156 = vst [vmem:[%s10603_s9 + $0xe78] sm:$0xff] %v1155_v15  ;;  %v1159_v17 = vld [vmem:[%s10598_s8 + $0x3a08] sm:$0xff]  ;;  %v1161_v18 = vld [vmem:[%s10598_s8 + $0x3a10] sm:$0xff] }
  0xf9   : > { %1158 = vst [vmem:[%s10603_s9 + $0xe80] sm:$0xff] %v1157_v16  ;;  %v1163_v19 = vld [vmem:[%s10598_s8 + $0x3a18] sm:$0xff]  ;;  %1160 = vst [vmem:[%s10603_s9 + $0xe88] sm:$0xff] %v1159_v17  ;;  %v1165_v20 = vld [vmem:[%s10598_s8 + $0x3a80] sm:$0xff] }
  0xfa   : > { %1162 = vst [vmem:[%s10603_s9 + $0xe90] sm:$0xff] %v1161_v18  ;;  %1164 = vst [vmem:[%s10603_s9 + $0xe98] sm:$0xff] %v1163_v19  ;;  %v1167_v21 = vld [vmem:[%s10598_s8 + $0x3a88] sm:$0xff]  ;;  %v1169_v22 = vld [vmem:[%s10598_s8 + $0x3a90] sm:$0xff] }
  0xfb   : > { %1166 = vst [vmem:[%s10603_s9 + $0xea0] sm:$0xff] %v1165_v20  ;;  %1168 = vst [vmem:[%s10603_s9 + $0xea8] sm:$0xff] %v1167_v21  ;;  %v1171_v23 = vld [vmem:[%s10598_s8 + $0x3a98] sm:$0xff]  ;;  %v1173_v24 = vld [vmem:[%s10598_s8 + $0x3b00] sm:$0xff] }
  0xfc   : > { %1170 = vst [vmem:[%s10603_s9 + $0xeb0] sm:$0xff] %v1169_v22  ;;  %v1175_v25 = vld [vmem:[%s10598_s8 + $0x3b08] sm:$0xff]  ;;  %1172 = vst [vmem:[%s10603_s9 + $0xeb8] sm:$0xff] %v1171_v23  ;;  %v1177_v26 = vld [vmem:[%s10598_s8 + $0x3b10] sm:$0xff] }
  0xfd   : > { %1174 = vst [vmem:[%s10603_s9 + $0xec0] sm:$0xff] %v1173_v24  ;;  %1176 = vst [vmem:[%s10603_s9 + $0xec8] sm:$0xff] %v1175_v25  ;;  %v1179_v27 = vld [vmem:[%s10598_s8 + $0x3b18] sm:$0xff]  ;;  %v1181_v28 = vld [vmem:[%s10598_s8 + $0x3b80] sm:$0xff] }
  0xfe   : > { %1178 = vst [vmem:[%s10603_s9 + $0xed0] sm:$0xff] %v1177_v26  ;;  %1180 = vst [vmem:[%s10603_s9 + $0xed8] sm:$0xff] %v1179_v27  ;;  %v1183_v29 = vld [vmem:[%s10598_s8 + $0x3b88] sm:$0xff]  ;;  %v1185_v30 = vld [vmem:[%s10598_s8 + $0x3b90] sm:$0xff] }
  0xff   : > { %1182 = vst [vmem:[%s10603_s9 + $0xee0] sm:$0xff] %v1181_v28  ;;  %v1187_v31 = vld [vmem:[%s10598_s8 + $0x3b98] sm:$0xff]  ;;  %1184 = vst [vmem:[%s10603_s9 + $0xee8] sm:$0xff] %v1183_v29  ;;  %v1189_v32 = vld [vmem:[%s10598_s8 + $0x3c00] sm:$0xff] }
 0x100   : > { %1186 = vst [vmem:[%s10603_s9 + $0xef0] sm:$0xff] %v1185_v30  ;;  %1188 = vst [vmem:[%s10603_s9 + $0xef8] sm:$0xff] %v1187_v31  ;;  %v1191_v33 = vld [vmem:[%s10598_s8 + $0x3c08] sm:$0xff]  ;;  %v1193_v34 = vld [vmem:[%s10598_s8 + $0x3c10] sm:$0xff] }
 0x101   : > { %1190 = vst [vmem:[%s10603_s9 + $0xf00] sm:$0xff] %v1189_v32  ;;  %1192 = vst [vmem:[%s10603_s9 + $0xf08] sm:$0xff] %v1191_v33  ;;  %v1195_v35 = vld [vmem:[%s10598_s8 + $0x3c18] sm:$0xff]  ;;  %v1197_v36 = vld [vmem:[%s10598_s8 + $0x3c80] sm:$0xff] }
 0x102   : > { %1194 = vst [vmem:[%s10603_s9 + $0xf10] sm:$0xff] %v1193_v34  ;;  %v1199_v37 = vld [vmem:[%s10598_s8 + $0x3c88] sm:$0xff]  ;;  %1196 = vst [vmem:[%s10603_s9 + $0xf18] sm:$0xff] %v1195_v35  ;;  %v1201_v38 = vld [vmem:[%s10598_s8 + $0x3c90] sm:$0xff] }
 0x103   : > { %1198 = vst [vmem:[%s10603_s9 + $0xf20] sm:$0xff] %v1197_v36  ;;  %1200 = vst [vmem:[%s10603_s9 + $0xf28] sm:$0xff] %v1199_v37  ;;  %v1203_v39 = vld [vmem:[%s10598_s8 + $0x3c98] sm:$0xff]  ;;  %v1205_v40 = vld [vmem:[%s10598_s8 + $0x3d00] sm:$0xff] }
 0x104   : > { %1202 = vst [vmem:[%s10603_s9 + $0xf30] sm:$0xff] %v1201_v38  ;;  %1204 = vst [vmem:[%s10603_s9 + $0xf38] sm:$0xff] %v1203_v39  ;;  %v1207_v41 = vld [vmem:[%s10598_s8 + $0x3d08] sm:$0xff]  ;;  %v1209_v42 = vld [vmem:[%s10598_s8 + $0x3d10] sm:$0xff] }
 0x105   : > { %1206 = vst [vmem:[%s10603_s9 + $0xf40] sm:$0xff] %v1205_v40  ;;  %v1211_v43 = vld [vmem:[%s10598_s8 + $0x3d18] sm:$0xff]  ;;  %1208 = vst [vmem:[%s10603_s9 + $0xf48] sm:$0xff] %v1207_v41  ;;  %v1213_v44 = vld [vmem:[%s10598_s8 + $0x3d80] sm:$0xff] }
 0x106   : > { %1210 = vst [vmem:[%s10603_s9 + $0xf50] sm:$0xff] %v1209_v42  ;;  %1212 = vst [vmem:[%s10603_s9 + $0xf58] sm:$0xff] %v1211_v43  ;;  %v1215_v45 = vld [vmem:[%s10598_s8 + $0x3d88] sm:$0xff]  ;;  %v1217_v46 = vld [vmem:[%s10598_s8 + $0x3d90] sm:$0xff] }
 0x107   : > { %1214 = vst [vmem:[%s10603_s9 + $0xf60] sm:$0xff] %v1213_v44  ;;  %1216 = vst [vmem:[%s10603_s9 + $0xf68] sm:$0xff] %v1215_v45  ;;  %v1219_v47 = vld [vmem:[%s10598_s8 + $0x3d98] sm:$0xff]  ;;  %v1221_v48 = vld [vmem:[%s10598_s8 + $0x3e00] sm:$0xff] }
 0x108   : > { %1218 = vst [vmem:[%s10603_s9 + $0xf70] sm:$0xff] %v1217_v46  ;;  %v1223_v49 = vld [vmem:[%s10598_s8 + $0x3e08] sm:$0xff]  ;;  %1220 = vst [vmem:[%s10603_s9 + $0xf78] sm:$0xff] %v1219_v47  ;;  %v1225_v50 = vld [vmem:[%s10598_s8 + $0x3e10] sm:$0xff] }
 0x109   : > { %1222 = vst [vmem:[%s10603_s9 + $0xf80] sm:$0xff] %v1221_v48  ;;  %1224 = vst [vmem:[%s10603_s9 + $0xf88] sm:$0xff] %v1223_v49  ;;  %v1227_v51 = vld [vmem:[%s10598_s8 + $0x3e18] sm:$0xff]  ;;  %v1229_v52 = vld [vmem:[%s10598_s8 + $0x3e80] sm:$0xff] }
 0x10a   : > { %1226 = vst [vmem:[%s10603_s9 + $0xf90] sm:$0xff] %v1225_v50  ;;  %1228 = vst [vmem:[%s10603_s9 + $0xf98] sm:$0xff] %v1227_v51  ;;  %v1231_v53 = vld [vmem:[%s10598_s8 + $0x3e88] sm:$0xff]  ;;  %v1233_v54 = vld [vmem:[%s10598_s8 + $0x3e90] sm:$0xff] }
 0x10b   : > { %1230 = vst [vmem:[%s10603_s9 + $0xfa0] sm:$0xff] %v1229_v52  ;;  %v1235_v55 = vld [vmem:[%s10598_s8 + $0x3e98] sm:$0xff]  ;;  %1232 = vst [vmem:[%s10603_s9 + $0xfa8] sm:$0xff] %v1231_v53  ;;  %v1237_v56 = vld [vmem:[%s10598_s8 + $0x3f00] sm:$0xff] }
 0x10c   : > { %1234 = vst [vmem:[%s10603_s9 + $0xfb0] sm:$0xff] %v1233_v54  ;;  %1236 = vst [vmem:[%s10603_s9 + $0xfb8] sm:$0xff] %v1235_v55  ;;  %v1239_v57 = vld [vmem:[%s10598_s8 + $0x3f08] sm:$0xff]  ;;  %v1241_v58 = vld [vmem:[%s10598_s8 + $0x3f10] sm:$0xff] }
 0x10d   : > { %1238 = vst [vmem:[%s10603_s9 + $0xfc0] sm:$0xff] %v1237_v56  ;;  %1240 = vst [vmem:[%s10603_s9 + $0xfc8] sm:$0xff] %v1239_v57  ;;  %v1243_v59 = vld [vmem:[%s10598_s8 + $0x3f18] sm:$0xff]  ;;  %v1245_v60 = vld [vmem:[%s10598_s8 + $0x3f80] sm:$0xff] }
 0x10e   : > { %1242 = vst [vmem:[%s10603_s9 + $0xfd0] sm:$0xff] %v1241_v58  ;;  %v1247_v61 = vld [vmem:[%s10598_s8 + $0x3f88] sm:$0xff]  ;;  %1244 = vst [vmem:[%s10603_s9 + $0xfd8] sm:$0xff] %v1243_v59  ;;  %v1249_v62 = vld [vmem:[%s10598_s8 + $0x3f90] sm:$0xff] }
 0x10f   : > { %1246 = vst [vmem:[%s10603_s9 + $0xfe0] sm:$0xff] %v1245_v60  ;;  %1248 = vst [vmem:[%s10603_s9 + $0xfe8] sm:$0xff] %v1247_v61  ;;  %v1251_v63 = vld [vmem:[%s10598_s8 + $0x3f98] sm:$0xff] }
 0x110   : > { %1250 = vst [vmem:[%s10603_s9 + $0xff0] sm:$0xff] %v1249_v62  ;;  %1252 = vst [vmem:[%s10603_s9 + $0xff8] sm:$0xff] %v1251_v63 }
 0x111 PF: > { %p9325_p6 = scmp.ge.s32.totalorder %s10519_s22, 1  ;;  %p1275_p7 = scmp.lt.s32.totalorder %s10519_s22, 5 }
 0x113   : > { %p1276_p8 = pnand %p9325_p6, %p1275_p7 }
 0x114   : > { %s1282_s10 = sand.u32 (!%p1276_p8), 1, %s10503_s18   ;;  %s9327_s11 = sshll.u32 (!%p1276_p8), %s10511_s20, 3 }
 0x115   : > { %1279 = sbr.rel (%p1276_p8) target bundleno = 1650 (0x672), region = 59  ;;  %s9326_s12 = sshll.u32 (!%p1276_p8), %s1282_s10, 12 }
 0x116   : > { %p1329_p9 = scmp.lt.s32.totalorder (!%p1276_p8), %s9327_s11, 31  ;;  %s9328_s13 = sshll.u32 (!%p1276_p8), %s10511_s20, 7 }
 0x117   : > { %p1334_p10 = scmp.lt.s32.totalorder (!%p1276_p8), %s9328_s13, 511  ;;  %s11641_s29 = scalar_lea.vmem (!%p1276_p8), [#allocation2], %s9326_s12 }
 0x118   : > { %p9331_p11 = scmp.ne.s32.totalorder (!%p1276_p8), %s10511_s20, 0 }
 0x11a   : > { %s13087_s11 = smov (!%p1329_p9, %s9327_s11), 31  ;;  %s13089_s13 = smov (!%p1334_p10, %s9328_s13), 511 }
 0x11b   : > { %s11634_s16 = scalar_lea.vmem %s13075_s2, %s13087_s11  ;;  %s10369_s17 = sshll.u32 %s13089_s13, 5 }
 0x11c   : > { %s11639_s28 = scalar_lea.vmem %s13076_s3, %s10369_s17  ;;  %1344 = sbr.rel (%p9331_p11) target bundleno = 305 (0x131), region = 67 }
 0x121   : > { %v1347_v0 = vlaneseq  ;;  %v1345_v2 = vld [vmem:[%s13077_s4] sm:$0xff] }
 0x123   : > { %v1348_v1 = vshrl.u32 %v1347_v0, 7 }
 0x125   : > { %v1349_v3 = vsub.s32 0, %v1348_v1  ;;  %v1353_v4 = vsub.s32 1, %v1348_v1  ;;  %v1357_v5 = vsub.s32 2, %v1348_v1  ;;  %v1361_v6 = vsub.s32 3, %v1348_v1 }
 0x126   : > { %v1365_v7 = vsub.s32 4, %v1348_v1  ;;  %v1369_v8 = vsub.s32 5, %v1348_v1  ;;  %v1373_v9 = vsub.s32 6, %v1348_v1  ;;  %v1377_v10 = vsub.s32 7, %v1348_v1 }
 0x127   : > { %v1350_v11 = vrot.slane %v1345_v2, %v1349_v3  ;;  %v1354_v12 = vrot.slane %v1345_v2, %v1353_v4  ;;  %v1358_v13 = vrot.slane %v1345_v2, %v1357_v5  ;;  %v1362_v14 = vrot.slane %v1345_v2, %v1361_v6 }
 0x128   : > { %v1366_v15 = vrot.slane %v1345_v2, %v1365_v7  ;;  %v1370_v16 = vrot.slane %v1345_v2, %v1369_v8  ;;  %v1374_v17 = vrot.slane %v1345_v2, %v1373_v9  ;;  %v1378_v18 = vrot.slane %v1345_v2, %v1377_v10 }
 0x129   : > { %1387 = vst [vmem:[#allocation3] sm:$0xff] %v1350_v11  ;;  %1395 = vst [vmem:[#allocation3 + $0x40] sm:$0xff] %v1350_v11 }
 0x12a   : > { %1388 = vst [vmem:[#allocation3 + $0x8] sm:$0xff] %v1354_v12  ;;  %1396 = vst [vmem:[#allocation3 + $0x48] sm:$0xff] %v1354_v12 }
 0x12b   : > { %1389 = vst [vmem:[#allocation3 + $0x10] sm:$0xff] %v1358_v13  ;;  %1397 = vst [vmem:[#allocation3 + $0x50] sm:$0xff] %v1358_v13 }
 0x12c   : > { %1390 = vst [vmem:[#allocation3 + $0x18] sm:$0xff] %v1362_v14  ;;  %1398 = vst [vmem:[#allocation3 + $0x58] sm:$0xff] %v1362_v14 }
 0x12d   : > { %1391 = vst [vmem:[#allocation3 + $0x20] sm:$0xff] %v1366_v15  ;;  %1399 = vst [vmem:[#allocation3 + $0x60] sm:$0xff] %v1366_v15 }
 0x12e   : > { %1392 = vst [vmem:[#allocation3 + $0x28] sm:$0xff] %v1370_v16  ;;  %1400 = vst [vmem:[#allocation3 + $0x68] sm:$0xff] %v1370_v16 }
 0x12f   : > { %1393 = vst [vmem:[#allocation3 + $0x30] sm:$0xff] %v1374_v17  ;;  %1401 = vst [vmem:[#allocation3 + $0x70] sm:$0xff] %v1374_v17 }
 0x130   : > { %1394 = vst [vmem:[#allocation3 + $0x38] sm:$0xff] %v1378_v18  ;;  %1402 = vst [vmem:[#allocation3 + $0x78] sm:$0xff] %v1378_v18 }
 0x131 PF: > { %v1467_v19 = vld [vmem:[%s11641_s29 + $0x1c0] sm:$0xff]  ;;  %v11694_v14 = vld [vmem:[%s13073_s0 + $0x8] sm:$0xff]  ;;  %p13043_p12 = scmp.eq.s32.totalorder %s9318_s23, 3 }
 0x132   : > { %v1471_v20 = vld [vmem:[%s11641_s29 + $0x1e0] sm:$0xff]  ;;  %v11699_v15 = vld [vmem:[%s13073_s0 + $0x28] sm:$0xff] }
 0x133   : > { %v1595_v21 = vld [vmem:[%s11641_s29 + $0x5c0] sm:$0xff]  ;;  %v9397_v22 = vcombine.high %v1467_v19, %v1471_v20  ;;  %v9396_v24 = vcombine.low %v1467_v19, %v1471_v20  ;;  %v11705_v18 = vcombine.high %v11694_v14, %v11699_v15 }
 0x134   : > { %v1599_v23 = vld [vmem:[%s11641_s29 + $0x5e0] sm:$0xff] }
 0x135   : > { %v1459_v25 = vld [vmem:[%s11641_s29 + $0x180] sm:$0xff]  ;;  %v9525_v27 = vcombine.high %v1595_v21, %v1599_v23  ;;  %v9524_v28 = vcombine.low %v1595_v21, %v1599_v23  ;;  %4565 = vmatprep.subr.bf16.mxu0 %v9397_v22  ;;  %4640 = vmatprep.mubr.bf16.mxu1 %v11705_v18 }
 0x136   : > { %v1463_v26 = vld [vmem:[%s11641_s29 + $0x1a0] sm:$0xff]  ;;  %4566 = vmatpush1.bf16.msra.mxu0 %v9396_v24 }
 0x137   : > { %v9389_v29 = vcombine.high %v1459_v25, %v1463_v26  ;;  %v1587_v30 = vld [vmem:[%s11641_s29 + $0x580] sm:$0xff]  ;;  %4608 = vmatprep.subr.bf16.mxu1 %v9525_v27  ;;  %v9388_v37 = vcombine.low %v1459_v25, %v1463_v26 }
 0x138   : > { %v1591_v31 = vld [vmem:[%s11641_s29 + $0x5a0] sm:$0xff]  ;;  %4609 = vmatpush1.bf16.msra.mxu1 %v9524_v28 }
 0x139   : > { %v1451_v32 = vld [vmem:[%s11641_s29 + $0x140] sm:$0xff]  ;;  %v9517_v33 = vcombine.high %v1587_v30, %v1591_v31  ;;  %4567 = vmatprep.subr.bf16.mxu0 %v9389_v29  ;;  %v9516_v38 = vcombine.low %v1587_v30, %v1591_v31 }
 0x13a   : > { %v1455_v34 = vld [vmem:[%s11641_s29 + $0x160] sm:$0xff]  ;;  %4568 = vmatpush1.bf16.msra.mxu0 %v9388_v37 }
 0x13b   : > { %v1579_v35 = vld [vmem:[%s11641_s29 + $0x540] sm:$0xff]  ;;  %v9381_v39 = vcombine.high %v1451_v32, %v1455_v34  ;;  %4610 = vmatprep.subr.bf16.mxu1 %v9517_v33  ;;  %v9380_v45 = vcombine.low %v1451_v32, %v1455_v34 }
 0x13c   : > { %v1583_v36 = vld [vmem:[%s11641_s29 + $0x560] sm:$0xff]  ;;  %4611 = vmatpush1.bf16.msra.mxu1 %v9516_v38 }
 0x13d   : > { %v9509_v40 = vcombine.high %v1579_v35, %v1583_v36  ;;  %v1443_v41 = vld [vmem:[%s11641_s29 + $0x100] sm:$0xff]  ;;  %4569 = vmatprep.subr.bf16.mxu0 %v9381_v39  ;;  %v9508_v46 = vcombine.low %v1579_v35, %v1583_v36 }
 0x13e   : > { %v1447_v42 = vld [vmem:[%s11641_s29 + $0x120] sm:$0xff]  ;;  %4570 = vmatpush1.bf16.msra.mxu0 %v9380_v45 }
 0x13f   : > { %v1571_v43 = vld [vmem:[%s11641_s29 + $0x500] sm:$0xff]  ;;  %v9373_v47 = vcombine.high %v1443_v41, %v1447_v42  ;;  %4612 = vmatprep.subr.bf16.mxu1 %v9509_v40  ;;  %v9372_v53 = vcombine.low %v1443_v41, %v1447_v42 }
 0x140   : > { %v1575_v44 = vld [vmem:[%s11641_s29 + $0x520] sm:$0xff]  ;;  %4613 = vmatpush1.bf16.msra.mxu1 %v9508_v46 }
 0x141   : > { %v9501_v48 = vcombine.high %v1571_v43, %v1575_v44  ;;  %v1435_v49 = vld [vmem:[%s11641_s29 + $0xc0] sm:$0xff]  ;;  %4571 = vmatprep.subr.bf16.mxu0 %v9373_v47  ;;  %v9500_v54 = vcombine.low %v1571_v43, %v1575_v44 }
 0x142   : > { %v1439_v50 = vld [vmem:[%s11641_s29 + $0xe0] sm:$0xff]  ;;  %4572 = vmatpush1.bf16.msra.mxu0 %v9372_v53 }
 0x143   : > { %v1563_v51 = vld [vmem:[%s11641_s29 + $0x4c0] sm:$0xff]  ;;  %v9365_v55 = vcombine.high %v1435_v49, %v1439_v50  ;;  %4614 = vmatprep.subr.bf16.mxu1 %v9501_v48  ;;  %v9364_v61 = vcombine.low %v1435_v49, %v1439_v50 }
 0x144   : > { %v1567_v52 = vld [vmem:[%s11641_s29 + $0x4e0] sm:$0xff]  ;;  %4615 = vmatpush1.bf16.msra.mxu1 %v9500_v54 }
 0x145   : > { %v9493_v56 = vcombine.high %v1563_v51, %v1567_v52  ;;  %v1427_v57 = vld [vmem:[%s11641_s29 + $0x80] sm:$0xff]  ;;  %4573 = vmatprep.subr.bf16.mxu0 %v9365_v55  ;;  %v9492_v62 = vcombine.low %v1563_v51, %v1567_v52 }
 0x146   : > { %v1431_v58 = vld [vmem:[%s11641_s29 + $0xa0] sm:$0xff]  ;;  %4574 = vmatpush1.bf16.msra.mxu0 %v9364_v61 }
 0x147   : > { %v1555_v59 = vld [vmem:[%s11641_s29 + $0x480] sm:$0xff]  ;;  %v9357_v63 = vcombine.high %v1427_v57, %v1431_v58  ;;  %4616 = vmatprep.subr.bf16.mxu1 %v9493_v56  ;;  %v9356_v5 = vcombine.low %v1427_v57, %v1431_v58 }
 0x148   : > { %v1559_v60 = vld [vmem:[%s11641_s29 + $0x4a0] sm:$0xff]  ;;  %4617 = vmatpush1.bf16.msra.mxu1 %v9492_v62 }
 0x149   : > { %v9485_v0 = vcombine.high %v1555_v59, %v1559_v60  ;;  %v1419_v1 = vld [vmem:[%s11641_s29 + $0x40] sm:$0xff]  ;;  %4575 = vmatprep.subr.bf16.mxu0 %v9357_v63  ;;  %v9484_v6 = vcombine.low %v1555_v59, %v1559_v60 }
 0x14a   : > { %v1423_v2 = vld [vmem:[%s11641_s29 + $0x60] sm:$0xff]  ;;  %4576 = vmatpush1.bf16.msra.mxu0 %v9356_v5 }
 0x14b   : > { %v1547_v3 = vld [vmem:[%s11641_s29 + $0x440] sm:$0xff]  ;;  %v9349_v7 = vcombine.high %v1419_v1, %v1423_v2  ;;  %4618 = vmatprep.subr.bf16.mxu1 %v9485_v0  ;;  %v9348_v19 = vcombine.low %v1419_v1, %v1423_v2 }
 0x14c   : > { %v1551_v4 = vld [vmem:[%s11641_s29 + $0x460] sm:$0xff]  ;;  %4619 = vmatpush1.bf16.msra.mxu1 %v9484_v6 }
 0x14d   : > { %v1411_v8 = vld [vmem:[%s11641_s29] sm:$0xff]  ;;  %v9477_v11 = vcombine.high %v1547_v3, %v1551_v4  ;;  %4577 = vmatprep.subr.bf16.mxu0 %v9349_v7  ;;  %v9476_v20 = vcombine.low %v1547_v3, %v1551_v4 }
 0x14e   : > { %v11679_v9 = vld [vmem:[%s13073_s0] sm:$0xff]  ;;  %4578 = vmatpush1.bf16.msra.mxu0 %v9348_v19 }
 0x14f   : > { %v11684_v10 = vld [vmem:[%s13073_s0 + $0x20] sm:$0xff]  ;;  %4620 = vmatprep.subr.bf16.mxu1 %v9477_v11 }
 0x150   : > { %v1415_v12 = vld [vmem:[%s11641_s29 + $0x20] sm:$0xff]  ;;  %v11689_v13 = vcombine.high %v11679_v9, %v11684_v10  ;;  %4621 = vmatpush1.bf16.msra.mxu1 %v9476_v20 }
 0x151   : > { %v1539_v16 = vld [vmem:[%s11641_s29 + $0x400] sm:$0xff]  ;;  %v9341_v21 = vcombine.high %v1411_v8, %v1415_v12  ;;  %v9340_v27 = vcombine.low %v1411_v8, %v1415_v12 }
 0x152   : > { %v1543_v17 = vld [vmem:[%s11641_s29 + $0x420] sm:$0xff]  ;;  %4597 = vmatprep.mubr.bf16.mxu0 %v11689_v13 }
 0x153   : > { %v9469_v22 = vcombine.high %v1539_v16, %v1543_v17  ;;  %v1531_v23 = vld [vmem:[%s11641_s29 + $0x3c0] sm:$0xff]  ;;  %4579 = vmatprep.subr.bf16.mxu0 %v9341_v21  ;;  %v9468_v28 = vcombine.low %v1539_v16, %v1543_v17 }
 0x154   : > { %v1535_v24 = vld [vmem:[%s11641_s29 + $0x3e0] sm:$0xff]  ;;  %4580 = vmatpush1.bf16.msra.mxu0 %v9340_v27 }
 0x155   : > { %v1659_v25 = vld [vmem:[%s11641_s29 + $0x7c0] sm:$0xff]  ;;  %v9461_v29 = vcombine.high %v1531_v23, %v1535_v24  ;;  %4622 = vmatprep.subr.bf16.mxu1 %v9469_v22  ;;  %v9460_v35 = vcombine.low %v1531_v23, %v1535_v24 }
 0x156   : > { %v1663_v26 = vld [vmem:[%s11641_s29 + $0x7e0] sm:$0xff]  ;;  %4623 = vmatpush1.bf16.msra.mxu1 %v9468_v28 }
 0x157   : > { %v9589_v30 = vcombine.high %v1659_v25, %v1663_v26  ;;  %v1523_v31 = vld [vmem:[%s11641_s29 + $0x380] sm:$0xff]  ;;  %4581 = vmatprep.subr.bf16.mxu0 %v9461_v29  ;;  %v9588_v36 = vcombine.low %v1659_v25, %v1663_v26 }
 0x158   : > { %v1527_v32 = vld [vmem:[%s11641_s29 + $0x3a0] sm:$0xff]  ;;  %4582 = vmatpush2.bf16.msra.mxu0 %v9460_v35 }
 0x159   : > { %v1651_v33 = vld [vmem:[%s11641_s29 + $0x780] sm:$0xff]  ;;  %v9453_v37 = vcombine.high %v1523_v31, %v1527_v32  ;;  %4624 = vmatprep.subr.bf16.mxu1 %v9589_v30  ;;  %v9452_v43 = vcombine.low %v1523_v31, %v1527_v32 }
 0x15a   : > { %v1655_v34 = vld [vmem:[%s11641_s29 + $0x7a0] sm:$0xff]  ;;  %4625 = vmatpush2.bf16.msra.mxu1 %v9588_v36 }
 0x15b   : > { %v9581_v38 = vcombine.high %v1651_v33, %v1655_v34  ;;  %v1515_v39 = vld [vmem:[%s11641_s29 + $0x340] sm:$0xff]  ;;  %4583 = vmatprep.subr.bf16.mxu0 %v9453_v37  ;;  %v9580_v44 = vcombine.low %v1651_v33, %v1655_v34 }
 0x15c   : > { %v1519_v40 = vld [vmem:[%s11641_s29 + $0x360] sm:$0xff]  ;;  %4584 = vmatpush2.bf16.msra.mxu0 %v9452_v43  ;;  %v11761_v43 = vld [vmem:[%s13073_s0 + $0x30] sm:$0xff] }
 0x15d   : > { %v1643_v41 = vld [vmem:[%s11641_s29 + $0x740] sm:$0xff]  ;;  %v9445_v45 = vcombine.high %v1515_v39, %v1519_v40  ;;  %4626 = vmatprep.subr.bf16.mxu1 %v9581_v38  ;;  %v9444_v51 = vcombine.low %v1515_v39, %v1519_v40  ;;  %v11750_v40 = vcombine.low %v11679_v9, %v11684_v10  ;;  %v11770_v10 = vld [vmem:[%s13073_s0 + $0x18] sm:$0xff] }
 0x15e   : > { %v1647_v42 = vld [vmem:[%s11641_s29 + $0x760] sm:$0xff]  ;;  %4627 = vmatpush2.bf16.msra.mxu1 %v9580_v44  ;;  %v11765_v44 = vcombine.low %v11694_v14, %v11699_v15 }
 0x15f   : > { %v9573_v46 = vcombine.high %v1643_v41, %v1647_v42  ;;  %v1507_v47 = vld [vmem:[%s11641_s29 + $0x300] sm:$0xff]  ;;  %4585 = vmatprep.subr.bf16.mxu0 %v9445_v45  ;;  %v9572_v52 = vcombine.low %v1643_v41, %v1647_v42  ;;  %v11756_v42 = vld [vmem:[%s13073_s0 + $0x10] sm:$0xff]  ;;  %v11775_v45 = vld [vmem:[%s13073_s0 + $0x38] sm:$0xff] }
 0x160   : > { %v1511_v48 = vld [vmem:[%s11641_s29 + $0x320] sm:$0xff]  ;;  %4586 = vmatpush2.bf16.msra.mxu0 %v9444_v51  ;;  %v11781_v15 = vcombine.high %v11756_v42, %v11761_v43 }
 0x161   : > { %v1635_v49 = vld [vmem:[%s11641_s29 + $0x700] sm:$0xff]  ;;  %v9437_v53 = vcombine.high %v1507_v47, %v1511_v48  ;;  %4628 = vmatprep.subr.bf16.mxu1 %v9573_v46  ;;  %v9436_v59 = vcombine.low %v1507_v47, %v1511_v48 }
 0x162   : > { %v1639_v50 = vld [vmem:[%s11641_s29 + $0x720] sm:$0xff]  ;;  %4629 = vmatpush2.bf16.msra.mxu1 %v9572_v52  ;;  %v11788_v52 = vcombine.high %v11770_v10, %v11775_v45 }
 0x163   : > { %v9565_v54 = vcombine.high %v1635_v49, %v1639_v50  ;;  %v1499_v55 = vld [vmem:[%s11641_s29 + $0x2c0] sm:$0xff]  ;;  %4587 = vmatprep.subr.bf16.mxu0 %v9437_v53  ;;  %v9564_v60 = vcombine.low %v1635_v49, %v1639_v50 }
 0x164   : > { %v1503_v56 = vld [vmem:[%s11641_s29 + $0x2e0] sm:$0xff]  ;;  %4588 = vmatpush2.bf16.msra.mxu0 %v9436_v59 }
 0x165   : > { %v1627_v57 = vld [vmem:[%s11641_s29 + $0x6c0] sm:$0xff]  ;;  %v9429_v61 = vcombine.high %v1499_v55, %v1503_v56  ;;  %4630 = vmatprep.subr.bf16.mxu1 %v9565_v54  ;;  %v9428_v3 = vcombine.low %v1499_v55, %v1503_v56 }
 0x166   : > { %v1631_v58 = vld [vmem:[%s11641_s29 + $0x6e0] sm:$0xff]  ;;  %4631 = vmatpush2.bf16.msra.mxu1 %v9564_v60 }
 0x167   : > { %v9557_v62 = vcombine.high %v1627_v57, %v1631_v58  ;;  %v1491_v63 = vld [vmem:[%s11641_s29 + $0x280] sm:$0xff]  ;;  %4589 = vmatprep.subr.bf16.mxu0 %v9429_v61  ;;  %v9556_v4 = vcombine.low %v1627_v57, %v1631_v58 }
 0x168   : > { %v1495_v0 = vld [vmem:[%s11641_s29 + $0x2a0] sm:$0xff]  ;;  %4590 = vmatpush2.bf16.msra.mxu0 %v9428_v3 }
 0x169   : > { %v1619_v1 = vld [vmem:[%s11641_s29 + $0x680] sm:$0xff]  ;;  %v9421_v5 = vcombine.high %v1491_v63, %v1495_v0  ;;  %4632 = vmatprep.subr.bf16.mxu1 %v9557_v62  ;;  %v9420_v16 = vcombine.low %v1491_v63, %v1495_v0 }
 0x16a   : > { %v1623_v2 = vld [vmem:[%s11641_s29 + $0x6a0] sm:$0xff]  ;;  %4633 = vmatpush2.bf16.msra.mxu1 %v9556_v4 }
 0x16b   : > { %v9549_v6 = vcombine.high %v1619_v1, %v1623_v2  ;;  %v1483_v7 = vld [vmem:[%s11641_s29 + $0x240] sm:$0xff]  ;;  %4591 = vmatprep.subr.bf16.mxu0 %v9421_v5  ;;  %v9548_v17 = vcombine.low %v1619_v1, %v1623_v2 }
 0x16c   : > { %v1487_v8 = vld [vmem:[%s11641_s29 + $0x260] sm:$0xff]  ;;  %4592 = vmatpush2.bf16.msra.mxu0 %v9420_v16 }
 0x16d   : > { %v1611_v11 = vld [vmem:[%s11641_s29 + $0x640] sm:$0xff]  ;;  %v9413_v19 = vcombine.high %v1483_v7, %v1487_v8  ;;  %4634 = vmatprep.subr.bf16.mxu1 %v9549_v6  ;;  %v9412_v25 = vcombine.low %v1483_v7, %v1487_v8 }
 0x16e   : > { %v1615_v12 = vld [vmem:[%s11641_s29 + $0x660] sm:$0xff]  ;;  %4635 = vmatpush2.bf16.msra.mxu1 %v9548_v17 }
 0x16f   : > { %v9541_v20 = vcombine.high %v1611_v11, %v1615_v12  ;;  %v1475_v21 = vld [vmem:[%s11641_s29 + $0x200] sm:$0xff]  ;;  %4593 = vmatprep.subr.bf16.mxu0 %v9413_v19  ;;  %v9540_v26 = vcombine.low %v1611_v11, %v1615_v12 }
 0x170   : > { %v1479_v22 = vld [vmem:[%s11641_s29 + $0x220] sm:$0xff]  ;;  %4594 = vmatpush2.bf16.msra.mxu0 %v9412_v25 }
 0x171   : > { %v1603_v23 = vld [vmem:[%s11641_s29 + $0x600] sm:$0xff]  ;;  %v9405_v27 = vcombine.high %v1475_v21, %v1479_v22  ;;  %4636 = vmatprep.subr.bf16.mxu1 %v9541_v20  ;;  %v9404_v33 = vcombine.low %v1475_v21, %v1479_v22 }
 0x172   : > { %v1607_v24 = vld [vmem:[%s11641_s29 + $0x620] sm:$0xff]  ;;  %4637 = vmatpush2.bf16.msra.mxu1 %v9540_v26 }
 0x173   : > { %v9533_v28 = vcombine.high %v1603_v23, %v1607_v24  ;;  %v1723_v29 = vld [vmem:[%s11641_s29 + $0x9c0] sm:$0xff]  ;;  %4595 = vmatprep.subr.bf16.mxu0 %v9405_v27  ;;  %v9532_v34 = vcombine.low %v1603_v23, %v1607_v24 }
 0x174   : > { %v1727_v30 = vld [vmem:[%s11641_s29 + $0x9e0] sm:$0xff]  ;;  %4596 = vmatpush2.bf16.msra.mxu0 %v9404_v33 }
 0x175   : > { %v1851_v31 = vld [vmem:[%s11641_s29 + $0xdc0] sm:$0xff]  ;;  %v9653_v35 = vcombine.high %v1723_v29, %v1727_v30  ;;  %4638 = vmatprep.subr.bf16.mxu1 %v9533_v28  ;;  %v9652_v9 = vcombine.low %v1723_v29, %v1727_v30 }
 0x176   : > { %v1855_v32 = vld [vmem:[%s11641_s29 + $0xde0] sm:$0xff]  ;;  %4639 = vmatpush2.bf16.msra.mxu1 %v9532_v34 }
 0x177   : > { %v9781_v36 = vcombine.high %v1851_v31, %v1855_v32  ;;  %v1715_v37 = vld [vmem:[%s11641_s29 + $0x980] sm:$0xff]  ;;  %4651 = vmatprep.subr.bf16.mxu0 %v9653_v35  ;;  %v9780_v46 = vcombine.low %v1851_v31, %v1855_v32  ;;  %4598 = vmatmul.mubr.bf16.vlgmr.msra.gmra.mxu0 %v11750_v40 }
 0x178   : > { %v1719_v38 = vld [vmem:[%s11641_s29 + $0x9a0] sm:$0xff]  ;;  %4652 = vmatpush1.bf16.msra.mxu0 %v9652_v9  ;;  %4683 = vmatprep.mubr.bf16.mxu0 %v11781_v15 }
 0x179   : > { %v1843_v39 = vld [vmem:[%s11641_s29 + $0xd80] sm:$0xff]  ;;  %v9645_v47 = vcombine.high %v1715_v37, %v1719_v38  ;;  %4694 = vmatprep.subr.bf16.mxu1 %v9781_v36  ;;  %4641 = vmatmul.mubr.bf16.vlgmr.msra.gmra.mxu1 %v11765_v44  ;;  %v9644_v53 = vcombine.low %v1715_v37, %v1719_v38 }
 0x17a   : > { %v1847_v41 = vld [vmem:[%s11641_s29 + $0xda0] sm:$0xff]  ;;  %4695 = vmatpush1.bf16.msra.mxu1 %v9780_v46  ;;  %4726 = vmatprep.mubr.bf16.mxu1 %v11788_v52 }
 0x17b   : > { %v9773_v48 = vcombine.high %v1843_v39, %v1847_v41  ;;  %v1707_v49 = vld [vmem:[%s11641_s29 + $0x940] sm:$0xff]  ;;  %4653 = vmatprep.subr.bf16.mxu0 %v9645_v47  ;;  %v9772_v54 = vcombine.low %v1843_v39, %v1847_v41 }
 0x17c   : > { %v1711_v14 = vld [vmem:[%s11641_s29 + $0x960] sm:$0xff]  ;;  %4654 = vmatpush1.bf16.msra.mxu0 %v9644_v53 }
 0x17d   : > { %v1835_v50 = vld [vmem:[%s11641_s29 + $0xd40] sm:$0xff]  ;;  %v9637_v55 = vcombine.high %v1707_v49, %v1711_v14  ;;  %4696 = vmatprep.subr.bf16.mxu1 %v9773_v48  ;;  %v9636_v61 = vcombine.low %v1707_v49, %v1711_v14 }
 0x17e   : > { %v1839_v51 = vld [vmem:[%s11641_s29 + $0xd60] sm:$0xff]  ;;  %4697 = vmatpush1.bf16.msra.mxu1 %v9772_v54 }
 0x17f   : > { %v9765_v56 = vcombine.high %v1835_v50, %v1839_v51  ;;  %v1699_v57 = vld [vmem:[%s11641_s29 + $0x900] sm:$0xff]  ;;  %4655 = vmatprep.subr.bf16.mxu0 %v9637_v55  ;;  %v9764_v62 = vcombine.low %v1835_v50, %v1839_v51 }
 0x180   : > { %v1703_v58 = vld [vmem:[%s11641_s29 + $0x920] sm:$0xff]  ;;  %4656 = vmatpush1.bf16.msra.mxu0 %v9636_v61 }
 0x181   : > { %v1827_v59 = vld [vmem:[%s11641_s29 + $0xd00] sm:$0xff]  ;;  %v9629_v63 = vcombine.high %v1699_v57, %v1703_v58  ;;  %4698 = vmatprep.subr.bf16.mxu1 %v9765_v56  ;;  %v9628_v5 = vcombine.low %v1699_v57, %v1703_v58 }
 0x182   : > { %v1831_v60 = vld [vmem:[%s11641_s29 + $0xd20] sm:$0xff]  ;;  %4699 = vmatpush1.bf16.msra.mxu1 %v9764_v62 }
 0x183   : > { %v9757_v0 = vcombine.high %v1827_v59, %v1831_v60  ;;  %v1691_v1 = vld [vmem:[%s11641_s29 + $0x8c0] sm:$0xff]  ;;  %4657 = vmatprep.subr.bf16.mxu0 %v9629_v63  ;;  %v9756_v6 = vcombine.low %v1827_v59, %v1831_v60 }
 0x184   : > { %v1695_v2 = vld [vmem:[%s11641_s29 + $0x8e0] sm:$0xff]  ;;  %4658 = vmatpush1.bf16.msra.mxu0 %v9628_v5 }
 0x185   : > { %v1819_v3 = vld [vmem:[%s11641_s29 + $0xcc0] sm:$0xff]  ;;  %v9621_v7 = vcombine.high %v1691_v1, %v1695_v2  ;;  %4700 = vmatprep.subr.bf16.mxu1 %v9757_v0  ;;  %v9620_v19 = vcombine.low %v1691_v1, %v1695_v2 }
 0x186   : > { %v1823_v4 = vld [vmem:[%s11641_s29 + $0xce0] sm:$0xff]  ;;  %4701 = vmatpush1.bf16.msra.mxu1 %v9756_v6 }
 0x187   : > { %v9749_v8 = vcombine.high %v1819_v3, %v1823_v4  ;;  %v1683_v11 = vld [vmem:[%s11641_s29 + $0x880] sm:$0xff]  ;;  %4659 = vmatprep.subr.bf16.mxu0 %v9621_v7  ;;  %v9748_v20 = vcombine.low %v1819_v3, %v1823_v4 }
 0x188   : > { %v1687_v12 = vld [vmem:[%s11641_s29 + $0x8a0] sm:$0xff]  ;;  %4660 = vmatpush1.bf16.msra.mxu0 %v9620_v19 }
 0x189   : > { %v1811_v16 = vld [vmem:[%s11641_s29 + $0xc80] sm:$0xff]  ;;  %v9613_v21 = vcombine.high %v1683_v11, %v1687_v12  ;;  %4702 = vmatprep.subr.bf16.mxu1 %v9749_v8  ;;  %v9612_v27 = vcombine.low %v1683_v11, %v1687_v12 }
 0x18a   : > { %v1815_v17 = vld [vmem:[%s11641_s29 + $0xca0] sm:$0xff]  ;;  %4703 = vmatpush1.bf16.msra.mxu1 %v9748_v20 }
 0x18b   : > { %v9741_v22 = vcombine.high %v1811_v16, %v1815_v17  ;;  %v1675_v23 = vld [vmem:[%s11641_s29 + $0x840] sm:$0xff]  ;;  %4661 = vmatprep.subr.bf16.mxu0 %v9613_v21  ;;  %v9740_v28 = vcombine.low %v1811_v16, %v1815_v17 }
 0x18c   : > { %v1679_v24 = vld [vmem:[%s11641_s29 + $0x860] sm:$0xff]  ;;  %4662 = vmatpush1.bf16.msra.mxu0 %v9612_v27 }
 0x18d   : > { %v1803_v25 = vld [vmem:[%s11641_s29 + $0xc40] sm:$0xff]  ;;  %v9605_v29 = vcombine.high %v1675_v23, %v1679_v24  ;;  %4704 = vmatprep.subr.bf16.mxu1 %v9741_v22  ;;  %v9604_v35 = vcombine.low %v1675_v23, %v1679_v24 }
 0x18e   : > { %v1807_v26 = vld [vmem:[%s11641_s29 + $0xc60] sm:$0xff]  ;;  %4705 = vmatpush1.bf16.msra.mxu1 %v9740_v28 }
 0x18f   : > { %v9733_v30 = vcombine.high %v1803_v25, %v1807_v26  ;;  %v1667_v31 = vld [vmem:[%s11641_s29 + $0x800] sm:$0xff]  ;;  %4663 = vmatprep.subr.bf16.mxu0 %v9605_v29  ;;  %v9732_v36 = vcombine.low %v1803_v25, %v1807_v26 }
 0x190   : > { %v1671_v32 = vld [vmem:[%s11641_s29 + $0x820] sm:$0xff]  ;;  %4664 = vmatpush1.bf16.msra.mxu0 %v9604_v35 }
 0x191   : > { %v1795_v33 = vld [vmem:[%s11641_s29 + $0xc00] sm:$0xff]  ;;  %v9597_v37 = vcombine.high %v1667_v31, %v1671_v32  ;;  %4706 = vmatprep.subr.bf16.mxu1 %v9733_v30  ;;  %v9596_v47 = vcombine.low %v1667_v31, %v1671_v32 }
 0x192   : > { %v1799_v34 = vld [vmem:[%s11641_s29 + $0xc20] sm:$0xff]  ;;  %4707 = vmatpush1.bf16.msra.mxu1 %v9732_v36 }
 0x193   : > { %v9725_v38 = vcombine.high %v1795_v33, %v1799_v34  ;;  %v1787_v39 = vld [vmem:[%s11641_s29 + $0xbc0] sm:$0xff]  ;;  %4665 = vmatprep.subr.bf16.mxu0 %v9597_v37  ;;  %v9724_v48 = vcombine.low %v1795_v33, %v1799_v34 }
 0x194   : > { %v1791_v41 = vld [vmem:[%s11641_s29 + $0xbe0] sm:$0xff]  ;;  %4666 = vmatpush1.bf16.msra.mxu0 %v9596_v47 }
 0x195   : > { %v1915_v9 = vld [vmem:[%s11641_s29 + $0xfc0] sm:$0xff]  ;;  %v9717_v49 = vcombine.high %v1787_v39, %v1791_v41  ;;  %4708 = vmatprep.subr.bf16.mxu1 %v9725_v38  ;;  %v9716_v55 = vcombine.low %v1787_v39, %v1791_v41 }
 0x196   : > { %v1919_v46 = vld [vmem:[%s11641_s29 + $0xfe0] sm:$0xff]  ;;  %4709 = vmatpush1.bf16.msra.mxu1 %v9724_v48 }
 0x197   : > { %v9845_v14 = vcombine.high %v1915_v9, %v1919_v46  ;;  %v1779_v50 = vld [vmem:[%s11641_s29 + $0xb80] sm:$0xff]  ;;  %4667 = vmatprep.subr.bf16.mxu0 %v9717_v49  ;;  %v9844_v56 = vcombine.low %v1915_v9, %v1919_v46 }
 0x198   : > { %v1783_v51 = vld [vmem:[%s11641_s29 + $0xba0] sm:$0xff]  ;;  %4668 = vmatpush2.bf16.msra.mxu0 %v9716_v55  ;;  %v1596_v55 = vld [vmem:[%s11641_s29 + $0x5c8] sm:$0xff] }
 0x199   : > { %v1907_v53 = vld [vmem:[%s11641_s29 + $0xf80] sm:$0xff]  ;;  %v9709_v57 = vcombine.high %v1779_v50, %v1783_v51  ;;  %4710 = vmatprep.subr.bf16.mxu1 %v9845_v14  ;;  %v9708_v63 = vcombine.low %v1779_v50, %v1783_v51 }
 0x19a   : > { %v1911_v54 = vld [vmem:[%s11641_s29 + $0xfa0] sm:$0xff]  ;;  %4711 = vmatpush2.bf16.msra.mxu1 %v9844_v56  ;;  %v1600_v56 = vld [vmem:[%s11641_s29 + $0x5e8] sm:$0xff] }
 0x19b   : > { %v9837_v58 = vcombine.high %v1907_v53, %v1911_v54  ;;  %v1771_v59 = vld [vmem:[%s11641_s29 + $0xb40] sm:$0xff]  ;;  %4669 = vmatprep.subr.bf16.mxu0 %v9709_v57  ;;  %v9836_v0 = vcombine.low %v1907_v53, %v1911_v54  ;;  %v1468_v53 = vld [vmem:[%s11641_s29 + $0x1c8] sm:$0xff] }
 0x19c   : > { %v1775_v60 = vld [vmem:[%s11641_s29 + $0xb60] sm:$0xff]  ;;  %4670 = vmatpush2.bf16.msra.mxu0 %v9708_v63  ;;  %v1472_v54 = vld [vmem:[%s11641_s29 + $0x1e8] sm:$0xff]  ;;  %v11853_v63 = vcombine.low %v11756_v42, %v11761_v43 }
 0x19d   : > { %v1899_v61 = vld [vmem:[%s11641_s29 + $0xf40] sm:$0xff]  ;;  %v9701_v1 = vcombine.high %v1771_v59, %v1775_v60  ;;  %4712 = vmatprep.subr.bf16.mxu1 %v9837_v58  ;;  %v9700_v7 = vcombine.low %v1771_v59, %v1775_v60  ;;  %v9399_v59 = vcombine.high %v1468_v53, %v1472_v54  ;;  %v9527_v60 = vcombine.high %v1596_v55, %v1600_v56  ;;  %v1456_v42 = vld [vmem:[%s11641_s29 + $0x168] sm:$0xff] }
 0x19e   : > { %v1903_v62 = vld [vmem:[%s11641_s29 + $0xf60] sm:$0xff]  ;;  %4713 = vmatpush2.bf16.msra.mxu1 %v9836_v0  ;;  %v1588_v0 = vld [vmem:[%s11641_s29 + $0x588] sm:$0xff] }
 0x19f   : > { %v9829_v2 = vcombine.high %v1899_v61, %v1903_v62  ;;  %v1763_v3 = vld [vmem:[%s11641_s29 + $0xb00] sm:$0xff]  ;;  %4671 = vmatprep.subr.bf16.mxu0 %v9701_v1  ;;  %v9828_v8 = vcombine.low %v1899_v61, %v1903_v62  ;;  %v1460_v61 = vld [vmem:[%s11641_s29 + $0x188] sm:$0xff] }
 0x1a0   : > { %v1767_v4 = vld [vmem:[%s11641_s29 + $0xb20] sm:$0xff]  ;;  %4672 = vmatpush2.bf16.msra.mxu0 %v9700_v7  ;;  %v1464_v62 = vld [vmem:[%s11641_s29 + $0x1a8] sm:$0xff] }
 0x1a1   : > { %v1891_v5 = vld [vmem:[%s11641_s29 + $0xf00] sm:$0xff]  ;;  %v9693_v11 = vcombine.high %v1763_v3, %v1767_v4  ;;  %4714 = vmatprep.subr.bf16.mxu1 %v9829_v2  ;;  %v9692_v21 = vcombine.low %v1763_v3, %v1767_v4  ;;  %v1592_v1 = vld [vmem:[%s11641_s29 + $0x5a8] sm:$0xff]  ;;  %v11859_v2 = vcombine.low %v11770_v10, %v11775_v45  ;;  %v9398_v3 = vcombine.low %v1468_v53, %v1472_v54 }
 0x1a2   : > { %v1895_v6 = vld [vmem:[%s11641_s29 + $0xf20] sm:$0xff]  ;;  %4715 = vmatpush2.bf16.msra.mxu1 %v9828_v8  ;;  %v9526_v4 = vcombine.low %v1596_v55, %v1600_v56  ;;  %v1452_v7 = vld [vmem:[%s11641_s29 + $0x148] sm:$0xff]  ;;  %v9390_v10 = vcombine.low %v1460_v61, %v1464_v62  ;;  %v9518_v45 = vcombine.low %v1588_v0, %v1592_v1 }
 0x1a3   : > { %v9821_v12 = vcombine.high %v1891_v5, %v1895_v6  ;;  %v1755_v16 = vld [vmem:[%s11641_s29 + $0xac0] sm:$0xff]  ;;  %4673 = vmatprep.subr.bf16.mxu0 %v9693_v11  ;;  %v9820_v22 = vcombine.low %v1891_v5, %v1895_v6  ;;  %v9391_v5 = vcombine.high %v1460_v61, %v1464_v62  ;;  %v9519_v6 = vcombine.high %v1588_v0, %v1592_v1  ;;  %v1580_v43 = vld [vmem:[%s11641_s29 + $0x548] sm:$0xff] }
 0x1a4   : > { %v1759_v17 = vld [vmem:[%s11641_s29 + $0xae0] sm:$0xff]  ;;  %4674 = vmatpush2.bf16.msra.mxu0 %v9692_v21  ;;  %v1584_v8 = vld [vmem:[%s11641_s29 + $0x568] sm:$0xff]  ;;  %v9383_v11 = vcombine.high %v1452_v7, %v1456_v42  ;;  %v9382_v21 = vcombine.low %v1452_v7, %v1456_v42 }
 0x1a5   : > { %v1883_v19 = vld [vmem:[%s11641_s29 + $0xec0] sm:$0xff]  ;;  %v9685_v23 = vcombine.high %v1755_v16, %v1759_v17  ;;  %4716 = vmatprep.subr.bf16.mxu1 %v9821_v12  ;;  %v9684_v29 = vcombine.low %v1755_v16, %v1759_v17  ;;  %v9511_v12 = vcombine.high %v1580_v43, %v1584_v8  ;;  %v1444_v16 = vld [vmem:[%s11641_s29 + $0x108] sm:$0xff] }
 0x1a6   : > { %v1887_v20 = vld [vmem:[%s11641_s29 + $0xee0] sm:$0xff]  ;;  %4717 = vmatpush2.bf16.msra.mxu1 %v9820_v22  ;;  %v1448_v17 = vld [vmem:[%s11641_s29 + $0x128] sm:$0xff]  ;;  %v9510_v22 = vcombine.low %v1580_v43, %v1584_v8 }
 0x1a7   : > { %v9813_v24 = vcombine.high %v1883_v19, %v1887_v20  ;;  %v1747_v25 = vld [vmem:[%s11641_s29 + $0xa80] sm:$0xff]  ;;  %4675 = vmatprep.subr.bf16.mxu0 %v9685_v23  ;;  %v9812_v30 = vcombine.low %v1883_v19, %v1887_v20  ;;  %v1572_v19 = vld [vmem:[%s11641_s29 + $0x508] sm:$0xff]  ;;  %v9375_v23 = vcombine.high %v1444_v16, %v1448_v17 }
 0x1a8   : > { %v1751_v26 = vld [vmem:[%s11641_s29 + $0xaa0] sm:$0xff]  ;;  %4676 = vmatpush2.bf16.msra.mxu0 %v9684_v29  ;;  %v1576_v20 = vld [vmem:[%s11641_s29 + $0x528] sm:$0xff]  ;;  %v9374_v29 = vcombine.low %v1444_v16, %v1448_v17 }
 0x1a9   : > { %v1875_v27 = vld [vmem:[%s11641_s29 + $0xe80] sm:$0xff]  ;;  %v9677_v31 = vcombine.high %v1747_v25, %v1751_v26  ;;  %4718 = vmatprep.subr.bf16.mxu1 %v9813_v24  ;;  %v9676_v37 = vcombine.low %v1747_v25, %v1751_v26  ;;  %v9503_v24 = vcombine.high %v1572_v19, %v1576_v20  ;;  %v1436_v25 = vld [vmem:[%s11641_s29 + $0xc8] sm:$0xff] }
 0x1aa   : > { %v1879_v28 = vld [vmem:[%s11641_s29 + $0xea0] sm:$0xff]  ;;  %4719 = vmatpush2.bf16.msra.mxu1 %v9812_v30  ;;  %v1440_v26 = vld [vmem:[%s11641_s29 + $0xe8] sm:$0xff]  ;;  %v9502_v30 = vcombine.low %v1572_v19, %v1576_v20 }
 0x1ab   : > { %v9805_v32 = vcombine.high %v1875_v27, %v1879_v28  ;;  %v1739_v33 = vld [vmem:[%s11641_s29 + $0xa40] sm:$0xff]  ;;  %4677 = vmatprep.subr.bf16.mxu0 %v9677_v31  ;;  %v9804_v38 = vcombine.low %v1875_v27, %v1879_v28  ;;  %v1564_v27 = vld [vmem:[%s11641_s29 + $0x4c8] sm:$0xff]  ;;  %v9367_v31 = vcombine.high %v1436_v25, %v1440_v26 }
 0x1ac   : > { %v1743_v34 = vld [vmem:[%s11641_s29 + $0xa60] sm:$0xff]  ;;  %4678 = vmatpush2.bf16.msra.mxu0 %v9676_v37  ;;  %v1568_v28 = vld [vmem:[%s11641_s29 + $0x4e8] sm:$0xff]  ;;  %v9366_v37 = vcombine.low %v1436_v25, %v1440_v26 }
 0x1ad   : > { %v1867_v35 = vld [vmem:[%s11641_s29 + $0xe40] sm:$0xff]  ;;  %v9669_v39 = vcombine.high %v1739_v33, %v1743_v34  ;;  %4720 = vmatprep.subr.bf16.mxu1 %v9805_v32  ;;  %v9668_v49 = vcombine.low %v1739_v33, %v1743_v34  ;;  %v9495_v32 = vcombine.high %v1564_v27, %v1568_v28  ;;  %v1428_v33 = vld [vmem:[%s11641_s29 + $0x88] sm:$0xff] }
 0x1ae   : > { %v1871_v36 = vld [vmem:[%s11641_s29 + $0xe60] sm:$0xff]  ;;  %4721 = vmatpush2.bf16.msra.mxu1 %v9804_v38  ;;  %v1432_v34 = vld [vmem:[%s11641_s29 + $0xa8] sm:$0xff]  ;;  %v9494_v38 = vcombine.low %v1564_v27, %v1568_v28 }
 0x1af   : > { %v9797_v41 = vcombine.high %v1867_v35, %v1871_v36  ;;  %v1731_v9 = vld [vmem:[%s11641_s29 + $0xa00] sm:$0xff]  ;;  %4679 = vmatprep.subr.bf16.mxu0 %v9669_v39  ;;  %v9796_v14 = vcombine.low %v1867_v35, %v1871_v36  ;;  %v1556_v35 = vld [vmem:[%s11641_s29 + $0x488] sm:$0xff]  ;;  %v9359_v39 = vcombine.high %v1428_v33, %v1432_v34 }
 0x1b0   : > { %v1735_v46 = vld [vmem:[%s11641_s29 + $0xa20] sm:$0xff]  ;;  %4680 = vmatpush2.bf16.msra.mxu0 %v9668_v49  ;;  %v1560_v36 = vld [vmem:[%s11641_s29 + $0x4a8] sm:$0xff]  ;;  %v9358_v49 = vcombine.low %v1428_v33, %v1432_v34 }
 0x1b1   : > { %v1859_v47 = vld [vmem:[%s11641_s29 + $0xe00] sm:$0xff]  ;;  %v9661_v50 = vcombine.high %v1731_v9, %v1735_v46  ;;  %4722 = vmatprep.subr.bf16.mxu1 %v9797_v41  ;;  %v9660_v57 = vcombine.low %v1731_v9, %v1735_v46  ;;  %v9487_v41 = vcombine.high %v1556_v35, %v1560_v36  ;;  %v1420_v9 = vld [vmem:[%s11641_s29 + $0x48] sm:$0xff] }
 0x1b2   : > { %v1863_v48 = vld [vmem:[%s11641_s29 + $0xe20] sm:$0xff]  ;;  %4723 = vmatpush2.bf16.msra.mxu1 %v9796_v14  ;;  %v1424_v46 = vld [vmem:[%s11641_s29 + $0x68] sm:$0xff]  ;;  %v9486_v14 = vcombine.low %v1556_v35, %v1560_v36 }
 0x1b3   : > { %v9789_v51 = vcombine.high %v1859_v47, %v1863_v48  ;;  %4681 = vmatprep.subr.bf16.mxu0 %v9661_v50  ;;  %v9788_v58 = vcombine.low %v1859_v47, %v1863_v48  ;;  %v1548_v47 = vld [vmem:[%s11641_s29 + $0x448] sm:$0xff]  ;;  %v9351_v50 = vcombine.high %v1420_v9, %v1424_v46 }
 0x1b4   : > { %4682 = vmatpush2.bf16.msra.mxu0 %v9660_v57  ;;  %v1552_v48 = vld [vmem:[%s11641_s29 + $0x468] sm:$0xff]  ;;  %v9350_v57 = vcombine.low %v1420_v9, %v1424_v46 }
 0x1b5   : > { %4724 = vmatprep.subr.bf16.mxu1 %v9789_v51  ;;  %4737 = vmatprep.subr.bf16.mxu0 %v9399_v59  ;;  %v9479_v51 = vcombine.high %v1548_v47, %v1552_v48  ;;  %v1412_v53 = vld [vmem:[%s11641_s29 + $0x8] sm:$0xff] }
 0x1b6   : > { %4725 = vmatpush2.bf16.msra.mxu1 %v9788_v58  ;;  %v1416_v54 = vld [vmem:[%s11641_s29 + $0x28] sm:$0xff]  ;;  %v9478_v58 = vcombine.low %v1548_v47, %v1552_v48 }
 0x1b7   : > { %4780 = vmatprep.subr.bf16.mxu1 %v9527_v60  ;;  %4684 = vmatmul.mubr.bf16.vlgmr.msra.gmra.mxu0 %v11853_v63  ;;  %v1540_v55 = vld [vmem:[%s11641_s29 + $0x408] sm:$0xff]  ;;  %v9343_v59 = vcombine.high %v1412_v53, %v1416_v54 }
 0x1b8   : > { %4738 = vmatpush1.bf16.msra.mxu0 %v9398_v3  ;;  %4769 = vmatprep.mubr.bf16.mxu0 %v11689_v13  ;;  %v1544_v56 = vld [vmem:[%s11641_s29 + $0x428] sm:$0xff]  ;;  %v9342_v3 = vcombine.low %v1412_v53, %v1416_v54 }
 0x1b9   : > { %4727 = vmatmul.mubr.bf16.vlgmr.msra.gmra.mxu1 %v11859_v2  ;;  %4739 = vmatprep.subr.bf16.mxu0 %v9391_v5  ;;  %v9471_v60 = vcombine.high %v1540_v55, %v1544_v56  ;;  %v1532_v61 = vld [vmem:[%s11641_s29 + $0x3c8] sm:$0xff] }
 0x1ba   : > { %4781 = vmatpush1.bf16.msra.mxu1 %v9526_v4  ;;  %4812 = vmatprep.mubr.bf16.mxu1 %v11705_v18  ;;  %v1536_v62 = vld [vmem:[%s11641_s29 + $0x3e8] sm:$0xff]  ;;  %v9470_v4 = vcombine.low %v1540_v55, %v1544_v56 }
 0x1bb   : > { %4782 = vmatprep.subr.bf16.mxu1 %v9519_v6  ;;  %v1660_v0 = vld [vmem:[%s11641_s29 + $0x7c8] sm:$0xff]  ;;  %v9463_v5 = vcombine.high %v1532_v61, %v1536_v62 }
 0x1bc   : > { %4740 = vmatpush1.bf16.msra.mxu0 %v9390_v10  ;;  %v1664_v1 = vld [vmem:[%s11641_s29 + $0x7e8] sm:$0xff]  ;;  %v9462_v10 = vcombine.low %v1532_v61, %v1536_v62 }
 0x1bd   : > { %4741 = vmatprep.subr.bf16.mxu0 %v9383_v11  ;;  %v9591_v6 = vcombine.high %v1660_v0, %v1664_v1  ;;  %v1524_v7 = vld [vmem:[%s11641_s29 + $0x388] sm:$0xff] }
 0x1be   : > { %4783 = vmatpush1.bf16.msra.mxu1 %v9518_v45  ;;  %v1528_v42 = vld [vmem:[%s11641_s29 + $0x3a8] sm:$0xff]  ;;  %v9590_v45 = vcombine.low %v1660_v0, %v1664_v1 }
 0x1bf   : > { %4784 = vmatprep.subr.bf16.mxu1 %v9511_v12  ;;  %v1652_v43 = vld [vmem:[%s11641_s29 + $0x788] sm:$0xff]  ;;  %v9455_v11 = vcombine.high %v1524_v7, %v1528_v42 }
 0x1c0   : > { %4742 = vmatpush1.bf16.msra.mxu0 %v9382_v21  ;;  %v1656_v8 = vld [vmem:[%s11641_s29 + $0x7a8] sm:$0xff]  ;;  %v9454_v21 = vcombine.low %v1524_v7, %v1528_v42 }
 0x1c1   : > { %4743 = vmatprep.subr.bf16.mxu0 %v9375_v23  ;;  %v9583_v12 = vcombine.high %v1652_v43, %v1656_v8  ;;  %v1516_v16 = vld [vmem:[%s11641_s29 + $0x348] sm:$0xff] }
 0x1c2   : > { %4785 = vmatpush1.bf16.msra.mxu1 %v9510_v22  ;;  %v1520_v17 = vld [vmem:[%s11641_s29 + $0x368] sm:$0xff]  ;;  %v9582_v22 = vcombine.low %v1652_v43, %v1656_v8 }
 0x1c3   : > { %4786 = vmatprep.subr.bf16.mxu1 %v9503_v24  ;;  %v1644_v19 = vld [vmem:[%s11641_s29 + $0x748] sm:$0xff]  ;;  %v9447_v23 = vcombine.high %v1516_v16, %v1520_v17 }
 0x1c4   : > { %4744 = vmatpush1.bf16.msra.mxu0 %v9374_v29  ;;  %v1648_v20 = vld [vmem:[%s11641_s29 + $0x768] sm:$0xff]  ;;  %v9446_v29 = vcombine.low %v1516_v16, %v1520_v17 }
 0x1c5   : > { %4745 = vmatprep.subr.bf16.mxu0 %v9367_v31  ;;  %v9575_v24 = vcombine.high %v1644_v19, %v1648_v20  ;;  %v1508_v25 = vld [vmem:[%s11641_s29 + $0x308] sm:$0xff] }
 0x1c6   : > { %4787 = vmatpush1.bf16.msra.mxu1 %v9502_v30  ;;  %v1512_v26 = vld [vmem:[%s11641_s29 + $0x328] sm:$0xff]  ;;  %v9574_v30 = vcombine.low %v1644_v19, %v1648_v20 }
 0x1c7   : > { %4788 = vmatprep.subr.bf16.mxu1 %v9495_v32  ;;  %v1636_v27 = vld [vmem:[%s11641_s29 + $0x708] sm:$0xff]  ;;  %v9439_v31 = vcombine.high %v1508_v25, %v1512_v26 }
 0x1c8   : > { %4746 = vmatpush1.bf16.msra.mxu0 %v9366_v37  ;;  %v1640_v28 = vld [vmem:[%s11641_s29 + $0x728] sm:$0xff]  ;;  %v9438_v37 = vcombine.low %v1508_v25, %v1512_v26 }
 0x1c9   : > { %4747 = vmatprep.subr.bf16.mxu0 %v9359_v39  ;;  %v9567_v32 = vcombine.high %v1636_v27, %v1640_v28  ;;  %v1500_v33 = vld [vmem:[%s11641_s29 + $0x2c8] sm:$0xff] }
 0x1ca   : > { %4789 = vmatpush1.bf16.msra.mxu1 %v9494_v38  ;;  %v1504_v34 = vld [vmem:[%s11641_s29 + $0x2e8] sm:$0xff]  ;;  %v9566_v38 = vcombine.low %v1636_v27, %v1640_v28 }
 0x1cb   : > { %4790 = vmatprep.subr.bf16.mxu1 %v9487_v41  ;;  %v1628_v35 = vld [vmem:[%s11641_s29 + $0x6c8] sm:$0xff]  ;;  %v9431_v39 = vcombine.high %v1500_v33, %v1504_v34 }
 0x1cc   : > { %4748 = vmatpush1.bf16.msra.mxu0 %v9358_v49  ;;  %v1632_v36 = vld [vmem:[%s11641_s29 + $0x6e8] sm:$0xff]  ;;  %v9430_v49 = vcombine.low %v1500_v33, %v1504_v34 }
 0x1cd   : > { %4749 = vmatprep.subr.bf16.mxu0 %v9351_v50  ;;  %v9559_v41 = vcombine.high %v1628_v35, %v1632_v36  ;;  %v1492_v9 = vld [vmem:[%s11641_s29 + $0x288] sm:$0xff] }
 0x1ce   : > { %4791 = vmatpush1.bf16.msra.mxu1 %v9486_v14  ;;  %v1496_v46 = vld [vmem:[%s11641_s29 + $0x2a8] sm:$0xff]  ;;  %v9558_v14 = vcombine.low %v1628_v35, %v1632_v36 }
 0x1cf   : > { %4792 = vmatprep.subr.bf16.mxu1 %v9479_v51  ;;  %v1620_v47 = vld [vmem:[%s11641_s29 + $0x688] sm:$0xff]  ;;  %v9423_v50 = vcombine.high %v1492_v9, %v1496_v46 }
 0x1d0   : > { %4750 = vmatpush1.bf16.msra.mxu0 %v9350_v57  ;;  %v1624_v48 = vld [vmem:[%s11641_s29 + $0x6a8] sm:$0xff]  ;;  %v9422_v57 = vcombine.low %v1492_v9, %v1496_v46 }
 0x1d1   : > { %4751 = vmatprep.subr.bf16.mxu0 %v9343_v59  ;;  %v9551_v51 = vcombine.high %v1620_v47, %v1624_v48  ;;  %v1484_v53 = vld [vmem:[%s11641_s29 + $0x248] sm:$0xff] }
 0x1d2   : > { %4793 = vmatpush1.bf16.msra.mxu1 %v9478_v58  ;;  %v1488_v54 = vld [vmem:[%s11641_s29 + $0x268] sm:$0xff]  ;;  %v9550_v58 = vcombine.low %v1620_v47, %v1624_v48 }
 0x1d3   : > { %4794 = vmatprep.subr.bf16.mxu1 %v9471_v60  ;;  %v1612_v55 = vld [vmem:[%s11641_s29 + $0x648] sm:$0xff]  ;;  %v9415_v59 = vcombine.high %v1484_v53, %v1488_v54 }
 0x1d4   : > { %4752 = vmatpush1.bf16.msra.mxu0 %v9342_v3  ;;  %v1616_v56 = vld [vmem:[%s11641_s29 + $0x668] sm:$0xff]  ;;  %v9414_v3 = vcombine.low %v1484_v53, %v1488_v54 }
 0x1d5   : > { %4753 = vmatprep.subr.bf16.mxu0 %v9463_v5  ;;  %v9543_v60 = vcombine.high %v1612_v55, %v1616_v56  ;;  %v1476_v61 = vld [vmem:[%s11641_s29 + $0x208] sm:$0xff] }
 0x1d6   : > { %4795 = vmatpush1.bf16.msra.mxu1 %v9470_v4  ;;  %v1480_v62 = vld [vmem:[%s11641_s29 + $0x228] sm:$0xff]  ;;  %v9542_v4 = vcombine.low %v1612_v55, %v1616_v56 }
 0x1d7   : > { %4796 = vmatprep.subr.bf16.mxu1 %v9591_v6  ;;  %v1604_v0 = vld [vmem:[%s11641_s29 + $0x608] sm:$0xff]  ;;  %v9407_v5 = vcombine.high %v1476_v61, %v1480_v62 }
 0x1d8   : > { %4754 = vmatpush2.bf16.msra.mxu0 %v9462_v10  ;;  %v1608_v1 = vld [vmem:[%s11641_s29 + $0x628] sm:$0xff]  ;;  %v9406_v10 = vcombine.low %v1476_v61, %v1480_v62 }
 0x1d9   : > { %4755 = vmatprep.subr.bf16.mxu0 %v9455_v11  ;;  %v9535_v6 = vcombine.high %v1604_v0, %v1608_v1  ;;  %v1724_v7 = vld [vmem:[%s11641_s29 + $0x9c8] sm:$0xff] }
 0x1da   : > { %4797 = vmatpush2.bf16.msra.mxu1 %v9590_v45  ;;  %v1728_v42 = vld [vmem:[%s11641_s29 + $0x9e8] sm:$0xff]  ;;  %v9534_v45 = vcombine.low %v1604_v0, %v1608_v1 }
 0x1db   : > { %4798 = vmatprep.subr.bf16.mxu1 %v9583_v12  ;;  %v1852_v43 = vld [vmem:[%s11641_s29 + $0xdc8] sm:$0xff]  ;;  %v9655_v11 = vcombine.high %v1724_v7, %v1728_v42 }
 0x1dc   : > { %4756 = vmatpush2.bf16.msra.mxu0 %v9454_v21  ;;  %v1856_v8 = vld [vmem:[%s11641_s29 + $0xde8] sm:$0xff]  ;;  %v9654_v21 = vcombine.low %v1724_v7, %v1728_v42 }
 0x1dd   : > { %4757 = vmatprep.subr.bf16.mxu0 %v9447_v23  ;;  %v9783_v12 = vcombine.high %v1852_v43, %v1856_v8  ;;  %v1716_v16 = vld [vmem:[%s11641_s29 + $0x988] sm:$0xff] }
 0x1de   : > { %4799 = vmatpush2.bf16.msra.mxu1 %v9582_v22  ;;  %v1720_v17 = vld [vmem:[%s11641_s29 + $0x9a8] sm:$0xff]  ;;  %v9782_v22 = vcombine.low %v1852_v43, %v1856_v8 }
 0x1df   : > { %4800 = vmatprep.subr.bf16.mxu1 %v9575_v24  ;;  %v1844_v19 = vld [vmem:[%s11641_s29 + $0xd88] sm:$0xff]  ;;  %v9647_v23 = vcombine.high %v1716_v16, %v1720_v17 }
 0x1e0   : > { %4758 = vmatpush2.bf16.msra.mxu0 %v9446_v29  ;;  %v1848_v20 = vld [vmem:[%s11641_s29 + $0xda8] sm:$0xff]  ;;  %v9646_v29 = vcombine.low %v1716_v16, %v1720_v17 }
 0x1e1   : > { %4759 = vmatprep.subr.bf16.mxu0 %v9439_v31  ;;  %v9775_v24 = vcombine.high %v1844_v19, %v1848_v20  ;;  %v1708_v25 = vld [vmem:[%s11641_s29 + $0x948] sm:$0xff] }
 0x1e2   : > { %4801 = vmatpush2.bf16.msra.mxu1 %v9574_v30  ;;  %v1712_v26 = vld [vmem:[%s11641_s29 + $0x968] sm:$0xff]  ;;  %v9774_v30 = vcombine.low %v1844_v19, %v1848_v20 }
 0x1e3   : > { %4802 = vmatprep.subr.bf16.mxu1 %v9567_v32  ;;  %v1836_v27 = vld [vmem:[%s11641_s29 + $0xd48] sm:$0xff]  ;;  %v9639_v31 = vcombine.high %v1708_v25, %v1712_v26 }
 0x1e4   : > { %4760 = vmatpush2.bf16.msra.mxu0 %v9438_v37  ;;  %v1840_v28 = vld [vmem:[%s11641_s29 + $0xd68] sm:$0xff]  ;;  %v9638_v37 = vcombine.low %v1708_v25, %v1712_v26 }
 0x1e5   : > { %4761 = vmatprep.subr.bf16.mxu0 %v9431_v39  ;;  %v9767_v32 = vcombine.high %v1836_v27, %v1840_v28  ;;  %v1700_v33 = vld [vmem:[%s11641_s29 + $0x908] sm:$0xff] }
 0x1e6   : > { %4803 = vmatpush2.bf16.msra.mxu1 %v9566_v38  ;;  %v1704_v34 = vld [vmem:[%s11641_s29 + $0x928] sm:$0xff]  ;;  %v9766_v38 = vcombine.low %v1836_v27, %v1840_v28 }
 0x1e7   : > { %4804 = vmatprep.subr.bf16.mxu1 %v9559_v41  ;;  %v1828_v35 = vld [vmem:[%s11641_s29 + $0xd08] sm:$0xff]  ;;  %v9631_v39 = vcombine.high %v1700_v33, %v1704_v34 }
 0x1e8   : > { %4762 = vmatpush2.bf16.msra.mxu0 %v9430_v49  ;;  %v1832_v36 = vld [vmem:[%s11641_s29 + $0xd28] sm:$0xff]  ;;  %v9630_v49 = vcombine.low %v1700_v33, %v1704_v34 }
 0x1e9   : > { %4763 = vmatprep.subr.bf16.mxu0 %v9423_v50  ;;  %v9759_v41 = vcombine.high %v1828_v35, %v1832_v36  ;;  %v1692_v9 = vld [vmem:[%s11641_s29 + $0x8c8] sm:$0xff] }
 0x1ea   : > { %4805 = vmatpush2.bf16.msra.mxu1 %v9558_v14  ;;  %v1696_v46 = vld [vmem:[%s11641_s29 + $0x8e8] sm:$0xff]  ;;  %v9758_v14 = vcombine.low %v1828_v35, %v1832_v36 }
 0x1eb   : > { %4806 = vmatprep.subr.bf16.mxu1 %v9551_v51  ;;  %v1820_v47 = vld [vmem:[%s11641_s29 + $0xcc8] sm:$0xff]  ;;  %v9623_v50 = vcombine.high %v1692_v9, %v1696_v46 }
 0x1ec   : > { %4764 = vmatpush2.bf16.msra.mxu0 %v9422_v57  ;;  %v1824_v48 = vld [vmem:[%s11641_s29 + $0xce8] sm:$0xff]  ;;  %v9622_v57 = vcombine.low %v1692_v9, %v1696_v46 }
 0x1ed   : > { %4765 = vmatprep.subr.bf16.mxu0 %v9415_v59  ;;  %v9751_v51 = vcombine.high %v1820_v47, %v1824_v48  ;;  %v1684_v53 = vld [vmem:[%s11641_s29 + $0x888] sm:$0xff] }
 0x1ee   : > { %4807 = vmatpush2.bf16.msra.mxu1 %v9550_v58  ;;  %v1688_v54 = vld [vmem:[%s11641_s29 + $0x8a8] sm:$0xff]  ;;  %v9750_v58 = vcombine.low %v1820_v47, %v1824_v48 }
 0x1ef   : > { %4808 = vmatprep.subr.bf16.mxu1 %v9543_v60  ;;  %v1812_v55 = vld [vmem:[%s11641_s29 + $0xc88] sm:$0xff]  ;;  %v9615_v59 = vcombine.high %v1684_v53, %v1688_v54 }
 0x1f0   : > { %4766 = vmatpush2.bf16.msra.mxu0 %v9414_v3  ;;  %v1816_v56 = vld [vmem:[%s11641_s29 + $0xca8] sm:$0xff]  ;;  %v9614_v3 = vcombine.low %v1684_v53, %v1688_v54 }
 0x1f1   : > { %4767 = vmatprep.subr.bf16.mxu0 %v9407_v5  ;;  %v9743_v60 = vcombine.high %v1812_v55, %v1816_v56  ;;  %v1676_v61 = vld [vmem:[%s11641_s29 + $0x848] sm:$0xff] }
 0x1f2   : > { %4809 = vmatpush2.bf16.msra.mxu1 %v9542_v4  ;;  %v1680_v62 = vld [vmem:[%s11641_s29 + $0x868] sm:$0xff]  ;;  %v9742_v4 = vcombine.low %v1812_v55, %v1816_v56 }
 0x1f3   : > { %4810 = vmatprep.subr.bf16.mxu1 %v9535_v6  ;;  %v1804_v0 = vld [vmem:[%s11641_s29 + $0xc48] sm:$0xff]  ;;  %v9607_v5 = vcombine.high %v1676_v61, %v1680_v62 }
 0x1f4   : > { %4768 = vmatpush2.bf16.msra.mxu0 %v9406_v10  ;;  %v1808_v1 = vld [vmem:[%s11641_s29 + $0xc68] sm:$0xff]  ;;  %v9606_v10 = vcombine.low %v1676_v61, %v1680_v62 }
 0x1f5   : > { %4823 = vmatprep.subr.bf16.mxu0 %v9655_v11  ;;  %v9735_v6 = vcombine.high %v1804_v0, %v1808_v1  ;;  %v1668_v7 = vld [vmem:[%s11641_s29 + $0x808] sm:$0xff] }
 0x1f6   : > { %4811 = vmatpush2.bf16.msra.mxu1 %v9534_v45  ;;  %v1672_v42 = vld [vmem:[%s11641_s29 + $0x828] sm:$0xff]  ;;  %v9734_v45 = vcombine.low %v1804_v0, %v1808_v1 }
 0x1f7   : > { %4866 = vmatprep.subr.bf16.mxu1 %v9783_v12  ;;  %4770 = vmatmul.mubr.bf16.vlgmr.msra.gmra.mxu0 %v11750_v40  ;;  %v1796_v43 = vld [vmem:[%s11641_s29 + $0xc08] sm:$0xff]  ;;  %v9599_v11 = vcombine.high %v1668_v7, %v1672_v42 }
 0x1f8   : > { %4824 = vmatpush1.bf16.msra.mxu0 %v9654_v21  ;;  %4855 = vmatprep.mubr.bf16.mxu0 %v11781_v15  ;;  %v1800_v8 = vld [vmem:[%s11641_s29 + $0xc28] sm:$0xff]  ;;  %v9598_v21 = vcombine.low %v1668_v7, %v1672_v42 }
 0x1f9   : > { %4813 = vmatmul.mubr.bf16.vlgmr.msra.gmra.mxu1 %v11765_v44  ;;  %4825 = vmatprep.subr.bf16.mxu0 %v9647_v23  ;;  %v9727_v12 = vcombine.high %v1796_v43, %v1800_v8  ;;  %v1788_v16 = vld [vmem:[%s11641_s29 + $0xbc8] sm:$0xff] }
 0x1fa   : > { %4867 = vmatpush1.bf16.msra.mxu1 %v9782_v22  ;;  %4898 = vmatprep.mubr.bf16.mxu1 %v11788_v52  ;;  %v1792_v17 = vld [vmem:[%s11641_s29 + $0xbe8] sm:$0xff]  ;;  %v9726_v22 = vcombine.low %v1796_v43, %v1800_v8 }
 0x1fb   : > { %4868 = vmatprep.subr.bf16.mxu1 %v9775_v24  ;;  %v1916_v19 = vld [vmem:[%s11641_s29 + $0xfc8] sm:$0xff]  ;;  %v9719_v23 = vcombine.high %v1788_v16, %v1792_v17 }
 0x1fc   : > { %4826 = vmatpush1.bf16.msra.mxu0 %v9646_v29  ;;  %v1920_v20 = vld [vmem:[%s11641_s29 + $0xfe8] sm:$0xff]  ;;  %v9718_v29 = vcombine.low %v1788_v16, %v1792_v17 }
 0x1fd   : > { %4827 = vmatprep.subr.bf16.mxu0 %v9639_v31  ;;  %v9847_v24 = vcombine.high %v1916_v19, %v1920_v20  ;;  %v1780_v25 = vld [vmem:[%s11641_s29 + $0xb88] sm:$0xff] }
 0x1fe   : > { %4869 = vmatpush1.bf16.msra.mxu1 %v9774_v30  ;;  %v1784_v26 = vld [vmem:[%s11641_s29 + $0xba8] sm:$0xff]  ;;  %v9846_v30 = vcombine.low %v1916_v19, %v1920_v20 }
 0x1ff   : > { %4870 = vmatprep.subr.bf16.mxu1 %v9767_v32  ;;  %v1908_v27 = vld [vmem:[%s11641_s29 + $0xf88] sm:$0xff]  ;;  %v9711_v31 = vcombine.high %v1780_v25, %v1784_v26 }
 0x200   : > { %4828 = vmatpush1.bf16.msra.mxu0 %v9638_v37  ;;  %v1912_v28 = vld [vmem:[%s11641_s29 + $0xfa8] sm:$0xff]  ;;  %v9710_v37 = vcombine.low %v1780_v25, %v1784_v26 }
 0x201   : > { %4829 = vmatprep.subr.bf16.mxu0 %v9631_v39  ;;  %v9839_v32 = vcombine.high %v1908_v27, %v1912_v28  ;;  %v1772_v33 = vld [vmem:[%s11641_s29 + $0xb48] sm:$0xff] }
 0x202   : > { %4871 = vmatpush1.bf16.msra.mxu1 %v9766_v38  ;;  %v1776_v34 = vld [vmem:[%s11641_s29 + $0xb68] sm:$0xff]  ;;  %v9838_v38 = vcombine.low %v1908_v27, %v1912_v28  ;;  %v1469_v27 = vld [vmem:[%s11641_s29 + $0x1d0] sm:$0xff] }
 0x203   : > { %4872 = vmatprep.subr.bf16.mxu1 %v9759_v41  ;;  %v1900_v35 = vld [vmem:[%s11641_s29 + $0xf48] sm:$0xff]  ;;  %v9703_v39 = vcombine.high %v1772_v33, %v1776_v34  ;;  %v1473_v28 = vld [vmem:[%s11641_s29 + $0x1f0] sm:$0xff] }
 0x204   : > { %4830 = vmatpush1.bf16.msra.mxu0 %v9630_v49  ;;  %v1904_v36 = vld [vmem:[%s11641_s29 + $0xf68] sm:$0xff]  ;;  %v9702_v49 = vcombine.low %v1772_v33, %v1776_v34  ;;  %v11997_v34 = vld [vmem:[%s11634_s16] sm:$0xff] }
 0x205   : > { %4831 = vmatprep.subr.bf16.mxu0 %v9623_v50  ;;  %v9831_v41 = vcombine.high %v1900_v35, %v1904_v36  ;;  %v1764_v9 = vld [vmem:[%s11641_s29 + $0xb08] sm:$0xff] }
 0x206   : > { %4873 = vmatpush1.bf16.msra.mxu1 %v9758_v14  ;;  %v1768_v46 = vld [vmem:[%s11641_s29 + $0xb28] sm:$0xff]  ;;  %v9830_v14 = vcombine.low %v1900_v35, %v1904_v36  ;;  %v9401_v35 = vcombine.high %v1469_v27, %v1473_v28 }
 0x207   : > { %4874 = vmatprep.subr.bf16.mxu1 %v9751_v51  ;;  %v1892_v47 = vld [vmem:[%s11641_s29 + $0xf08] sm:$0xff]  ;;  %v9695_v50 = vcombine.high %v1764_v9, %v1768_v46 }
 0x208   : > { %4832 = vmatpush1.bf16.msra.mxu0 %v9622_v57  ;;  %v1896_v48 = vld [vmem:[%s11641_s29 + $0xf28] sm:$0xff]  ;;  %v9694_v57 = vcombine.low %v1764_v9, %v1768_v46  ;;  %v9400_v46 = vcombine.low %v1469_v27, %v1473_v28  ;;  %v1557_v27 = vld [vmem:[%s11641_s29 + $0x490] sm:$0xff] }
 0x209   : > { %4833 = vmatprep.subr.bf16.mxu0 %v9615_v59  ;;  %v9823_v51 = vcombine.high %v1892_v47, %v1896_v48  ;;  %v1756_v53 = vld [vmem:[%s11641_s29 + $0xac8] sm:$0xff]  ;;  %v1561_v28 = vld [vmem:[%s11641_s29 + $0x4b0] sm:$0xff] }
 0x20a   : > { %4875 = vmatpush1.bf16.msra.mxu1 %v9750_v58  ;;  %v1760_v54 = vld [vmem:[%s11641_s29 + $0xae8] sm:$0xff]  ;;  %v9822_v58 = vcombine.low %v1892_v47, %v1896_v48 }
 0x20b   : > { %4876 = vmatprep.subr.bf16.mxu1 %v9743_v60  ;;  %v1884_v55 = vld [vmem:[%s11641_s29 + $0xec8] sm:$0xff]  ;;  %v9687_v59 = vcombine.high %v1756_v53, %v1760_v54 }
 0x20c   : > { %4834 = vmatpush1.bf16.msra.mxu0 %v9614_v3  ;;  %v1888_v56 = vld [vmem:[%s11641_s29 + $0xee8] sm:$0xff]  ;;  %v9686_v3 = vcombine.low %v1756_v53, %v1760_v54  ;;  %v1581_v53 = vld [vmem:[%s11641_s29 + $0x550] sm:$0xff] }
 0x20d   : > { %4835 = vmatprep.subr.bf16.mxu0 %v9607_v5  ;;  %v9815_v60 = vcombine.high %v1884_v55, %v1888_v56  ;;  %v1748_v61 = vld [vmem:[%s11641_s29 + $0xa88] sm:$0xff]  ;;  %v1585_v54 = vld [vmem:[%s11641_s29 + $0x570] sm:$0xff] }
 0x20e   : > { %4877 = vmatpush1.bf16.msra.mxu1 %v9742_v4  ;;  %v1752_v62 = vld [vmem:[%s11641_s29 + $0xaa8] sm:$0xff]  ;;  %v9814_v4 = vcombine.low %v1884_v55, %v1888_v56 }
 0x20f   : > { %4878 = vmatprep.subr.bf16.mxu1 %v9735_v6  ;;  %v1876_v0 = vld [vmem:[%s11641_s29 + $0xe88] sm:$0xff]  ;;  %v9679_v5 = vcombine.high %v1748_v61, %v1752_v62 }
 0x210   : > { %4836 = vmatpush1.bf16.msra.mxu0 %v9606_v10  ;;  %v1880_v1 = vld [vmem:[%s11641_s29 + $0xea8] sm:$0xff]  ;;  %v9678_v10 = vcombine.low %v1748_v61, %v1752_v62 }
 0x211   : > { %4837 = vmatprep.subr.bf16.mxu0 %v9599_v11  ;;  %v9807_v6 = vcombine.high %v1876_v0, %v1880_v1  ;;  %v1740_v7 = vld [vmem:[%s11641_s29 + $0xa48] sm:$0xff]  ;;  %v9806_v11 = vcombine.low %v1876_v0, %v1880_v1  ;;  %v9513_v0 = vcombine.high %v1581_v53, %v1585_v54  ;;  %v1445_v1 = vld [vmem:[%s11641_s29 + $0x110] sm:$0xff] }
 0x212   : > { %4879 = vmatpush1.bf16.msra.mxu1 %v9734_v45  ;;  %v1744_v42 = vld [vmem:[%s11641_s29 + $0xa68] sm:$0xff]  ;;  %v1925_v45 = vlaneseq }
 0x213   : > { %4880 = vmatprep.subr.bf16.mxu1 %v9727_v12  ;;  %v1868_v43 = vld [vmem:[%s11641_s29 + $0xe48] sm:$0xff]  ;;  %v9671_v12 = vcombine.high %v1740_v7, %v1744_v42 }
 0x214   : > { %4838 = vmatpush1.bf16.msra.mxu0 %v9598_v21  ;;  %v1872_v8 = vld [vmem:[%s11641_s29 + $0xe68] sm:$0xff] }
 0x215   : > { %4839 = vmatprep.subr.bf16.mxu0 %v9719_v23  ;;  %v9799_v16 = vcombine.high %v1868_v43, %v1872_v8  ;;  %v1732_v17 = vld [vmem:[%s11641_s29 + $0xa08] sm:$0xff]  ;;  %v11989_v23 = vshrl.u32 %v1925_v45, 7 }
 0x216   : > { %4881 = vmatpush1.bf16.msra.mxu1 %v9726_v22  ;;  %v1736_v19 = vld [vmem:[%s11641_s29 + $0xa28] sm:$0xff]  ;;  %v9670_v22 = vcombine.low %v1740_v7, %v1744_v42 }
 0x217   : > { %4882 = vmatprep.subr.bf16.mxu1 %v9847_v24  ;;  %v1860_v20 = vld [vmem:[%s11641_s29 + $0xe08] sm:$0xff]  ;;  %v9798_v24 = vcombine.low %v1868_v43, %v1872_v8  ;;  %v9663_v25 = vcombine.high %v1732_v17, %v1736_v19  ;;  %v9512_v8 = vcombine.low %v1581_v53, %v1585_v54  ;;  %v1533_v54 = vld [vmem:[%s11641_s29 + $0x3d0] sm:$0xff] }
 0x218   : > { %4840 = vmatpush2.bf16.msra.mxu0 %v9718_v29  ;;  %v1864_v21 = vld [vmem:[%s11641_s29 + $0xe28] sm:$0xff]  ;;  %v1597_v29 = vld [vmem:[%s11641_s29 + $0x5d0] sm:$0xff] }
 0x219   : > { %4841 = vmatprep.subr.bf16.mxu0 %v9711_v31  ;;  %v9791_v26 = vcombine.high %v1860_v20, %v1864_v21  ;;  %v9662_v31 = vcombine.low %v1732_v17, %v1736_v19  ;;  %v9790_v33 = vcombine.low %v1860_v20, %v1864_v21  ;;  %v1565_v17 = vld [vmem:[%s11641_s29 + $0x4d0] sm:$0xff] }
 0x21a   : > { %4883 = vmatpush2.bf16.msra.mxu1 %v9846_v30  ;;  %v1601_v30 = vld [vmem:[%s11641_s29 + $0x5f0] sm:$0xff] }
 0x21b   : > { %4884 = vmatprep.subr.bf16.mxu1 %v9839_v32  ;;  %v1927_v32 = vsub.s32 0, %v11989_v23  ;;  %v9529_v36 = vcombine.high %v1597_v29, %v1601_v30  ;;  %v9528_v47 = vcombine.low %v1597_v29, %v1601_v30  ;;  %v1569_v19 = vld [vmem:[%s11641_s29 + $0x4f0] sm:$0xff] }
 0x21c   : > { %4842 = vmatpush2.bf16.msra.mxu0 %v9710_v37  ;;  %v1461_v37 = vld [vmem:[%s11641_s29 + $0x190] sm:$0xff]  ;;  %v9496_v30 = vcombine.low %v1565_v17, %v1569_v19 }
 0x21d   : > { %4843 = vmatprep.subr.bf16.mxu0 %v9703_v39  ;;  %v1589_v39 = vld [vmem:[%s11641_s29 + $0x590] sm:$0xff]  ;;  %v1928_v9 = vrot.slane %v11997_v34, %v1927_v32  ;;  %v9489_v32 = vcombine.high %v1557_v27, %v1561_v28 }
 0x21e   : > { %4885 = vmatpush2.bf16.msra.mxu1 %v9838_v38  ;;  %v1465_v38 = vld [vmem:[%s11641_s29 + $0x1b0] sm:$0xff] }
 0x21f   : > { %4886 = vmatprep.subr.bf16.mxu1 %v9831_v41  ;;  %v1593_v41 = vld [vmem:[%s11641_s29 + $0x5b0] sm:$0xff]  ;;  %v9393_v48 = vcombine.high %v1461_v37, %v1465_v38 }
 0x220   : > { %4844 = vmatpush2.bf16.msra.mxu0 %v9702_v49  ;;  %v9521_v49 = vcombine.high %v1589_v39, %v1593_v41 }
 0x221   : > { %4845 = vmatprep.subr.bf16.mxu0 %v9695_v50  ;;  %v1457_v50 = vld [vmem:[%s11641_s29 + $0x170] sm:$0xff] }
 0x222   : > { %4887 = vmatpush2.bf16.msra.mxu1 %v9830_v14  ;;  %v1453_v14 = vld [vmem:[%s11641_s29 + $0x150] sm:$0xff] }
 0x223   : > { %4888 = vmatprep.subr.bf16.mxu1 %v9823_v51  ;;  %v9384_v42 = vcombine.low %v1453_v14, %v1457_v50 }
 0x224   : > { %4846 = vmatpush2.bf16.msra.mxu0 %v9694_v57  ;;  %v9392_v57 = vcombine.low %v1461_v37, %v1465_v38  ;;  %v1553_v37 = vld [vmem:[%s11641_s29 + $0x470] sm:$0xff] }
 0x225   : > { %4847 = vmatprep.subr.bf16.mxu0 %v9687_v59  ;;  %v9520_v59 = vcombine.low %v1589_v39, %v1593_v41  ;;  %v9488_v39 = vcombine.low %v1557_v27, %v1561_v28 }
 0x226   : > { %4889 = vmatpush2.bf16.msra.mxu1 %v9822_v58 }
 0x227   : > { %4890 = vmatprep.subr.bf16.mxu1 %v9815_v60  ;;  %v9385_v60 = vcombine.high %v1453_v14, %v1457_v50 }
 0x228   : > { %4848 = vmatpush2.bf16.msra.mxu0 %v9686_v3  ;;  %v1449_v3 = vld [vmem:[%s11641_s29 + $0x130] sm:$0xff] }
 0x229   : > { %4849 = vmatprep.subr.bf16.mxu0 %v9679_v5  ;;  %v1573_v5 = vld [vmem:[%s11641_s29 + $0x510] sm:$0xff]  ;;  %v9376_v20 = vcombine.low %v1445_v1, %v1449_v3 }
 0x22a   : > { %4891 = vmatpush2.bf16.msra.mxu1 %v9814_v4 }
 0x22b   : > { %4892 = vmatprep.subr.bf16.mxu1 %v9807_v6  ;;  %v1577_v6 = vld [vmem:[%s11641_s29 + $0x530] sm:$0xff] }
 0x22c   : > { %4850 = vmatpush2.bf16.msra.mxu0 %v9678_v10  ;;  %v9377_v10 = vcombine.high %v1445_v1, %v1449_v3  ;;  %v9504_v21 = vcombine.low %v1573_v5, %v1577_v6  ;;  %v1525_v3 = vld [vmem:[%s11641_s29 + $0x390] sm:$0xff] }
 0x22d   : > { %4851 = vmatprep.subr.bf16.mxu0 %v9671_v12  ;;  %v1437_v12 = vld [vmem:[%s11641_s29 + $0xd0] sm:$0xff] }
 0x22e   : > { %4893 = vmatpush2.bf16.msra.mxu1 %v9806_v11  ;;  %v9505_v11 = vcombine.high %v1573_v5, %v1577_v6  ;;  %v1653_v5 = vld [vmem:[%s11641_s29 + $0x790] sm:$0xff] }
 0x22f   : > { %4894 = vmatprep.subr.bf16.mxu1 %v9799_v16  ;;  %v1441_v16 = vld [vmem:[%s11641_s29 + $0xf0] sm:$0xff] }
 0x230   : > { %4852 = vmatpush2.bf16.msra.mxu0 %v9670_v22  ;;  %v9369_v22 = vcombine.high %v1437_v12, %v1441_v16  ;;  %v9368_v29 = vcombine.low %v1437_v12, %v1441_v16  ;;  %v1657_v6 = vld [vmem:[%s11641_s29 + $0x7b0] sm:$0xff] }
 0x231   : > { %4853 = vmatprep.subr.bf16.mxu0 %v9663_v25  ;;  %v1429_v25 = vld [vmem:[%s11641_s29 + $0x90] sm:$0xff] }
 0x232   : > { %4895 = vmatpush2.bf16.msra.mxu1 %v9798_v24  ;;  %v9497_v24 = vcombine.high %v1565_v17, %v1569_v19  ;;  %v1645_v12 = vld [vmem:[%s11641_s29 + $0x750] sm:$0xff]  ;;  %v9584_v19 = vcombine.low %v1653_v5, %v1657_v6 }
 0x233   : > { %4896 = vmatprep.subr.bf16.mxu1 %v9791_v26  ;;  %v1433_v26 = vld [vmem:[%s11641_s29 + $0xb0] sm:$0xff] }
 0x234   : > { %4854 = vmatpush2.bf16.msra.mxu0 %v9662_v31  ;;  %v9361_v31 = vcombine.high %v1429_v25, %v1433_v26  ;;  %v9360_v38 = vcombine.low %v1429_v25, %v1433_v26  ;;  %v1649_v16 = vld [vmem:[%s11641_s29 + $0x770] sm:$0xff] }
 0x235   : > { %4909 = vmatprep.subr.bf16.mxu0 %v9401_v35  ;;  %v1425_v35 = vld [vmem:[%s11641_s29 + $0x70] sm:$0xff]  ;;  %v9576_v28 = vcombine.low %v1645_v12, %v1649_v16 }
 0x236   : > { %4897 = vmatpush2.bf16.msra.mxu1 %v9790_v33  ;;  %v1421_v33 = vld [vmem:[%s11641_s29 + $0x50] sm:$0xff] }
 0x237   : > { %4952 = vmatprep.subr.bf16.mxu1 %v9529_v36  ;;  %v4599_v51 = vpop.f32.mrf.mxu0  ;;  %4856 = vmatmul.mubr.bf16.vlgmr.msra.gmra.mxu0 %v11853_v63  ;;  %v1549_v36 = vld [vmem:[%s11641_s29 + $0x450] sm:$0xff]  ;;  %v9353_v41 = vcombine.high %v1421_v33, %v1425_v35  ;;  %v9352_v14 = vcombine.low %v1421_v33, %v1425_v35 }
 0x238   : > { %v4600_v55 = vadd.f32 %v4599_v51, %v1928_v9  ;;  %4910 = vmatpush1.bf16.msra.mxu0 %v9400_v46  ;;  %4941 = vmatprep.mubr.bf16.mxu0 %v11689_v13  ;;  %v1413_v46 = vld [vmem:[%s11641_s29 + $0x10] sm:$0xff]  ;;  %v9480_v50 = vcombine.low %v1549_v36, %v1553_v37 }
 0x239   : > { %v4642_v56 = vpop.f32.mrf.mxu1  ;;  %4899 = vmatmul.mubr.bf16.vlgmr.msra.gmra.mxu1 %v11859_v2  ;;  %v12010_v58 = vpop.f32.mrf.mxu0  ;;  %4911 = vmatprep.subr.bf16.mxu0 %v9393_v48  ;;  %v1541_v48 = vld [vmem:[%s11641_s29 + $0x410] sm:$0xff] }
 0x23a   : > { %4953 = vmatpush1.bf16.msra.mxu1 %v9528_v47  ;;  %v12012_v61 = vadd.f32 %v4642_v56, %v4600_v55  ;;  %4984 = vmatprep.mubr.bf16.mxu1 %v11705_v18  ;;  %v1417_v47 = vld [vmem:[%s11641_s29 + $0x30] sm:$0xff] }
 0x23b   : > { %v12014_v62 = vpop.f32.mrf.mxu1  ;;  %4954 = vmatprep.subr.bf16.mxu1 %v9521_v49  ;;  %v4603_v4 = vpop.f32.mrf.mxu0  ;;  %v1545_v49 = vld [vmem:[%s11641_s29 + $0x430] sm:$0xff]  ;;  %v9345_v51 = vcombine.high %v1413_v46, %v1417_v47 }
 0x23c   : > { %v4604_v7 = vadd.f32 %v4603_v4, %v1928_v9  ;;  %4912 = vmatpush1.bf16.msra.mxu0 %v9392_v57  ;;  %v9481_v9 = vcombine.high %v1549_v36, %v1553_v37  ;;  %v9473_v53 = vcombine.high %v1541_v48, %v1545_v49  ;;  %v1537_v55 = vld [vmem:[%s11641_s29 + $0x3f0] sm:$0xff] }
 0x23d   : > { %v4646_v43 = vpop.f32.mrf.mxu1  ;;  %4913 = vmatprep.subr.bf16.mxu0 %v9385_v60  ;;  %v1661_v56 = vld [vmem:[%s11641_s29 + $0x7d0] sm:$0xff]  ;;  %v9472_v60 = vcombine.low %v1541_v48, %v1545_v49 }
 0x23e   : > { %4955 = vmatpush1.bf16.msra.mxu1 %v9520_v59  ;;  %v12022_v45 = vadd.f32 %v4646_v43, %v4604_v7  ;;  %v1665_v57 = vld [vmem:[%s11641_s29 + $0x7f0] sm:$0xff]  ;;  %v9344_v59 = vcombine.low %v1413_v46, %v1417_v47  ;;  %v9464_v7 = vcombine.low %v1533_v54, %v1537_v55 }
 0x23f   : > { %4956 = vmatprep.subr.bf16.mxu1 %v9513_v0  ;;  %v9465_v0 = vcombine.high %v1533_v54, %v1537_v55  ;;  %v9593_v1 = vcombine.high %v1661_v56, %v1665_v57  ;;  %v1529_v4 = vld [vmem:[%s11641_s29 + $0x3b0] sm:$0xff] }
 0x240   : > { %4914 = vmatpush1.bf16.msra.mxu0 %v9384_v42  ;;  %v9592_v42 = vcombine.low %v1661_v56, %v1665_v57  ;;  %v9457_v43 = vcombine.high %v1525_v3, %v1529_v4  ;;  %v9456_v17 = vcombine.low %v1525_v3, %v1529_v4  ;;  %v1637_v25 = vld [vmem:[%s11641_s29 + $0x710] sm:$0xff] }
 0x241   : > { %4915 = vmatprep.subr.bf16.mxu0 %v9377_v10  ;;  %v1517_v10 = vld [vmem:[%s11641_s29 + $0x350] sm:$0xff] }
 0x242   : > { %4957 = vmatpush1.bf16.msra.mxu1 %v9512_v8  ;;  %v9585_v8 = vcombine.high %v1653_v5, %v1657_v6  ;;  %v1641_v26 = vld [vmem:[%s11641_s29 + $0x730] sm:$0xff] }
 0x243   : > { %4958 = vmatprep.subr.bf16.mxu1 %v9505_v11  ;;  %v1521_v11 = vld [vmem:[%s11641_s29 + $0x370] sm:$0xff]  ;;  %v9568_v37 = vcombine.low %v1637_v25, %v1641_v26 }
 0x244   : > { %4916 = vmatpush1.bf16.msra.mxu0 %v9376_v20  ;;  %v9449_v20 = vcombine.high %v1517_v10, %v1521_v11  ;;  %v9448_v27 = vcombine.low %v1517_v10, %v1521_v11  ;;  %v1629_v33 = vld [vmem:[%s11641_s29 + $0x6d0] sm:$0xff] }
 0x245   : > { %4917 = vmatprep.subr.bf16.mxu0 %v9369_v22  ;;  %v1509_v22 = vld [vmem:[%s11641_s29 + $0x310] sm:$0xff] }
 0x246   : > { %4959 = vmatpush1.bf16.msra.mxu1 %v9504_v21  ;;  %v9577_v21 = vcombine.high %v1645_v12, %v1649_v16  ;;  %v1633_v35 = vld [vmem:[%s11641_s29 + $0x6f0] sm:$0xff] }
 0x247   : > { %4960 = vmatprep.subr.bf16.mxu1 %v9497_v24  ;;  %v1513_v24 = vld [vmem:[%s11641_s29 + $0x330] sm:$0xff]  ;;  %v9560_v49 = vcombine.low %v1629_v33, %v1633_v35 }
 0x248   : > { %4918 = vmatpush1.bf16.msra.mxu0 %v9368_v29  ;;  %v9441_v29 = vcombine.high %v1509_v22, %v1513_v24  ;;  %v9440_v36 = vcombine.low %v1509_v22, %v1513_v24  ;;  %v1621_v46 = vld [vmem:[%s11641_s29 + $0x690] sm:$0xff] }
 0x249   : > { %4919 = vmatprep.subr.bf16.mxu0 %v9361_v31  ;;  %v1501_v31 = vld [vmem:[%s11641_s29 + $0x2d0] sm:$0xff] }
 0x24a   : > { %4961 = vmatpush1.bf16.msra.mxu1 %v9496_v30  ;;  %v9569_v30 = vcombine.high %v1637_v25, %v1641_v26  ;;  %v1625_v47 = vld [vmem:[%s11641_s29 + $0x6b0] sm:$0xff]  ;;  %v12080_v26 = vpop.f32.mrf.mxu0 }
 0x24b   : > { %4962 = vmatprep.subr.bf16.mxu1 %v9489_v32  ;;  %v1505_v32 = vld [vmem:[%s11641_s29 + $0x2f0] sm:$0xff]  ;;  %v9552_v57 = vcombine.low %v1621_v46, %v1625_v47 }
 0x24c   : > { %4920 = vmatpush1.bf16.msra.mxu0 %v9360_v38  ;;  %v9433_v38 = vcombine.high %v1501_v31, %v1505_v32  ;;  %v9432_v48 = vcombine.low %v1501_v31, %v1505_v32  ;;  %v1613_v54 = vld [vmem:[%s11641_s29 + $0x650] sm:$0xff] }
 0x24d   : > { %4921 = vmatprep.subr.bf16.mxu0 %v9353_v41  ;;  %v1493_v41 = vld [vmem:[%s11641_s29 + $0x290] sm:$0xff] }
 0x24e   : > { %4963 = vmatpush1.bf16.msra.mxu1 %v9488_v39  ;;  %v9561_v39 = vcombine.high %v1629_v33, %v1633_v35  ;;  %v1617_v55 = vld [vmem:[%s11641_s29 + $0x670] sm:$0xff] }
 0x24f   : > { %4964 = vmatprep.subr.bf16.mxu1 %v9481_v9  ;;  %v1497_v9 = vld [vmem:[%s11641_s29 + $0x2b0] sm:$0xff]  ;;  %v9544_v6 = vcombine.low %v1613_v54, %v1617_v55 }
 0x250   : > { %4922 = vmatpush1.bf16.msra.mxu0 %v9352_v14  ;;  %v9425_v14 = vcombine.high %v1493_v41, %v1497_v9  ;;  %v9424_v56 = vcombine.low %v1493_v41, %v1497_v9  ;;  %v1605_v3 = vld [vmem:[%s11641_s29 + $0x610] sm:$0xff] }
 0x251   : > { %4923 = vmatprep.subr.bf16.mxu0 %v9345_v51  ;;  %v1485_v51 = vld [vmem:[%s11641_s29 + $0x250] sm:$0xff] }
 0x252   : > { %4965 = vmatpush1.bf16.msra.mxu1 %v9480_v50  ;;  %v9553_v50 = vcombine.high %v1621_v46, %v1625_v47  ;;  %v1609_v4 = vld [vmem:[%s11641_s29 + $0x630] sm:$0xff] }
 0x253   : > { %4966 = vmatprep.subr.bf16.mxu1 %v9473_v53  ;;  %v1489_v53 = vld [vmem:[%s11641_s29 + $0x270] sm:$0xff]  ;;  %v9536_v16 = vcombine.low %v1605_v3, %v1609_v4 }
 0x254   : > { %4924 = vmatpush1.bf16.msra.mxu0 %v9344_v59  ;;  %v9417_v59 = vcombine.high %v1485_v51, %v1489_v53  ;;  %v9416_v5 = vcombine.low %v1485_v51, %v1489_v53  ;;  %v1853_v10 = vld [vmem:[%s11641_s29 + $0xdd0] sm:$0xff] }
 0x255   : > { %4925 = vmatprep.subr.bf16.mxu0 %v9465_v0  ;;  %v1477_v0 = vld [vmem:[%s11641_s29 + $0x210] sm:$0xff] }
 0x256   : > { %4967 = vmatpush1.bf16.msra.mxu1 %v9472_v60  ;;  %v9545_v60 = vcombine.high %v1613_v54, %v1617_v55  ;;  %v1857_v11 = vld [vmem:[%s11641_s29 + $0xdf0] sm:$0xff] }
 0x257   : > { %4968 = vmatprep.subr.bf16.mxu1 %v9593_v1  ;;  %v1481_v1 = vld [vmem:[%s11641_s29 + $0x230] sm:$0xff] }
 0x258   : > { %4926 = vmatpush2.bf16.msra.mxu0 %v9464_v7  ;;  %v9409_v7 = vcombine.high %v1477_v0, %v1481_v1  ;;  %v9408_v12 = vcombine.low %v1477_v0, %v1481_v1  ;;  %v1845_v22 = vld [vmem:[%s11641_s29 + $0xd90] sm:$0xff] }
 0x259   : > { %4927 = vmatprep.subr.bf16.mxu0 %v9457_v43  ;;  %v1725_v43 = vld [vmem:[%s11641_s29 + $0x9d0] sm:$0xff] }
 0x25a   : > { %4969 = vmatpush2.bf16.msra.mxu1 %v9592_v42  ;;  %v9537_v42 = vcombine.high %v1605_v3, %v1609_v4  ;;  %v1849_v24 = vld [vmem:[%s11641_s29 + $0xdb0] sm:$0xff] }
 0x25b   : > { %4970 = vmatprep.subr.bf16.mxu1 %v9585_v8  ;;  %v1729_v8 = vld [vmem:[%s11641_s29 + $0x9f0] sm:$0xff]  ;;  %v9776_v9 = vcombine.low %v1845_v22, %v1849_v24 }
 0x25c   : > { %4928 = vmatpush2.bf16.msra.mxu0 %v9456_v17  ;;  %v9657_v17 = vcombine.high %v1725_v43, %v1729_v8  ;;  %v9656_v25 = vcombine.low %v1725_v43, %v1729_v8  ;;  %v1709_v31 = vld [vmem:[%s11641_s29 + $0x950] sm:$0xff] }
 0x25d   : > { %4929 = vmatprep.subr.bf16.mxu0 %v9449_v20  ;;  %v1717_v20 = vld [vmem:[%s11641_s29 + $0x990] sm:$0xff] }
 0x25e   : > { %4971 = vmatpush2.bf16.msra.mxu1 %v9584_v19  ;;  %v9785_v19 = vcombine.high %v1853_v10, %v1857_v11  ;;  %v1713_v32 = vld [vmem:[%s11641_s29 + $0x970] sm:$0xff] }
 0x25f   : > { %4972 = vmatprep.subr.bf16.mxu1 %v9577_v21  ;;  %v1721_v21 = vld [vmem:[%s11641_s29 + $0x9b0] sm:$0xff]  ;;  %v9641_v46 = vcombine.high %v1709_v31, %v1713_v32 }
 0x260   : > { %4930 = vmatpush2.bf16.msra.mxu0 %v9448_v27  ;;  %v9784_v27 = vcombine.low %v1853_v10, %v1857_v11  ;;  %v1837_v35 = vld [vmem:[%s11641_s29 + $0xd50] sm:$0xff] }
 0x261   : > { %4931 = vmatprep.subr.bf16.mxu0 %v9441_v29  ;;  %v12082_v29 = vpop.f32.mrf.mxu1  ;;  %v1829_v51 = vld [vmem:[%s11641_s29 + $0xd10] sm:$0xff] }
 0x262   : > { %4973 = vmatpush2.bf16.msra.mxu1 %v9576_v28  ;;  %v9649_v28 = vcombine.high %v1717_v20, %v1721_v21  ;;  %v1833_v53 = vld [vmem:[%s11641_s29 + $0xd30] sm:$0xff] }
 0x263   : > { %4974 = vmatprep.subr.bf16.mxu1 %v9569_v30  ;;  %v9777_v30 = vcombine.high %v1845_v22, %v1849_v24  ;;  %v9761_v3 = vcombine.high %v1829_v51, %v1833_v53  ;;  %v1693_v4 = vld [vmem:[%s11641_s29 + $0x8d0] sm:$0xff]  ;;  %v9760_v8 = vcombine.low %v1829_v51, %v1833_v53 }
 0x264   : > { %4932 = vmatpush2.bf16.msra.mxu0 %v9440_v36  ;;  %v1841_v36 = vld [vmem:[%s11641_s29 + $0xd70] sm:$0xff] }
 0x265   : > { %4933 = vmatprep.subr.bf16.mxu0 %v9433_v38 }
 0x266   : > { %4975 = vmatpush2.bf16.msra.mxu1 %v9568_v37 }
 0x267   : > { %4976 = vmatprep.subr.bf16.mxu1 %v9561_v39  ;;  %v9648_v39 = vcombine.low %v1717_v20, %v1721_v21  ;;  %v1813_v20 = vld [vmem:[%s11641_s29 + $0xc90] sm:$0xff] }
 0x268   : > { %4934 = vmatpush2.bf16.msra.mxu0 %v9432_v48  ;;  %v1817_v21 = vld [vmem:[%s11641_s29 + $0xcb0] sm:$0xff] }
 0x269   : > { %4935 = vmatprep.subr.bf16.mxu0 %v9425_v14  ;;  %v1705_v14 = vld [vmem:[%s11641_s29 + $0x930] sm:$0xff] }
 0x26a   : > { %4977 = vmatpush2.bf16.msra.mxu1 %v9560_v49  ;;  %v9769_v49 = vcombine.high %v1837_v35, %v1841_v36 }
 0x26b   : > { %4978 = vmatprep.subr.bf16.mxu1 %v9553_v50 }
 0x26c   : > { %4936 = vmatpush2.bf16.msra.mxu0 %v9424_v56  ;;  %v9640_v56 = vcombine.low %v1709_v31, %v1713_v32  ;;  %v9745_v31 = vcombine.high %v1813_v20, %v1817_v21  ;;  %v1677_v32 = vld [vmem:[%s11641_s29 + $0x850] sm:$0xff] }
 0x26d   : > { %4937 = vmatprep.subr.bf16.mxu0 %v9417_v59  ;;  %v9768_v59 = vcombine.low %v1837_v35, %v1841_v36  ;;  %v1805_v35 = vld [vmem:[%s11641_s29 + $0xc50] sm:$0xff] }
 0x26e   : > { %4979 = vmatpush2.bf16.msra.mxu1 %v9552_v57  ;;  %v1809_v36 = vld [vmem:[%s11641_s29 + $0xc70] sm:$0xff] }
 0x26f   : > { %4980 = vmatprep.subr.bf16.mxu1 %v9545_v60  ;;  %v9736_v53 = vcombine.low %v1805_v35, %v1809_v36 }
 0x270   : > { %4938 = vmatpush2.bf16.msra.mxu0 %v9416_v5  ;;  %v1697_v5 = vld [vmem:[%s11641_s29 + $0x8f0] sm:$0xff] }
 0x271   : > { %4939 = vmatprep.subr.bf16.mxu0 %v9409_v7  ;;  %v9625_v10 = vcombine.high %v1693_v4, %v1697_v5 }
 0x272   : > { %4981 = vmatpush2.bf16.msra.mxu1 %v9544_v6  ;;  %v1821_v6 = vld [vmem:[%s11641_s29 + $0xcd0] sm:$0xff] }
 0x273   : > { %4982 = vmatprep.subr.bf16.mxu1 %v9537_v42 }
 0x274   : > { %4940 = vmatpush2.bf16.msra.mxu0 %v9408_v12 }
 0x275   : > { %4995 = vmatprep.subr.bf16.mxu0 %v9657_v17  ;;  %v1685_v17 = vld [vmem:[%s11641_s29 + $0x890] sm:$0xff] }
 0x276   : > { %4983 = vmatpush2.bf16.msra.mxu1 %v9536_v16 }
 0x277   : > { %5038 = vmatprep.subr.bf16.mxu1 %v9785_v19  ;;  %v4685_v33 = vpop.f32.mrf.mxu0  ;;  %4942 = vmatmul.mubr.bf16.vlgmr.msra.gmra.mxu0 %v11750_v40  ;;  %v1689_v19 = vld [vmem:[%s11641_s29 + $0x8b0] sm:$0xff] }
 0x278   : > { %v4686_v37 = vadd.f32 %v4685_v33, %v12012_v61  ;;  %4996 = vmatpush1.bf16.msra.mxu0 %v9656_v25  ;;  %v1701_v61 = vld [vmem:[%s11641_s29 + $0x910] sm:$0xff]  ;;  %5027 = vmatprep.mubr.bf16.mxu0 %v11781_v15  ;;  %v9624_v25 = vcombine.low %v1693_v4, %v1697_v5 }
 0x279   : > { %v4728_v38 = vpop.f32.mrf.mxu1  ;;  %4985 = vmatmul.mubr.bf16.vlgmr.msra.gmra.mxu1 %v11765_v44  ;;  %v12091_v41 = vpop.f32.mrf.mxu0  ;;  %4997 = vmatprep.subr.bf16.mxu0 %v9649_v28  ;;  %v9633_v60 = vcombine.high %v1701_v61, %v1705_v14  ;;  %v9632_v43 = vcombine.low %v1701_v61, %v1705_v14  ;;  %v9617_v28 = vcombine.high %v1685_v17, %v1689_v19  ;;  %v1681_v33 = vld [vmem:[%s11641_s29 + $0x870] sm:$0xff] }
 0x27a   : > { %5039 = vmatpush1.bf16.msra.mxu1 %v9784_v27  ;;  %v12093_v47 = vadd.f32 %v4728_v38, %v4686_v37  ;;  %5070 = vmatprep.mubr.bf16.mxu1 %v11788_v52  ;;  %v9616_v38 = vcombine.low %v1685_v17, %v1689_v19  ;;  %v1673_v61 = vld [vmem:[%s11641_s29 + $0x830] sm:$0xff]  ;;  %v9608_v51 = vcombine.low %v1677_v32, %v1681_v33 }
 0x27b   : > { %v12095_v48 = vpop.f32.mrf.mxu1  ;;  %5040 = vmatprep.subr.bf16.mxu1 %v9777_v30  ;;  %v4689_v50 = vpop.f32.mrf.mxu0  ;;  %v1797_v14 = vld [vmem:[%s11641_s29 + $0xc10] sm:$0xff] }
 0x27c   : > { %v5269_v54 = vmul.f32 0.044715, %v12093_v47  ;;  %v4690_v55 = vadd.f32 %v4689_v50, %v12022_v45  ;;  %4998 = vmatpush1.bf16.msra.mxu0 %v9648_v39  ;;  %v1825_v45 = vld [vmem:[%s11641_s29 + $0xcf0] sm:$0xff]  ;;  %v9744_v39 = vcombine.low %v1813_v20, %v1817_v21 }
 0x27d   : > { %v4732_v57 = vpop.f32.mrf.mxu1  ;;  %4999 = vmatprep.subr.bf16.mxu0 %v9641_v46  ;;  %v9753_v16 = vcombine.high %v1821_v6, %v1825_v45  ;;  %v9752_v27 = vcombine.low %v1821_v6, %v1825_v45  ;;  %v9737_v46 = vcombine.high %v1805_v35, %v1809_v36  ;;  %v1801_v50 = vld [vmem:[%s11641_s29 + $0xc30] sm:$0xff] }
 0x27e   : > { %5041 = vmatpush1.bf16.msra.mxu1 %v9776_v9  ;;  %v5285_v0 = vmul.f32 %v5269_v54, %v12093_v47  ;;  %v12106_v1 = vadd.f32 %v4732_v57, %v4690_v55  ;;  %v9609_v9 = vcombine.high %v1677_v32, %v1681_v33  ;;  %v9729_v55 = vcombine.high %v1797_v14, %v1801_v50  ;;  %v1793_v57 = vld [vmem:[%s11641_s29 + $0xbf0] sm:$0xff] }
 0x27f   : > { %5042 = vmatprep.subr.bf16.mxu1 %v9769_v49  ;;  %v1669_v49 = vld [vmem:[%s11641_s29 + $0x810] sm:$0xff] }
 0x280   : > { %v5301_v7 = vmul.f32 %v5285_v0, %v12093_v47  ;;  %v5277_v42 = vmul.f32 0.044715, %v12106_v1  ;;  %5000 = vmatpush1.bf16.msra.mxu0 %v9640_v56  ;;  %v9601_v54 = vcombine.high %v1669_v49, %v1673_v61  ;;  %v1789_v56 = vld [vmem:[%s11641_s29 + $0xbd0] sm:$0xff]  ;;  %v9600_v0 = vcombine.low %v1669_v49, %v1673_v61 }
 0x281   : > { %5001 = vmatprep.subr.bf16.mxu0 %v9633_v60  ;;  %v1921_v60 = vld [vmem:[%s11641_s29 + $0xff0] sm:$0xff]  ;;  %v9721_v4 = vcombine.high %v1789_v56, %v1793_v57 }
 0x282   : > { %5043 = vmatpush1.bf16.msra.mxu1 %v9768_v59  ;;  %v5317_v11 = vadd.f32 %v5301_v7, %v12093_v47  ;;  %v5293_v12 = vmul.f32 %v5277_v42, %v12106_v1  ;;  %v1917_v59 = vld [vmem:[%s11641_s29 + $0xfd0] sm:$0xff] }
 0x283   : > { %5044 = vmatprep.subr.bf16.mxu1 %v9761_v3  ;;  %v9728_v3 = vcombine.low %v1797_v14, %v1801_v50  ;;  %v9849_v5 = vcombine.high %v1917_v59, %v1921_v60  ;;  %v1781_v6 = vld [vmem:[%s11641_s29 + $0xb90] sm:$0xff] }
 0x284   : > { %v5333_v22 = vmul.f32 0.7978846, %v5317_v11  ;;  %v5309_v24 = vmul.f32 %v5293_v12, %v12106_v1  ;;  %5002 = vmatpush1.bf16.msra.mxu0 %v9632_v43  ;;  %v1785_v45 = vld [vmem:[%s11641_s29 + $0xbb0] sm:$0xff] }
 0x285   : > { %5003 = vmatprep.subr.bf16.mxu0 %v9625_v10  ;;  %v1909_v42 = vld [vmem:[%s11641_s29 + $0xf90] sm:$0xff]  ;;  %v9848_v10 = vcombine.low %v1917_v59, %v1921_v60  ;;  %v9713_v11 = vcombine.high %v1781_v6, %v1785_v45 }
 0x286   : > { %5045 = vmatpush1.bf16.msra.mxu1 %v9760_v8  ;;  %10419 = vtanh.f32 %v5333_v22  ;;  %v5325_v30 = vadd.f32 %v5309_v24, %v12106_v1  ;;  %v1913_v43 = vld [vmem:[%s11641_s29 + $0xfb0] sm:$0xff]  ;;  %v9720_v8 = vcombine.low %v1789_v56, %v1793_v57  ;;  %v9712_v24 = vcombine.low %v1781_v6, %v1785_v45 }
 0x287   : > { %5046 = vmatprep.subr.bf16.mxu1 %v9753_v16  ;;  %v9841_v12 = vcombine.high %v1909_v42, %v1913_v43  ;;  %v1773_v16 = vld [vmem:[%s11641_s29 + $0xb50] sm:$0xff] }
 0x288   : > { %v5341_v37 = vmul.f32 0.7978846, %v5325_v30  ;;  %5004 = vmatpush1.bf16.msra.mxu0 %v9624_v25  ;;  %v1777_v17 = vld [vmem:[%s11641_s29 + $0xb70] sm:$0xff]  ;;  %v5253_v25 = vmul.f32 0.5, %v12093_v47  ;;  %v9840_v30 = vcombine.low %v1909_v42, %v1913_v43 }
 0x289   : > { %5005 = vmatprep.subr.bf16.mxu0 %v9617_v28  ;;  %v1901_v21 = vld [vmem:[%s11641_s29 + $0xf50] sm:$0xff]  ;;  %v9704_v47 = vcombine.low %v1773_v16, %v1777_v17 }
 0x28a   : > { %5047 = vmatpush1.bf16.msra.mxu1 %v9752_v27  ;;  %10421 = vtanh.f32 %v5341_v37  ;;  %v1905_v22 = vld [vmem:[%s11641_s29 + $0xf70] sm:$0xff]  ;;  %v5261_v27 = vmul.f32 0.5, %v12106_v1 }
 0x28b   : > { %5048 = vmatprep.subr.bf16.mxu1 %v9745_v31  ;;  %v9705_v31 = vcombine.high %v1773_v16, %v1777_v17  ;;  %v9833_v32 = vcombine.high %v1901_v21, %v1905_v22  ;;  %v1765_v33 = vld [vmem:[%s11641_s29 + $0xb10] sm:$0xff] }
 0x28c   : > { %5006 = vmatpush1.bf16.msra.mxu0 %v9616_v38  ;;  %v1769_v35 = vld [vmem:[%s11641_s29 + $0xb30] sm:$0xff] }
 0x28d   : > { %5007 = vmatprep.subr.bf16.mxu0 %v9609_v9  ;;  %v1893_v38 = vld [vmem:[%s11641_s29 + $0xf10] sm:$0xff]  ;;  %v9832_v9 = vcombine.low %v1901_v21, %v1905_v22 }
 0x28e   : > { %5049 = vmatpush1.bf16.msra.mxu1 %v9744_v39  ;;  %v1897_v39 = vld [vmem:[%s11641_s29 + $0xf30] sm:$0xff] }
 0x28f   : > { %5050 = vmatprep.subr.bf16.mxu1 %v9737_v46  ;;  %v9697_v46 = vcombine.high %v1765_v33, %v1769_v35  ;;  %v9825_v49 = vcombine.high %v1893_v38, %v1897_v39  ;;  %v1757_v61 = vld [vmem:[%s11641_s29 + $0xad0] sm:$0xff] }
 0x290   : > { %5008 = vmatpush1.bf16.msra.mxu0 %v9608_v51  ;;  %v1761_v14 = vld [vmem:[%s11641_s29 + $0xaf0] sm:$0xff] }
 0x291   : > { %5009 = vmatprep.subr.bf16.mxu0 %v9601_v54  ;;  %v1885_v50 = vld [vmem:[%s11641_s29 + $0xed0] sm:$0xff]  ;;  %v9824_v54 = vcombine.low %v1893_v38, %v1897_v39  ;;  %v1462_v38 = vld [vmem:[%s11641_s29 + $0x198] sm:$0xff] }
 0x292   : > { %5051 = vmatpush1.bf16.msra.mxu1 %v9736_v53  ;;  %v1889_v51 = vld [vmem:[%s11641_s29 + $0xef0] sm:$0xff]  ;;  %v9696_v53 = vcombine.low %v1765_v33, %v1769_v35  ;;  %v1935_v33 = vsub.s32 2, %v11989_v23  ;;  %v1466_v39 = vld [vmem:[%s11641_s29 + $0x1b8] sm:$0xff] }
 0x293   : > { %5052 = vmatprep.subr.bf16.mxu1 %v9729_v55  ;;  %v10420_v7 = vpop.eup %10419  ;;  %v9689_v55 = vcombine.high %v1757_v61, %v1761_v14  ;;  %v9817_v56 = vcombine.high %v1885_v50, %v1889_v51  ;;  %v1749_v57 = vld [vmem:[%s11641_s29 + $0xa90] sm:$0xff] }
 0x294   : > { %5010 = vmatpush1.bf16.msra.mxu0 %v9600_v0  ;;  %v5365_v19 = vadd.f32 1.0, %v10420_v7  ;;  %v1753_v59 = vld [vmem:[%s11641_s29 + $0xab0] sm:$0xff] }
 0x295   : > { %5011 = vmatprep.subr.bf16.mxu0 %v9721_v4  ;;  %v1877_v60 = vld [vmem:[%s11641_s29 + $0xe90] sm:$0xff]  ;;  %v9816_v4 = vcombine.low %v1885_v50, %v1889_v51  ;;  %v9395_v50 = vcombine.high %v1462_v38, %v1466_v39  ;;  %v12178_v51 = vpop.f32.mrf.mxu1 }
 0x296   : > { %5053 = vmatpush1.bf16.msra.mxu1 %v9728_v3  ;;  %v5381_v36 = vmul.f32 %v5365_v19, %v5253_v25  ;;  %v1881_v0 = vld [vmem:[%s11641_s29 + $0xeb0] sm:$0xff]  ;;  %v9688_v3 = vcombine.low %v1757_v61, %v1761_v14  ;;  %v12176_v61 = vpop.f32.mrf.mxu0 }
 0x297   : > { %5054 = vmatprep.subr.bf16.mxu1 %v9849_v5  ;;  %v10422_v20 = vpop.eup %10421  ;;  %v9681_v5 = vcombine.high %v1749_v57, %v1753_v59  ;;  %v9809_v6 = vcombine.high %v1877_v60, %v1881_v0  ;;  %v1741_v45 = vld [vmem:[%s11641_s29 + $0xa50] sm:$0xff] }
 0x298   : > { %5012 = vmatpush2.bf16.msra.mxu0 %v9720_v8  ;;  %v5373_v28 = vadd.f32 1.0, %v10422_v20  ;;  %v1745_v7 = vld [vmem:[%s11641_s29 + $0xa70] sm:$0xff]  ;;  %v9680_v8 = vcombine.low %v1749_v57, %v1753_v59  ;;  %v1582_v57 = vld [vmem:[%s11641_s29 + $0x558] sm:$0xff] }
 0x299   : > { %5013 = vmatprep.subr.bf16.mxu0 %v9713_v11  ;;  %v1869_v42 = vld [vmem:[%s11641_s29 + $0xe50] sm:$0xff]  ;;  %v9673_v11 = vcombine.high %v1741_v45, %v1745_v7  ;;  %v9672_v21 = vcombine.low %v1741_v45, %v1745_v7  ;;  %v1586_v59 = vld [vmem:[%s11641_s29 + $0x578] sm:$0xff] }
 0x29a   : > { %5055 = vmatpush2.bf16.msra.mxu1 %v9848_v10  ;;  %v5389_v37 = vmul.f32 %v5373_v28, %v5261_v27  ;;  %v1873_v43 = vld [vmem:[%s11641_s29 + $0xe70] sm:$0xff]  ;;  %v9808_v10 = vcombine.low %v1877_v60, %v1881_v0  ;;  %v1470_v27 = vld [vmem:[%s11641_s29 + $0x1d8] sm:$0xff]  ;;  %v9394_v0 = vcombine.low %v1462_v38, %v1466_v39  ;;  %v9515_v7 = vcombine.high %v1582_v57, %v1586_v59 }
 0x29b   : > { %5056 = vmatprep.subr.bf16.mxu1 %v9841_v12  ;;  %v9801_v12 = vcombine.high %v1869_v42, %v1873_v43  ;;  %v1733_v16 = vld [vmem:[%s11641_s29 + $0xa10] sm:$0xff]  ;;  %v9800_v22 = vcombine.low %v1869_v42, %v1873_v43  ;;  %v1474_v28 = vld [vmem:[%s11641_s29 + $0x1f8] sm:$0xff] }
 0x29c   : > { %5014 = vmatpush2.bf16.msra.mxu0 %v9712_v24  ;;  %v12148_v1 = vpack.c.bf16 %v5389_v37, %v5381_v36  ;;  %v1737_v17 = vld [vmem:[%s11641_s29 + $0xa30] sm:$0xff]  ;;  %v9403_v36 = vcombine.high %v1470_v27, %v1474_v28  ;;  %v1446_v42 = vld [vmem:[%s11641_s29 + $0x118] sm:$0xff] }
 0x29d   : > { %5015 = vmatprep.subr.bf16.mxu0 %v9705_v31  ;;  %v1861_v19 = vld [vmem:[%s11641_s29 + $0xe10] sm:$0xff]  ;;  %v9665_v24 = vcombine.high %v1733_v16, %v1737_v17  ;;  %v1602_v31 = vld [vmem:[%s11641_s29 + $0x5f8] sm:$0xff] }
 0x29e   : > { %5057 = vmatpush2.bf16.msra.mxu1 %v9840_v30  ;;  %v1865_v20 = vld [vmem:[%s11641_s29 + $0xe30] sm:$0xff]  ;;  %v1598_v30 = vld [vmem:[%s11641_s29 + $0x5d8] sm:$0xff] }
 0x29f   : > { %5058 = vmatprep.subr.bf16.mxu1 %v9833_v32  ;;  %v9793_v25 = vcombine.high %v1861_v19, %v1865_v20  ;;  %v9664_v32 = vcombine.low %v1733_v16, %v1737_v17  ;;  %v9792_v35 = vcombine.low %v1861_v19, %v1865_v20  ;;  %v9531_v37 = vcombine.high %v1598_v30, %v1602_v31  ;;  %v1450_v43 = vld [vmem:[%s11641_s29 + $0x138] sm:$0xff] }
 0x2a0   : > { %5016 = vmatpush2.bf16.msra.mxu0 %v9704_v47  ;;  %v1590_v47 = vld [vmem:[%s11641_s29 + $0x598] sm:$0xff]  ;;  %v9530_v14 = vcombine.low %v1598_v30, %v1602_v31  ;;  %v9514_v19 = vcombine.low %v1582_v57, %v1586_v59  ;;  %v9379_v20 = vcombine.high %v1446_v42, %v1450_v43 }
 0x2a1   : > { %5017 = vmatprep.subr.bf16.mxu0 %v9697_v46  ;;  %v1936_v46 = vrot.slane %v11997_v34, %v1935_v33  ;;  %v1434_v33 = vld [vmem:[%s11641_s29 + $0xb8] sm:$0xff] }
 0x2a2   : > { %5059 = vmatpush2.bf16.msra.mxu1 %v9832_v9  ;;  %v1594_v9 = vld [vmem:[%s11641_s29 + $0x5b8] sm:$0xff] }
 0x2a3   : > { %5060 = vmatprep.subr.bf16.mxu1 %v9825_v49  ;;  %v9402_v49 = vcombine.low %v1470_v27, %v1474_v28  ;;  %v9378_v27 = vcombine.low %v1446_v42, %v1450_v43  ;;  %v1418_v57 = vld [vmem:[%s11641_s29 + $0x38] sm:$0xff] }
 0x2a4   : > { %5018 = vmatpush2.bf16.msra.mxu0 %v9696_v53  ;;  %v9523_v53 = vcombine.high %v1590_v47, %v1594_v9  ;;  %v1542_v59 = vld [vmem:[%s11641_s29 + $0x418] sm:$0xff] }
 0x2a5   : > { %5019 = vmatprep.subr.bf16.mxu0 %v9689_v55  ;;  %v1458_v55 = vld [vmem:[%s11641_s29 + $0x178] sm:$0xff] }
 0x2a6   : > { %5061 = vmatpush2.bf16.msra.mxu1 %v9824_v54  ;;  %v1454_v54 = vld [vmem:[%s11641_s29 + $0x158] sm:$0xff] }
 0x2a7   : > { %5062 = vmatprep.subr.bf16.mxu1 %v9817_v56  ;;  %v9386_v16 = vcombine.low %v1454_v54, %v1458_v55  ;;  %v1538_v42 = vld [vmem:[%s11641_s29 + $0x3f8] sm:$0xff] }
 0x2a8   : > { %5020 = vmatpush2.bf16.msra.mxu0 %v9688_v3  ;;  %v1662_v43 = vld [vmem:[%s11641_s29 + $0x7d8] sm:$0xff] }
 0x2a9   : > { %5021 = vmatprep.subr.bf16.mxu0 %v9681_v5  ;;  %v9387_v5 = vcombine.high %v1454_v54, %v1458_v55 }
 0x2aa   : > { %5063 = vmatpush2.bf16.msra.mxu1 %v9816_v4  ;;  %v9522_v4 = vcombine.low %v1590_v47, %v1594_v9  ;;  %v1422_v9 = vld [vmem:[%s11641_s29 + $0x58] sm:$0xff] }
 0x2ab   : > { %5064 = vmatprep.subr.bf16.mxu1 %v9809_v6 }
 0x2ac   : > { %5022 = vmatpush2.bf16.msra.mxu0 %v9680_v8 }
 0x2ad   : > { %5023 = vmatprep.subr.bf16.mxu0 %v9673_v11  ;;  %v1578_v11 = vld [vmem:[%s11641_s29 + $0x538] sm:$0xff] }
 0x2ae   : > { %5065 = vmatpush2.bf16.msra.mxu1 %v9808_v10  ;;  %v1574_v10 = vld [vmem:[%s11641_s29 + $0x518] sm:$0xff] }
 0x2af   : > { %5066 = vmatprep.subr.bf16.mxu1 %v9801_v12  ;;  %v9506_v28 = vcombine.low %v1574_v10, %v1578_v11 }
 0x2b0   : > { %5024 = vmatpush2.bf16.msra.mxu0 %v9672_v21 }
 0x2b1   : > { %5025 = vmatprep.subr.bf16.mxu0 %v9665_v24  ;;  %v1442_v24 = vld [vmem:[%s11641_s29 + $0xf8] sm:$0xff] }
 0x2b2   : > { %5067 = vmatpush2.bf16.msra.mxu1 %v9800_v22  ;;  %v1438_v22 = vld [vmem:[%s11641_s29 + $0xd8] sm:$0xff] }
 0x2b3   : > { %5068 = vmatprep.subr.bf16.mxu1 %v9793_v25  ;;  %v1566_v25 = vld [vmem:[%s11641_s29 + $0x4d8] sm:$0xff]  ;;  %v9371_v30 = vcombine.high %v1438_v22, %v1442_v24 }
 0x2b4   : > { %5026 = vmatpush2.bf16.msra.mxu0 %v9664_v32  ;;  %v1430_v32 = vld [vmem:[%s11641_s29 + $0x98] sm:$0xff] }
 0x2b5   : > { %5081 = vmatprep.subr.bf16.mxu0 %v9403_v36  ;;  %v1562_v36 = vld [vmem:[%s11641_s29 + $0x4b8] sm:$0xff]  ;;  %v9363_v39 = vcombine.high %v1430_v32, %v1434_v33 }
 0x2b6   : > { %5069 = vmatpush2.bf16.msra.mxu1 %v9792_v35  ;;  %v1558_v35 = vld [vmem:[%s11641_s29 + $0x498] sm:$0xff] }
 0x2b7   : > { %5124 = vmatprep.subr.bf16.mxu1 %v9531_v37  ;;  %v4771_v56 = vpop.f32.mrf.mxu0  ;;  %5028 = vmatmul.mubr.bf16.vlgmr.msra.gmra.mxu0 %v11853_v63  ;;  %v9370_v37 = vcombine.low %v1438_v22, %v1442_v24  ;;  %v9491_v47 = vcombine.high %v1558_v35, %v1562_v36 }
 0x2b8   : > { %v4772_v34 = vadd.f32 %v4771_v56, %v1936_v46  ;;  %5082 = vmatpush1.bf16.msra.mxu0 %v9402_v49  ;;  %5113 = vmatprep.mubr.bf16.mxu0 %v11689_v13  ;;  %v9507_v13 = vcombine.high %v1574_v10, %v1578_v11  ;;  %v1550_v49 = vld [vmem:[%s11641_s29 + $0x458] sm:$0xff] }
 0x2b9   : > { %v4814_v60 = vpop.f32.mrf.mxu1  ;;  %5071 = vmatmul.mubr.bf16.vlgmr.msra.gmra.mxu1 %v11859_v2  ;;  %v12186_v3 = vpop.f32.mrf.mxu0  ;;  %5083 = vmatprep.subr.bf16.mxu0 %v9395_v50  ;;  %v9362_v50 = vcombine.low %v1430_v32, %v1434_v33  ;;  %v1414_v56 = vld [vmem:[%s11641_s29 + $0x18] sm:$0xff] }
 0x2ba   : > { %5125 = vmatpush1.bf16.msra.mxu1 %v9530_v14  ;;  %v12188_v6 = vadd.f32 %v4814_v60, %v4772_v34  ;;  %5156 = vmatprep.mubr.bf16.mxu1 %v11705_v18  ;;  %v1570_v18 = vld [vmem:[%s11641_s29 + $0x4f8] sm:$0xff]  ;;  %v9346_v10 = vcombine.low %v1414_v56, %v1418_v57 }
 0x2bb   : > { %v12190_v45 = vpop.f32.mrf.mxu1  ;;  %5126 = vmatprep.subr.bf16.mxu1 %v9523_v53  ;;  %v4775_v8 = vpop.f32.mrf.mxu0  ;;  %v9499_v31 = vcombine.high %v1566_v25, %v1570_v18  ;;  %v9498_v38 = vcombine.low %v1566_v25, %v1570_v18  ;;  %v1554_v14 = vld [vmem:[%s11641_s29 + $0x478] sm:$0xff]  ;;  %v9490_v53 = vcombine.low %v1558_v35, %v1562_v36 }
 0x2bc   : > { %v4776_v12 = vadd.f32 %v4775_v8, %v1936_v46  ;;  %5084 = vmatpush1.bf16.msra.mxu0 %v9394_v0  ;;  %v1426_v46 = vld [vmem:[%s11641_s29 + $0x78] sm:$0xff]  ;;  %v9483_v55 = vcombine.high %v1550_v49, %v1554_v14  ;;  %v9482_v0 = vcombine.low %v1550_v49, %v1554_v14 }
 0x2bd   : > { %v4818_v17 = vpop.f32.mrf.mxu1  ;;  %5085 = vmatprep.subr.bf16.mxu0 %v9387_v5  ;;  %v9355_v54 = vcombine.high %v1422_v9, %v1426_v46  ;;  %v1546_v34 = vld [vmem:[%s11641_s29 + $0x438] sm:$0xff]  ;;  %v9354_v60 = vcombine.low %v1422_v9, %v1426_v46 }
 0x2be   : > { %5127 = vmatpush1.bf16.msra.mxu1 %v9522_v4  ;;  %v12198_v21 = vadd.f32 %v4818_v17, %v4776_v12  ;;  %v9347_v4 = vcombine.high %v1414_v56, %v1418_v57  ;;  %v9475_v5 = vcombine.high %v1542_v59, %v1546_v34  ;;  %v1666_v8 = vld [vmem:[%s11641_s29 + $0x7f8] sm:$0xff]  ;;  %v9474_v11 = vcombine.low %v1542_v59, %v1546_v34 }
 0x2bf   : > { %5128 = vmatprep.subr.bf16.mxu1 %v9515_v7  ;;  %v1534_v7 = vld [vmem:[%s11641_s29 + $0x3d8] sm:$0xff]  ;;  %v9594_v24 = vcombine.low %v1662_v43, %v1666_v8 }
 0x2c0   : > { %5086 = vmatpush1.bf16.msra.mxu0 %v9386_v16  ;;  %v9467_v12 = vcombine.high %v1534_v7, %v1538_v42  ;;  %v9595_v16 = vcombine.high %v1662_v43, %v1666_v8  ;;  %v1526_v17 = vld [vmem:[%s11641_s29 + $0x398] sm:$0xff]  ;;  %v9466_v22 = vcombine.low %v1534_v7, %v1538_v42 }
 0x2c1   : > { %5087 = vmatprep.subr.bf16.mxu0 %v9379_v20  ;;  %v1654_v20 = vld [vmem:[%s11641_s29 + $0x798] sm:$0xff] }
 0x2c2   : > { %5129 = vmatpush1.bf16.msra.mxu1 %v9514_v19  ;;  %v1530_v19 = vld [vmem:[%s11641_s29 + $0x3b8] sm:$0xff] }
 0x2c3   : > { %5130 = vmatprep.subr.bf16.mxu1 %v9507_v13  ;;  %v1658_v13 = vld [vmem:[%s11641_s29 + $0x7b8] sm:$0xff]  ;;  %v9459_v25 = vcombine.high %v1526_v17, %v1530_v19  ;;  %v9458_v32 = vcombine.low %v1526_v17, %v1530_v19 }
 0x2c4   : > { %5088 = vmatpush1.bf16.msra.mxu0 %v9378_v27  ;;  %v9587_v18 = vcombine.high %v1654_v20, %v1658_v13  ;;  %v1518_v27 = vld [vmem:[%s11641_s29 + $0x358] sm:$0xff]  ;;  %v9586_v33 = vcombine.low %v1654_v20, %v1658_v13 }
 0x2c5   : > { %5089 = vmatprep.subr.bf16.mxu0 %v9371_v30  ;;  %v1646_v30 = vld [vmem:[%s11641_s29 + $0x758] sm:$0xff] }
 0x2c6   : > { %5131 = vmatpush1.bf16.msra.mxu1 %v9506_v28  ;;  %v1522_v28 = vld [vmem:[%s11641_s29 + $0x378] sm:$0xff] }
 0x2c7   : > { %5132 = vmatprep.subr.bf16.mxu1 %v9499_v31  ;;  %v1650_v31 = vld [vmem:[%s11641_s29 + $0x778] sm:$0xff]  ;;  %v9451_v35 = vcombine.high %v1518_v27, %v1522_v28  ;;  %v9450_v9 = vcombine.low %v1518_v27, %v1522_v28 }
 0x2c8   : > { %5090 = vmatpush1.bf16.msra.mxu0 %v9370_v37  ;;  %v9579_v36 = vcombine.high %v1646_v30, %v1650_v31  ;;  %v1510_v37 = vld [vmem:[%s11641_s29 + $0x318] sm:$0xff]  ;;  %v9578_v46 = vcombine.low %v1646_v30, %v1650_v31 }
 0x2c9   : > { %5091 = vmatprep.subr.bf16.mxu0 %v9363_v39  ;;  %v1638_v39 = vld [vmem:[%s11641_s29 + $0x718] sm:$0xff] }
 0x2ca   : > { %5133 = vmatpush1.bf16.msra.mxu1 %v9498_v38  ;;  %v1514_v38 = vld [vmem:[%s11641_s29 + $0x338] sm:$0xff] }
 0x2cb   : > { %5134 = vmatprep.subr.bf16.mxu1 %v9491_v47  ;;  %v1642_v47 = vld [vmem:[%s11641_s29 + $0x738] sm:$0xff]  ;;  %v9443_v49 = vcombine.high %v1510_v37, %v1514_v38  ;;  %v9442_v56 = vcombine.low %v1510_v37, %v1514_v38 }
 0x2cc   : > { %5092 = vmatpush1.bf16.msra.mxu0 %v9362_v50  ;;  %v9571_v14 = vcombine.high %v1638_v39, %v1642_v47  ;;  %v1502_v50 = vld [vmem:[%s11641_s29 + $0x2d8] sm:$0xff]  ;;  %v9570_v57 = vcombine.low %v1638_v39, %v1642_v47 }
 0x2cd   : > { %5093 = vmatprep.subr.bf16.mxu0 %v9355_v54  ;;  %v1630_v54 = vld [vmem:[%s11641_s29 + $0x6d8] sm:$0xff] }
 0x2ce   : > { %5135 = vmatpush1.bf16.msra.mxu1 %v9490_v53  ;;  %v1506_v53 = vld [vmem:[%s11641_s29 + $0x2f8] sm:$0xff] }
 0x2cf   : > { %5136 = vmatprep.subr.bf16.mxu1 %v9483_v55  ;;  %v1634_v55 = vld [vmem:[%s11641_s29 + $0x6f8] sm:$0xff]  ;;  %v9435_v59 = vcombine.high %v1502_v50, %v1506_v53  ;;  %v9434_v7 = vcombine.low %v1502_v50, %v1506_v53  ;;  %v4777_v53 = vpop.f32.mrf.mxu0 }
 0x2d0   : > { %5094 = vmatpush1.bf16.msra.mxu0 %v9354_v60  ;;  %v9563_v34 = vcombine.high %v1630_v54, %v1634_v55  ;;  %v1494_v60 = vld [vmem:[%s11641_s29 + $0x298] sm:$0xff]  ;;  %v9562_v42 = vcombine.low %v1630_v54, %v1634_v55 }
 0x2d1   : > { %5095 = vmatprep.subr.bf16.mxu0 %v9347_v4  ;;  %v1622_v4 = vld [vmem:[%s11641_s29 + $0x698] sm:$0xff] }
 0x2d2   : > { %5137 = vmatpush1.bf16.msra.mxu1 %v9482_v0  ;;  %v1498_v0 = vld [vmem:[%s11641_s29 + $0x2b8] sm:$0xff] }
 0x2d3   : > { %5138 = vmatprep.subr.bf16.mxu1 %v9475_v5  ;;  %v1626_v5 = vld [vmem:[%s11641_s29 + $0x6b8] sm:$0xff]  ;;  %v9427_v43 = vcombine.high %v1494_v60, %v1498_v0  ;;  %v9426_v17 = vcombine.low %v1494_v60, %v1498_v0  ;;  %v1931_v60 = vsub.s32 1, %v11989_v23 }
 0x2d4   : > { %5096 = vmatpush1.bf16.msra.mxu0 %v9346_v10  ;;  %v9555_v8 = vcombine.high %v1622_v4, %v1626_v5  ;;  %v1486_v10 = vld [vmem:[%s11641_s29 + $0x258] sm:$0xff]  ;;  %v9554_v19 = vcombine.low %v1622_v4, %v1626_v5 }
 0x2d5   : > { %5097 = vmatprep.subr.bf16.mxu0 %v9467_v12  ;;  %v1614_v12 = vld [vmem:[%s11641_s29 + $0x658] sm:$0xff] }
 0x2d6   : > { %5139 = vmatpush1.bf16.msra.mxu1 %v9474_v11  ;;  %v1490_v11 = vld [vmem:[%s11641_s29 + $0x278] sm:$0xff] }
 0x2d7   : > { %5140 = vmatprep.subr.bf16.mxu1 %v9595_v16  ;;  %v1618_v16 = vld [vmem:[%s11641_s29 + $0x678] sm:$0xff]  ;;  %v9419_v20 = vcombine.high %v1486_v10, %v1490_v11  ;;  %v9418_v27 = vcombine.low %v1486_v10, %v1490_v11 }
 0x2d8   : > { %5098 = vmatpush2.bf16.msra.mxu0 %v9466_v22  ;;  %v9547_v13 = vcombine.high %v1614_v12, %v1618_v16  ;;  %v1478_v22 = vld [vmem:[%s11641_s29 + $0x218] sm:$0xff]  ;;  %v9546_v28 = vcombine.low %v1614_v12, %v1618_v16 }
 0x2d9   : > { %5099 = vmatprep.subr.bf16.mxu0 %v9459_v25  ;;  %v1606_v25 = vld [vmem:[%s11641_s29 + $0x618] sm:$0xff] }
 0x2da   : > { %5141 = vmatpush2.bf16.msra.mxu1 %v9594_v24  ;;  %v1482_v24 = vld [vmem:[%s11641_s29 + $0x238] sm:$0xff] }
 0x2db   : > { %5142 = vmatprep.subr.bf16.mxu1 %v9587_v18  ;;  %v1610_v18 = vld [vmem:[%s11641_s29 + $0x638] sm:$0xff]  ;;  %v9411_v30 = vcombine.high %v1478_v22, %v1482_v24  ;;  %v9410_v37 = vcombine.low %v1478_v22, %v1482_v24 }
 0x2dc   : > { %5100 = vmatpush2.bf16.msra.mxu0 %v9458_v32  ;;  %v9539_v31 = vcombine.high %v1606_v25, %v1610_v18  ;;  %v1726_v32 = vld [vmem:[%s11641_s29 + $0x9d8] sm:$0xff]  ;;  %v9538_v38 = vcombine.low %v1606_v25, %v1610_v18 }
 0x2dd   : > { %5101 = vmatprep.subr.bf16.mxu0 %v9451_v35  ;;  %v1854_v35 = vld [vmem:[%s11641_s29 + $0xdd8] sm:$0xff] }
 0x2de   : > { %5143 = vmatpush2.bf16.msra.mxu1 %v9586_v33  ;;  %v1730_v33 = vld [vmem:[%s11641_s29 + $0x9f8] sm:$0xff] }
 0x2df   : > { %5144 = vmatprep.subr.bf16.mxu1 %v9579_v36  ;;  %v1858_v36 = vld [vmem:[%s11641_s29 + $0xdf8] sm:$0xff]  ;;  %v9659_v39 = vcombine.high %v1726_v32, %v1730_v33  ;;  %v9658_v50 = vcombine.low %v1726_v32, %v1730_v33 }
 0x2e0   : > { %5102 = vmatpush2.bf16.msra.mxu0 %v9450_v9  ;;  %v9787_v47 = vcombine.high %v1854_v35, %v1858_v36  ;;  %v1718_v9 = vld [vmem:[%s11641_s29 + $0x998] sm:$0xff]  ;;  %v9786_v54 = vcombine.low %v1854_v35, %v1858_v36 }
 0x2e1   : > { %5103 = vmatprep.subr.bf16.mxu0 %v9443_v49  ;;  %v1846_v49 = vld [vmem:[%s11641_s29 + $0xd98] sm:$0xff] }
 0x2e2   : > { %5145 = vmatpush2.bf16.msra.mxu1 %v9578_v46  ;;  %v1722_v46 = vld [vmem:[%s11641_s29 + $0x9b8] sm:$0xff] }
 0x2e3   : > { %5146 = vmatprep.subr.bf16.mxu1 %v9571_v14  ;;  %v1850_v14 = vld [vmem:[%s11641_s29 + $0xdb8] sm:$0xff]  ;;  %v9651_v55 = vcombine.high %v1718_v9, %v1722_v46 }
 0x2e4   : > { %5104 = vmatpush2.bf16.msra.mxu0 %v9442_v56  ;;  %v12256_v56 = vpop.f32.mrf.mxu1  ;;  %v1838_v4 = vld [vmem:[%s11641_s29 + $0xd58] sm:$0xff] }
 0x2e5   : > { %5105 = vmatprep.subr.bf16.mxu0 %v9435_v59  ;;  %v1710_v59 = vld [vmem:[%s11641_s29 + $0x958] sm:$0xff] }
 0x2e6   : > { %5147 = vmatpush2.bf16.msra.mxu1 %v9570_v57  ;;  %v9779_v57 = vcombine.high %v1846_v49, %v1850_v14  ;;  %v1842_v5 = vld [vmem:[%s11641_s29 + $0xd78] sm:$0xff] }
 0x2e7   : > { %5148 = vmatprep.subr.bf16.mxu1 %v9563_v34  ;;  %v1714_v34 = vld [vmem:[%s11641_s29 + $0x978] sm:$0xff] }
 0x2e8   : > { %5106 = vmatpush2.bf16.msra.mxu0 %v9434_v7  ;;  %v1939_v7 = vsub.s32 3, %v11989_v23  ;;  %v9643_v11 = vcombine.high %v1710_v59, %v1714_v34  ;;  %v1830_v22 = vld [vmem:[%s11641_s29 + $0xd18] sm:$0xff] }
 0x2e9   : > { %5107 = vmatprep.subr.bf16.mxu0 %v9427_v43  ;;  %v1834_v24 = vld [vmem:[%s11641_s29 + $0xd38] sm:$0xff] }
 0x2ea   : > { %5149 = vmatpush2.bf16.msra.mxu1 %v9562_v42  ;;  %v9763_v36 = vcombine.high %v1830_v22, %v1834_v24 }
 0x2eb   : > { %5150 = vmatprep.subr.bf16.mxu1 %v9555_v8  ;;  %v9650_v8 = vcombine.low %v1718_v9, %v1722_v46 }
 0x2ec   : > { %5108 = vmatpush2.bf16.msra.mxu0 %v9426_v17  ;;  %v1702_v17 = vld [vmem:[%s11641_s29 + $0x918] sm:$0xff] }
 0x2ed   : > { %5109 = vmatprep.subr.bf16.mxu0 %v9419_v20 }
 0x2ee   : > { %5151 = vmatpush2.bf16.msra.mxu1 %v9554_v19  ;;  %v1706_v19 = vld [vmem:[%s11641_s29 + $0x938] sm:$0xff] }
 0x2ef   : > { %5152 = vmatprep.subr.bf16.mxu1 %v9547_v13  ;;  %v9635_v32 = vcombine.high %v1702_v17, %v1706_v19 }
 0x2f0   : > { %5110 = vmatpush2.bf16.msra.mxu0 %v9418_v27 }
 0x2f1   : > { %5111 = vmatprep.subr.bf16.mxu0 %v9411_v30 }
 0x2f2   : > { %5153 = vmatpush2.bf16.msra.mxu1 %v9546_v28 }
 0x2f3   : > { %5154 = vmatprep.subr.bf16.mxu1 %v9539_v31  ;;  %v9770_v31 = vcombine.low %v1838_v4, %v1842_v5 }
 0x2f4   : > { %5112 = vmatpush2.bf16.msra.mxu0 %v9410_v37  ;;  %v1694_v37 = vld [vmem:[%s11641_s29 + $0x8d8] sm:$0xff] }
 0x2f5   : > { %5167 = vmatprep.subr.bf16.mxu0 %v9659_v39  ;;  %v1822_v39 = vld [vmem:[%s11641_s29 + $0xcd8] sm:$0xff] }
 0x2f6   : > { %5155 = vmatpush2.bf16.msra.mxu1 %v9538_v38 }
 0x2f7   : > { %5210 = vmatprep.subr.bf16.mxu1 %v9787_v47  ;;  %v4857_v0 = vpop.f32.mrf.mxu0  ;;  %5114 = vmatmul.mubr.bf16.vlgmr.msra.gmra.mxu0 %v11750_v40  ;;  %v9778_v40 = vcombine.low %v1846_v49, %v1850_v14  ;;  %v1826_v47 = vld [vmem:[%s11641_s29 + $0xcf8] sm:$0xff]  ;;  %v9634_v49 = vcombine.low %v1702_v17, %v1706_v19 }
 0x2f8   : > { %v4858_v42 = vadd.f32 %v4857_v0, %v12188_v6  ;;  %5168 = vmatpush1.bf16.msra.mxu0 %v9658_v50  ;;  %v9771_v6 = vcombine.high %v1838_v4, %v1842_v5  ;;  %5199 = vmatprep.mubr.bf16.mxu0 %v11781_v15  ;;  %v9642_v15 = vcombine.low %v1710_v59, %v1714_v34  ;;  %v1686_v59 = vld [vmem:[%s11641_s29 + $0x898] sm:$0xff] }
 0x2f9   : > { %v4900_v43 = vpop.f32.mrf.mxu1  ;;  %5157 = vmatmul.mubr.bf16.vlgmr.msra.gmra.mxu1 %v11765_v44  ;;  %v12267_v10 = vpop.f32.mrf.mxu0  ;;  %5169 = vmatprep.subr.bf16.mxu0 %v9651_v55  ;;  %v12277_v44 = vld [vmem:[%s11634_s16] sm:$0xff]  ;;  %v1690_v34 = vld [vmem:[%s11641_s29 + $0x8b8] sm:$0xff] }
 0x2fa   : > { %5211 = vmatpush1.bf16.msra.mxu1 %v9786_v54  ;;  %v12269_v12 = vadd.f32 %v4900_v43, %v4858_v42  ;;  %v1932_v20 = vrot.slane %v12277_v44, %v1931_v60  ;;  %5242 = vmatprep.mubr.bf16.mxu1 %v11788_v52  ;;  %v1940_v25 = vrot.slane %v12277_v44, %v1939_v7  ;;  %v1814_v4 = vld [vmem:[%s11641_s29 + $0xc98] sm:$0xff] }
 0x2fb   : > { %v12271_v16 = vpop.f32.mrf.mxu1  ;;  %5212 = vmatprep.subr.bf16.mxu1 %v9779_v57  ;;  %v4861_v13 = vpop.f32.mrf.mxu0  ;;  %v9755_v57 = vcombine.high %v1822_v39, %v1826_v47  ;;  %v1818_v5 = vld [vmem:[%s11641_s29 + $0xcb8] sm:$0xff] }
 0x2fc   : > { %v5271_v18 = vmul.f32 0.044715, %v12269_v12  ;;  %v4862_v27 = vadd.f32 %v4861_v13, %v12198_v21  ;;  %5170 = vmatpush1.bf16.msra.mxu0 %v9650_v8  ;;  %v4606_v28 = vadd.f32 %v12080_v26, %v1932_v20  ;;  %v4778_v52 = vadd.f32 %v4777_v53, %v1940_v25  ;;  %v1698_v21 = vld [vmem:[%s11641_s29 + $0x8f8] sm:$0xff] }
 0x2fd   : > { %v4904_v30 = vpop.f32.mrf.mxu1  ;;  %5171 = vmatprep.subr.bf16.mxu0 %v9643_v11  ;;  %v4602_v38 = vadd.f32 %v12010_v58, %v1932_v20  ;;  %v4774_v26 = vadd.f32 %v12186_v3, %v1940_v25  ;;  %v4863_v50 = vpop.f32.mrf.mxu0  ;;  %v9762_v58 = vcombine.low %v1830_v22, %v1834_v24  ;;  %v9627_v53 = vcombine.high %v1694_v37, %v1698_v21  ;;  %v1682_v17 = vld [vmem:[%s11641_s29 + $0x878] sm:$0xff] }
 0x2fe   : > { %5213 = vmatpush1.bf16.msra.mxu1 %v9778_v40  ;;  %v5287_v33 = vmul.f32 %v5271_v18, %v12269_v12  ;;  %v12288_v35 = vadd.f32 %v4904_v30, %v4862_v27  ;;  %v4649_v14 = vadd.f32 %v12082_v29, %v4606_v28  ;;  %v4821_v54 = vadd.f32 %v12256_v56, %v4778_v52  ;;  %v1806_v13 = vld [vmem:[%s11641_s29 + $0xc58] sm:$0xff] }
 0x2ff   : > { %5214 = vmatprep.subr.bf16.mxu1 %v9771_v6  ;;  %v4645_v60 = vadd.f32 %v12014_v62, %v4602_v38  ;;  %v9626_v0 = vcombine.low %v1694_v37, %v1698_v21  ;;  %v4817_v7 = vadd.f32 %v12190_v45, %v4774_v26  ;;  %v9754_v62 = vcombine.low %v1822_v39, %v1826_v47  ;;  %v1678_v6 = vld [vmem:[%s11641_s29 + $0x858] sm:$0xff]  ;;  %v4906_v20 = vpop.f32.mrf.mxu1 }
 0x300   : > { %v5303_v9 = vmul.f32 %v5287_v33, %v12269_v12  ;;  %v5279_v46 = vmul.f32 0.044715, %v12288_v35  ;;  %5172 = vmatpush1.bf16.msra.mxu0 %v9642_v15  ;;  %v4692_v29 = vadd.f32 %v12176_v61, %v4649_v14  ;;  %v4864_v43 = vadd.f32 %v4863_v50, %v4821_v54  ;;  %v1670_v28 = vld [vmem:[%s11641_s29 + $0x818] sm:$0xff] }
 0x301   : > { %5173 = vmatprep.subr.bf16.mxu0 %v9635_v32  ;;  %v4688_v8 = vadd.f32 %v12091_v41, %v4645_v60  ;;  %v9619_v61 = vcombine.high %v1686_v59, %v1690_v34  ;;  %v4860_v40 = vadd.f32 %v12267_v10, %v4817_v7  ;;  %v9747_v45 = vcombine.high %v1814_v4, %v1818_v5  ;;  %v1810_v41 = vld [vmem:[%s11641_s29 + $0xc78] sm:$0xff] }
 0x302   : > { %5215 = vmatpush1.bf16.msra.mxu1 %v9770_v31  ;;  %v5319_v3 = vadd.f32 %v5303_v9, %v12269_v12  ;;  %v5295_v55 = vmul.f32 %v5279_v46, %v12288_v35  ;;  %v12316_v19 = vadd.f32 %v12178_v51, %v4692_v29  ;;  %v12320_v24 = vadd.f32 %v4906_v20, %v4864_v43  ;;  %v1674_v30 = vld [vmem:[%s11641_s29 + $0x838] sm:$0xff] }
 0x303   : > { %5216 = vmatprep.subr.bf16.mxu1 %v9763_v36  ;;  %v9618_v10 = vcombine.low %v1686_v59, %v1690_v34  ;;  %v12323_v25 = vadd.f32 %v12095_v48, %v4688_v8  ;;  %v9746_v18 = vcombine.low %v1814_v4, %v1818_v5  ;;  %v9611_v51 = vcombine.high %v1678_v6, %v1682_v17  ;;  %v1798_v32 = vld [vmem:[%s11641_s29 + $0xc18] sm:$0xff] }
 0x304   : > { %v5335_v56 = vmul.f32 0.7978846, %v5319_v3  ;;  %v5311_v42 = vmul.f32 %v5295_v55, %v12288_v35  ;;  %5174 = vmatpush1.bf16.msra.mxu0 %v9634_v49  ;;  %v12326_v27 = vadd.f32 %v12271_v16, %v4860_v40  ;;  %v9739_v15 = vcombine.high %v1806_v13, %v1810_v41  ;;  %v1802_v48 = vld [vmem:[%s11641_s29 + $0xc38] sm:$0xff] }
 0x305   : > { %5175 = vmatprep.subr.bf16.mxu0 %v9627_v53  ;;  %v5278_v31 = vmul.f32 0.044715, %v12316_v19  ;;  %v5280_v52 = vmul.f32 0.044715, %v12320_v24  ;;  %v9610_v33 = vcombine.low %v1678_v6, %v1682_v17  ;;  %v5270_v16 = vmul.f32 0.044715, %v12323_v25 }
 0x306   : > { %5217 = vmatpush1.bf16.msra.mxu1 %v9762_v58  ;;  %10423 = vtanh.f32 %v5335_v56  ;;  %v5327_v11 = vadd.f32 %v5311_v42, %v12288_v35  ;;  %v9738_v36 = vcombine.low %v1806_v13, %v1810_v41  ;;  %v9603_v37 = vcombine.high %v1670_v28, %v1674_v30  ;;  %v1790_v39 = vld [vmem:[%s11641_s29 + $0xbd8] sm:$0xff] }
 0x307   : > { %5218 = vmatprep.subr.bf16.mxu1 %v9755_v57  ;;  %v5272_v21 = vmul.f32 0.044715, %v12326_v27  ;;  %v9731_v38 = vcombine.high %v1798_v32, %v1802_v48  ;;  %v1794_v47 = vld [vmem:[%s11641_s29 + $0xbf8] sm:$0xff]  ;;  %v5294_v26 = vmul.f32 %v5278_v31, %v12316_v19  ;;  %v5296_v49 = vmul.f32 %v5280_v52, %v12320_v24 }
 0x308   : > { %v5343_v22 = vmul.f32 0.7978846, %v5327_v11  ;;  %5176 = vmatpush1.bf16.msra.mxu0 %v9626_v0  ;;  %v1918_v9 = vld [vmem:[%s11641_s29 + $0xfd8] sm:$0xff]  ;;  %v9602_v14 = vcombine.low %v1670_v28, %v1674_v30  ;;  %v5286_v50 = vmul.f32 %v5270_v16, %v12323_v25  ;;  %v9730_v58 = vcombine.low %v1798_v32, %v1802_v48 }
 0x309   : > { %5177 = vmatprep.subr.bf16.mxu0 %v9619_v61  ;;  %v1922_v46 = vld [vmem:[%s11641_s29 + $0xff8] sm:$0xff]  ;;  %v9723_v53 = vcombine.high %v1790_v39, %v1794_v47  ;;  %v5288_v54 = vmul.f32 %v5272_v21, %v12326_v27  ;;  %v5310_v34 = vmul.f32 %v5294_v26, %v12316_v19  ;;  %v5312_v0 = vmul.f32 %v5296_v49, %v12320_v24 }
 0x30a   : > { %5219 = vmatpush1.bf16.msra.mxu1 %v9754_v62  ;;  %10425 = vtanh.f32 %v5343_v22  ;;  %v9851_v3 = vcombine.high %v1918_v9, %v1922_v46  ;;  %v1782_v55 = vld [vmem:[%s11641_s29 + $0xb98] sm:$0xff]  ;;  %v9722_v4 = vcombine.low %v1790_v39, %v1794_v47  ;;  %v5302_v5 = vmul.f32 %v5286_v50, %v12323_v25 }
 0x30b   : > { %5220 = vmatprep.subr.bf16.mxu1 %v9747_v45  ;;  %v1786_v57 = vld [vmem:[%s11641_s29 + $0xbb8] sm:$0xff]  ;;  %v9850_v7 = vcombine.low %v1918_v9, %v1922_v46  ;;  %v5304_v42 = vmul.f32 %v5288_v54, %v12326_v27  ;;  %v5326_v11 = vadd.f32 %v5310_v34, %v12316_v19  ;;  %v5328_v20 = vadd.f32 %v5312_v0, %v12320_v24 }
 0x30c   : > { %5178 = vmatpush1.bf16.msra.mxu0 %v9618_v10  ;;  %v1910_v60 = vld [vmem:[%s11641_s29 + $0xf98] sm:$0xff]  ;;  %v9715_v56 = vcombine.high %v1782_v55, %v1786_v57  ;;  %v9714_v45 = vcombine.low %v1782_v55, %v1786_v57  ;;  %v5255_v13 = vmul.f32 0.5, %v12269_v12  ;;  %v5263_v41 = vmul.f32 0.5, %v12288_v35 }
 0x30d   : > { %5179 = vmatprep.subr.bf16.mxu0 %v9611_v51  ;;  %v1914_v29 = vld [vmem:[%s11641_s29 + $0xfb8] sm:$0xff]  ;;  %v5318_v10 = vadd.f32 %v5302_v5, %v12323_v25  ;;  %v5342_v12 = vmul.f32 0.7978846, %v5326_v11 }
 0x30e   : > { %5221 = vmatpush1.bf16.msra.mxu1 %v9746_v18  ;;  %v9843_v43 = vcombine.high %v1910_v60, %v1914_v29  ;;  %v1774_v8 = vld [vmem:[%s11641_s29 + $0xb58] sm:$0xff]  ;;  %v9842_v18 = vcombine.low %v1910_v60, %v1914_v29 }
 0x30f   : > { %5222 = vmatprep.subr.bf16.mxu1 %v9739_v15  ;;  %v1778_v62 = vld [vmem:[%s11641_s29 + $0xb78] sm:$0xff]  ;;  %v5320_v15 = vadd.f32 %v5304_v42, %v12326_v27  ;;  %10427 = vtanh.f32 %v5342_v12 }
 0x310   : > { %5180 = vmatpush1.bf16.msra.mxu0 %v9610_v33  ;;  %v1902_v6 = vld [vmem:[%s11641_s29 + $0xf58] sm:$0xff]  ;;  %v9707_v51 = vcombine.high %v1774_v8, %v1778_v62  ;;  %v5344_v33 = vmul.f32 0.7978846, %v5328_v20  ;;  %v9706_v16 = vcombine.low %v1774_v8, %v1778_v62 }
 0x311   : > { %5181 = vmatprep.subr.bf16.mxu0 %v9603_v37  ;;  %v1906_v17 = vld [vmem:[%s11641_s29 + $0xf78] sm:$0xff]  ;;  %v5334_v37 = vmul.f32 0.7978846, %v5318_v10  ;;  %v5336_v39 = vmul.f32 0.7978846, %v5320_v15  ;;  %v5477_v10 = vld [vmem:[%s11639_s28 + $0x1c0] sm:$0xff] }
 0x312   : > { %5223 = vmatpush1.bf16.msra.mxu1 %v9738_v36  ;;  %v9835_v28 = vcombine.high %v1902_v6, %v1906_v17  ;;  %v1766_v30 = vld [vmem:[%s11641_s29 + $0xb18] sm:$0xff]  ;;  %v9834_v21 = vcombine.low %v1902_v6, %v1906_v17  ;;  %10429 = vtanh.f32 %v5344_v33  ;;  %v5605_v15 = vld [vmem:[%s11639_s28 + $0x5c0] sm:$0xff] }
 0x313   : > { %5224 = vmatprep.subr.bf16.mxu1 %v9731_v38  ;;  %v10424_v59 = vpop.eup %10423  ;;  %v1770_v31 = vld [vmem:[%s11641_s29 + $0xb38] sm:$0xff]  ;;  %10431 = vtanh.f32 %v5334_v37 }
 0x314   : > { %5182 = vmatpush1.bf16.msra.mxu0 %v9602_v14  ;;  %v5367_v61 = vadd.f32 1.0, %v10424_v59  ;;  %v1894_v35 = vld [vmem:[%s11641_s29 + $0xf18] sm:$0xff]  ;;  %v9699_v38 = vcombine.high %v1766_v30, %v1770_v31  ;;  %v9698_v14 = vcombine.low %v1766_v30, %v1770_v31  ;;  %10433 = vtanh.f32 %v5336_v39  ;;  %v5469_v39 = vld [vmem:[%s11639_s28 + $0x180] sm:$0xff] }
 0x315   : > { %5183 = vmatprep.subr.bf16.mxu0 %v9723_v53  ;;  %v1898_v52 = vld [vmem:[%s11641_s29 + $0xf38] sm:$0xff] }
 0x316   : > { %5225 = vmatpush1.bf16.msra.mxu1 %v9730_v58  ;;  %v5383_v32 = vmul.f32 %v5367_v61, %v5255_v13  ;;  %v9827_v47 = vcombine.high %v1894_v35, %v1898_v52  ;;  %v1758_v26 = vld [vmem:[%s11641_s29 + $0xad8] sm:$0xff]  ;;  %v9826_v50 = vcombine.low %v1894_v35, %v1898_v52  ;;  %v5262_v35 = vmul.f32 0.5, %v12316_v19  ;;  %v5597_v19 = vld [vmem:[%s11639_s28 + $0x580] sm:$0xff] }
 0x317   : > { %5226 = vmatprep.subr.bf16.mxu1 %v9851_v3  ;;  %v10426_v40 = vpop.eup %10425  ;;  %v1762_v9 = vld [vmem:[%s11641_s29 + $0xaf8] sm:$0xff] }
 0x318   : > { %5184 = vmatpush2.bf16.msra.mxu0 %v9722_v4  ;;  %v5375_v22 = vadd.f32 1.0, %v10426_v40  ;;  %v1886_v46 = vld [vmem:[%s11641_s29 + $0xed8] sm:$0xff]  ;;  %v9691_v58 = vcombine.high %v1758_v26, %v1762_v9  ;;  %v9690_v59 = vcombine.low %v1758_v26, %v1762_v9  ;;  %v5256_v9 = vmul.f32 0.5, %v12326_v27 }
 0x319   : > { %5185 = vmatprep.subr.bf16.mxu0 %v9715_v56  ;;  %v1890_v49 = vld [vmem:[%s11641_s29 + $0xef8] sm:$0xff] }
 0x31a   : > { %5227 = vmatpush2.bf16.msra.mxu1 %v9850_v7  ;;  %v5391_v48 = vmul.f32 %v5375_v22, %v5263_v41  ;;  %v9819_v53 = vcombine.high %v1886_v46, %v1890_v49  ;;  %v1750_v54 = vld [vmem:[%s11641_s29 + $0xa98] sm:$0xff]  ;;  %v9818_v34 = vcombine.low %v1886_v46, %v1890_v49  ;;  %v5601_v49 = vld [vmem:[%s11639_s28 + $0x5a0] sm:$0xff] }
 0x31b   : > { %5228 = vmatprep.subr.bf16.mxu1 %v9843_v43  ;;  %v1754_v3 = vld [vmem:[%s11641_s29 + $0xab8] sm:$0xff]  ;;  %v10029_v27 = vcombine.high %v5597_v19, %v5601_v49 }
 0x31c   : > { %5186 = vmatpush2.bf16.msra.mxu0 %v9714_v45  ;;  %v12366_v36 = vpack.c.bf16 %v5391_v48, %v5383_v32  ;;  %v1878_v55 = vld [vmem:[%s11641_s29 + $0xe98] sm:$0xff]  ;;  %v9683_v60 = vcombine.high %v1750_v54, %v1754_v3  ;;  %v9682_v56 = vcombine.low %v1750_v54, %v1754_v3  ;;  %v10428_v45 = vpop.eup %10427  ;;  %v5589_v3 = vld [vmem:[%s11639_s28 + $0x540] sm:$0xff] }
 0x31d   : > { %5187 = vmatprep.subr.bf16.mxu0 %v9707_v51  ;;  %v1882_v57 = vld [vmem:[%s11641_s29 + $0xeb8] sm:$0xff]  ;;  %v5374_v30 = vadd.f32 1.0, %v10428_v45 }
 0x31e   : > { %5229 = vmatpush2.bf16.msra.mxu1 %v9842_v18  ;;  %v9811_v29 = vcombine.high %v1878_v55, %v1882_v57  ;;  %v1742_v0 = vld [vmem:[%s11641_s29 + $0xa58] sm:$0xff]  ;;  %v9810_v42 = vcombine.low %v1878_v55, %v1882_v57  ;;  %v5481_v18 = vld [vmem:[%s11639_s28 + $0x1e0] sm:$0xff] }
 0x31f   : > { %5230 = vmatprep.subr.bf16.mxu1 %v9835_v28  ;;  %v1746_v4 = vld [vmem:[%s11641_s29 + $0xa78] sm:$0xff]  ;;  %v10430_v17 = vpop.eup %10429  ;;  %v5609_v28 = vld [vmem:[%s11639_s28 + $0x5e0] sm:$0xff]  ;;  %v9909_v12 = vcombine.high %v5477_v10, %v5481_v18  ;;  %v9908_v26 = vcombine.low %v5477_v10, %v5481_v18 }
 0x320   : > { %5188 = vmatpush2.bf16.msra.mxu0 %v9706_v16  ;;  %v1870_v5 = vld [vmem:[%s11641_s29 + $0xe58] sm:$0xff]  ;;  %v9675_v43 = vcombine.high %v1742_v0, %v1746_v4  ;;  %v9674_v6 = vcombine.low %v1742_v0, %v1746_v4  ;;  %v10432_v41 = vpop.eup %10431  ;;  %v5376_v32 = vadd.f32 1.0, %v10430_v17  ;;  %v10037_v33 = vcombine.high %v5605_v15, %v5609_v28  ;;  %v5593_v55 = vld [vmem:[%s11639_s28 + $0x560] sm:$0xff] }
 0x321   : > { %5189 = vmatprep.subr.bf16.mxu0 %v9699_v38  ;;  %v1874_v7 = vld [vmem:[%s11641_s29 + $0xe78] sm:$0xff]  ;;  %v10434_v51 = vpop.eup %10433  ;;  %v5366_v52 = vadd.f32 1.0, %v10432_v41  ;;  %v5264_v16 = vmul.f32 0.5, %v12320_v24  ;;  %v5390_v38 = vmul.f32 %v5374_v30, %v5262_v35  ;;  %v10036_v24 = vcombine.low %v5605_v15, %v5609_v28  ;;  %v5457_v0 = vld [vmem:[%s11639_s28 + $0x120] sm:$0xff] }
 0x322   : > { %5231 = vmatpush2.bf16.msra.mxu1 %v9834_v21  ;;  %v9803_v8 = vcombine.high %v1870_v5, %v1874_v7  ;;  %v1734_v62 = vld [vmem:[%s11641_s29 + $0xa18] sm:$0xff]  ;;  %v9802_v20 = vcombine.low %v1870_v5, %v1874_v7  ;;  %v5368_v37 = vadd.f32 1.0, %v10434_v51  ;;  %v5254_v21 = vmul.f32 0.5, %v12323_v25  ;;  %v5585_v4 = vld [vmem:[%s11639_s28 + $0x520] sm:$0xff] }
 0x323   : > { %5232 = vmatprep.subr.bf16.mxu1 %v9827_v47  ;;  %v1738_v61 = vld [vmem:[%s11641_s29 + $0xa38] sm:$0xff]  ;;  %v5473_v47 = vld [vmem:[%s11639_s28 + $0x1a0] sm:$0xff]  ;;  %v5392_v46 = vmul.f32 %v5376_v32, %v5264_v16  ;;  %v10020_v7 = vcombine.low %v5589_v3, %v5593_v55 }
 0x324   : > { %5190 = vmatpush2.bf16.msra.mxu0 %v9698_v14  ;;  %v1862_v40 = vld [vmem:[%s11641_s29 + $0xe18] sm:$0xff]  ;;  %v9667_v13 = vcombine.high %v1734_v62, %v1738_v61  ;;  %v9666_v31 = vcombine.low %v1734_v62, %v1738_v61  ;;  %v5382_v14 = vmul.f32 %v5366_v52, %v5254_v21  ;;  %v5384_v25 = vmul.f32 %v5368_v37, %v5256_v9  ;;  %v5573_v62 = vld [vmem:[%s11639_s28 + $0x4c0] sm:$0xff] }
 0x325   : > { %5191 = vmatprep.subr.bf16.mxu0 %v9691_v58  ;;  %v1866_v11 = vld [vmem:[%s11641_s29 + $0xe38] sm:$0xff]  ;;  %v5461_v58 = vld [vmem:[%s11639_s28 + $0x140] sm:$0xff] }
 0x326   : > { %5233 = vmatpush2.bf16.msra.mxu1 %v9826_v50  ;;  %v9795_v22 = vcombine.high %v1862_v40, %v1866_v11  ;;  %v9794_v48 = vcombine.low %v1862_v40, %v1866_v11  ;;  %v9901_v50 = vcombine.high %v5469_v39, %v5473_v47  ;;  %v12399_v54 = vpack.c.bf16 %v5390_v38, %v5382_v14  ;;  %v5577_v61 = vld [vmem:[%s11639_s28 + $0x4e0] sm:$0xff] }
 0x327   : > { %5234 = vmatprep.subr.bf16.mxu1 %v9819_v53  ;;  %v5465_v53 = vld [vmem:[%s11639_s28 + $0x160] sm:$0xff]  ;;  %v12404_v57 = vpack.c.bf16 %v5392_v46, %v5384_v25  ;;  %v10004_v10 = vcombine.low %v5573_v62, %v5577_v61 }
 0x328   : > { %5192 = vmatpush2.bf16.msra.mxu0 %v9690_v59  ;;  %v9900_v59 = vcombine.low %v5469_v39, %v5473_v47  ;;  %v9892_v5 = vcombine.low %v5461_v58, %v5465_v53  ;;  %v5437_v17 = vld [vmem:[%s11639_s28 + $0x80] sm:$0xff] }
 0x329   : > { %5193 = vmatprep.subr.bf16.mxu0 %v9683_v60  ;;  %v10021_v60 = vcombine.high %v5589_v3, %v5593_v55  ;;  %v5569_v41 = vld [vmem:[%s11639_s28 + $0x4a0] sm:$0xff] }
 0x32a   : > { %5235 = vmatpush2.bf16.msra.mxu1 %v9818_v34  ;;  %v10028_v34 = vcombine.low %v5597_v19, %v5601_v49  ;;  %v5429_v15 = vld [vmem:[%s11639_s28 + $0x40] sm:$0xff] }
 0x32b   : > { %5236 = vmatprep.subr.bf16.mxu1 %v9811_v29  ;;  %v5453_v29 = vld [vmem:[%s11639_s28 + $0x100] sm:$0xff] }
 0x32c   : > { %5194 = vmatpush2.bf16.msra.mxu0 %v9682_v56  ;;  %v9885_v56 = vcombine.high %v5453_v29, %v5457_v0  ;;  %v9884_v40 = vcombine.low %v5453_v29, %v5457_v0  ;;  %v5433_v28 = vld [vmem:[%s11639_s28 + $0x60] sm:$0xff] }
 0x32d   : > { %5195 = vmatprep.subr.bf16.mxu0 %v9675_v43  ;;  %v5445_v43 = vld [vmem:[%s11639_s28 + $0xc0] sm:$0xff]  ;;  %v9860_v21 = vcombine.low %v5429_v15, %v5433_v28 }
 0x32e   : > { %5237 = vmatpush2.bf16.msra.mxu1 %v9810_v42  ;;  %v5557_v30 = vld [vmem:[%s11639_s28 + $0x440] sm:$0xff] }
 0x32f   : > { %5238 = vmatprep.subr.bf16.mxu1 %v9803_v8  ;;  %v5449_v8 = vld [vmem:[%s11639_s28 + $0xe0] sm:$0xff] }
 0x330   : > { %5196 = vmatpush2.bf16.msra.mxu0 %v9674_v6  ;;  %v9877_v45 = vcombine.high %v5445_v43, %v5449_v8  ;;  %v10005_v6 = vcombine.high %v5573_v62, %v5577_v61  ;;  %v5421_v52 = vld [vmem:[%s11639_s28] sm:$0xff] }
 0x331   : > { %5197 = vmatprep.subr.bf16.mxu0 %v9667_v13  ;;  %v5565_v13 = vld [vmem:[%s11639_s28 + $0x480] sm:$0xff] }
 0x332   : > { %5239 = vmatpush2.bf16.msra.mxu1 %v9802_v20  ;;  %v5441_v20 = vld [vmem:[%s11639_s28 + $0xa0] sm:$0xff]  ;;  %v9997_v51 = vcombine.high %v5565_v13, %v5569_v41 }
 0x333   : > { %5240 = vmatprep.subr.bf16.mxu1 %v9795_v22  ;;  %v9876_v22 = vcombine.low %v5445_v43, %v5449_v8  ;;  %v9869_v18 = vcombine.high %v5437_v17, %v5441_v20  ;;  %v9868_v32 = vcombine.low %v5437_v17, %v5441_v20  ;;  %v5549_v16 = vld [vmem:[%s11639_s28 + $0x400] sm:$0xff] }
 0x334   : > { %5198 = vmatpush2.bf16.msra.mxu0 %v9666_v31  ;;  %v5561_v31 = vld [vmem:[%s11639_s28 + $0x460] sm:$0xff] }
 0x335   : > { %8493 = vmatprep.subr.bf16.mxu0 %v9909_v12  ;;  %v9861_v12 = vcombine.high %v5429_v15, %v5433_v28  ;;  %v9989_v35 = vcombine.high %v5557_v30, %v5561_v31  ;;  %v5553_v37 = vld [vmem:[%s11639_s28 + $0x420] sm:$0xff]  ;;  %v9988_v38 = vcombine.low %v5557_v30, %v5561_v31 }
 0x336   : > { %5241 = vmatpush2.bf16.msra.mxu1 %v9794_v48  ;;  %v9996_v48 = vcombine.low %v5565_v13, %v5569_v41  ;;  %v9981_v47 = vcombine.high %v5549_v16, %v5553_v37  ;;  %v5545_v9 = vld [vmem:[%s11639_s28 + $0x3e0] sm:$0xff] }
 0x337   : > { %8536 = vmatprep.subr.bf16.mxu1 %v10037_v33  ;;  %5200 = vmatmul.mubr.bf16.vlgmr.msra.gmra.mxu0 %v11853_v63  ;;  %v9893_v63 = vcombine.high %v5461_v58, %v5465_v53  ;;  %v5425_v33 = vld [vmem:[%s11639_s28 + $0x20] sm:$0xff] }
 0x338   : > { %8494 = vmatpush1.bf16.msra.mxu0 %v9908_v26  ;;  %8525 = vmatprep.mubr.bf16.mxu0 %v12399_v54  ;;  %v9853_v39 = vcombine.high %v5421_v52, %v5425_v33  ;;  %v5541_v26 = vld [vmem:[%s11639_s28 + $0x3c0] sm:$0xff]  ;;  %v9852_v49 = vcombine.low %v5421_v52, %v5425_v33 }
 0x339   : > { %5243 = vmatmul.mubr.bf16.vlgmr.msra.gmra.mxu1 %v11859_v2  ;;  %8495 = vmatprep.subr.bf16.mxu0 %v9901_v50  ;;  %v5581_v2 = vld [vmem:[%s11639_s28 + $0x500] sm:$0xff]  ;;  %v9973_v14 = vcombine.high %v5541_v26, %v5545_v9  ;;  %v9972_v3 = vcombine.low %v5541_v26, %v5545_v9 }
 0x33a   : > { %8537 = vmatpush1.bf16.msra.mxu1 %v10036_v24  ;;  %8568 = vmatprep.mubr.bf16.mxu1 %v12404_v57  ;;  %v10013_v42 = vcombine.high %v5581_v2, %v5585_v4  ;;  %v10012_v11 = vcombine.low %v5581_v2, %v5585_v4  ;;  %v5669_v46 = vld [vmem:[%s11639_s28 + $0x7c0] sm:$0xff]  ;;  %v9980_v24 = vcombine.low %v5549_v16, %v5553_v37  ;;  %v12456_v37 = vpop.f32.mrf.mxu0 }
 0x33b   : > { %8538 = vmatprep.subr.bf16.mxu1 %v10029_v27  ;;  %v5673_v19 = vld [vmem:[%s11639_s28 + $0x7e0] sm:$0xff] }
 0x33c   : > { %8496 = vmatpush1.bf16.msra.mxu0 %v9900_v59  ;;  %v10101_v25 = vcombine.high %v5669_v46, %v5673_v19  ;;  %v5533_v50 = vld [vmem:[%s11639_s28 + $0x380] sm:$0xff]  ;;  %v10100_v55 = vcombine.low %v5669_v46, %v5673_v19 }
 0x33d   : > { %8497 = vmatprep.subr.bf16.mxu0 %v9893_v63  ;;  %v5537_v58 = vld [vmem:[%s11639_s28 + $0x3a0] sm:$0xff] }
 0x33e   : > { %8539 = vmatpush1.bf16.msra.mxu1 %v10028_v34  ;;  %v5661_v53 = vld [vmem:[%s11639_s28 + $0x780] sm:$0xff]  ;;  %v9965_v59 = vcombine.high %v5533_v50, %v5537_v58  ;;  %v9964_v2 = vcombine.low %v5533_v50, %v5537_v58 }
 0x33f   : > { %8540 = vmatprep.subr.bf16.mxu1 %v10021_v60  ;;  %v5665_v27 = vld [vmem:[%s11639_s28 + $0x7a0] sm:$0xff] }
 0x340   : > { %8498 = vmatpush1.bf16.msra.mxu0 %v9892_v5  ;;  %v10093_v34 = vcombine.high %v5661_v53, %v5665_v27  ;;  %v5525_v63 = vld [vmem:[%s11639_s28 + $0x340] sm:$0xff]  ;;  %v10092_v4 = vcombine.low %v5661_v53, %v5665_v27 }
 0x341   : > { %8499 = vmatprep.subr.bf16.mxu0 %v9885_v56  ;;  %v5529_v60 = vld [vmem:[%s11639_s28 + $0x360] sm:$0xff] }
 0x342   : > { %8541 = vmatpush1.bf16.msra.mxu1 %v10020_v7  ;;  %v5653_v29 = vld [vmem:[%s11639_s28 + $0x740] sm:$0xff]  ;;  %v9957_v5 = vcombine.high %v5525_v63, %v5529_v60  ;;  %v9956_v62 = vcombine.low %v5525_v63, %v5529_v60 }
 0x343   : > { %8542 = vmatprep.subr.bf16.mxu1 %v10013_v42  ;;  %v5657_v0 = vld [vmem:[%s11639_s28 + $0x760] sm:$0xff] }
 0x344   : > { %8500 = vmatpush1.bf16.msra.mxu0 %v9884_v40  ;;  %v10085_v7 = vcombine.high %v5653_v29, %v5657_v0  ;;  %v5517_v56 = vld [vmem:[%s11639_s28 + $0x300] sm:$0xff]  ;;  %v10084_v61 = vcombine.low %v5653_v29, %v5657_v0 }
 0x345   : > { %8501 = vmatprep.subr.bf16.mxu0 %v9877_v45  ;;  %v5521_v42 = vld [vmem:[%s11639_s28 + $0x320] sm:$0xff] }
 0x346   : > { %8543 = vmatpush1.bf16.msra.mxu1 %v10012_v11  ;;  %v5645_v43 = vld [vmem:[%s11639_s28 + $0x700] sm:$0xff]  ;;  %v9949_v40 = vcombine.high %v5517_v56, %v5521_v42  ;;  %v9948_v13 = vcombine.low %v5517_v56, %v5521_v42 }
 0x347   : > { %8544 = vmatprep.subr.bf16.mxu1 %v10005_v6  ;;  %v5649_v8 = vld [vmem:[%s11639_s28 + $0x720] sm:$0xff] }
 0x348   : > { %8502 = vmatpush1.bf16.msra.mxu0 %v9876_v22  ;;  %v10077_v11 = vcombine.high %v5645_v43, %v5649_v8  ;;  %v5509_v45 = vld [vmem:[%s11639_s28 + $0x2c0] sm:$0xff]  ;;  %v10076_v41 = vcombine.low %v5645_v43, %v5649_v8 }
 0x349   : > { %8503 = vmatprep.subr.bf16.mxu0 %v9869_v18  ;;  %v5513_v6 = vld [vmem:[%s11639_s28 + $0x2e0] sm:$0xff] }
 0x34a   : > { %8545 = vmatpush1.bf16.msra.mxu1 %v10004_v10  ;;  %v5637_v17 = vld [vmem:[%s11639_s28 + $0x6c0] sm:$0xff]  ;;  %v9941_v22 = vcombine.high %v5509_v45, %v5513_v6  ;;  %v9940_v30 = vcombine.low %v5509_v45, %v5513_v6 }
 0x34b   : > { %8546 = vmatprep.subr.bf16.mxu1 %v9997_v51  ;;  %v5641_v20 = vld [vmem:[%s11639_s28 + $0x6e0] sm:$0xff] }
 0x34c   : > { %8504 = vmatpush1.bf16.msra.mxu0 %v9868_v32  ;;  %v10069_v10 = vcombine.high %v5637_v17, %v5641_v20  ;;  %v5501_v18 = vld [vmem:[%s11639_s28 + $0x280] sm:$0xff]  ;;  %v10068_v31 = vcombine.low %v5637_v17, %v5641_v20 }
 0x34d   : > { %8505 = vmatprep.subr.bf16.mxu0 %v9861_v12  ;;  %v5505_v51 = vld [vmem:[%s11639_s28 + $0x2a0] sm:$0xff] }
 0x34e   : > { %8547 = vmatpush1.bf16.msra.mxu1 %v9996_v48  ;;  %v5629_v15 = vld [vmem:[%s11639_s28 + $0x680] sm:$0xff]  ;;  %v9933_v32 = vcombine.high %v5501_v18, %v5505_v51  ;;  %v9932_v16 = vcombine.low %v5501_v18, %v5505_v51 }
 0x34f   : > { %8548 = vmatprep.subr.bf16.mxu1 %v9989_v35  ;;  %v5633_v28 = vld [vmem:[%s11639_s28 + $0x6a0] sm:$0xff] }
 0x350   : > { %8506 = vmatpush1.bf16.msra.mxu0 %v9860_v21  ;;  %v10061_v48 = vcombine.high %v5629_v15, %v5633_v28  ;;  %v5493_v12 = vld [vmem:[%s11639_s28 + $0x240] sm:$0xff]  ;;  %v10060_v21 = vcombine.low %v5629_v15, %v5633_v28 }
 0x351   : > { %8507 = vmatprep.subr.bf16.mxu0 %v9853_v39  ;;  %v5497_v35 = vld [vmem:[%s11639_s28 + $0x260] sm:$0xff]  ;;  %v12458_v39 = vpop.f32.mrf.mxu1 }
 0x352   : > { %8549 = vmatpush1.bf16.msra.mxu1 %v9988_v38  ;;  %v5621_v52 = vld [vmem:[%s11639_s28 + $0x640] sm:$0xff]  ;;  %v9925_v38 = vcombine.high %v5493_v12, %v5497_v35 }
 0x353   : > { %8550 = vmatprep.subr.bf16.mxu1 %v9981_v47  ;;  %v5625_v33 = vld [vmem:[%s11639_s28 + $0x660] sm:$0xff]  ;;  %v4988_v58 = vpop.f32.mrf.mxu1 }
 0x354   : > { %8508 = vmatpush1.bf16.msra.mxu0 %v9852_v49  ;;  %v10053_v47 = vcombine.high %v5621_v52, %v5625_v33  ;;  %v5485_v26 = vld [vmem:[%s11639_s28 + $0x200] sm:$0xff]  ;;  %v1947_v49 = vsub.s32 5, %v11989_v23 }
 0x355   : > { %8509 = vmatprep.subr.bf16.mxu0 %v9973_v14  ;;  %v5489_v9 = vld [vmem:[%s11639_s28 + $0x220] sm:$0xff]  ;;  %v4945_v14 = vpop.f32.mrf.mxu0 }
 0x356   : > { %8551 = vmatpush1.bf16.msra.mxu1 %v9980_v24  ;;  %v5613_v46 = vld [vmem:[%s11639_s28 + $0x600] sm:$0xff]  ;;  %v9924_v24 = vcombine.low %v5493_v12, %v5497_v35  ;;  %v9917_v50 = vcombine.high %v5485_v26, %v5489_v9  ;;  %v9916_v63 = vcombine.low %v5485_v26, %v5489_v9 }
 0x357   : > { %8552 = vmatprep.subr.bf16.mxu1 %v10101_v25  ;;  %v5617_v19 = vld [vmem:[%s11639_s28 + $0x620] sm:$0xff]  ;;  %v10052_v25 = vcombine.low %v5621_v52, %v5625_v33  ;;  %v4947_v60 = vpop.f32.mrf.mxu0 }
 0x358   : > { %8510 = vmatpush2.bf16.msra.mxu0 %v9972_v3  ;;  %v10045_v53 = vcombine.high %v5613_v46, %v5617_v19  ;;  %v5733_v27 = vld [vmem:[%s11639_s28 + $0x9c0] sm:$0xff]  ;;  %v10044_v29 = vcombine.low %v5613_v46, %v5617_v19 }
 0x359   : > { %8511 = vmatprep.subr.bf16.mxu0 %v9965_v59  ;;  %v5737_v3 = vld [vmem:[%s11639_s28 + $0x9e0] sm:$0xff] }
 0x35a   : > { %8553 = vmatpush2.bf16.msra.mxu1 %v10100_v55  ;;  %v5861_v55 = vld [vmem:[%s11639_s28 + $0xdc0] sm:$0xff]  ;;  %v10165_v0 = vcombine.high %v5733_v27, %v5737_v3  ;;  %v10164_v8 = vcombine.low %v5733_v27, %v5737_v3 }
 0x35b   : > { %8554 = vmatprep.subr.bf16.mxu1 %v10093_v34  ;;  %v5865_v59 = vld [vmem:[%s11639_s28 + $0xde0] sm:$0xff]  ;;  %v1948_v34 = vrot.slane %v12277_v44, %v1947_v49 }
 0x35c   : > { %8512 = vmatpush2.bf16.msra.mxu0 %v9964_v2  ;;  %v12470_v2 = vpop.f32.mrf.mxu1  ;;  %v5853_v56 = vld [vmem:[%s11639_s28 + $0xd80] sm:$0xff] }
 0x35d   : > { %8513 = vmatprep.subr.bf16.mxu0 %v9957_v5  ;;  %v5729_v5 = vld [vmem:[%s11639_s28 + $0x9a0] sm:$0xff]  ;;  %v4946_v43 = vadd.f32 %v4945_v14, %v1948_v34 }
 0x35e   : > { %8555 = vmatpush2.bf16.msra.mxu1 %v10092_v4  ;;  %v5725_v4 = vld [vmem:[%s11639_s28 + $0x980] sm:$0xff]  ;;  %v4992_v45 = vpop.f32.mrf.mxu1 }
 0x35f   : > { %8556 = vmatprep.subr.bf16.mxu1 %v10085_v7  ;;  %v10293_v7 = vcombine.high %v5861_v55, %v5865_v59  ;;  %v5857_v42 = vld [vmem:[%s11639_s28 + $0xda0] sm:$0xff]  ;;  %v10156_v15 = vcombine.low %v5725_v4, %v5729_v5 }
 0x360   : > { %8514 = vmatpush2.bf16.msra.mxu0 %v9956_v62  ;;  %v1943_v62 = vsub.s32 4, %v11989_v23  ;;  %v5717_v6 = vld [vmem:[%s11639_s28 + $0x940] sm:$0xff]  ;;  %v10285_v20 = vcombine.high %v5853_v56, %v5857_v42 }
 0x361   : > { %8515 = vmatprep.subr.bf16.mxu0 %v9949_v40  ;;  %v10157_v40 = vcombine.high %v5725_v4, %v5729_v5  ;;  %v5721_v17 = vld [vmem:[%s11639_s28 + $0x960] sm:$0xff] }
 0x362   : > { %8557 = vmatpush2.bf16.msra.mxu1 %v10084_v61  ;;  %v4949_v61 = vpop.f32.mrf.mxu0  ;;  %v1944_v28 = vrot.slane %v12277_v44, %v1943_v62  ;;  %v5709_v35 = vld [vmem:[%s11639_s28 + $0x900] sm:$0xff]  ;;  %v10148_v46 = vcombine.low %v5717_v6, %v5721_v17 }
 0x363   : > { %8558 = vmatprep.subr.bf16.mxu1 %v10077_v11  ;;  %v10292_v11 = vcombine.low %v5861_v55, %v5865_v59  ;;  %v4950_v18 = vadd.f32 %v4949_v61, %v1948_v34  ;;  %v5713_v52 = vld [vmem:[%s11639_s28 + $0x920] sm:$0xff] }
 0x364   : > { %8516 = vmatpush2.bf16.msra.mxu0 %v9948_v13  ;;  %v4944_v19 = vadd.f32 %v12456_v37, %v1944_v28  ;;  %v5701_v14 = vld [vmem:[%s11639_s28 + $0x8c0] sm:$0xff] }
 0x365   : > { %8517 = vmatprep.subr.bf16.mxu0 %v9941_v22  ;;  %v5849_v22 = vld [vmem:[%s11639_s28 + $0xd60] sm:$0xff]  ;;  %v4993_v26 = vadd.f32 %v4992_v45, %v4950_v18 }
 0x366   : > { %8559 = vmatpush2.bf16.msra.mxu1 %v10076_v41  ;;  %v5845_v41 = vld [vmem:[%s11639_s28 + $0xd40] sm:$0xff] }
 0x367   : > { %8560 = vmatprep.subr.bf16.mxu1 %v10069_v10  ;;  %v4989_v10 = vadd.f32 %v4988_v58, %v4946_v43  ;;  %v10277_v33 = vcombine.high %v5845_v41, %v5849_v22  ;;  %v5829_v59 = vld [vmem:[%s11639_s28 + $0xcc0] sm:$0xff] }
 0x368   : > { %8518 = vmatpush2.bf16.msra.mxu0 %v9940_v30  ;;  %v5833_v34 = vld [vmem:[%s11639_s28 + $0xce0] sm:$0xff] }
 0x369   : > { %8519 = vmatprep.subr.bf16.mxu0 %v9933_v32  ;;  %v10284_v32 = vcombine.low %v5853_v56, %v5857_v42  ;;  %v5693_v56 = vld [vmem:[%s11639_s28 + $0x880] sm:$0xff]  ;;  %v10261_v43 = vcombine.high %v5829_v59, %v5833_v34 }
 0x36a   : > { %8561 = vmatpush2.bf16.msra.mxu1 %v10068_v31  ;;  %v10149_v31 = vcombine.high %v5717_v6, %v5721_v17  ;;  %v5697_v42 = vld [vmem:[%s11639_s28 + $0x8a0] sm:$0xff]  ;;  %v10260_v17 = vcombine.low %v5829_v59, %v5833_v34 }
 0x36b   : > { %8562 = vmatprep.subr.bf16.mxu1 %v10061_v48  ;;  %v5821_v62 = vld [vmem:[%s11639_s28 + $0xc80] sm:$0xff]  ;;  %v10125_v6 = vcombine.high %v5693_v56, %v5697_v42 }
 0x36c   : > { %8520 = vmatpush2.bf16.msra.mxu0 %v9932_v16  ;;  %v4948_v16 = vadd.f32 %v4947_v60, %v1944_v28  ;;  %v10140_v60 = vcombine.low %v5709_v35, %v5713_v52  ;;  %v5825_v61 = vld [vmem:[%s11639_s28 + $0xca0] sm:$0xff] }
 0x36d   : > { %8521 = vmatprep.subr.bf16.mxu0 %v9925_v38  ;;  %v5837_v38 = vld [vmem:[%s11639_s28 + $0xd00] sm:$0xff] }
 0x36e   : > { %8563 = vmatpush2.bf16.msra.mxu1 %v10060_v21  ;;  %v4991_v3 = vadd.f32 %v12470_v2, %v4948_v16  ;;  %v5817_v28 = vld [vmem:[%s11639_s28 + $0xc60] sm:$0xff] }
 0x36f   : > { %8564 = vmatprep.subr.bf16.mxu1 %v10053_v47  ;;  %v5841_v47 = vld [vmem:[%s11639_s28 + $0xd20] sm:$0xff] }
 0x370   : > { %8522 = vmatpush2.bf16.msra.mxu0 %v9924_v24  ;;  %v10141_v24 = vcombine.high %v5709_v35, %v5713_v52  ;;  %v10269_v27 = vcombine.high %v5837_v38, %v5841_v47  ;;  %v10268_v2 = vcombine.low %v5837_v38, %v5841_v47  ;;  %v5677_v52 = vld [vmem:[%s11639_s28 + $0x800] sm:$0xff] }
 0x371   : > { %8523 = vmatprep.subr.bf16.mxu0 %v9917_v50  ;;  %v10276_v50 = vcombine.low %v5845_v41, %v5849_v22  ;;  %v5689_v22 = vld [vmem:[%s11639_s28 + $0x860] sm:$0xff] }
 0x372   : > { %8565 = vmatpush2.bf16.msra.mxu1 %v10052_v25  ;;  %v5705_v25 = vld [vmem:[%s11639_s28 + $0x8e0] sm:$0xff] }
 0x373   : > { %8566 = vmatprep.subr.bf16.mxu1 %v10045_v53  ;;  %v5809_v38 = vld [vmem:[%s11639_s28 + $0xc20] sm:$0xff] }
 0x374   : > { %8524 = vmatpush2.bf16.msra.mxu0 %v9916_v63  ;;  %v5793_v59 = vld [vmem:[%s11639_s28 + $0xba0] sm:$0xff] }
 0x375   : > { %8579 = vmatprep.subr.bf16.mxu0 %v10165_v0  ;;  %v4987_v0 = vadd.f32 %v12458_v39, %v4944_v19  ;;  %v5797_v19 = vld [vmem:[%s11639_s28 + $0xbc0] sm:$0xff] }
 0x376   : > { %8567 = vmatpush2.bf16.msra.mxu1 %v10044_v29  ;;  %v10133_v29 = vcombine.high %v5701_v14, %v5705_v25 }
 0x377   : > { %8622 = vmatprep.subr.bf16.mxu1 %v10293_v7  ;;  %v12479_v13 = vpop.f32.mrf.mxu0  ;;  %8526 = vmatmul.mubr.bf16.vlgmr.msra.gmra.mxu0 %v12148_v1 }
 0x378   : > { %8580 = vmatpush1.bf16.msra.mxu0 %v10164_v8  ;;  %v5030_v8 = vadd.f32 %v12479_v13, %v4987_v0  ;;  %v5685_v13 = vld [vmem:[%s11639_s28 + $0x840] sm:$0xff] }
 0x379   : > { %v12484_v51 = vpop.f32.mrf.mxu1  ;;  %8569 = vmatmul.mubr.bf16.vlgmr.msra.gmra.mxu1 %v12366_v36  ;;  %v5031_v30 = vpop.f32.mrf.mxu0  ;;  %8581 = vmatprep.subr.bf16.mxu0 %v10157_v40  ;;  %v10116_v47 = vcombine.low %v5685_v13, %v5689_v22 }
 0x37a   : > { %8623 = vmatpush1.bf16.msra.mxu1 %v10292_v11  ;;  %v5032_v48 = vadd.f32 %v5031_v30, %v4989_v10  ;;  %v10132_v11 = vcombine.low %v5701_v14, %v5705_v25  ;;  %v10253_v10 = vcombine.high %v5821_v62, %v5825_v61  ;;  %v12520_v18 = vadd.f32 %v12484_v51, %v5030_v8  ;;  %v5681_v51 = vld [vmem:[%s11639_s28 + $0x820] sm:$0xff] }
 0x37b   : > { %v5074_v12 = vpop.f32.mrf.mxu1  ;;  %8624 = vmatprep.subr.bf16.mxu1 %v10285_v20  ;;  %v5033_v21 = vpop.f32.mrf.mxu0  ;;  %v5925_v25 = vld [vmem:[%s11639_s28 + $0xfc0] sm:$0xff] }
 0x37c   : > { %v12492_v9 = vadd.f32 %v5074_v12, %v5032_v48  ;;  %8582 = vmatpush1.bf16.msra.mxu0 %v10156_v15  ;;  %v5034_v4 = vadd.f32 %v5033_v21, %v4991_v3  ;;  %v5813_v15 = vld [vmem:[%s11639_s28 + $0xc40] sm:$0xff]  ;;  %v10117_v48 = vcombine.high %v5685_v13, %v5689_v22  ;;  %v10252_v12 = vcombine.low %v5821_v62, %v5825_v61 }
 0x37d   : > { %v5076_v44 = vpop.f32.mrf.mxu1  ;;  %v5035_v49 = vpop.f32.mrf.mxu0  ;;  %8583 = vmatprep.subr.bf16.mxu0 %v10149_v31  ;;  %v10124_v31 = vcombine.low %v5693_v56, %v5697_v42  ;;  %v5273_v16 = vmul.f32 0.044715, %v12520_v18  ;;  %v5805_v21 = vld [vmem:[%s11639_s28 + $0xc00] sm:$0xff] }
 0x37e   : > { %8625 = vmatpush1.bf16.msra.mxu1 %v10284_v32  ;;  %v5274_v58 = vmul.f32 0.044715, %v12492_v9  ;;  %v5036_v53 = vadd.f32 %v5035_v49, %v4993_v26  ;;  %v12514_v45 = vadd.f32 %v5076_v44, %v5034_v4  ;;  %v10109_v44 = vcombine.high %v5677_v52, %v5681_v51  ;;  %v5801_v49 = vld [vmem:[%s11639_s28 + $0xbe0] sm:$0xff] }
 0x37f   : > { %8626 = vmatprep.subr.bf16.mxu1 %v10277_v33  ;;  %v5078_v55 = vpop.f32.mrf.mxu1  ;;  %v10245_v33 = vcombine.high %v5813_v15, %v5817_v28  ;;  %v5289_v14 = vmul.f32 %v5273_v16, %v12520_v18  ;;  %v10236_v3 = vcombine.low %v5805_v21, %v5809_v38  ;;  %v10228_v0 = vcombine.low %v5797_v19, %v5801_v49  ;;  %v5781_v56 = vld [vmem:[%s11639_s28 + $0xb40] sm:$0xff] }
 0x380   : > { %v5290_v37 = vmul.f32 %v5274_v58, %v12492_v9  ;;  %v12502_v63 = vadd.f32 %v5078_v55, %v5036_v53  ;;  %8584 = vmatpush1.bf16.msra.mxu0 %v10148_v46  ;;  %v5281_v32 = vmul.f32 0.044715, %v12514_v45  ;;  %v10244_v46 = vcombine.low %v5813_v15, %v5817_v28  ;;  %v5789_v55 = vld [vmem:[%s11639_s28 + $0xb80] sm:$0xff] }
 0x381   : > { %8585 = vmatprep.subr.bf16.mxu0 %v10141_v24  ;;  %v10237_v24 = vcombine.high %v5805_v21, %v5809_v38  ;;  %v10108_v58 = vcombine.low %v5677_v52, %v5681_v51  ;;  %v5785_v42 = vld [vmem:[%s11639_s28 + $0xb60] sm:$0xff] }
 0x382   : > { %8627 = vmatpush1.bf16.msra.mxu1 %v10276_v50  ;;  %v5306_v5 = vmul.f32 %v5290_v37, %v12492_v9  ;;  %v5282_v7 = vmul.f32 0.044715, %v12502_v63  ;;  %v5297_v26 = vmul.f32 %v5281_v32, %v12514_v45  ;;  %v5929_v50 = vld [vmem:[%s11639_s28 + $0xfe0] sm:$0xff]  ;;  %v5305_v37 = vmul.f32 %v5289_v14, %v12520_v18 }
 0x383   : > { %8628 = vmatprep.subr.bf16.mxu1 %v10269_v27  ;;  %v10229_v27 = vcombine.high %v5797_v19, %v5801_v49  ;;  %v10357_v34 = vcombine.high %v5925_v25, %v5929_v50  ;;  %v5909_v62 = vld [vmem:[%s11639_s28 + $0xf40] sm:$0xff]  ;;  %v5266_v13 = vmul.f32 0.5, %v12502_v63 }
 0x384   : > { %v5322_v39 = vadd.f32 %v5306_v5, %v12492_v9  ;;  %v5298_v40 = vmul.f32 %v5282_v7, %v12502_v63  ;;  %8586 = vmatpush1.bf16.msra.mxu0 %v10140_v60  ;;  %v5313_v53 = vmul.f32 %v5297_v26, %v12514_v45  ;;  %v5917_v60 = vld [vmem:[%s11639_s28 + $0xf80] sm:$0xff]  ;;  %v10221_v5 = vcombine.high %v5789_v55, %v5793_v59  ;;  %v12563_v26 = vld [vmem:[%s11639_s28 + $0x5c8] sm:$0xff] }
 0x385   : > { %8587 = vmatprep.subr.bf16.mxu0 %v10133_v29  ;;  %v5921_v29 = vld [vmem:[%s11639_s28 + $0xfa0] sm:$0xff]  ;;  %v10356_v7 = vcombine.low %v5925_v25, %v5929_v50  ;;  %v5321_v8 = vadd.f32 %v5305_v37, %v12520_v18 }
 0x386   : > { %8629 = vmatpush1.bf16.msra.mxu1 %v10268_v2  ;;  %v5338_v20 = vmul.f32 0.7978846, %v5322_v39  ;;  %v5314_v41 = vmul.f32 %v5298_v40, %v12502_v63  ;;  %v5329_v2 = vadd.f32 %v5313_v53, %v12514_v45  ;;  %v5913_v61 = vld [vmem:[%s11639_s28 + $0xf60] sm:$0xff]  ;;  %v10220_v39 = vcombine.low %v5789_v55, %v5793_v59 }
 0x387   : > { %8630 = vmatprep.subr.bf16.mxu1 %v10261_v43  ;;  %v10349_v43 = vcombine.high %v5917_v60, %v5921_v29  ;;  %v5777_v15 = vld [vmem:[%s11639_s28 + $0xb20] sm:$0xff]  ;;  %v10341_v28 = vcombine.high %v5909_v62, %v5913_v61 }
 0x388   : > { %10435 = vtanh.f32 %v5338_v20  ;;  %v5330_v30 = vadd.f32 %v5314_v41, %v12502_v63  ;;  %8588 = vmatpush1.bf16.msra.mxu0 %v10132_v11  ;;  %v10348_v20 = vcombine.low %v5917_v60, %v5921_v29  ;;  %v5258_v41 = vmul.f32 0.5, %v12492_v9  ;;  %v5905_v32 = vld [vmem:[%s11639_s28 + $0xf20] sm:$0xff] }
 0x389   : > { %8589 = vmatprep.subr.bf16.mxu0 %v10125_v6  ;;  %v5345_v6 = vmul.f32 0.7978846, %v5329_v2  ;;  %v10340_v63 = vcombine.low %v5909_v62, %v5913_v61  ;;  %v5765_v51 = vld [vmem:[%s11639_s28 + $0xac0] sm:$0xff] }
 0x38a   : > { %8631 = vmatpush1.bf16.msra.mxu1 %v10260_v17  ;;  %v5346_v35 = vmul.f32 0.7978846, %v5330_v30  ;;  %v10213_v17 = vcombine.high %v5781_v56, %v5785_v42  ;;  %v5337_v30 = vmul.f32 0.7978846, %v5321_v8  ;;  %v5893_v21 = vld [vmem:[%s11639_s28 + $0xec0] sm:$0xff] }
 0x38b   : > { %8632 = vmatprep.subr.bf16.mxu1 %v10253_v10  ;;  %v5773_v10 = vld [vmem:[%s11639_s28 + $0xb00] sm:$0xff] }
 0x38c   : > { %10437 = vtanh.f32 %v5346_v35  ;;  %8590 = vmatpush1.bf16.msra.mxu0 %v10124_v31  ;;  %v5901_v31 = vld [vmem:[%s11639_s28 + $0xf00] sm:$0xff]  ;;  %v10205_v9 = vcombine.high %v5773_v10, %v5777_v15 }
 0x38d   : > { %8591 = vmatprep.subr.bf16.mxu0 %v10117_v48  ;;  %v10212_v48 = vcombine.low %v5781_v56, %v5785_v42  ;;  %10439 = vtanh.f32 %v5345_v6  ;;  %v10333_v16 = vcombine.high %v5901_v31, %v5905_v32  ;;  %v5897_v38 = vld [vmem:[%s11639_s28 + $0xee0] sm:$0xff]  ;;  %v10332_v19 = vcombine.low %v5901_v31, %v5905_v32  ;;  %v5482_v6 = vld [vmem:[%s11639_s28 + $0x1e8] sm:$0xff] }
 0x38e   : > { %8633 = vmatpush1.bf16.msra.mxu1 %v10252_v12  ;;  %10441 = vtanh.f32 %v5337_v30  ;;  %v5761_v14 = vld [vmem:[%s11639_s28 + $0xaa0] sm:$0xff]  ;;  %v10325_v25 = vcombine.high %v5893_v21, %v5897_v38  ;;  %v5470_v30 = vld [vmem:[%s11639_s28 + $0x188] sm:$0xff] }
 0x38f   : > { %8634 = vmatprep.subr.bf16.mxu1 %v10245_v33  ;;  %v5769_v33 = vld [vmem:[%s11639_s28 + $0xae0] sm:$0xff]  ;;  %v5474_v31 = vld [vmem:[%s11639_s28 + $0x1a8] sm:$0xff] }
 0x390   : > { %8592 = vmatpush1.bf16.msra.mxu0 %v10116_v47  ;;  %v10204_v47 = vcombine.low %v5773_v10, %v5777_v15  ;;  %v5885_v50 = vld [vmem:[%s11639_s28 + $0xe80] sm:$0xff]  ;;  %v10196_v53 = vcombine.low %v5765_v51, %v5769_v33 }
 0x391   : > { %8593 = vmatprep.subr.bf16.mxu0 %v10109_v44  ;;  %v12566_v44 = vld [vmem:[%s11639_s28 + $0x5e8] sm:$0xff]  ;;  %v5749_v55 = vld [vmem:[%s11639_s28 + $0xa40] sm:$0xff] }
 0x392   : > { %8635 = vmatpush1.bf16.msra.mxu1 %v10244_v46  ;;  %v10197_v46 = vcombine.high %v5765_v51, %v5769_v33  ;;  %v10038_v49 = vcombine.low %v12563_v26, %v12566_v44  ;;  %v5753_v59 = vld [vmem:[%s11639_s28 + $0xa60] sm:$0xff]  ;;  %v10039_v32 = vcombine.high %v12563_v26, %v12566_v44  ;;  %v5454_v33 = vld [vmem:[%s11639_s28 + $0x108] sm:$0xff] }
 0x393   : > { %8636 = vmatprep.subr.bf16.mxu1 %v10237_v24  ;;  %v5757_v24 = vld [vmem:[%s11639_s28 + $0xa80] sm:$0xff]  ;;  %v10180_v62 = vcombine.low %v5749_v55, %v5753_v59  ;;  %v5750_v44 = vld [vmem:[%s11639_s28 + $0xa48] sm:$0xff] }
 0x394   : > { %8594 = vmatpush1.bf16.msra.mxu0 %v10108_v58  ;;  %v5889_v58 = vld [vmem:[%s11639_s28 + $0xea0] sm:$0xff]  ;;  %v10188_v29 = vcombine.low %v5757_v24, %v5761_v14 }
 0x395   : > { %v10436_v4 = vpop.eup %10435  ;;  %8595 = vmatprep.subr.bf16.mxu0 %v10229_v27  ;;  %v10189_v27 = vcombine.high %v5757_v24, %v5761_v14  ;;  %v5877_v37 = vld [vmem:[%s11639_s28 + $0xe40] sm:$0xff]  ;;  %v5438_v14 = vld [vmem:[%s11639_s28 + $0x88] sm:$0xff] }
 0x396   : > { %8637 = vmatpush1.bf16.msra.mxu1 %v10236_v3  ;;  %v5370_v40 = vadd.f32 1.0, %v10436_v4  ;;  %v10324_v3 = vcombine.low %v5893_v21, %v5897_v38  ;;  %v5881_v60 = vld [vmem:[%s11639_s28 + $0xe60] sm:$0xff]  ;;  %v10316_v4 = vcombine.low %v5885_v50, %v5889_v58 }
 0x397   : > { %8638 = vmatprep.subr.bf16.mxu1 %v10357_v34  ;;  %v10317_v34 = vcombine.high %v5885_v50, %v5889_v58  ;;  %v10309_v56 = vcombine.high %v5877_v37, %v5881_v60  ;;  %v5869_v42 = vld [vmem:[%s11639_s28 + $0xe00] sm:$0xff] }
 0x398   : > { %8596 = vmatpush2.bf16.msra.mxu0 %v10228_v0  ;;  %v5386_v12 = vmul.f32 %v5370_v40, %v5258_v41  ;;  %v10181_v0 = vcombine.high %v5749_v55, %v5753_v59  ;;  %v10308_v40 = vcombine.low %v5877_v37, %v5881_v60  ;;  %v5422_v59 = vld [vmem:[%s11639_s28 + $0x8] sm:$0xff] }
 0x399   : > { %v10438_v11 = vpop.eup %10437  ;;  %8597 = vmatprep.subr.bf16.mxu0 %v10221_v5  ;;  %v5741_v5 = vld [vmem:[%s11639_s28 + $0xa00] sm:$0xff] }
 0x39a   : > { %8639 = vmatpush2.bf16.msra.mxu1 %v10356_v7  ;;  %v5378_v22 = vadd.f32 1.0, %v10438_v11  ;;  %v10440_v2 = vpop.eup %10439  ;;  %v5745_v7 = vld [vmem:[%s11639_s28 + $0xa20] sm:$0xff]  ;;  %v5478_v11 = vld [vmem:[%s11639_s28 + $0x1c8] sm:$0xff] }
 0x39b   : > { %8640 = vmatprep.subr.bf16.mxu1 %v10349_v43  ;;  %v5873_v43 = vld [vmem:[%s11639_s28 + $0xe20] sm:$0xff]  ;;  %v10442_v8 = vpop.eup %10441  ;;  %v10173_v61 = vcombine.high %v5741_v5, %v5745_v7  ;;  %v9911_v15 = vcombine.high %v5478_v11, %v5482_v6 }
 0x39c   : > { %8598 = vmatpush2.bf16.msra.mxu0 %v10220_v39  ;;  %v5394_v35 = vmul.f32 %v5378_v22, %v5266_v13  ;;  %v5377_v39 = vadd.f32 1.0, %v10440_v2  ;;  %v5369_v41 = vadd.f32 1.0, %v10442_v8  ;;  %v10172_v13 = vcombine.low %v5741_v5, %v5745_v7  ;;  %v5534_v5 = vld [vmem:[%s11639_s28 + $0x388] sm:$0xff] }
 0x39d   : > { %8599 = vmatprep.subr.bf16.mxu0 %v10213_v17  ;;  %v10301_v17 = vcombine.high %v5869_v42, %v5873_v43  ;;  %v5257_v22 = vmul.f32 0.5, %v12520_v18  ;;  %v9903_v18 = vcombine.high %v5470_v30, %v5474_v31  ;;  %v5538_v7 = vld [vmem:[%s11639_s28 + $0x3a8] sm:$0xff] }
 0x39e   : > { %8641 = vmatpush2.bf16.msra.mxu1 %v10348_v20  ;;  %v12555_v52 = vpack.c.bf16 %v5394_v35, %v5386_v12  ;;  %v5265_v20 = vmul.f32 0.5, %v12514_v45  ;;  %v9910_v45 = vcombine.low %v5478_v11, %v5482_v6  ;;  %v5462_v35 = vld [vmem:[%s11639_s28 + $0x148] sm:$0xff] }
 0x39f   : > { %8642 = vmatprep.subr.bf16.mxu1 %v10341_v28  ;;  %v10300_v28 = vcombine.low %v5869_v42, %v5873_v43  ;;  %v9967_v42 = vcombine.high %v5534_v5, %v5538_v7  ;;  %v5526_v43 = vld [vmem:[%s11639_s28 + $0x348] sm:$0xff] }
 0x3a0   : > { %8600 = vmatpush2.bf16.msra.mxu0 %v10212_v48  ;;  %8611 = vmatprep.mubr.bf16.mxu0 %v12555_v52  ;;  %v5393_v10 = vmul.f32 %v5377_v39, %v5265_v20  ;;  %v5385_v48 = vmul.f32 %v5369_v41, %v5257_v22  ;;  %v5530_v8 = vld [vmem:[%s11639_s28 + $0x368] sm:$0xff] }
 0x3a1   : > { %8601 = vmatprep.subr.bf16.mxu0 %v10205_v9  ;;  %v5466_v9 = vld [vmem:[%s11639_s28 + $0x168] sm:$0xff]  ;;  %v9958_v11 = vcombine.low %v5526_v43, %v5530_v8 }
 0x3a2   : > { %8643 = vmatpush2.bf16.msra.mxu1 %v10340_v63  ;;  %v12590_v12 = vpack.c.bf16 %v5393_v10, %v5385_v48  ;;  %v9902_v63 = vcombine.low %v5470_v30, %v5474_v31  ;;  %v9895_v51 = vcombine.high %v5462_v35, %v5466_v9  ;;  %v9894_v21 = vcombine.low %v5462_v35, %v5466_v9  ;;  %v5518_v39 = vld [vmem:[%s11639_s28 + $0x308] sm:$0xff] }
 0x3a3   : > { %8644 = vmatprep.subr.bf16.mxu1 %v10333_v16  ;;  %v5458_v16 = vld [vmem:[%s11639_s28 + $0x128] sm:$0xff] }
 0x3a4   : > { %8602 = vmatpush2.bf16.msra.mxu0 %v10204_v47  ;;  %v9887_v38 = vcombine.high %v5454_v33, %v5458_v16  ;;  %v5446_v47 = vld [vmem:[%s11639_s28 + $0xc8] sm:$0xff] }
 0x3a5   : > { %8603 = vmatprep.subr.bf16.mxu0 %v10197_v46  ;;  %v5450_v46 = vld [vmem:[%s11639_s28 + $0xe8] sm:$0xff] }
 0x3a6   : > { %8645 = vmatpush2.bf16.msra.mxu1 %v10332_v19  ;;  %v9886_v19 = vcombine.low %v5454_v33, %v5458_v16  ;;  %v9879_v24 = vcombine.high %v5446_v47, %v5450_v46  ;;  %v9878_v50 = vcombine.low %v5446_v47, %v5450_v46  ;;  %v5514_v20 = vld [vmem:[%s11639_s28 + $0x2e8] sm:$0xff] }
 0x3a7   : > { %8646 = vmatprep.subr.bf16.mxu1 %v10325_v25  ;;  %v5442_v25 = vld [vmem:[%s11639_s28 + $0xa8] sm:$0xff] }
 0x3a8   : > { %8604 = vmatpush2.bf16.msra.mxu0 %v10196_v53  ;;  %v9871_v58 = vcombine.high %v5438_v14, %v5442_v25  ;;  %v5430_v53 = vld [vmem:[%s11639_s28 + $0x48] sm:$0xff] }
 0x3a9   : > { %8605 = vmatprep.subr.bf16.mxu0 %v10189_v27  ;;  %v5434_v27 = vld [vmem:[%s11639_s28 + $0x68] sm:$0xff] }
 0x3aa   : > { %8647 = vmatpush2.bf16.msra.mxu1 %v10324_v3  ;;  %v9870_v3 = vcombine.low %v5438_v14, %v5442_v25  ;;  %v9863_v55 = vcombine.high %v5430_v53, %v5434_v27  ;;  %v9862_v37 = vcombine.low %v5430_v53, %v5434_v27  ;;  %v5502_v22 = vld [vmem:[%s11639_s28 + $0x288] sm:$0xff] }
 0x3ab   : > { %8648 = vmatprep.subr.bf16.mxu1 %v10317_v34  ;;  %v5426_v34 = vld [vmem:[%s11639_s28 + $0x28] sm:$0xff] }
 0x3ac   : > { %8606 = vmatpush2.bf16.msra.mxu0 %v10188_v29  ;;  %v9855_v60 = vcombine.high %v5422_v59, %v5426_v34  ;;  %v5542_v29 = vld [vmem:[%s11639_s28 + $0x3c8] sm:$0xff] }
 0x3ad   : > { %8607 = vmatprep.subr.bf16.mxu0 %v10181_v0  ;;  %v5546_v0 = vld [vmem:[%s11639_s28 + $0x3e8] sm:$0xff] }
 0x3ae   : > { %8649 = vmatpush2.bf16.msra.mxu1 %v10316_v4  ;;  %v9854_v4 = vcombine.low %v5422_v59, %v5426_v34  ;;  %v9975_v2 = vcombine.high %v5542_v29, %v5546_v0  ;;  %v5506_v10 = vld [vmem:[%s11639_s28 + $0x2a8] sm:$0xff] }
 0x3af   : > { %8650 = vmatprep.subr.bf16.mxu1 %v10309_v56  ;;  %v9974_v56 = vcombine.low %v5542_v29, %v5546_v0  ;;  %v5494_v30 = vld [vmem:[%s11639_s28 + $0x248] sm:$0xff] }
 0x3b0   : > { %8608 = vmatpush2.bf16.msra.mxu0 %v10180_v62  ;;  %v9966_v62 = vcombine.low %v5534_v5, %v5538_v7  ;;  %v5498_v31 = vld [vmem:[%s11639_s28 + $0x268] sm:$0xff] }
 0x3b1   : > { %8609 = vmatprep.subr.bf16.mxu0 %v10173_v61  ;;  %v9959_v61 = vcombine.high %v5526_v43, %v5530_v8  ;;  %v5486_v9 = vld [vmem:[%s11639_s28 + $0x208] sm:$0xff]  ;;  %v9926_v33 = vcombine.low %v5494_v30, %v5498_v31 }
 0x3b2   : > { %8651 = vmatpush2.bf16.msra.mxu1 %v10308_v40  ;;  %v5522_v40 = vld [vmem:[%s11639_s28 + $0x328] sm:$0xff] }
 0x3b3   : > { %8652 = vmatprep.subr.bf16.mxu1 %v10301_v17  ;;  %v9951_v6 = vcombine.high %v5518_v39, %v5522_v40  ;;  %v5510_v17 = vld [vmem:[%s11639_s28 + $0x2c8] sm:$0xff]  ;;  %v9950_v41 = vcombine.low %v5518_v39, %v5522_v40 }
 0x3b4   : > { %8610 = vmatpush2.bf16.msra.mxu0 %v10172_v13  ;;  %v9943_v13 = vcombine.high %v5510_v17, %v5514_v20  ;;  %v5726_v27 = vld [vmem:[%s11639_s28 + $0x988] sm:$0xff] }
 0x3b5   : > { %8665 = vmatprep.subr.bf16.mxu0 %v9911_v15  ;;  %v9942_v15 = vcombine.low %v5510_v17, %v5514_v20  ;;  %v5710_v17 = vld [vmem:[%s11639_s28 + $0x908] sm:$0xff] }
 0x3b6   : > { %8653 = vmatpush2.bf16.msra.mxu1 %v10300_v28  ;;  %v9935_v28 = vcombine.high %v5502_v22, %v5506_v10  ;;  %v5714_v20 = vld [vmem:[%s11639_s28 + $0x928] sm:$0xff] }
 0x3b7   : > { %8708 = vmatprep.subr.bf16.mxu1 %v10039_v32  ;;  %8612 = vmatmul.mubr.bf16.vlgmr.msra.gmra.mxu0 %v12590_v12  ;;  %v9934_v32 = vcombine.low %v5502_v22, %v5506_v10  ;;  %v5115_v48 = vpop.f32.mrf.mxu0 }
 0x3b8   : > { %8666 = vmatpush1.bf16.msra.mxu0 %v9910_v45  ;;  %8697 = vmatprep.mubr.bf16.mxu0 %v12399_v54  ;;  %v9927_v45 = vcombine.high %v5494_v30, %v5498_v31 }
 0x3b9   : > { %8667 = vmatprep.subr.bf16.mxu0 %v9903_v18  ;;  %v1951_v18 = vsub.s32 6, %v11989_v23  ;;  %v5158_v35 = vpop.f32.mrf.mxu1  ;;  %v5117_v16 = vpop.f32.mrf.mxu0 }
 0x3bb   : > { %v5160_v46 = vpop.f32.mrf.mxu1 }
 0x3bc   : > { %8668 = vmatpush1.bf16.msra.mxu0 %v9902_v63  ;;  %v5490_v63 = vld [vmem:[%s11639_s28 + $0x228] sm:$0xff] }
 0x3bd   : > { %8669 = vmatprep.subr.bf16.mxu0 %v9895_v51  ;;  %v1955_v51 = vsub.s32 7, %v11989_v23  ;;  %v9918_v25 = vcombine.low %v5486_v9, %v5490_v63  ;;  %v5162_v53 = vpop.f32.mrf.mxu1 }
 0x3bf   : > { %v5164_v0 = vpop.f32.mrf.mxu1 }
 0x3c0   : > { %8670 = vmatpush1.bf16.msra.mxu0 %v9894_v21  ;;  %v9919_v21 = vcombine.high %v5486_v9, %v5490_v63  ;;  %v5702_v9 = vld [vmem:[%s11639_s28 + $0x8c8] sm:$0xff] }
 0x3c1   : > { %8671 = vmatprep.subr.bf16.mxu0 %v9887_v38  ;;  %v10452_v38 = vld [vmem:[%s11634_s16] sm:$0xff]  ;;  %v5706_v63 = vld [vmem:[%s11639_s28 + $0x8e8] sm:$0xff]  ;;  %s10521_s16 = smov [#allocation3]  }
 0x3c2   : > { %v1952_v47 = vrot.slane %v10452_v38, %v1951_v18  ;;  %v1956_v14 = vrot.slane %v10452_v38, %v1955_v51 }
 0x3c4   : > { %8672 = vmatpush1.bf16.msra.mxu0 %v9886_v19  ;;  %v5734_v19 = vld [vmem:[%s11639_s28 + $0x9c8] sm:$0xff] }
 0x3c5   : > { %8673 = vmatprep.subr.bf16.mxu0 %v9879_v24  ;;  %v5738_v24 = vld [vmem:[%s11639_s28 + $0x9e8] sm:$0xff] }
 0x3c6   : > { %v10167_v23 = vcombine.high %v5734_v19, %v5738_v24  ;;  %v10166_v59 = vcombine.low %v5734_v19, %v5738_v24 }
 0x3c8   : > { %8674 = vmatpush1.bf16.msra.mxu0 %v9878_v50  ;;  %v5119_v50 = vpop.f32.mrf.mxu0 }
 0x3c9   : > { %8675 = vmatprep.subr.bf16.mxu0 %v9871_v58  ;;  %v5116_v58 = vadd.f32 %v5115_v48, %v1952_v47  ;;  %v5120_v29 = vadd.f32 %v5119_v50, %v1952_v47  ;;  %v5694_v50 = vld [vmem:[%s11639_s28 + $0x888] sm:$0xff] }
 0x3ca   : > { %v5121_v34 = vpop.f32.mrf.mxu0 }
 0x3cb   : > { %v5163_v39 = vadd.f32 %v5162_v53, %v5120_v29  ;;  %v5686_v29 = vld [vmem:[%s11639_s28 + $0x848] sm:$0xff] }
 0x3cc   : > { %8676 = vmatpush1.bf16.msra.mxu0 %v9870_v3  ;;  %v5730_v3 = vld [vmem:[%s11639_s28 + $0x9a8] sm:$0xff] }
 0x3cd   : > { %8677 = vmatprep.subr.bf16.mxu0 %v9863_v55  ;;  %v5118_v55 = vadd.f32 %v5117_v16, %v1956_v14  ;;  %v10158_v7 = vcombine.low %v5726_v27, %v5730_v3 }
 0x3d0   : > { %8678 = vmatpush1.bf16.msra.mxu0 %v9862_v37  ;;  %v10159_v37 = vcombine.high %v5726_v27, %v5730_v3  ;;  %v10134_v3 = vcombine.low %v5702_v9, %v5706_v63 }
 0x3d1   : > { %8679 = vmatprep.subr.bf16.mxu0 %v9855_v60  ;;  %v5159_v60 = vadd.f32 %v5158_v35, %v5116_v58 }
 0x3d4   : > { %8680 = vmatpush1.bf16.msra.mxu0 %v9854_v4  ;;  %v5718_v4 = vld [vmem:[%s11639_s28 + $0x948] sm:$0xff] }
 0x3d5   : > { %8681 = vmatprep.subr.bf16.mxu0 %v9975_v2  ;;  %v5722_v2 = vld [vmem:[%s11639_s28 + $0x968] sm:$0xff] }
 0x3d8   : > { %8682 = vmatpush2.bf16.msra.mxu0 %v9974_v56  ;;  %v5161_v56 = vadd.f32 %v5160_v46, %v5118_v55  ;;  %v10135_v46 = vcombine.high %v5702_v9, %v5706_v63 }
 0x3d9   : > { %8683 = vmatprep.subr.bf16.mxu0 %v9967_v42  ;;  %v5122_v42 = vadd.f32 %v5121_v34, %v1956_v14 }
 0x3db   : > { %v5165_v22 = vadd.f32 %v5164_v0, %v5122_v42  ;;  %v5690_v0 = vld [vmem:[%s11639_s28 + $0x868] sm:$0xff] }
 0x3dc   : > { %8684 = vmatpush2.bf16.msra.mxu0 %v9966_v62  ;;  %v5678_v42 = vld [vmem:[%s11639_s28 + $0x808] sm:$0xff] }
 0x3dd   : > { %8685 = vmatprep.subr.bf16.mxu0 %v9959_v61  ;;  %v10151_v61 = vcombine.high %v5718_v4, %v5722_v2 }
 0x3e0   : > { %8686 = vmatpush2.bf16.msra.mxu0 %v9958_v11 }
 0x3e1   : > { %8687 = vmatprep.subr.bf16.mxu0 %v9951_v6 }
 0x3e4   : > { %8688 = vmatpush2.bf16.msra.mxu0 %v9950_v41 }
 0x3e5   : > { %8689 = vmatprep.subr.bf16.mxu0 %v9943_v13  ;;  %v10150_v13 = vcombine.low %v5718_v4, %v5722_v2 }
 0x3e8   : > { %8690 = vmatpush2.bf16.msra.mxu0 %v9942_v15 }
 0x3e9   : > { %8691 = vmatprep.subr.bf16.mxu0 %v9935_v28 }
 0x3ec   : > { %8692 = vmatpush2.bf16.msra.mxu0 %v9934_v32  ;;  %v10143_v32 = vcombine.high %v5710_v17, %v5714_v20 }
 0x3ed   : > { %8693 = vmatprep.subr.bf16.mxu0 %v9927_v45 }
 0x3f0   : > { %8694 = vmatpush2.bf16.msra.mxu0 %v9926_v33  ;;  %v10142_v33 = vcombine.low %v5710_v17, %v5714_v20  ;;  %v5790_v17 = vld [vmem:[%s11639_s28 + $0xb88] sm:$0xff] }
 0x3f1   : > { %8695 = vmatprep.subr.bf16.mxu0 %v9919_v21  ;;  %v5794_v20 = vld [vmem:[%s11639_s28 + $0xba8] sm:$0xff] }
 0x3f4   : > { %8696 = vmatpush2.bf16.msra.mxu0 %v9918_v25 }
 0x3f5   : > { %8751 = vmatprep.subr.bf16.mxu0 %v10167_v23  ;;  %v5698_v23 = vld [vmem:[%s11639_s28 + $0x8a8] sm:$0xff] }
 0x3f7   : > { %v5201_v5 = vpop.f32.mrf.mxu0  ;;  %8698 = vmatmul.mubr.bf16.vlgmr.msra.gmra.mxu0 %v12148_v1 }
 0x3f8   : > { %v5202_v43 = vadd.f32 %v5201_v5, %v5159_v60  ;;  %8752 = vmatpush1.bf16.msra.mxu0 %v10166_v59  ;;  %8783 = vmatprep.mubr.bf16.mxu0 %v12555_v52  ;;  %v10127_v59 = vcombine.high %v5694_v50, %v5698_v23  ;;  %v10126_v5 = vcombine.low %v5694_v50, %v5698_v23  ;;  %v5602_v23 = vld [vmem:[%s11639_s28 + $0x5a8] sm:$0xff] }
 0x3f9   : > { %v5244_v8 = vpop.f32.mrf.mxu1  ;;  %v5203_v62 = vpop.f32.mrf.mxu0  ;;  %8753 = vmatprep.subr.bf16.mxu0 %v10159_v37 }
 0x3fa   : > { %v12633_v40 = vadd.f32 %v5244_v8, %v5202_v43  ;;  %v5204_v11 = vadd.f32 %v5203_v62, %v5161_v56  ;;  %v5682_v43 = vld [vmem:[%s11639_s28 + $0x828] sm:$0xff]  ;;  %v10118_v8 = vcombine.low %v5686_v29, %v5690_v0 }
 0x3fb   : > { %v5246_v6 = vpop.f32.mrf.mxu1  ;;  %v5205_v41 = vpop.f32.mrf.mxu0  ;;  %v10111_v62 = vcombine.high %v5678_v42, %v5682_v43 }
 0x3fc   : > { %v5275_v10 = vmul.f32 0.044715, %v12633_v40  ;;  %v12638_v15 = vadd.f32 %v5246_v6, %v5204_v11  ;;  %v5206_v28 = vadd.f32 %v5205_v41, %v5163_v39  ;;  %8754 = vmatpush1.bf16.msra.mxu0 %v10158_v7  ;;  %v10119_v7 = vcombine.high %v5686_v29, %v5690_v0  ;;  %v5802_v39 = vld [vmem:[%s11639_s28 + $0xbe8] sm:$0xff] }
 0x3fd   : > { %v5248_v30 = vpop.f32.mrf.mxu1  ;;  %v5207_v31 = vpop.f32.mrf.mxu0  ;;  %8755 = vmatprep.subr.bf16.mxu0 %v10151_v61  ;;  %v5798_v61 = vld [vmem:[%s11639_s28 + $0xbc8] sm:$0xff]  ;;  %v10110_v11 = vcombine.low %v5678_v42, %v5682_v43 }
 0x3fe   : > { %v5291_v48 = vmul.f32 %v5275_v10, %v12633_v40  ;;  %v5276_v45 = vmul.f32 0.044715, %v12638_v15  ;;  %v12642_v18 = vadd.f32 %v5248_v30, %v5206_v28  ;;  %v5208_v35 = vadd.f32 %v5207_v31, %v5165_v22  ;;  %v5782_v28 = vld [vmem:[%s11639_s28 + $0xb48] sm:$0xff] }
 0x3ff   : > { %v5250_v51 = vpop.f32.mrf.mxu1  ;;  %v10231_v6 = vcombine.high %v5798_v61, %v5802_v39  ;;  %v10230_v41 = vcombine.low %v5798_v61, %v5802_v39  ;;  %v10223_v22 = vcombine.high %v5790_v17, %v5794_v20  ;;  %v5786_v30 = vld [vmem:[%s11639_s28 + $0xb68] sm:$0xff] }
 0x400   : > { %v5307_v16 = vmul.f32 %v5291_v48, %v12633_v40  ;;  %v5292_v21 = vmul.f32 %v5276_v45, %v12638_v15  ;;  %v5283_v38 = vmul.f32 0.044715, %v12642_v18  ;;  %v12649_v47 = vadd.f32 %v5250_v51, %v5208_v35  ;;  %8756 = vmatpush1.bf16.msra.mxu0 %v10150_v13  ;;  %v5758_v29 = vld [vmem:[%s11639_s28 + $0xa88] sm:$0xff] }
 0x401   : > { %8757 = vmatprep.subr.bf16.mxu0 %v10143_v32  ;;  %v10222_v32 = vcombine.low %v5790_v17, %v5794_v20  ;;  %v10215_v9 = vcombine.high %v5782_v28, %v5786_v30  ;;  %v5267_v63 = vmul.f32 0.5, %v12642_v18  ;;  %v5762_v0 = vld [vmem:[%s11639_s28 + $0xaa8] sm:$0xff] }
 0x402   : > { %v5323_v19 = vadd.f32 %v5307_v16, %v12633_v40  ;;  %v5308_v24 = vmul.f32 %v5292_v21, %v12638_v15  ;;  %v5299_v14 = vmul.f32 %v5283_v38, %v12642_v18  ;;  %v5284_v25 = vmul.f32 0.044715, %v12649_v47  ;;  %v5774_v38 = vld [vmem:[%s11639_s28 + $0xb08] sm:$0xff] }
 0x403   : > { %v5268_v16 = vmul.f32 0.5, %v12649_v47  ;;  %v10190_v43 = vcombine.low %v5758_v29, %v5762_v0 }
 0x404   : > { %v5324_v58 = vadd.f32 %v5308_v24, %v12638_v15  ;;  %v5315_v53 = vmul.f32 %v5299_v14, %v12642_v18  ;;  %v5300_v27 = vmul.f32 %v5284_v25, %v12649_v47  ;;  %8758 = vmatpush1.bf16.msra.mxu0 %v10142_v33  ;;  %v5339_v55 = vmul.f32 0.7978846, %v5323_v19 }
 0x405   : > { %8759 = vmatprep.subr.bf16.mxu0 %v10135_v46  ;;  %v5260_v33 = vmul.f32 0.5, %v12638_v15  ;;  %v5778_v46 = vld [vmem:[%s11639_s28 + $0xb28] sm:$0xff]  ;;  %v5259_v19 = vmul.f32 0.5, %v12633_v40  ;;  %v10214_v14 = vcombine.low %v5782_v28, %v5786_v30  ;;  %v5479_v28 = vld [vmem:[%s11639_s28 + $0x1d0] sm:$0xff] }
 0x406   : > { %v5340_v34 = vmul.f32 0.7978846, %v5324_v58  ;;  %v5331_v37 = vadd.f32 %v5315_v53, %v12642_v18  ;;  %v5316_v60 = vmul.f32 %v5300_v27, %v12649_v47  ;;  %v5598_v18 = vld [vmem:[%s11639_s28 + $0x588] sm:$0xff]  ;;  %v10207_v58 = vcombine.high %v5774_v38, %v5778_v46  ;;  %v5483_v30 = vld [vmem:[%s11639_s28 + $0x1f0] sm:$0xff] }
 0x407   : > { %v5766_v53 = vld [vmem:[%s11639_s28 + $0xac8] sm:$0xff]  ;;  %v10031_v40 = vcombine.high %v5598_v18, %v5602_v23 }
 0x408   : > { %10443 = vtanh.f32 %v5340_v34  ;;  %v5347_v4 = vmul.f32 0.7978846, %v5331_v37  ;;  %v5332_v2 = vadd.f32 %v5316_v60, %v12649_v47  ;;  %8760 = vmatpush1.bf16.msra.mxu0 %v10134_v3  ;;  %v5770_v27 = vld [vmem:[%s11639_s28 + $0xae8] sm:$0xff]  ;;  %v10030_v60 = vcombine.low %v5598_v18, %v5602_v23 }
 0x409   : > { %10445 = vtanh.f32 %v5339_v55  ;;  %8761 = vmatprep.subr.bf16.mxu0 %v10127_v59  ;;  %v10206_v55 = vcombine.low %v5774_v38, %v5778_v46  ;;  %v5590_v59 = vld [vmem:[%s11639_s28 + $0x548] sm:$0xff]  ;;  %v10199_v37 = vcombine.high %v5766_v53, %v5770_v27 }
 0x40a   : > { %10447 = vtanh.f32 %v5347_v4  ;;  %v5348_v56 = vmul.f32 0.7978846, %v5332_v2  ;;  %v5594_v34 = vld [vmem:[%s11639_s28 + $0x568] sm:$0xff]  ;;  %v10198_v2 = vcombine.low %v5766_v53, %v5770_v27  ;;  %v5455_v53 = vld [vmem:[%s11639_s28 + $0x110] sm:$0xff] }
 0x40b   : > { %v10023_v4 = vcombine.high %v5590_v59, %v5594_v34  ;;  %v10022_v26 = vcombine.low %v5590_v59, %v5594_v34  ;;  %v5554_v38 = vld [vmem:[%s11639_s28 + $0x428] sm:$0xff]  ;;  %v5459_v27 = vld [vmem:[%s11639_s28 + $0x130] sm:$0xff] }
 0x40c   : > { %10449 = vtanh.f32 %v5348_v56  ;;  %8762 = vmatpush1.bf16.msra.mxu0 %v10126_v5  ;;  %v5582_v5 = vld [vmem:[%s11639_s28 + $0x508] sm:$0xff]  ;;  %v10191_v56 = vcombine.high %v5758_v29, %v5762_v0  ;;  %v5447_v29 = vld [vmem:[%s11639_s28 + $0xd0] sm:$0xff] }
 0x40d   : > { %8763 = vmatprep.subr.bf16.mxu0 %v10119_v7  ;;  %v5586_v7 = vld [vmem:[%s11639_s28 + $0x528] sm:$0xff]  ;;  %v5451_v0 = vld [vmem:[%s11639_s28 + $0xf0] sm:$0xff] }
 0x40e   : > { %v10015_v42 = vcombine.high %v5582_v5, %v5586_v7  ;;  %v10014_v39 = vcombine.low %v5582_v5, %v5586_v7  ;;  %v5670_v18 = vld [vmem:[%s11639_s28 + $0x7c8] sm:$0xff] }
 0x40f   : > { %v5674_v23 = vld [vmem:[%s11639_s28 + $0x7e8] sm:$0xff] }
 0x410   : > { %8764 = vmatpush1.bf16.msra.mxu0 %v10118_v8  ;;  %v5574_v8 = vld [vmem:[%s11639_s28 + $0x4c8] sm:$0xff] }
 0x411   : > { %8765 = vmatprep.subr.bf16.mxu0 %v10111_v62  ;;  %v5578_v62 = vld [vmem:[%s11639_s28 + $0x4e8] sm:$0xff] }
 0x412   : > { %v10007_v17 = vcombine.high %v5574_v8, %v5578_v62  ;;  %v5662_v59 = vld [vmem:[%s11639_s28 + $0x788] sm:$0xff] }
 0x413   : > { %v5666_v34 = vld [vmem:[%s11639_s28 + $0x7a8] sm:$0xff] }
 0x414   : > { %8766 = vmatpush1.bf16.msra.mxu0 %v10110_v11  ;;  %v5742_v11 = vld [vmem:[%s11639_s28 + $0xa08] sm:$0xff] }
 0x415   : > { %v10444_v13 = vpop.eup %10443  ;;  %8767 = vmatprep.subr.bf16.mxu0 %v10231_v6  ;;  %v5746_v6 = vld [vmem:[%s11639_s28 + $0xa28] sm:$0xff] }
 0x416   : > { %v10446_v10 = vpop.eup %10445  ;;  %v5372_v48 = vadd.f32 1.0, %v10444_v13  ;;  %v5570_v13 = vld [vmem:[%s11639_s28 + $0x4a8] sm:$0xff] }
 0x417   : > { %v10448_v31 = vpop.eup %10447  ;;  %v5371_v51 = vadd.f32 1.0, %v10446_v10  ;;  %v10006_v10 = vcombine.low %v5574_v8, %v5578_v62  ;;  %v5654_v5 = vld [vmem:[%s11639_s28 + $0x748] sm:$0xff] }
 0x418   : > { %8768 = vmatpush2.bf16.msra.mxu0 %v10230_v41  ;;  %v5379_v45 = vadd.f32 1.0, %v10448_v31  ;;  %v5388_v25 = vmul.f32 %v5372_v48, %v5260_v33  ;;  %v5566_v41 = vld [vmem:[%s11639_s28 + $0x488] sm:$0xff] }
 0x419   : > { %v10450_v35 = vpop.eup %10449  ;;  %8769 = vmatprep.subr.bf16.mxu0 %v10223_v22  ;;  %v5387_v15 = vmul.f32 %v5371_v51, %v5259_v19  ;;  %v10175_v22 = vcombine.high %v5742_v11, %v5746_v6  ;;  %v9999_v31 = vcombine.high %v5566_v41, %v5570_v13  ;;  %v5558_v48 = vld [vmem:[%s11639_s28 + $0x448] sm:$0xff]  ;;  %v5475_v51 = vld [vmem:[%s11639_s28 + $0x1b0] sm:$0xff] }
 0x41a   : > { %v5380_v21 = vadd.f32 1.0, %v10450_v35  ;;  %v5395_v24 = vmul.f32 %v5379_v45, %v5267_v63  ;;  %v5562_v45 = vld [vmem:[%s11639_s28 + $0x468] sm:$0xff]  ;;  %v9913_v35 = vcombine.high %v5479_v28, %v5483_v30  ;;  %v5471_v63 = vld [vmem:[%s11639_s28 + $0x190] sm:$0xff] }
 0x41b   : > { %v9991_v33 = vcombine.high %v5558_v48, %v5562_v45  ;;  %v9905_v46 = vcombine.high %v5471_v63, %v5475_v51  ;;  %v9990_v19 = vcombine.low %v5558_v48, %v5562_v45  ;;  %v5658_v7 = vld [vmem:[%s11639_s28 + $0x768] sm:$0xff] }
 0x41c   : > { %8770 = vmatpush2.bf16.msra.mxu0 %v10222_v32  ;;  %v5396_v50 = vmul.f32 %v5380_v21, %v5268_v16  ;;  %v12685_v3 = vpack.c.bf16 %v5395_v24, %v5387_v15  ;;  %v10174_v32 = vcombine.low %v5742_v11, %v5746_v6  ;;  %v9912_v16 = vcombine.low %v5479_v28, %v5483_v30  ;;  %v5550_v21 = vld [vmem:[%s11639_s28 + $0x408] sm:$0xff]  ;;  %v5463_v24 = vld [vmem:[%s11639_s28 + $0x150] sm:$0xff] }
 0x41d   : > { %8771 = vmatprep.subr.bf16.mxu0 %v10215_v9  ;;  %v9998_v9 = vcombine.low %v5566_v41, %v5570_v13  ;;  %v5646_v8 = vld [vmem:[%s11639_s28 + $0x708] sm:$0xff]  ;;  %v5431_v11 = vld [vmem:[%s11639_s28 + $0x50] sm:$0xff] }
 0x41e   : > { %v12681_v47 = vpack.c.bf16 %v5396_v50, %v5388_v25  ;;  %v9983_v25 = vcombine.high %v5550_v21, %v5554_v38  ;;  %v9904_v50 = vcombine.low %v5471_v63, %v5475_v51  ;;  %v5650_v62 = vld [vmem:[%s11639_s28 + $0x728] sm:$0xff]  ;;  %v5435_v6 = vld [vmem:[%s11639_s28 + $0x70] sm:$0xff] }
 0x41f   : > { %v5638_v41 = vld [vmem:[%s11639_s28 + $0x6c8] sm:$0xff]  ;;  %v5423_v28 = vld [vmem:[%s11639_s28 + $0x10] sm:$0xff] }
 0x420   : > { %8654 = vmatprep.mubr.bf16.mxu1 %v12681_v47  ;;  %8772 = vmatpush2.bf16.msra.mxu0 %v10214_v14  ;;  %v5467_v14 = vld [vmem:[%s11639_s28 + $0x170] sm:$0xff]  ;;  %v5642_v13 = vld [vmem:[%s11639_s28 + $0x6e8] sm:$0xff] }
 0x421   : > { %8655 = vmatmul.mubr.bf16.vlgmr.msra.gmra.mxu1 %v12685_v3  ;;  %8773 = vmatprep.subr.bf16.mxu0 %v10207_v58  ;;  %v9897_v15 = vcombine.high %v5463_v24, %v5467_v14  ;;  %v9982_v58 = vcombine.low %v5550_v21, %v5554_v38  ;;  %v5427_v30 = vld [vmem:[%s11639_s28 + $0x30] sm:$0xff]  ;;  %v5630_v48 = vld [vmem:[%s11639_s28 + $0x688] sm:$0xff] }
 0x422   : > { %8709 = vmatpush1.bf16.msra.mxu1 %v10038_v49  ;;  %8740 = vmatprep.mubr.bf16.mxu1 %v12404_v57  ;;  %v5754_v49 = vld [vmem:[%s11639_s28 + $0xa68] sm:$0xff]  ;;  %v5543_v63 = vld [vmem:[%s11639_s28 + $0x3d0] sm:$0xff] }
 0x423   : > { %8710 = vmatprep.subr.bf16.mxu1 %v10031_v40  ;;  %v10183_v61 = vcombine.high %v5750_v44, %v5754_v49  ;;  %v10182_v20 = vcombine.low %v5750_v44, %v5754_v49  ;;  %v10103_v40 = vcombine.high %v5670_v18, %v5674_v23  ;;  %v5439_v44 = vld [vmem:[%s11639_s28 + $0x90] sm:$0xff]  ;;  %v5634_v45 = vld [vmem:[%s11639_s28 + $0x6a8] sm:$0xff] }
 0x424   : > { %8774 = vmatpush2.bf16.msra.mxu0 %v10206_v55  ;;  %v9896_v55 = vcombine.low %v5463_v24, %v5467_v14  ;;  %v5443_v49 = vld [vmem:[%s11639_s28 + $0xb0] sm:$0xff]  ;;  %v5622_v21 = vld [vmem:[%s11639_s28 + $0x648] sm:$0xff] }
 0x425   : > { %8775 = vmatprep.subr.bf16.mxu0 %v10199_v37  ;;  %v9889_v37 = vcombine.high %v5455_v53, %v5459_v27  ;;  %v5547_v51 = vld [vmem:[%s11639_s28 + $0x3f0] sm:$0xff]  ;;  %v5626_v38 = vld [vmem:[%s11639_s28 + $0x668] sm:$0xff] }
 0x426   : > { %8711 = vmatpush1.bf16.msra.mxu1 %v10030_v60  ;;  %v10102_v60 = vcombine.low %v5670_v18, %v5674_v23  ;;  %v5535_v24 = vld [vmem:[%s11639_s28 + $0x390] sm:$0xff]  ;;  %v5614_v18 = vld [vmem:[%s11639_s28 + $0x608] sm:$0xff] }
 0x427   : > { %8712 = vmatprep.subr.bf16.mxu1 %v10023_v4  ;;  %v10095_v4 = vcombine.high %v5662_v59, %v5666_v34  ;;  %v5539_v14 = vld [vmem:[%s11639_s28 + $0x3b0] sm:$0xff]  ;;  %v5618_v23 = vld [vmem:[%s11639_s28 + $0x628] sm:$0xff] }
 0x428   : > { %8776 = vmatpush2.bf16.msra.mxu0 %v10198_v2  ;;  %v9888_v2 = vcombine.low %v5455_v53, %v5459_v27  ;;  %v5527_v53 = vld [vmem:[%s11639_s28 + $0x350] sm:$0xff] }
 0x429   : > { %8777 = vmatprep.subr.bf16.mxu0 %v10191_v56  ;;  %v9881_v56 = vcombine.high %v5447_v29, %v5451_v0  ;;  %v5531_v27 = vld [vmem:[%s11639_s28 + $0x370] sm:$0xff] }
 0x42a   : > { %8713 = vmatpush1.bf16.msra.mxu1 %v10022_v26  ;;  %v10094_v26 = vcombine.low %v5662_v59, %v5666_v34  ;;  %v5862_v59 = vld [vmem:[%s11639_s28 + $0xdc8] sm:$0xff] }
 0x42b   : > { %8714 = vmatprep.subr.bf16.mxu1 %v10015_v42  ;;  %v10087_v42 = vcombine.high %v5654_v5, %v5658_v7  ;;  %v5866_v34 = vld [vmem:[%s11639_s28 + $0xde8] sm:$0xff] }
 0x42c   : > { %8778 = vmatpush2.bf16.msra.mxu0 %v10190_v43  ;;  %v9880_v43 = vcombine.low %v5447_v29, %v5451_v0  ;;  %v5519_v29 = vld [vmem:[%s11639_s28 + $0x310] sm:$0xff] }
 0x42d   : > { %8779 = vmatprep.subr.bf16.mxu0 %v10183_v61  ;;  %v9873_v61 = vcombine.high %v5439_v44, %v5443_v49  ;;  %v5523_v0 = vld [vmem:[%s11639_s28 + $0x330] sm:$0xff] }
 0x42e   : > { %8715 = vmatpush1.bf16.msra.mxu1 %v10014_v39  ;;  %v10086_v39 = vcombine.low %v5654_v5, %v5658_v7  ;;  %v5854_v5 = vld [vmem:[%s11639_s28 + $0xd88] sm:$0xff] }
 0x42f   : > { %8716 = vmatprep.subr.bf16.mxu1 %v10007_v17  ;;  %v10079_v17 = vcombine.high %v5646_v8, %v5650_v62  ;;  %v5858_v7 = vld [vmem:[%s11639_s28 + $0xda8] sm:$0xff] }
 0x430   : > { %8780 = vmatpush2.bf16.msra.mxu0 %v10182_v20  ;;  %v9872_v20 = vcombine.low %v5439_v44, %v5443_v49  ;;  %v5511_v44 = vld [vmem:[%s11639_s28 + $0x2d0] sm:$0xff] }
 0x431   : > { %8781 = vmatprep.subr.bf16.mxu0 %v10175_v22  ;;  %v9865_v22 = vcombine.high %v5431_v11, %v5435_v6  ;;  %v5515_v49 = vld [vmem:[%s11639_s28 + $0x2f0] sm:$0xff] }
 0x432   : > { %8717 = vmatpush1.bf16.msra.mxu1 %v10006_v10  ;;  %v10078_v10 = vcombine.low %v5646_v8, %v5650_v62  ;;  %v5846_v8 = vld [vmem:[%s11639_s28 + $0xd48] sm:$0xff] }
 0x433   : > { %8718 = vmatprep.subr.bf16.mxu1 %v9999_v31  ;;  %v10071_v31 = vcombine.high %v5638_v41, %v5642_v13  ;;  %v5850_v62 = vld [vmem:[%s11639_s28 + $0xd68] sm:$0xff] }
 0x434   : > { %8782 = vmatpush2.bf16.msra.mxu0 %v10174_v32  ;;  %v9864_v32 = vcombine.low %v5431_v11, %v5435_v6  ;;  %v5503_v11 = vld [vmem:[%s11639_s28 + $0x290] sm:$0xff] }
 0x435   : > { %8837 = vmatprep.subr.bf16.mxu0 %v9913_v35  ;;  %v9857_v35 = vcombine.high %v5423_v28, %v5427_v30  ;;  %v5507_v6 = vld [vmem:[%s11639_s28 + $0x2b0] sm:$0xff] }
 0x436   : > { %8719 = vmatpush1.bf16.msra.mxu1 %v9998_v9  ;;  %v10070_v9 = vcombine.low %v5638_v41, %v5642_v13  ;;  %v5838_v41 = vld [vmem:[%s11639_s28 + $0xd08] sm:$0xff] }
 0x437   : > { %8784 = vmatmul.mubr.bf16.vlgmr.msra.gmra.mxu0 %v12590_v12  ;;  %8720 = vmatprep.subr.bf16.mxu1 %v9991_v33  ;;  %v10063_v33 = vcombine.high %v5630_v48, %v5634_v45  ;;  %v5842_v13 = vld [vmem:[%s11639_s28 + $0xd28] sm:$0xff] }
 0x438   : > { %8838 = vmatpush1.bf16.msra.mxu0 %v9912_v16  ;;  %8869 = vmatprep.mubr.bf16.mxu0 %v12399_v54  ;;  %v9856_v16 = vcombine.low %v5423_v28, %v5427_v30  ;;  %v5495_v28 = vld [vmem:[%s11639_s28 + $0x250] sm:$0xff] }
 0x439   : > { %8839 = vmatprep.subr.bf16.mxu0 %v9905_v46  ;;  %v9977_v46 = vcombine.high %v5543_v63, %v5547_v51  ;;  %v5499_v30 = vld [vmem:[%s11639_s28 + $0x270] sm:$0xff] }
 0x43a   : > { %8721 = vmatpush1.bf16.msra.mxu1 %v9990_v19  ;;  %v10062_v19 = vcombine.low %v5630_v48, %v5634_v45  ;;  %v5830_v48 = vld [vmem:[%s11639_s28 + $0xcc8] sm:$0xff] }
 0x43b   : > { %8722 = vmatprep.subr.bf16.mxu1 %v9983_v25  ;;  %v10055_v25 = vcombine.high %v5622_v21, %v5626_v38  ;;  %v5834_v45 = vld [vmem:[%s11639_s28 + $0xce8] sm:$0xff] }
 0x43c   : > { %8840 = vmatpush1.bf16.msra.mxu0 %v9904_v50  ;;  %v9976_v50 = vcombine.low %v5543_v63, %v5547_v51  ;;  %v5487_v63 = vld [vmem:[%s11639_s28 + $0x210] sm:$0xff] }
 0x43d   : > { %8841 = vmatprep.subr.bf16.mxu0 %v9897_v15  ;;  %v9969_v15 = vcombine.high %v5535_v24, %v5539_v14  ;;  %v5491_v51 = vld [vmem:[%s11639_s28 + $0x230] sm:$0xff] }
 0x43e   : > { %8723 = vmatpush1.bf16.msra.mxu1 %v9982_v58  ;;  %v10054_v58 = vcombine.low %v5622_v21, %v5626_v38  ;;  %v5822_v21 = vld [vmem:[%s11639_s28 + $0xc88] sm:$0xff] }
 0x43f   : > { %8724 = vmatprep.subr.bf16.mxu1 %v10103_v40  ;;  %v10047_v40 = vcombine.high %v5614_v18, %v5618_v23  ;;  %v5826_v38 = vld [vmem:[%s11639_s28 + $0xca8] sm:$0xff] }
 0x440   : > { %8842 = vmatpush1.bf16.msra.mxu0 %v9896_v55  ;;  %v9968_v55 = vcombine.low %v5535_v24, %v5539_v14  ;;  %v5735_v24 = vld [vmem:[%s11639_s28 + $0x9d0] sm:$0xff] }
 0x441   : > { %8843 = vmatprep.subr.bf16.mxu0 %v9889_v37  ;;  %v9961_v37 = vcombine.high %v5527_v53, %v5531_v27  ;;  %v5739_v14 = vld [vmem:[%s11639_s28 + $0x9f0] sm:$0xff] }
 0x442   : > { %8725 = vmatpush2.bf16.msra.mxu1 %v10102_v60  ;;  %v10046_v60 = vcombine.low %v5614_v18, %v5618_v23  ;;  %v5814_v18 = vld [vmem:[%s11639_s28 + $0xc48] sm:$0xff] }
 0x443   : > { %8726 = vmatprep.subr.bf16.mxu1 %v10095_v4  ;;  %v10295_v4 = vcombine.high %v5862_v59, %v5866_v34  ;;  %v5818_v23 = vld [vmem:[%s11639_s28 + $0xc68] sm:$0xff] }
 0x444   : > { %8844 = vmatpush1.bf16.msra.mxu0 %v9888_v2  ;;  %v9960_v2 = vcombine.low %v5527_v53, %v5531_v27  ;;  %v5727_v53 = vld [vmem:[%s11639_s28 + $0x990] sm:$0xff] }
 0x445   : > { %8845 = vmatprep.subr.bf16.mxu0 %v9881_v56  ;;  %v9953_v56 = vcombine.high %v5519_v29, %v5523_v0  ;;  %v5731_v27 = vld [vmem:[%s11639_s28 + $0x9b0] sm:$0xff] }
 0x446   : > { %8727 = vmatpush2.bf16.msra.mxu1 %v10094_v26  ;;  %v10294_v26 = vcombine.low %v5862_v59, %v5866_v34  ;;  %v5806_v59 = vld [vmem:[%s11639_s28 + $0xc08] sm:$0xff] }
 0x447   : > { %8728 = vmatprep.subr.bf16.mxu1 %v10087_v42  ;;  %v10287_v42 = vcombine.high %v5854_v5, %v5858_v7  ;;  %v5810_v34 = vld [vmem:[%s11639_s28 + $0xc28] sm:$0xff] }
 0x448   : > { %8846 = vmatpush1.bf16.msra.mxu0 %v9880_v43  ;;  %v9952_v43 = vcombine.low %v5519_v29, %v5523_v0  ;;  %v5719_v29 = vld [vmem:[%s11639_s28 + $0x950] sm:$0xff] }
 0x449   : > { %8847 = vmatprep.subr.bf16.mxu0 %v9873_v61  ;;  %v9945_v61 = vcombine.high %v5511_v44, %v5515_v49  ;;  %v5723_v0 = vld [vmem:[%s11639_s28 + $0x970] sm:$0xff] }
 0x44a   : > { %8729 = vmatpush2.bf16.msra.mxu1 %v10086_v39  ;;  %v10286_v39 = vcombine.low %v5854_v5, %v5858_v7  ;;  %v5926_v5 = vld [vmem:[%s11639_s28 + $0xfc8] sm:$0xff] }
 0x44b   : > { %8730 = vmatprep.subr.bf16.mxu1 %v10079_v17  ;;  %v10279_v17 = vcombine.high %v5846_v8, %v5850_v62  ;;  %v5930_v7 = vld [vmem:[%s11639_s28 + $0xfe8] sm:$0xff] }
 0x44c   : > { %8848 = vmatpush1.bf16.msra.mxu0 %v9872_v20  ;;  %v9944_v20 = vcombine.low %v5511_v44, %v5515_v49  ;;  %v5711_v44 = vld [vmem:[%s11639_s28 + $0x910] sm:$0xff] }
 0x44d   : > { %8849 = vmatprep.subr.bf16.mxu0 %v9865_v22  ;;  %v9937_v22 = vcombine.high %v5503_v11, %v5507_v6  ;;  %v5715_v49 = vld [vmem:[%s11639_s28 + $0x930] sm:$0xff] }
 0x44e   : > { %8731 = vmatpush2.bf16.msra.mxu1 %v10078_v10  ;;  %v10278_v10 = vcombine.low %v5846_v8, %v5850_v62  ;;  %v5918_v8 = vld [vmem:[%s11639_s28 + $0xf88] sm:$0xff] }
 0x44f   : > { %8732 = vmatprep.subr.bf16.mxu1 %v10071_v31  ;;  %v10271_v31 = vcombine.high %v5838_v41, %v5842_v13  ;;  %v5922_v62 = vld [vmem:[%s11639_s28 + $0xfa8] sm:$0xff] }
 0x450   : > { %8850 = vmatpush1.bf16.msra.mxu0 %v9864_v32  ;;  %v9936_v32 = vcombine.low %v5503_v11, %v5507_v6  ;;  %v5703_v11 = vld [vmem:[%s11639_s28 + $0x8d0] sm:$0xff] }
 0x451   : > { %8851 = vmatprep.subr.bf16.mxu0 %v9857_v35  ;;  %v9929_v35 = vcombine.high %v5495_v28, %v5499_v30  ;;  %v5707_v6 = vld [vmem:[%s11639_s28 + $0x8f0] sm:$0xff] }
 0x452   : > { %8733 = vmatpush2.bf16.msra.mxu1 %v10070_v9  ;;  %v10270_v9 = vcombine.low %v5838_v41, %v5842_v13  ;;  %v5910_v41 = vld [vmem:[%s11639_s28 + $0xf48] sm:$0xff] }
 0x453   : > { %8734 = vmatprep.subr.bf16.mxu1 %v10063_v33  ;;  %v10263_v33 = vcombine.high %v5830_v48, %v5834_v45  ;;  %v5914_v13 = vld [vmem:[%s11639_s28 + $0xf68] sm:$0xff] }
 0x454   : > { %8852 = vmatpush1.bf16.msra.mxu0 %v9856_v16  ;;  %v9928_v16 = vcombine.low %v5495_v28, %v5499_v30  ;;  %v5695_v28 = vld [vmem:[%s11639_s28 + $0x890] sm:$0xff] }
 0x455   : > { %8853 = vmatprep.subr.bf16.mxu0 %v9977_v46  ;;  %v9921_v46 = vcombine.high %v5487_v63, %v5491_v51  ;;  %v5699_v30 = vld [vmem:[%s11639_s28 + $0x8b0] sm:$0xff] }
 0x456   : > { %8735 = vmatpush2.bf16.msra.mxu1 %v10062_v19  ;;  %v10262_v19 = vcombine.low %v5830_v48, %v5834_v45  ;;  %v5902_v48 = vld [vmem:[%s11639_s28 + $0xf08] sm:$0xff] }
 0x457   : > { %8736 = vmatprep.subr.bf16.mxu1 %v10055_v25  ;;  %v10255_v25 = vcombine.high %v5822_v21, %v5826_v38  ;;  %v5906_v45 = vld [vmem:[%s11639_s28 + $0xf28] sm:$0xff] }
 0x458   : > { %8854 = vmatpush2.bf16.msra.mxu0 %v9976_v50  ;;  %v9920_v50 = vcombine.low %v5487_v63, %v5491_v51  ;;  %v5687_v63 = vld [vmem:[%s11639_s28 + $0x850] sm:$0xff] }
 0x459   : > { %8855 = vmatprep.subr.bf16.mxu0 %v9969_v15  ;;  %v10169_v15 = vcombine.high %v5735_v24, %v5739_v14  ;;  %v5691_v51 = vld [vmem:[%s11639_s28 + $0x870] sm:$0xff] }
 0x45a   : > { %8737 = vmatpush2.bf16.msra.mxu1 %v10054_v58  ;;  %v10254_v58 = vcombine.low %v5822_v21, %v5826_v38  ;;  %v5894_v21 = vld [vmem:[%s11639_s28 + $0xec8] sm:$0xff] }
 0x45b   : > { %8738 = vmatprep.subr.bf16.mxu1 %v10047_v40  ;;  %v10247_v40 = vcombine.high %v5814_v18, %v5818_v23  ;;  %v5898_v38 = vld [vmem:[%s11639_s28 + $0xee8] sm:$0xff] }
 0x45c   : > { %8856 = vmatpush2.bf16.msra.mxu0 %v9968_v55  ;;  %v10168_v55 = vcombine.low %v5735_v24, %v5739_v14  ;;  %v5679_v24 = vld [vmem:[%s11639_s28 + $0x810] sm:$0xff] }
 0x45d   : > { %8857 = vmatprep.subr.bf16.mxu0 %v9961_v37  ;;  %v10161_v37 = vcombine.high %v5727_v53, %v5731_v27  ;;  %v5683_v14 = vld [vmem:[%s11639_s28 + $0x830] sm:$0xff] }
 0x45e   : > { %8739 = vmatpush2.bf16.msra.mxu1 %v10046_v60  ;;  %v10246_v60 = vcombine.low %v5814_v18, %v5818_v23  ;;  %v5886_v18 = vld [vmem:[%s11639_s28 + $0xe88] sm:$0xff] }
 0x45f   : > { %8794 = vmatprep.subr.bf16.mxu1 %v10295_v4  ;;  %v10239_v4 = vcombine.high %v5806_v59, %v5810_v34  ;;  %v5890_v23 = vld [vmem:[%s11639_s28 + $0xea8] sm:$0xff] }
 0x460   : > { %8858 = vmatpush2.bf16.msra.mxu0 %v9960_v2  ;;  %v10160_v2 = vcombine.low %v5727_v53, %v5731_v27  ;;  %v5799_v53 = vld [vmem:[%s11639_s28 + $0xbd0] sm:$0xff] }
 0x461   : > { %8741 = vmatmul.mubr.bf16.vlgmr.msra.gmra.mxu1 %v12366_v36  ;;  %8859 = vmatprep.subr.bf16.mxu0 %v9953_v56  ;;  %v10153_v56 = vcombine.high %v5719_v29, %v5723_v0  ;;  %v5803_v27 = vld [vmem:[%s11639_s28 + $0xbf0] sm:$0xff] }
 0x462   : > { %8795 = vmatpush1.bf16.msra.mxu1 %v10294_v26  ;;  %8826 = vmatprep.mubr.bf16.mxu1 %v12681_v47  ;;  %v10238_v26 = vcombine.low %v5806_v59, %v5810_v34  ;;  %v5878_v59 = vld [vmem:[%s11639_s28 + $0xe48] sm:$0xff] }
 0x463   : > { %8796 = vmatprep.subr.bf16.mxu1 %v10287_v42  ;;  %v10359_v42 = vcombine.high %v5926_v5, %v5930_v7  ;;  %v5882_v34 = vld [vmem:[%s11639_s28 + $0xe68] sm:$0xff] }
 0x464   : > { %8860 = vmatpush2.bf16.msra.mxu0 %v9952_v43  ;;  %v10152_v43 = vcombine.low %v5719_v29, %v5723_v0  ;;  %v5791_v29 = vld [vmem:[%s11639_s28 + $0xb90] sm:$0xff] }
 0x465   : > { %8861 = vmatprep.subr.bf16.mxu0 %v9945_v61  ;;  %v10145_v61 = vcombine.high %v5711_v44, %v5715_v49  ;;  %v5795_v0 = vld [vmem:[%s11639_s28 + $0xbb0] sm:$0xff] }
 0x466   : > { %8797 = vmatpush1.bf16.msra.mxu1 %v10286_v39  ;;  %v10358_v39 = vcombine.low %v5926_v5, %v5930_v7  ;;  %v5870_v5 = vld [vmem:[%s11639_s28 + $0xe08] sm:$0xff] }
 0x467   : > { %8798 = vmatprep.subr.bf16.mxu1 %v10279_v17  ;;  %v10351_v17 = vcombine.high %v5918_v8, %v5922_v62  ;;  %v5874_v7 = vld [vmem:[%s11639_s28 + $0xe28] sm:$0xff] }
 0x468   : > { %8862 = vmatpush2.bf16.msra.mxu0 %v9944_v20  ;;  %v10144_v20 = vcombine.low %v5711_v44, %v5715_v49  ;;  %v5783_v44 = vld [vmem:[%s11639_s28 + $0xb50] sm:$0xff] }
 0x469   : > { %8863 = vmatprep.subr.bf16.mxu0 %v9937_v22  ;;  %v10137_v22 = vcombine.high %v5703_v11, %v5707_v6  ;;  %v5787_v49 = vld [vmem:[%s11639_s28 + $0xb70] sm:$0xff] }
 0x46a   : > { %8799 = vmatpush1.bf16.msra.mxu1 %v10278_v10  ;;  %v10350_v10 = vcombine.low %v5918_v8, %v5922_v62  ;;  %v5607_v8 = vld [vmem:[%s11639_s28 + $0x5d0] sm:$0xff] }
 0x46b   : > { %8800 = vmatprep.subr.bf16.mxu1 %v10271_v31  ;;  %v10343_v31 = vcombine.high %v5910_v41, %v5914_v13  ;;  %v5611_v62 = vld [vmem:[%s11639_s28 + $0x5f0] sm:$0xff] }
 0x46c   : > { %8864 = vmatpush2.bf16.msra.mxu0 %v9936_v32  ;;  %v10136_v32 = vcombine.low %v5703_v11, %v5707_v6  ;;  %v5775_v11 = vld [vmem:[%s11639_s28 + $0xb10] sm:$0xff] }
 0x46d   : > { %8865 = vmatprep.subr.bf16.mxu0 %v9929_v35  ;;  %v10129_v35 = vcombine.high %v5695_v28, %v5699_v30  ;;  %v5779_v6 = vld [vmem:[%s11639_s28 + $0xb30] sm:$0xff] }
 0x46e   : > { %8801 = vmatpush1.bf16.msra.mxu1 %v10270_v9  ;;  %v10342_v9 = vcombine.low %v5910_v41, %v5914_v13  ;;  %v5599_v41 = vld [vmem:[%s11639_s28 + $0x590] sm:$0xff] }
 0x46f   : > { %8802 = vmatprep.subr.bf16.mxu1 %v10263_v33  ;;  %v10335_v33 = vcombine.high %v5902_v48, %v5906_v45  ;;  %v5603_v13 = vld [vmem:[%s11639_s28 + $0x5b0] sm:$0xff] }
 0x470   : > { %8866 = vmatpush2.bf16.msra.mxu0 %v9928_v16  ;;  %v10128_v16 = vcombine.low %v5695_v28, %v5699_v30  ;;  %v5767_v28 = vld [vmem:[%s11639_s28 + $0xad0] sm:$0xff] }
 0x471   : > { %8867 = vmatprep.subr.bf16.mxu0 %v9921_v46  ;;  %v10121_v46 = vcombine.high %v5687_v63, %v5691_v51  ;;  %v5771_v30 = vld [vmem:[%s11639_s28 + $0xaf0] sm:$0xff] }
 0x472   : > { %8803 = vmatpush1.bf16.msra.mxu1 %v10262_v19  ;;  %v10334_v19 = vcombine.low %v5902_v48, %v5906_v45  ;;  %v5591_v48 = vld [vmem:[%s11639_s28 + $0x550] sm:$0xff] }
 0x473   : > { %8804 = vmatprep.subr.bf16.mxu1 %v10255_v25  ;;  %v10327_v25 = vcombine.high %v5894_v21, %v5898_v38  ;;  %v5595_v45 = vld [vmem:[%s11639_s28 + $0x570] sm:$0xff] }
 0x474   : > { %8868 = vmatpush2.bf16.msra.mxu0 %v9920_v50  ;;  %v10120_v50 = vcombine.low %v5687_v63, %v5691_v51  ;;  %v5759_v63 = vld [vmem:[%s11639_s28 + $0xa90] sm:$0xff] }
 0x475   : > { %8923 = vmatprep.subr.bf16.mxu0 %v10169_v15  ;;  %v10113_v15 = vcombine.high %v5679_v24, %v5683_v14  ;;  %v5763_v51 = vld [vmem:[%s11639_s28 + $0xab0] sm:$0xff] }
 0x476   : > { %8805 = vmatpush1.bf16.msra.mxu1 %v10254_v58  ;;  %v10326_v58 = vcombine.low %v5894_v21, %v5898_v38  ;;  %v5583_v21 = vld [vmem:[%s11639_s28 + $0x510] sm:$0xff] }
 0x477   : > { %8870 = vmatmul.mubr.bf16.vlgmr.msra.gmra.mxu0 %v12148_v1  ;;  %8806 = vmatprep.subr.bf16.mxu1 %v10247_v40  ;;  %v10319_v40 = vcombine.high %v5886_v18, %v5890_v23  ;;  %v5587_v38 = vld [vmem:[%s11639_s28 + $0x530] sm:$0xff] }
 0x478   : > { %8924 = vmatpush1.bf16.msra.mxu0 %v10168_v55  ;;  %8955 = vmatprep.mubr.bf16.mxu0 %v12555_v52  ;;  %v10112_v55 = vcombine.low %v5679_v24, %v5683_v14  ;;  %v5751_v24 = vld [vmem:[%s11639_s28 + $0xa50] sm:$0xff] }
 0x479   : > { %8925 = vmatprep.subr.bf16.mxu0 %v10161_v37  ;;  %v10233_v37 = vcombine.high %v5799_v53, %v5803_v27  ;;  %v5755_v14 = vld [vmem:[%s11639_s28 + $0xa70] sm:$0xff] }
 0x47a   : > { %8807 = vmatpush1.bf16.msra.mxu1 %v10246_v60  ;;  %v10318_v60 = vcombine.low %v5886_v18, %v5890_v23  ;;  %v5575_v18 = vld [vmem:[%s11639_s28 + $0x4d0] sm:$0xff] }
 0x47b   : > { %8808 = vmatprep.subr.bf16.mxu1 %v10239_v4  ;;  %v10311_v4 = vcombine.high %v5878_v59, %v5882_v34  ;;  %v5579_v23 = vld [vmem:[%s11639_s28 + $0x4f0] sm:$0xff] }
 0x47c   : > { %8926 = vmatpush1.bf16.msra.mxu0 %v10160_v2  ;;  %v10232_v2 = vcombine.low %v5799_v53, %v5803_v27  ;;  %v5743_v53 = vld [vmem:[%s11639_s28 + $0xa10] sm:$0xff] }
 0x47d   : > { %8927 = vmatprep.subr.bf16.mxu0 %v10153_v56  ;;  %v10225_v56 = vcombine.high %v5791_v29, %v5795_v0  ;;  %v5747_v27 = vld [vmem:[%s11639_s28 + $0xa30] sm:$0xff] }
 0x47e   : > { %8809 = vmatpush1.bf16.msra.mxu1 %v10238_v26  ;;  %v10310_v26 = vcombine.low %v5878_v59, %v5882_v34  ;;  %v5567_v59 = vld [vmem:[%s11639_s28 + $0x490] sm:$0xff] }
 0x47f   : > { %8810 = vmatprep.subr.bf16.mxu1 %v10359_v42  ;;  %v10303_v42 = vcombine.high %v5870_v5, %v5874_v7  ;;  %v5571_v34 = vld [vmem:[%s11639_s28 + $0x4b0] sm:$0xff] }
 0x480   : > { %8928 = vmatpush1.bf16.msra.mxu0 %v10152_v43  ;;  %v10224_v43 = vcombine.low %v5791_v29, %v5795_v0  ;;  %v5480_v29 = vld [vmem:[%s11639_s28 + $0x1d8] sm:$0xff] }
 0x481   : > { %8929 = vmatprep.subr.bf16.mxu0 %v10145_v61  ;;  %v10217_v61 = vcombine.high %v5783_v44, %v5787_v49  ;;  %v5484_v0 = vld [vmem:[%s11639_s28 + $0x1f8] sm:$0xff] }
 0x482   : > { %8811 = vmatpush2.bf16.msra.mxu1 %v10358_v39  ;;  %v10302_v39 = vcombine.low %v5870_v5, %v5874_v7  ;;  %v5559_v5 = vld [vmem:[%s11639_s28 + $0x450] sm:$0xff] }
 0x483   : > { %8812 = vmatprep.subr.bf16.mxu1 %v10351_v17  ;;  %v10041_v17 = vcombine.high %v5607_v8, %v5611_v62  ;;  %v5563_v7 = vld [vmem:[%s11639_s28 + $0x470] sm:$0xff] }
 0x484   : > { %8930 = vmatpush1.bf16.msra.mxu0 %v10144_v20  ;;  %v10216_v20 = vcombine.low %v5783_v44, %v5787_v49  ;;  %v5472_v44 = vld [vmem:[%s11639_s28 + $0x198] sm:$0xff] }
 0x485   : > { %8931 = vmatprep.subr.bf16.mxu0 %v10137_v22  ;;  %v10209_v22 = vcombine.high %v5775_v11, %v5779_v6  ;;  %v5476_v49 = vld [vmem:[%s11639_s28 + $0x1b8] sm:$0xff] }
 0x486   : > { %8813 = vmatpush2.bf16.msra.mxu1 %v10350_v10  ;;  %v10040_v10 = vcombine.low %v5607_v8, %v5611_v62  ;;  %v5551_v8 = vld [vmem:[%s11639_s28 + $0x410] sm:$0xff] }
 0x487   : > { %8814 = vmatprep.subr.bf16.mxu1 %v10343_v31  ;;  %v10033_v31 = vcombine.high %v5599_v41, %v5603_v13  ;;  %v5555_v62 = vld [vmem:[%s11639_s28 + $0x430] sm:$0xff] }
 0x488   : > { %8932 = vmatpush1.bf16.msra.mxu0 %v10136_v32  ;;  %v10208_v32 = vcombine.low %v5775_v11, %v5779_v6  ;;  %v5464_v11 = vld [vmem:[%s11639_s28 + $0x158] sm:$0xff] }
 0x489   : > { %8933 = vmatprep.subr.bf16.mxu0 %v10129_v35  ;;  %v10201_v35 = vcombine.high %v5767_v28, %v5771_v30  ;;  %v5468_v6 = vld [vmem:[%s11639_s28 + $0x178] sm:$0xff] }
 0x48a   : > { %8815 = vmatpush2.bf16.msra.mxu1 %v10342_v9  ;;  %v10032_v9 = vcombine.low %v5599_v41, %v5603_v13  ;;  %v5671_v41 = vld [vmem:[%s11639_s28 + $0x7d0] sm:$0xff] }
 0x48b   : > { %8816 = vmatprep.subr.bf16.mxu1 %v10335_v33  ;;  %v10025_v33 = vcombine.high %v5591_v48, %v5595_v45  ;;  %v5675_v13 = vld [vmem:[%s11639_s28 + $0x7f0] sm:$0xff] }
 0x48c   : > { %8934 = vmatpush1.bf16.msra.mxu0 %v10128_v16  ;;  %v10200_v16 = vcombine.low %v5767_v28, %v5771_v30  ;;  %v5456_v28 = vld [vmem:[%s11639_s28 + $0x118] sm:$0xff] }
 0x48d   : > { %8935 = vmatprep.subr.bf16.mxu0 %v10121_v46  ;;  %v10193_v46 = vcombine.high %v5759_v63, %v5763_v51  ;;  %v5460_v30 = vld [vmem:[%s11639_s28 + $0x138] sm:$0xff] }
 0x48e   : > { %8817 = vmatpush2.bf16.msra.mxu1 %v10334_v19  ;;  %v10024_v19 = vcombine.low %v5591_v48, %v5595_v45  ;;  %v5663_v48 = vld [vmem:[%s11639_s28 + $0x790] sm:$0xff] }
 0x48f   : > { %8818 = vmatprep.subr.bf16.mxu1 %v10327_v25  ;;  %v10017_v25 = vcombine.high %v5583_v21, %v5587_v38  ;;  %v5667_v45 = vld [vmem:[%s11639_s28 + $0x7b0] sm:$0xff] }
 0x490   : > { %8936 = vmatpush1.bf16.msra.mxu0 %v10120_v50  ;;  %v10192_v50 = vcombine.low %v5759_v63, %v5763_v51  ;;  %v5452_v63 = vld [vmem:[%s11639_s28 + $0xf8] sm:$0xff]  ;;  %v10097_v51 = vcombine.high %v5663_v48, %v5667_v45 }
 0x491   : > { %8937 = vmatprep.subr.bf16.mxu0 %v10113_v15  ;;  %v10185_v15 = vcombine.high %v5751_v24, %v5755_v14 }
 0x492   : > { %8819 = vmatpush2.bf16.msra.mxu1 %v10326_v58  ;;  %v10016_v58 = vcombine.low %v5583_v21, %v5587_v38  ;;  %v5659_v21 = vld [vmem:[%s11639_s28 + $0x770] sm:$0xff] }
 0x493   : > { %8820 = vmatprep.subr.bf16.mxu1 %v10319_v40  ;;  %v10009_v40 = vcombine.high %v5575_v18, %v5579_v23 }
 0x494   : > { %8938 = vmatpush1.bf16.msra.mxu0 %v10112_v55  ;;  %v10184_v55 = vcombine.low %v5751_v24, %v5755_v14  ;;  %v5444_v24 = vld [vmem:[%s11639_s28 + $0xb8] sm:$0xff] }
 0x495   : > { %8939 = vmatprep.subr.bf16.mxu0 %v10233_v37  ;;  %v10177_v37 = vcombine.high %v5743_v53, %v5747_v27 }
 0x496   : > { %8821 = vmatpush2.bf16.msra.mxu1 %v10318_v60  ;;  %v10008_v60 = vcombine.low %v5575_v18, %v5579_v23  ;;  %v5651_v18 = vld [vmem:[%s11639_s28 + $0x730] sm:$0xff] }
 0x497   : > { %8822 = vmatprep.subr.bf16.mxu1 %v10311_v4  ;;  %v10001_v4 = vcombine.high %v5567_v59, %v5571_v34 }
 0x498   : > { %8940 = vmatpush2.bf16.msra.mxu0 %v10232_v2  ;;  %v10176_v2 = vcombine.low %v5743_v53, %v5747_v27  ;;  %v5436_v53 = vld [vmem:[%s11639_s28 + $0x78] sm:$0xff] }
 0x499   : > { %8941 = vmatprep.subr.bf16.mxu0 %v10225_v56  ;;  %v9915_v56 = vcombine.high %v5480_v29, %v5484_v0 }
 0x49a   : > { %8823 = vmatpush2.bf16.msra.mxu1 %v10310_v26  ;;  %v10000_v26 = vcombine.low %v5567_v59, %v5571_v34  ;;  %v5643_v59 = vld [vmem:[%s11639_s28 + $0x6f0] sm:$0xff]  ;;  %v12873_v34 = vpop.f32.mrf.mxu0 }
 0x49b   : > { %8824 = vmatprep.subr.bf16.mxu1 %v10303_v42  ;;  %v9993_v42 = vcombine.high %v5559_v5, %v5563_v7 }
 0x49c   : > { %8942 = vmatpush2.bf16.msra.mxu0 %v10224_v43  ;;  %v9914_v43 = vcombine.low %v5480_v29, %v5484_v0  ;;  %v5424_v29 = vld [vmem:[%s11639_s28 + $0x18] sm:$0xff] }
 0x49d   : > { %8943 = vmatprep.subr.bf16.mxu0 %v10217_v61  ;;  %v9907_v61 = vcombine.high %v5472_v44, %v5476_v49  ;;  %v5428_v0 = vld [vmem:[%s11639_s28 + $0x38] sm:$0xff] }
 0x49e   : > { %8825 = vmatpush2.bf16.msra.mxu1 %v10302_v39  ;;  %v9992_v39 = vcombine.low %v5559_v5, %v5563_v7  ;;  %v5631_v5 = vld [vmem:[%s11639_s28 + $0x690] sm:$0xff] }
 0x49f   : > { %8880 = vmatprep.subr.bf16.mxu1 %v10041_v17  ;;  %v9985_v17 = vcombine.high %v5551_v8, %v5555_v62  ;;  %v5635_v7 = vld [vmem:[%s11639_s28 + $0x6b0] sm:$0xff] }
 0x4a0   : > { %8944 = vmatpush2.bf16.msra.mxu0 %v10216_v20  ;;  %v9906_v20 = vcombine.low %v5472_v44, %v5476_v49  ;;  %v5544_v49 = vld [vmem:[%s11639_s28 + $0x3d8] sm:$0xff] }
 0x4a1   : > { %8827 = vmatmul.mubr.bf16.vlgmr.msra.gmra.mxu1 %v12685_v3  ;;  %8945 = vmatprep.subr.bf16.mxu0 %v10209_v22  ;;  %v9899_v22 = vcombine.high %v5464_v11, %v5468_v6 }
 0x4a2   : > { %8881 = vmatpush1.bf16.msra.mxu1 %v10040_v10  ;;  %8912 = vmatprep.mubr.bf16.mxu1 %v12404_v57  ;;  %v9984_v10 = vcombine.low %v5551_v8, %v5555_v62  ;;  %v9858_v8 = vcombine.low %v5424_v29, %v5428_v0  ;;  %v5623_v62 = vld [vmem:[%s11639_s28 + $0x650] sm:$0xff] }
 0x4a3   : > { %8882 = vmatprep.subr.bf16.mxu1 %v10033_v31  ;;  %v10105_v31 = vcombine.high %v5671_v41, %v5675_v13 }
 0x4a4   : > { %8946 = vmatpush2.bf16.msra.mxu0 %v10208_v32  ;;  %v9898_v32 = vcombine.low %v5464_v11, %v5468_v6  ;;  %v10064_v6 = vcombine.low %v5631_v5, %v5635_v7 }
 0x4a5   : > { %8947 = vmatprep.subr.bf16.mxu0 %v10201_v35  ;;  %v10104_v35 = vcombine.low %v5671_v41, %v5675_v13  ;;  %v8570_v41 = vpop.f32.mrf.mxu1 }
 0x4a6   : > { %8883 = vmatpush1.bf16.msra.mxu1 %v10032_v9  ;;  %v5448_v9 = vld [vmem:[%s11639_s28 + $0xd8] sm:$0xff] }
 0x4a7   : > { %8884 = vmatprep.subr.bf16.mxu1 %v10025_v33  ;;  %v9890_v33 = vcombine.low %v5456_v28, %v5460_v30  ;;  %v9883_v38 = vcombine.high %v5448_v9, %v5452_v63 }
 0x4a8   : > { %8948 = vmatpush2.bf16.msra.mxu0 %v10200_v16  ;;  %v5655_v16 = vld [vmem:[%s11639_s28 + $0x750] sm:$0xff] }
 0x4a9   : > { %8949 = vmatprep.subr.bf16.mxu0 %v10193_v46  ;;  %v10096_v46 = vcombine.low %v5663_v48, %v5667_v45  ;;  %v10089_v14 = vcombine.high %v5655_v16, %v5659_v21  ;;  %v5528_v48 = vld [vmem:[%s11639_s28 + $0x358] sm:$0xff] }
 0x4aa   : > { %8885 = vmatpush1.bf16.msra.mxu1 %v10024_v19  ;;  %v5440_v19 = vld [vmem:[%s11639_s28 + $0x98] sm:$0xff] }
 0x4ab   : > { %8886 = vmatprep.subr.bf16.mxu1 %v10017_v25  ;;  %v9882_v25 = vcombine.low %v5448_v9, %v5452_v63  ;;  %v9875_v23 = vcombine.high %v5440_v19, %v5444_v24  ;;  %v5532_v45 = vld [vmem:[%s11639_s28 + $0x378] sm:$0xff] }
 0x4ac   : > { %8950 = vmatpush2.bf16.msra.mxu0 %v10192_v50  ;;  %v5647_v50 = vld [vmem:[%s11639_s28 + $0x710] sm:$0xff] }
 0x4ad   : > { %8951 = vmatprep.subr.bf16.mxu0 %v10185_v15  ;;  %v10088_v15 = vcombine.low %v5655_v16, %v5659_v21  ;;  %v10081_v27 = vcombine.high %v5647_v50, %v5651_v18  ;;  %v9963_v16 = vcombine.high %v5528_v48, %v5532_v45 }
 0x4ae   : > { %8887 = vmatpush1.bf16.msra.mxu1 %v10016_v58  ;;  %v5432_v58 = vld [vmem:[%s11639_s28 + $0x58] sm:$0xff] }
 0x4af   : > { %8888 = vmatprep.subr.bf16.mxu1 %v10009_v40  ;;  %v9874_v40 = vcombine.low %v5440_v19, %v5444_v24 }
 0x4b0   : > { %8952 = vmatpush2.bf16.msra.mxu0 %v10184_v55  ;;  %v5639_v55 = vld [vmem:[%s11639_s28 + $0x6d0] sm:$0xff] }
 0x4b1   : > { %8953 = vmatprep.subr.bf16.mxu0 %v10177_v37  ;;  %v9867_v37 = vcombine.high %v5432_v58, %v5436_v53  ;;  %v10072_v44 = vcombine.low %v5639_v55, %v5643_v59 }
 0x4b2   : > { %8889 = vmatpush1.bf16.msra.mxu1 %v10008_v60  ;;  %v10080_v60 = vcombine.low %v5647_v50, %v5651_v18  ;;  %v5855_v50 = vld [vmem:[%s11639_s28 + $0xd90] sm:$0xff] }
 0x4b3   : > { %8890 = vmatprep.subr.bf16.mxu1 %v10001_v4  ;;  %v10073_v4 = vcombine.high %v5639_v55, %v5643_v59  ;;  %v5859_v18 = vld [vmem:[%s11639_s28 + $0xdb0] sm:$0xff] }
 0x4b4   : > { %8954 = vmatpush2.bf16.msra.mxu0 %v10176_v2  ;;  %v9866_v2 = vcombine.low %v5432_v58, %v5436_v53  ;;  %v5512_v53 = vld [vmem:[%s11639_s28 + $0x2d8] sm:$0xff]  ;;  %v10289_v59 = vcombine.high %v5855_v50, %v5859_v18 }
 0x4b5   : > { %9009 = vmatprep.subr.bf16.mxu0 %v9915_v56  ;;  %v12879_v56 = vpop.f32.mrf.mxu0 }
 0x4b6   : > { %8891 = vmatpush1.bf16.msra.mxu1 %v10000_v26  ;;  %v9859_v26 = vcombine.high %v5424_v29, %v5428_v0  ;;  %v5847_v0 = vld [vmem:[%s11639_s28 + $0xd50] sm:$0xff] }
 0x4b7   : > { %8956 = vmatmul.mubr.bf16.vlgmr.msra.gmra.mxu0 %v12590_v12  ;;  %8892 = vmatprep.subr.bf16.mxu1 %v9993_v42  ;;  %v5548_v42 = vld [vmem:[%s11639_s28 + $0x3f8] sm:$0xff] }
 0x4b8   : > { %9010 = vmatpush1.bf16.msra.mxu0 %v9914_v43  ;;  %9041 = vmatprep.mubr.bf16.mxu0 %v12399_v54  ;;  %v9891_v54 = vcombine.high %v5456_v28, %v5460_v30  ;;  %v10065_v43 = vcombine.high %v5631_v5, %v5635_v7  ;;  %v9979_v11 = vcombine.high %v5544_v49, %v5548_v42  ;;  %v5619_v28 = vld [vmem:[%s11639_s28 + $0x630] sm:$0xff] }
 0x4b9   : > { %9011 = vmatprep.subr.bf16.mxu0 %v9907_v61  ;;  %v5627_v61 = vld [vmem:[%s11639_s28 + $0x670] sm:$0xff] }
 0x4ba   : > { %8893 = vmatpush1.bf16.msra.mxu1 %v9992_v39  ;;  %v8531_v39 = vpop.f32.mrf.mxu0  ;;  %v10057_v13 = vcombine.high %v5623_v62, %v5627_v61 }
 0x4bb   : > { %8894 = vmatprep.subr.bf16.mxu1 %v9985_v17  ;;  %v5536_v17 = vld [vmem:[%s11639_s28 + $0x398] sm:$0xff] }
 0x4bc   : > { %9012 = vmatpush1.bf16.msra.mxu0 %v9906_v20  ;;  %v5540_v20 = vld [vmem:[%s11639_s28 + $0x3b8] sm:$0xff]  ;;  %v8533_v30 = vpop.f32.mrf.mxu0 }
 0x4bd   : > { %9013 = vmatprep.subr.bf16.mxu0 %v9899_v22  ;;  %v9978_v22 = vcombine.low %v5544_v49, %v5548_v42  ;;  %v9970_v63 = vcombine.low %v5536_v17, %v5540_v20  ;;  %v5504_v49 = vld [vmem:[%s11639_s28 + $0x298] sm:$0xff] }
 0x4be   : > { %8895 = vmatpush1.bf16.msra.mxu1 %v9984_v10  ;;  %v5615_v10 = vld [vmem:[%s11639_s28 + $0x610] sm:$0xff]  ;;  %v5508_v42 = vld [vmem:[%s11639_s28 + $0x2b8] sm:$0xff] }
 0x4bf   : > { %8896 = vmatprep.subr.bf16.mxu1 %v10105_v31  ;;  %v9971_v31 = vcombine.high %v5536_v17, %v5540_v20  ;;  %v10049_v9 = vcombine.high %v5615_v10, %v5619_v28  ;;  %v10048_v21 = vcombine.low %v5615_v10, %v5619_v28  ;;  %v9939_v28 = vcombine.high %v5504_v49, %v5508_v42 }
 0x4c0   : > { %9014 = vmatpush1.bf16.msra.mxu0 %v9898_v32  ;;  %v10056_v32 = vcombine.low %v5623_v62, %v5627_v61  ;;  %v5398_v62 = vld [vmem:[#allocation3 + $0x8] sm:$0xff] }
 0x4c1   : > { %9015 = vmatprep.subr.bf16.mxu0 %v9891_v54  ;;  %v8572_v54 = vpop.f32.mrf.mxu1 }
 0x4c2   : > { %8897 = vmatpush2.bf16.msra.mxu1 %v10104_v35  ;;  %v8613_v35 = vpop.f32.mrf.mxu0 }
 0x4c3   : > { %8898 = vmatprep.subr.bf16.mxu1 %v10097_v51  ;;  %v5863_v51 = vld [vmem:[%s11639_s28 + $0xdd0] sm:$0xff]  ;;  %v8574_v19 = vpop.f32.mrf.mxu1 }
 0x4c4   : > { %9016 = vmatpush1.bf16.msra.mxu0 %v9890_v33  ;;  %v5867_v33 = vld [vmem:[%s11639_s28 + $0xdf0] sm:$0xff]  ;;  %v8615_v24 = vpop.f32.mrf.mxu0 }
 0x4c5   : > { %9017 = vmatprep.subr.bf16.mxu0 %v9883_v38  ;;  %v5520_v38 = vld [vmem:[%s11639_s28 + $0x318] sm:$0xff]  ;;  %v10296_v58 = vcombine.low %v5863_v51, %v5867_v33 }
 0x4c6   : > { %8899 = vmatpush2.bf16.msra.mxu1 %v10096_v46  ;;  %v5524_v46 = vld [vmem:[%s11639_s28 + $0x338] sm:$0xff]  ;;  %v8617_v55 = vpop.f32.mrf.mxu0 }
 0x4c7   : > { %8900 = vmatprep.subr.bf16.mxu1 %v10089_v14  ;;  %v10297_v14 = vcombine.high %v5863_v51, %v5867_v33  ;;  %v9954_v29 = vcombine.low %v5520_v38, %v5524_v46 }
 0x4c8   : > { %9018 = vmatpush1.bf16.msra.mxu0 %v9882_v25  ;;  %v9962_v25 = vcombine.low %v5528_v48, %v5532_v45  ;;  %v5496_v45 = vld [vmem:[%s11639_s28 + $0x258] sm:$0xff] }
 0x4c9   : > { %9019 = vmatprep.subr.bf16.mxu0 %v9875_v23  ;;  %v9955_v23 = vcombine.high %v5520_v38, %v5524_v46  ;;  %v5835_v38 = vld [vmem:[%s11639_s28 + $0xcf0] sm:$0xff] }
 0x4ca   : > { %8901 = vmatpush2.bf16.msra.mxu1 %v10088_v15  ;;  %v8571_v15 = vadd.f32 %v8570_v41, %v12873_v34  ;;  %v5397_v34 = vld [vmem:[#allocation3] sm:$0xff]  ;;  %v5839_v41 = vld [vmem:[%s11639_s28 + $0xd10] sm:$0xff] }
 0x4cb   : > { %8902 = vmatprep.subr.bf16.mxu1 %v10081_v27  ;;  %v5516_v27 = vld [vmem:[%s11639_s28 + $0x2f8] sm:$0xff] }
 0x4cc   : > { %9020 = vmatpush1.bf16.msra.mxu0 %v9874_v40  ;;  %v8576_v40 = vpop.f32.mrf.mxu1  ;;  %v9947_v7 = vcombine.high %v5512_v53, %v5516_v27  ;;  %v9946_v20 = vcombine.low %v5512_v53, %v5516_v27  ;;  %v5736_v27 = vld [vmem:[%s11639_s28 + $0x9d8] sm:$0xff] }
 0x4cd   : > { %9021 = vmatprep.subr.bf16.mxu0 %v9867_v37  ;;  %v8573_v37 = vadd.f32 %v8572_v54, %v12879_v56  ;;  %v10288_v56 = vcombine.low %v5855_v50, %v5859_v18  ;;  %v5500_v54 = vld [vmem:[%s11639_s28 + $0x278] sm:$0xff] }
 0x4ce   : > { %8903 = vmatpush2.bf16.msra.mxu1 %v10080_v60  ;;  %v8614_v60 = vadd.f32 %v8613_v35, %v8571_v15  ;;  %v5406_v35 = vld [vmem:[#allocation3 + $0x48] sm:$0xff]  ;;  %v9931_v46 = vcombine.high %v5496_v45, %v5500_v54  ;;  %v9930_v18 = vcombine.low %v5496_v45, %v5500_v54  ;;  %v5827_v15 = vld [vmem:[%s11639_s28 + $0xcb0] sm:$0xff] }
 0x4cf   : > { %8904 = vmatprep.subr.bf16.mxu1 %v10073_v4  ;;  %v5851_v4 = vld [vmem:[%s11639_s28 + $0xd70] sm:$0xff] }
 0x4d0   : > { %9022 = vmatpush1.bf16.msra.mxu0 %v9866_v2  ;;  %v8575_v2 = vadd.f32 %v8574_v19, %v8531_v39  ;;  %v10281_v39 = vcombine.high %v5847_v0, %v5851_v4  ;;  %v10280_v48 = vcombine.low %v5847_v0, %v5851_v4  ;;  %v5728_v4 = vld [vmem:[%s11639_s28 + $0x998] sm:$0xff] }
 0x4d1   : > { %9023 = vmatprep.subr.bf16.mxu0 %v9859_v26  ;;  %v8616_v26 = vadd.f32 %v8615_v24, %v8573_v37  ;;  %v5815_v37 = vld [vmem:[%s11639_s28 + $0xc50] sm:$0xff] }
 0x4d2   : > { %8905 = vmatpush2.bf16.msra.mxu1 %v10072_v44 }
 0x4d3   : > { %8906 = vmatprep.subr.bf16.mxu1 %v10065_v43  ;;  %v8577_v43 = vadd.f32 %v8576_v40, %v8533_v30  ;;  %v5740_v40 = vld [vmem:[%s11639_s28 + $0x9f8] sm:$0xff] }
 0x4d4   : > { %9024 = vmatpush1.bf16.msra.mxu0 %v9858_v8  ;;  %v8619_v8 = vpop.f32.mrf.mxu0 }
 0x4d5   : > { %9025 = vmatprep.subr.bf16.mxu0 %v9979_v11  ;;  %v8618_v11 = vadd.f32 %v8617_v55, %v8575_v2  ;;  %v5732_v2 = vld [vmem:[%s11639_s28 + $0x9b8] sm:$0xff] }
 0x4d6   : > { %8907 = vmatpush2.bf16.msra.mxu1 %v10064_v6 }
 0x4d7   : > { %8908 = vmatprep.subr.bf16.mxu1 %v10057_v13  ;;  %v5843_v13 = vld [vmem:[%s11639_s28 + $0xd30] sm:$0xff] }
 0x4d8   : > { %9026 = vmatpush2.bf16.msra.mxu0 %v9978_v22  ;;  %v5405_v22 = vld [vmem:[#allocation3 + $0x40] sm:$0xff]  ;;  %v10272_v24 = vcombine.low %v5839_v41, %v5843_v13 }
 0x4d9   : > { %9027 = vmatprep.subr.bf16.mxu0 %v9971_v31  ;;  %v8620_v31 = vadd.f32 %v8619_v8, %v8577_v43  ;;  %v10162_v8 = vcombine.low %v5728_v4, %v5732_v2 }
 0x4da   : > { %8909 = vmatpush2.bf16.msra.mxu1 %v10056_v32 }
 0x4db   : > { %8910 = vmatprep.subr.bf16.mxu1 %v10049_v9 }
 0x4dc   : > { %9028 = vmatpush2.bf16.msra.mxu0 %v9970_v63  ;;  %v10273_v63 = vcombine.high %v5839_v41, %v5843_v13  ;;  %v5919_v41 = vld [vmem:[%s11639_s28 + $0xf90] sm:$0xff] }
 0x4dd   : > { %9029 = vmatprep.subr.bf16.mxu0 %v9963_v16  ;;  %v9938_v16 = vcombine.low %v5504_v49, %v5508_v42  ;;  %v5720_v49 = vld [vmem:[%s11639_s28 + $0x958] sm:$0xff]  ;;  %v5923_v13 = vld [vmem:[%s11639_s28 + $0xfb0] sm:$0xff] }
 0x4de   : > { %8911 = vmatpush2.bf16.msra.mxu1 %v10048_v21  ;;  %v5831_v21 = vld [vmem:[%s11639_s28 + $0xcd0] sm:$0xff]  ;;  %v5724_v42 = vld [vmem:[%s11639_s28 + $0x978] sm:$0xff]  ;;  %v10352_v54 = vcombine.low %v5919_v41, %v5923_v13 }
 0x4df   : > { %8966 = vmatprep.subr.bf16.mxu1 %v10297_v14  ;;  %v5488_v14 = vld [vmem:[%s11639_s28 + $0x218] sm:$0xff]  ;;  %v10265_v50 = vcombine.high %v5831_v21, %v5835_v38  ;;  %v10264_v53 = vcombine.low %v5831_v21, %v5835_v38 }
 0x4e0   : > { %9030 = vmatpush2.bf16.msra.mxu0 %v9962_v25  ;;  %v5492_v25 = vld [vmem:[%s11639_s28 + $0x238] sm:$0xff] }
 0x4e1   : > { %8913 = vmatmul.mubr.bf16.vlgmr.msra.gmra.mxu1 %v12366_v36  ;;  %v8656_v5 = vpop.f32.mrf.mxu1  ;;  %9031 = vmatprep.subr.bf16.mxu0 %v9955_v23  ;;  %v5823_v23 = vld [vmem:[%s11639_s28 + $0xc90] sm:$0xff] }
 0x4e2   : > { %v8657_v44 = vadd.f32 %v8656_v5, %v8614_v60  ;;  %8967 = vmatpush1.bf16.msra.mxu1 %v10296_v58  ;;  %8998 = vmatprep.mubr.bf16.mxu1 %v12681_v47  ;;  %v9923_v58 = vcombine.high %v5488_v14, %v5492_v25  ;;  %v10257_v55 = vcombine.high %v5823_v23, %v5827_v15  ;;  %v5819_v60 = vld [vmem:[%s11639_s28 + $0xc70] sm:$0xff] }
 0x4e3   : > { %v8658_v61 = vpop.f32.mrf.mxu1  ;;  %8968 = vmatprep.subr.bf16.mxu1 %v10289_v59  ;;  %v9922_v59 = vcombine.low %v5488_v14, %v5492_v25  ;;  %v10256_v0 = vcombine.low %v5823_v23, %v5827_v15  ;;  %v10170_v5 = vcombine.low %v5736_v27, %v5740_v40  ;;  %v5895_v25 = vld [vmem:[%s11639_s28 + $0xed0] sm:$0xff]  ;;  %v5680_v15 = vld [vmem:[%s11639_s28 + $0x818] sm:$0xff] }
 0x4e4   : > { %v9181_v6 = vadd.f32 %v8657_v44, %v5397_v34  ;;  %v8659_v17 = vadd.f32 %v8658_v61, %v8616_v26  ;;  %9032 = vmatpush2.bf16.msra.mxu0 %v9954_v29  ;;  %v10171_v29 = vcombine.high %v5736_v27, %v5740_v40  ;;  %v10249_v34 = vcombine.high %v5815_v37, %v5819_v60  ;;  %v5811_v26 = vld [vmem:[%s11639_s28 + $0xc30] sm:$0xff] }
 0x4e5   : > { %v8660_v10 = vpop.f32.mrf.mxu1  ;;  %9033 = vmatprep.subr.bf16.mxu0 %v9947_v7  ;;  %v5807_v7 = vld [vmem:[%s11639_s28 + $0xc10] sm:$0xff]  ;;  %v10163_v44 = vcombine.high %v5728_v4, %v5732_v2 }
 0x4e6   : > { %9197 = vst [vmem:[#allocation3] sm:$0xff] %v9181_v6  ;;  %v9182_v30 = vadd.f32 %v8659_v17, %v5398_v62  ;;  %v8661_v32 = vadd.f32 %v8660_v10, %v8618_v11  ;;  %8969 = vmatpush1.bf16.msra.mxu1 %v10288_v56  ;;  %v10248_v56 = vcombine.low %v5815_v37, %v5819_v60  ;;  %v5927_v62 = vld [vmem:[%s11639_s28 + $0xfd0] sm:$0xff]  ;;  %v5712_v6 = vld [vmem:[%s11639_s28 + $0x918] sm:$0xff] }
 0x4e7   : > { %v8662_v9 = vpop.f32.mrf.mxu1  ;;  %8970 = vmatprep.subr.bf16.mxu1 %v10281_v39  ;;  %v10241_v43 = vcombine.high %v5807_v7, %v5811_v26  ;;  %v5931_v61 = vld [vmem:[%s11639_s28 + $0xff0] sm:$0xff]  ;;  %v10155_v39 = vcombine.high %v5720_v49, %v5724_v42  ;;  %v10240_v11 = vcombine.low %v5807_v7, %v5811_v26  ;;  %v5716_v17 = vld [vmem:[%s11639_s28 + $0x938] sm:$0xff] }
 0x4e8   : > { %9198 = vst [vmem:[#allocation3 + $0x8] sm:$0xff] %v9182_v30  ;;  %v9189_v51 = vadd.f32 %v8661_v32, %v5405_v22  ;;  %v8663_v33 = vadd.f32 %v8662_v9, %v8620_v31  ;;  %9034 = vmatpush2.bf16.msra.mxu0 %v9946_v20  ;;  %v10154_v20 = vcombine.low %v5720_v49, %v5724_v42  ;;  %v5704_v10 = vld [vmem:[%s11639_s28 + $0x8d8] sm:$0xff]  ;;  %v5911_v32 = vld [vmem:[%s11639_s28 + $0xf50] sm:$0xff] }
 0x4e9   : > { %9035 = vmatprep.subr.bf16.mxu0 %v9939_v28  ;;  %v10360_v22 = vcombine.low %v5927_v62, %v5931_v61  ;;  %v5708_v28 = vld [vmem:[%s11639_s28 + $0x8f8] sm:$0xff]  ;;  %v10353_v31 = vcombine.high %v5919_v41, %v5923_v13  ;;  %v10146_v30 = vcombine.low %v5712_v6, %v5716_v17  ;;  %v5887_v40 = vld [vmem:[%s11639_s28 + $0xe90] sm:$0xff] }
 0x4ea   : > { %9205 = vst [vmem:[#allocation3 + $0x40] sm:$0xff] %v9189_v51  ;;  %v9190_v19 = vadd.f32 %v8663_v33, %v5406_v35  ;;  %8971 = vmatpush1.bf16.msra.mxu1 %v10280_v48  ;;  %v5915_v48 = vld [vmem:[%s11639_s28 + $0xf70] sm:$0xff]  ;;  %v10139_v45 = vcombine.high %v5704_v10, %v5708_v28  ;;  %v5696_v35 = vld [vmem:[%s11639_s28 + $0x898] sm:$0xff]  ;;  %v10138_v51 = vcombine.low %v5704_v10, %v5708_v28 }
 0x4eb   : > { %8972 = vmatprep.subr.bf16.mxu1 %v10273_v63  ;;  %v5700_v9 = vld [vmem:[%s11639_s28 + $0x8b8] sm:$0xff]  ;;  %v10345_v63 = vcombine.high %v5911_v32, %v5915_v48  ;;  %v5903_v33 = vld [vmem:[%s11639_s28 + $0xf10] sm:$0xff]  ;;  %v10344_v38 = vcombine.low %v5911_v32, %v5915_v48 }
 0x4ec   : > { %9206 = vst [vmem:[#allocation3 + $0x48] sm:$0xff] %v9190_v19  ;;  %9036 = vmatpush2.bf16.msra.mxu0 %v9938_v16  ;;  %v5907_v16 = vld [vmem:[%s11639_s28 + $0xf30] sm:$0xff]  ;;  %v10131_v21 = vcombine.high %v5696_v35, %v5700_v9  ;;  %v5692_v19 = vld [vmem:[%s11639_s28 + $0x878] sm:$0xff]  ;;  %v10130_v14 = vcombine.low %v5696_v35, %v5700_v9 }
 0x4ed   : > { %9037 = vmatprep.subr.bf16.mxu0 %v9931_v46  ;;  %v5688_v46 = vld [vmem:[%s11639_s28 + $0x858] sm:$0xff]  ;;  %v10336_v23 = vcombine.low %v5903_v33, %v5907_v16  ;;  %v5879_v2 = vld [vmem:[%s11639_s28 + $0xe50] sm:$0xff] }
 0x4ee   : > { %8973 = vmatpush1.bf16.msra.mxu1 %v10272_v24  ;;  %v10337_v24 = vcombine.high %v5903_v33, %v5907_v16  ;;  %v10122_v27 = vcombine.low %v5688_v46, %v5692_v19  ;;  %v5800_v60 = vld [vmem:[%s11639_s28 + $0xbd8] sm:$0xff]  ;;  %v5871_v42 = vld [vmem:[%s11639_s28 + $0xe10] sm:$0xff] }
 0x4ef   : > { %8974 = vmatprep.subr.bf16.mxu1 %v10265_v50  ;;  %v5899_v50 = vld [vmem:[%s11639_s28 + $0xef0] sm:$0xff]  ;;  %v5792_v26 = vld [vmem:[%s11639_s28 + $0xb98] sm:$0xff] }
 0x4f0   : > { %9038 = vmatpush2.bf16.msra.mxu0 %v9930_v18  ;;  %v10123_v18 = vcombine.high %v5688_v46, %v5692_v19  ;;  %v10328_v37 = vcombine.low %v5895_v25, %v5899_v50  ;;  %v5776_v13 = vld [vmem:[%s11639_s28 + $0xb18] sm:$0xff] }
 0x4f1   : > { %9039 = vmatprep.subr.bf16.mxu0 %v9923_v58  ;;  %v5684_v58 = vld [vmem:[%s11639_s28 + $0x838] sm:$0xff] }
 0x4f2   : > { %8975 = vmatpush1.bf16.msra.mxu1 %v10264_v53  ;;  %v10329_v53 = vcombine.high %v5895_v25, %v5899_v50  ;;  %v10114_v4 = vcombine.low %v5680_v15, %v5684_v58  ;;  %v5600_v28 = vld [vmem:[%s11639_s28 + $0x598] sm:$0xff] }
 0x4f3   : > { %8976 = vmatprep.subr.bf16.mxu1 %v10257_v55  ;;  %v5891_v55 = vld [vmem:[%s11639_s28 + $0xeb0] sm:$0xff]  ;;  %v5768_v48 = vld [vmem:[%s11639_s28 + $0xad8] sm:$0xff] }
 0x4f4   : > { %9040 = vmatpush2.bf16.msra.mxu0 %v9922_v59  ;;  %v10115_v59 = vcombine.high %v5680_v15, %v5684_v58  ;;  %v10320_v7 = vcombine.low %v5887_v40, %v5891_v55  ;;  %v5592_v9 = vld [vmem:[%s11639_s28 + $0x558] sm:$0xff] }
 0x4f5   : > { %9095 = vmatprep.subr.bf16.mxu0 %v10171_v29  ;;  %v5804_v29 = vld [vmem:[%s11639_s28 + $0xbf8] sm:$0xff] }
 0x4f6   : > { %8977 = vmatpush1.bf16.msra.mxu1 %v10256_v0  ;;  %v10321_v0 = vcombine.high %v5887_v40, %v5891_v55  ;;  %v10234_v49 = vcombine.low %v5800_v60, %v5804_v29  ;;  %v5760_v16 = vld [vmem:[%s11639_s28 + $0xa98] sm:$0xff] }
 0x4f7   : > { %9042 = vmatmul.mubr.bf16.vlgmr.msra.gmra.mxu0 %v12148_v1  ;;  %8978 = vmatprep.subr.bf16.mxu1 %v10249_v34  ;;  %v10361_v1 = vcombine.high %v5927_v62, %v5931_v61  ;;  %v5883_v34 = vld [vmem:[%s11639_s28 + $0xe70] sm:$0xff]  ;;  %v5784_v61 = vld [vmem:[%s11639_s28 + $0xb58] sm:$0xff] }
 0x4f8   : > { %9096 = vmatpush1.bf16.msra.mxu0 %v10170_v5  ;;  %9127 = vmatprep.mubr.bf16.mxu0 %v12555_v52  ;;  %v10147_v52 = vcombine.high %v5712_v6, %v5716_v17  ;;  %v10235_v5 = vcombine.high %v5800_v60, %v5804_v29  ;;  %v10312_v62 = vcombine.low %v5879_v2, %v5883_v34  ;;  %v5608_v17 = vld [vmem:[%s11639_s28 + $0x5d8] sm:$0xff] }
 0x4f9   : > { %9097 = vmatprep.subr.bf16.mxu0 %v10163_v44  ;;  %v5796_v44 = vld [vmem:[%s11639_s28 + $0xbb8] sm:$0xff] }
 0x4fa   : > { %8979 = vmatpush1.bf16.msra.mxu1 %v10248_v56  ;;  %v10313_v56 = vcombine.high %v5879_v2, %v5883_v34  ;;  %v10226_v6 = vcombine.low %v5792_v26, %v5796_v44  ;;  %v5584_v19 = vld [vmem:[%s11639_s28 + $0x518] sm:$0xff] }
 0x4fb   : > { %8980 = vmatprep.subr.bf16.mxu1 %v10241_v43  ;;  %v5875_v43 = vld [vmem:[%s11639_s28 + $0xe30] sm:$0xff]  ;;  %v5752_v50 = vld [vmem:[%s11639_s28 + $0xa58] sm:$0xff] }
 0x4fc   : > { %9098 = vmatpush1.bf16.msra.mxu0 %v10162_v8  ;;  %v10227_v8 = vcombine.high %v5792_v26, %v5796_v44  ;;  %v10304_v41 = vcombine.low %v5871_v42, %v5875_v43  ;;  %v5576_v15 = vld [vmem:[%s11639_s28 + $0x4d8] sm:$0xff] }
 0x4fd   : > { %9099 = vmatprep.subr.bf16.mxu0 %v10155_v39  ;;  %v5788_v39 = vld [vmem:[%s11639_s28 + $0xb78] sm:$0xff] }
 0x4fe   : > { %8981 = vmatpush1.bf16.msra.mxu1 %v10240_v11  ;;  %v10305_v11 = vcombine.high %v5871_v42, %v5875_v43  ;;  %v10218_v10 = vcombine.low %v5784_v61, %v5788_v39  ;;  %v5580_v58 = vld [vmem:[%s11639_s28 + $0x4f8] sm:$0xff] }
 0x4ff   : > { %8982 = vmatprep.subr.bf16.mxu1 %v10361_v1  ;;  %v5612_v1 = vld [vmem:[%s11639_s28 + $0x5f8] sm:$0xff] }
 0x500   : > { %9100 = vmatpush1.bf16.msra.mxu0 %v10154_v20  ;;  %v10219_v20 = vcombine.high %v5784_v61, %v5788_v39  ;;  %v10042_v32 = vcombine.low %v5608_v17, %v5612_v1  ;;  %v5744_v40 = vld [vmem:[%s11639_s28 + $0xa18] sm:$0xff] }
 0x501   : > { %9101 = vmatprep.subr.bf16.mxu0 %v10147_v52  ;;  %v5780_v52 = vld [vmem:[%s11639_s28 + $0xb38] sm:$0xff] }
 0x502   : > { %8983 = vmatpush2.bf16.msra.mxu1 %v10360_v22  ;;  %v10043_v22 = vcombine.high %v5608_v17, %v5612_v1  ;;  %v10210_v35 = vcombine.low %v5776_v13, %v5780_v52  ;;  %v5748_v55 = vld [vmem:[%s11639_s28 + $0xa38] sm:$0xff] }
 0x503   : > { %8984 = vmatprep.subr.bf16.mxu1 %v10353_v31  ;;  %v5604_v31 = vld [vmem:[%s11639_s28 + $0x5b8] sm:$0xff]  ;;  %v10178_v34 = vcombine.low %v5744_v40, %v5748_v55 }
 0x504   : > { %9102 = vmatpush1.bf16.msra.mxu0 %v10146_v30  ;;  %v10211_v30 = vcombine.high %v5776_v13, %v5780_v52  ;;  %v10034_v33 = vcombine.low %v5600_v28, %v5604_v31  ;;  %v5568_v60 = vld [vmem:[%s11639_s28 + $0x498] sm:$0xff] }
 0x505   : > { %9103 = vmatprep.subr.bf16.mxu0 %v10139_v45  ;;  %v5772_v45 = vld [vmem:[%s11639_s28 + $0xaf8] sm:$0xff] }
 0x506   : > { %8985 = vmatpush2.bf16.msra.mxu1 %v10352_v54  ;;  %v10035_v54 = vcombine.high %v5600_v28, %v5604_v31  ;;  %v10202_v46 = vcombine.low %v5768_v48, %v5772_v45  ;;  %v5572_v29 = vld [vmem:[%s11639_s28 + $0x4b8] sm:$0xff] }
 0x507   : > { %8986 = vmatprep.subr.bf16.mxu1 %v10345_v63  ;;  %v5596_v63 = vld [vmem:[%s11639_s28 + $0x578] sm:$0xff]  ;;  %v10003_v2 = vcombine.high %v5568_v60, %v5572_v29  ;;  %v10002_v26 = vcombine.low %v5568_v60, %v5572_v29 }
 0x508   : > { %9104 = vmatpush1.bf16.msra.mxu0 %v10138_v51  ;;  %v10203_v51 = vcombine.high %v5768_v48, %v5772_v45  ;;  %v10026_v25 = vcombine.low %v5592_v9, %v5596_v63  ;;  %v5648_v52 = vld [vmem:[%s11639_s28 + $0x718] sm:$0xff]  ;;  %v8699_v48 = vpop.f32.mrf.mxu0 }
 0x509   : > { %9105 = vmatprep.subr.bf16.mxu0 %v10131_v21  ;;  %v5764_v21 = vld [vmem:[%s11639_s28 + $0xab8] sm:$0xff] }
 0x50a   : > { %8987 = vmatpush2.bf16.msra.mxu1 %v10344_v38  ;;  %v10027_v38 = vcombine.high %v5592_v9, %v5596_v63  ;;  %v5640_v31 = vld [vmem:[%s11639_s28 + $0x6d8] sm:$0xff]  ;;  %v8701_v63 = vpop.f32.mrf.mxu0 }
 0x50b   : > { %8988 = vmatprep.subr.bf16.mxu1 %v10337_v24  ;;  %v5588_v24 = vld [vmem:[%s11639_s28 + $0x538] sm:$0xff] }
 0x50c   : > { %9106 = vmatpush1.bf16.msra.mxu0 %v10130_v14  ;;  %v10195_v14 = vcombine.high %v5760_v16, %v5764_v21 }
 0x50d   : > { %9107 = vmatprep.subr.bf16.mxu0 %v10123_v18  ;;  %v5756_v18 = vld [vmem:[%s11639_s28 + $0xa78] sm:$0xff] }
 0x50e   : > { %8989 = vmatpush2.bf16.msra.mxu1 %v10336_v23  ;;  %v10194_v23 = vcombine.low %v5760_v16, %v5764_v21  ;;  %v5628_v16 = vld [vmem:[%s11639_s28 + $0x678] sm:$0xff] }
 0x50f   : > { %8990 = vmatprep.subr.bf16.mxu1 %v10329_v53  ;;  %v10187_v53 = vcombine.high %v5752_v50, %v5756_v18 }
 0x510   : > { %9108 = vmatpush1.bf16.msra.mxu0 %v10122_v27  ;;  %v10018_v27 = vcombine.low %v5584_v19, %v5588_v24 }
 0x511   : > { %9109 = vmatprep.subr.bf16.mxu0 %v10115_v59  ;;  %v10011_v59 = vcombine.high %v5576_v15, %v5580_v58 }
 0x512   : > { %8991 = vmatpush2.bf16.msra.mxu1 %v10328_v37  ;;  %v10186_v37 = vcombine.low %v5752_v50, %v5756_v18 }
 0x513   : > { %8992 = vmatprep.subr.bf16.mxu1 %v10321_v0  ;;  %v10179_v0 = vcombine.high %v5744_v40, %v5748_v55 }
 0x514   : > { %9110 = vmatpush1.bf16.msra.mxu0 %v10114_v4  ;;  %v10010_v4 = vcombine.low %v5576_v15, %v5580_v58  ;;  %v5868_v15 = vld [vmem:[%s11639_s28 + $0xdf8] sm:$0xff] }
 0x515   : > { %9111 = vmatprep.subr.bf16.mxu0 %v10235_v5  ;;  %v5560_v5 = vld [vmem:[%s11639_s28 + $0x458] sm:$0xff] }
 0x516   : > { %8993 = vmatpush2.bf16.msra.mxu1 %v10320_v7  ;;  %v5564_v7 = vld [vmem:[%s11639_s28 + $0x478] sm:$0xff] }
 0x517   : > { %8994 = vmatprep.subr.bf16.mxu1 %v10313_v56  ;;  %v9995_v44 = vcombine.high %v5560_v5, %v5564_v7  ;;  %v5552_v56 = vld [vmem:[%s11639_s28 + $0x418] sm:$0xff]  ;;  %v9994_v42 = vcombine.low %v5560_v5, %v5564_v7 }
 0x518   : > { %9112 = vmatpush2.bf16.msra.mxu0 %v10234_v49  ;;  %v5556_v49 = vld [vmem:[%s11639_s28 + $0x438] sm:$0xff] }
 0x519   : > { %9113 = vmatprep.subr.bf16.mxu0 %v10227_v8  ;;  %v9987_v43 = vcombine.high %v5552_v56, %v5556_v49  ;;  %v5672_v8 = vld [vmem:[%s11639_s28 + $0x7d8] sm:$0xff]  ;;  %v9986_v61 = vcombine.low %v5552_v56, %v5556_v49  ;;  %v5399_v56 = vld [vmem:[#allocation3 + $0x10] sm:$0xff] }
 0x51a   : > { %8995 = vmatpush2.bf16.msra.mxu1 %v10312_v62  ;;  %v5676_v62 = vld [vmem:[%s11639_s28 + $0x7f8] sm:$0xff] }
 0x51b   : > { %8996 = vmatprep.subr.bf16.mxu1 %v10305_v11  ;;  %v10107_v39 = vcombine.high %v5672_v8, %v5676_v62  ;;  %v5664_v11 = vld [vmem:[%s11639_s28 + $0x798] sm:$0xff]  ;;  %v10106_v17 = vcombine.low %v5672_v8, %v5676_v62 }
 0x51c   : > { %9114 = vmatpush2.bf16.msra.mxu0 %v10226_v6  ;;  %v5668_v6 = vld [vmem:[%s11639_s28 + $0x7b8] sm:$0xff] }
 0x51d   : > { %9115 = vmatprep.subr.bf16.mxu0 %v10219_v20  ;;  %v10099_v1 = vcombine.high %v5664_v11, %v5668_v6  ;;  %v5660_v20 = vld [vmem:[%s11639_s28 + $0x778] sm:$0xff] }
 0x51e   : > { %8997 = vmatpush2.bf16.msra.mxu1 %v10304_v41  ;;  %v10098_v41 = vcombine.low %v5664_v11, %v5668_v6  ;;  %v5848_v7 = vld [vmem:[%s11639_s28 + $0xd58] sm:$0xff] }
 0x51f   : > { %9052 = vmatprep.subr.bf16.mxu1 %v10043_v22  ;;  %v5652_v22 = vld [vmem:[%s11639_s28 + $0x738] sm:$0xff] }
 0x520   : > { %9116 = vmatpush2.bf16.msra.mxu0 %v10218_v10  ;;  %v10083_v28 = vcombine.high %v5648_v52, %v5652_v22 }
 0x521   : > { %8999 = vmatmul.mubr.bf16.vlgmr.msra.gmra.mxu1 %v12685_v3  ;;  %9117 = vmatprep.subr.bf16.mxu0 %v10211_v30  ;;  %v5644_v30 = vld [vmem:[%s11639_s28 + $0x6f8] sm:$0xff] }
 0x522   : > { %9053 = vmatpush1.bf16.msra.mxu1 %v10042_v32  ;;  %9084 = vmatprep.mubr.bf16.mxu1 %v12404_v57  ;;  %v10019_v57 = vcombine.high %v5584_v19, %v5588_v24  ;;  %v10082_v32 = vcombine.low %v5648_v52, %v5652_v22  ;;  %v10075_v45 = vcombine.high %v5640_v31, %v5644_v30  ;;  %v5616_v24 = vld [vmem:[%s11639_s28 + $0x618] sm:$0xff] }
 0x523   : > { %9054 = vmatprep.subr.bf16.mxu1 %v10035_v54  ;;  %v5632_v54 = vld [vmem:[%s11639_s28 + $0x698] sm:$0xff]  ;;  %v10074_v9 = vcombine.low %v5640_v31, %v5644_v30 }
 0x524   : > { %9118 = vmatpush2.bf16.msra.mxu0 %v10210_v35  ;;  %v5636_v35 = vld [vmem:[%s11639_s28 + $0x6b8] sm:$0xff] }
 0x525   : > { %9119 = vmatprep.subr.bf16.mxu0 %v10203_v51  ;;  %v10067_v51 = vcombine.high %v5632_v54, %v5636_v35  ;;  %v10066_v21 = vcombine.low %v5632_v54, %v5636_v35  ;;  %v5836_v54 = vld [vmem:[%s11639_s28 + $0xcf8] sm:$0xff] }
 0x526   : > { %9055 = vmatpush1.bf16.msra.mxu1 %v10034_v33  ;;  %v5624_v33 = vld [vmem:[%s11639_s28 + $0x658] sm:$0xff] }
 0x527   : > { %9056 = vmatprep.subr.bf16.mxu1 %v10027_v38  ;;  %v8703_v38 = vpop.f32.mrf.mxu0  ;;  %v10059_v19 = vcombine.high %v5624_v33, %v5628_v16 }
 0x528   : > { %9120 = vmatpush2.bf16.msra.mxu0 %v10202_v46  ;;  %v8742_v46 = vpop.f32.mrf.mxu1 }
 0x529   : > { %9121 = vmatprep.subr.bf16.mxu0 %v10195_v14  ;;  %v5620_v14 = vld [vmem:[%s11639_s28 + $0x638] sm:$0xff]  ;;  %v8705_v50 = vpop.f32.mrf.mxu0  ;;  %v8743_v55 = vadd.f32 %v8742_v46, %v8699_v48 }
 0x52a   : > { %9057 = vmatpush1.bf16.msra.mxu1 %v10026_v25  ;;  %v10058_v25 = vcombine.low %v5624_v33, %v5628_v16  ;;  %v8744_v18 = vpop.f32.mrf.mxu1  ;;  %v5828_v33 = vld [vmem:[%s11639_s28 + $0xcb8] sm:$0xff] }
 0x52b   : > { %9058 = vmatprep.subr.bf16.mxu1 %v10019_v57  ;;  %v10051_v57 = vcombine.high %v5616_v24, %v5620_v14  ;;  %v8785_v58 = vpop.f32.mrf.mxu0  ;;  %v8745_v29 = vadd.f32 %v8744_v18, %v8701_v63  ;;  %v5820_v46 = vld [vmem:[%s11639_s28 + $0xc78] sm:$0xff] }
 0x52c   : > { %9122 = vmatpush2.bf16.msra.mxu0 %v10194_v23  ;;  %v5864_v23 = vld [vmem:[%s11639_s28 + $0xdd8] sm:$0xff]  ;;  %v8786_v5 = vadd.f32 %v8785_v58, %v8743_v55 }
 0x52d   : > { %9123 = vmatprep.subr.bf16.mxu0 %v10187_v53  ;;  %v10050_v53 = vcombine.low %v5616_v24, %v5620_v14  ;;  %v10299_v40 = vcombine.high %v5864_v23, %v5868_v15  ;;  %v8787_v60 = vpop.f32.mrf.mxu0  ;;  %v5808_v14 = vld [vmem:[%s11639_s28 + $0xc18] sm:$0xff] }
 0x52e   : > { %9059 = vmatpush1.bf16.msra.mxu1 %v10018_v27  ;;  %v8746_v27 = vpop.f32.mrf.mxu1  ;;  %v8788_v62 = vadd.f32 %v8787_v60, %v8745_v29 }
 0x52f   : > { %9060 = vmatprep.subr.bf16.mxu1 %v10011_v59  ;;  %v5856_v59 = vld [vmem:[%s11639_s28 + $0xd98] sm:$0xff] }
 0x530   : > { %9124 = vmatpush2.bf16.msra.mxu0 %v10186_v37  ;;  %v5860_v37 = vld [vmem:[%s11639_s28 + $0xdb8] sm:$0xff] }
 0x531   : > { %9125 = vmatprep.subr.bf16.mxu0 %v10179_v0  ;;  %v10298_v0 = vcombine.low %v5864_v23, %v5868_v15  ;;  %v5932_v23 = vld [vmem:[%s11639_s28 + $0xff8] sm:$0xff] }
 0x532   : > { %9061 = vmatpush1.bf16.msra.mxu1 %v10010_v4  ;;  %v8748_v4 = vpop.f32.mrf.mxu1 }
 0x533   : > { %9062 = vmatprep.subr.bf16.mxu1 %v10003_v2  ;;  %v10291_v2 = vcombine.high %v5856_v59, %v5860_v37 }
 0x534   : > { %9126 = vmatpush2.bf16.msra.mxu0 %v10178_v34  ;;  %v8747_v34 = vadd.f32 %v8746_v27, %v8703_v38  ;;  %v5816_v38 = vld [vmem:[%s11639_s28 + $0xc58] sm:$0xff] }
 0x535   : > { %v10251_v24 = vcombine.high %v5816_v38, %v5820_v46  ;;  %v5924_v27 = vld [vmem:[%s11639_s28 + $0xfb8] sm:$0xff] }
 0x536   : > { %9063 = vmatpush1.bf16.msra.mxu1 %v10002_v26  ;;  %v5852_v26 = vld [vmem:[%s11639_s28 + $0xd78] sm:$0xff] }
 0x537   : > { %9128 = vmatmul.mubr.bf16.vlgmr.msra.gmra.mxu0 %v12590_v12  ;;  %9064 = vmatprep.subr.bf16.mxu1 %v9995_v44  ;;  %v5656_v12 = vld [vmem:[%s11639_s28 + $0x758] sm:$0xff]  ;;  %v8789_v44 = vpop.f32.mrf.mxu0  ;;  %v10283_v11 = vcombine.high %v5848_v7, %v5852_v26 }
 0x538   : > { %v10091_v13 = vcombine.high %v5656_v12, %v5660_v20  ;;  %v10090_v10 = vcombine.low %v5656_v12, %v5660_v20  ;;  %v5840_v12 = vld [vmem:[%s11639_s28 + $0xd18] sm:$0xff] }
 0x539   : > { %v5844_v20 = vld [vmem:[%s11639_s28 + $0xd38] sm:$0xff] }
 0x53a   : > { %9065 = vmatpush1.bf16.msra.mxu1 %v9994_v42  ;;  %v10290_v42 = vcombine.low %v5856_v59, %v5860_v37  ;;  %v10275_v30 = vcombine.high %v5840_v12, %v5844_v20  ;;  %v5912_v59 = vld [vmem:[%s11639_s28 + $0xf58] sm:$0xff] }
 0x53b   : > { %9066 = vmatprep.subr.bf16.mxu1 %v9987_v43  ;;  %v8749_v43 = vadd.f32 %v8748_v4, %v8705_v50  ;;  %v10250_v50 = vcombine.low %v5816_v38, %v5820_v46  ;;  %v5916_v37 = vld [vmem:[%s11639_s28 + $0xf78] sm:$0xff] }
 0x53c   : > { %v10347_v29 = vcombine.high %v5912_v59, %v5916_v37  ;;  %v5908_v4 = vld [vmem:[%s11639_s28 + $0xf38] sm:$0xff] }
 0x53e   : > { %9067 = vmatpush1.bf16.msra.mxu1 %v9986_v61  ;;  %v5400_v61 = vld [vmem:[#allocation3 + $0x18] sm:$0xff] }
 0x53f   : > { %9068 = vmatprep.subr.bf16.mxu1 %v10107_v39 }
 0x542   : > { %9069 = vmatpush2.bf16.msra.mxu1 %v10106_v17 }
 0x543   : > { %9070 = vmatprep.subr.bf16.mxu1 %v10099_v1  ;;  %v8790_v1 = vadd.f32 %v8789_v44, %v8747_v34 }
 0x546   : > { %9071 = vmatpush2.bf16.msra.mxu1 %v10098_v41  ;;  %v8791_v41 = vpop.f32.mrf.mxu0 }
 0x547   : > { %9072 = vmatprep.subr.bf16.mxu1 %v10091_v13  ;;  %v5407_v13 = vld [vmem:[#allocation3 + $0x50] sm:$0xff] }
 0x54a   : > { %9073 = vmatpush2.bf16.msra.mxu1 %v10090_v10  ;;  %v10282_v10 = vcombine.low %v5848_v7, %v5852_v26  ;;  %v5900_v7 = vld [vmem:[%s11639_s28 + $0xef8] sm:$0xff] }
 0x54b   : > { %9074 = vmatprep.subr.bf16.mxu1 %v10083_v28  ;;  %v5408_v28 = vld [vmem:[#allocation3 + $0x58] sm:$0xff] }
 0x54e   : > { %9075 = vmatpush2.bf16.msra.mxu1 %v10082_v32 }
 0x54f   : > { %9076 = vmatprep.subr.bf16.mxu1 %v10075_v45  ;;  %v5832_v45 = vld [vmem:[%s11639_s28 + $0xcd8] sm:$0xff] }
 0x550   : > { %v10267_v63 = vcombine.high %v5832_v45, %v5836_v54  ;;  %v10266_v16 = vcombine.low %v5832_v45, %v5836_v54 }
 0x552   : > { %9077 = vmatpush2.bf16.msra.mxu1 %v10074_v9  ;;  %v10274_v9 = vcombine.low %v5840_v12, %v5844_v20  ;;  %v8871_v20 = vpop.f32.mrf.mxu0 }
 0x553   : > { %9078 = vmatprep.subr.bf16.mxu1 %v10067_v51  ;;  %v5824_v51 = vld [vmem:[%s11639_s28 + $0xc98] sm:$0xff] }
 0x556   : > { %9079 = vmatpush2.bf16.msra.mxu1 %v10066_v21  ;;  %v10259_v21 = vcombine.high %v5824_v51, %v5828_v33 }
 0x557   : > { %9080 = vmatprep.subr.bf16.mxu1 %v10059_v19  ;;  %v10258_v19 = vcombine.low %v5824_v51, %v5828_v33  ;;  %v5402_v33 = vld [vmem:[#allocation3 + $0x28] sm:$0xff] }
 0x55a   : > { %9081 = vmatpush2.bf16.msra.mxu1 %v10058_v25  ;;  %v5812_v25 = vld [vmem:[%s11639_s28 + $0xc38] sm:$0xff] }
 0x55b   : > { %9082 = vmatprep.subr.bf16.mxu1 %v10051_v57  ;;  %v10243_v18 = vcombine.high %v5808_v14, %v5812_v25  ;;  %v5928_v57 = vld [vmem:[%s11639_s28 + $0xfd8] sm:$0xff]  ;;  %v10242_v15 = vcombine.low %v5808_v14, %v5812_v25 }
 0x55c   : > { %v10363_v58 = vcombine.high %v5928_v57, %v5932_v23 }
 0x55e   : > { %9083 = vmatpush2.bf16.msra.mxu1 %v10050_v53  ;;  %v5920_v53 = vld [vmem:[%s11639_s28 + $0xf98] sm:$0xff] }
 0x55f   : > { %9138 = vmatprep.subr.bf16.mxu1 %v10299_v40  ;;  %v10362_v40 = vcombine.low %v5928_v57, %v5932_v23  ;;  %v10355_v55 = vcombine.high %v5920_v53, %v5924_v27  ;;  %v10354_v60 = vcombine.low %v5920_v53, %v5924_v27  ;;  %v5410_v57 = vld [vmem:[#allocation3 + $0x68] sm:$0xff] }
 0x561   : > { %v8828_v49 = vpop.f32.mrf.mxu1  ;;  %9085 = vmatmul.mubr.bf16.vlgmr.msra.gmra.mxu1 %v12366_v36 }
 0x562   : > { %v8829_v8 = vadd.f32 %v8828_v49, %v8786_v5  ;;  %9139 = vmatpush1.bf16.msra.mxu1 %v10298_v0  ;;  %9170 = vmatprep.mubr.bf16.mxu1 %v12681_v47  ;;  %v8792_v47 = vadd.f32 %v8791_v41, %v8749_v43  ;;  %v5904_v0 = vld [vmem:[%s11639_s28 + $0xf18] sm:$0xff]  ;;  %v8873_v41 = vpop.f32.mrf.mxu0 }
 0x563   : > { %v8830_v39 = vpop.f32.mrf.mxu1  ;;  %9140 = vmatprep.subr.bf16.mxu1 %v10291_v2  ;;  %v10346_v2 = vcombine.low %v5912_v59, %v5916_v37  ;;  %v10339_v34 = vcombine.high %v5904_v0, %v5908_v4  ;;  %v5896_v5 = vld [vmem:[%s11639_s28 + $0xed8] sm:$0xff]  ;;  %v10338_v26 = vcombine.low %v5904_v0, %v5908_v4 }
 0x564   : > { %v9183_v6 = vadd.f32 %v8829_v8, %v5399_v56  ;;  %v8831_v17 = vadd.f32 %v8830_v39, %v8788_v62  ;;  %v10331_v44 = vcombine.high %v5896_v5, %v5900_v7  ;;  %v5888_v56 = vld [vmem:[%s11639_s28 + $0xe98] sm:$0xff] }
 0x565   : > { %v8832_v36 = vpop.f32.mrf.mxu1  ;;  %v5892_v49 = vld [vmem:[%s11639_s28 + $0xeb8] sm:$0xff] }
 0x566   : > { %9199 = vst [vmem:[#allocation3 + $0x10] sm:$0xff] %v9183_v6  ;;  %v9184_v52 = vadd.f32 %v8831_v17, %v5400_v61  ;;  %v8833_v22 = vadd.f32 %v8832_v36, %v8790_v1  ;;  %9141 = vmatpush1.bf16.msra.mxu1 %v10290_v42  ;;  %v10330_v42 = vcombine.low %v5896_v5, %v5900_v7  ;;  %v5880_v8 = vld [vmem:[%s11639_s28 + $0xe58] sm:$0xff] }
 0x567   : > { %v8834_v31 = vpop.f32.mrf.mxu1  ;;  %9142 = vmatprep.subr.bf16.mxu1 %v10283_v11  ;;  %v10323_v43 = vcombine.high %v5888_v56, %v5892_v49  ;;  %v5884_v62 = vld [vmem:[%s11639_s28 + $0xe78] sm:$0xff]  ;;  %v10322_v61 = vcombine.low %v5888_v56, %v5892_v49  ;;  %v5403_v56 = vld [vmem:[#allocation3 + $0x30] sm:$0xff] }
 0x568   : > { %9200 = vst [vmem:[#allocation3 + $0x18] sm:$0xff] %v9184_v52  ;;  %v9191_v32 = vadd.f32 %v8833_v22, %v5407_v13  ;;  %v8835_v48 = vadd.f32 %v8834_v31, %v8792_v47  ;;  %v10315_v39 = vcombine.high %v5880_v8, %v5884_v62  ;;  %v5872_v11 = vld [vmem:[%s11639_s28 + $0xe18] sm:$0xff]  ;;  %v10314_v17 = vcombine.low %v5880_v8, %v5884_v62  ;;  %v8875_v13 = vpop.f32.mrf.mxu0 }
 0x569   : > { %v5876_v6 = vld [vmem:[%s11639_s28 + $0xe38] sm:$0xff]  ;;  %s9223_s28 = sshll.u32 %s10521_s16, 4  ;;  %s9224_s28 = int_to_ptr.vmem [resolvable:$true] %s9223_s28 }
 0x56a   : > { %9207 = vst [vmem:[#allocation3 + $0x50] sm:$0xff] %v9191_v32  ;;  %v9192_v35 = vadd.f32 %v8835_v48, %v5408_v28  ;;  %9143 = vmatpush1.bf16.msra.mxu1 %v10282_v10  ;;  %v10307_v1 = vcombine.high %v5872_v11, %v5876_v6  ;;  %v10306_v12 = vcombine.low %v5872_v11, %v5876_v6  ;;  %v8877_v52 = vpop.f32.mrf.mxu0  ;;  %v5404_v62 = vld [vmem:[#allocation3 + $0x38] sm:$0xff]  ;;  %s10453_s20 = scalar_lea.vmem %s9224_s28, 2048  ;;  %p10460_p2 = scmp.lt.s32.totalorder %s9224_s28, %s9224_s28 }
 0x56b   : > { %9144 = vmatprep.subr.bf16.mxu1 %v10275_v30  ;;  %p10454_p13 = scmp.ne.s32.totalorder %s9224_s28, %s10453_s20  ;;  %p10461_p3 = scmp.lt.s32.totalorder %s10453_s20, %s10453_s20 }
 0x56c   : > { %9208 = vst [vmem:[#allocation3 + $0x58] sm:$0xff] %v9192_v35  ;;  %v5401_v35 = vld [vmem:[#allocation3 + $0x20] sm:$0xff] }
 0x56d   : > { %p10455_p0 = pnand %p10454_p13, %p13043_p12  ;;  %p10462_p4 = por %p10461_p3, %p10460_p2 }
 0x56e   : > { %9145 = vmatpush1.bf16.msra.mxu1 %v10274_v9 }
 0x56f   : > { %9146 = vmatprep.subr.bf16.mxu1 %v10267_v63  ;;  %p10456_p1 = pneg %p10455_p0 }
 0x571   : > { %p10463_p5 = pnand %p10462_p4, %p10456_p1 }
 0x572   : > { %9147 = vmatpush1.bf16.msra.mxu1 %v10266_v16 }
 0x573   : > { %9148 = vmatprep.subr.bf16.mxu1 %v10259_v21 }
 0x576   : > { %9149 = vmatpush1.bf16.msra.mxu1 %v10258_v19 }
 0x577   : > { %9150 = vmatprep.subr.bf16.mxu1 %v10251_v24  ;;  %v8957_v47 = vpop.f32.mrf.mxu0  ;;  %v5409_v24 = vld [vmem:[#allocation3 + $0x60] sm:$0xff] }
 0x579   : > { %v8959_v31 = vpop.f32.mrf.mxu0 }
 0x57a   : > { %9151 = vmatpush1.bf16.msra.mxu1 %v10250_v50 }
 0x57b   : > { %9152 = vmatprep.subr.bf16.mxu1 %v10243_v18  ;;  %v8961_v54 = vpop.f32.mrf.mxu0 }
 0x57d   : > { %v8963_v19 = vpop.f32.mrf.mxu0 }
 0x57e   : > { %9153 = vmatpush1.bf16.msra.mxu1 %v10242_v15 }
 0x57f   : > { %9154 = vmatprep.subr.bf16.mxu1 %v10363_v58 }
 0x582   : > { %9155 = vmatpush2.bf16.msra.mxu1 %v10362_v40 }
 0x583   : > { %9156 = vmatprep.subr.bf16.mxu1 %v10355_v55 }
 0x586   : > { %9157 = vmatpush2.bf16.msra.mxu1 %v10354_v60 }
 0x587   : > { %9158 = vmatprep.subr.bf16.mxu1 %v10347_v29 }
 0x58a   : > { %9159 = vmatpush2.bf16.msra.mxu1 %v10346_v2 }
 0x58b   : > { %9160 = vmatprep.subr.bf16.mxu1 %v10339_v34 }
 0x58e   : > { %9161 = vmatpush2.bf16.msra.mxu1 %v10338_v26 }
 0x58f   : > { %9162 = vmatprep.subr.bf16.mxu1 %v10331_v44 }
 0x592   : > { %9163 = vmatpush2.bf16.msra.mxu1 %v10330_v42 }
 0x593   : > { %9164 = vmatprep.subr.bf16.mxu1 %v10323_v43 }
 0x596   : > { %9165 = vmatpush2.bf16.msra.mxu1 %v10322_v61 }
 0x597   : > { %9166 = vmatprep.subr.bf16.mxu1 %v10315_v39 }
 0x59a   : > { %9167 = vmatpush2.bf16.msra.mxu1 %v10314_v17 }
 0x59b   : > { %9168 = vmatprep.subr.bf16.mxu1 %v10307_v1  ;;  %v5411_v1 = vld [vmem:[#allocation3 + $0x70] sm:$0xff] }
 0x59e   : > { %9169 = vmatpush2.bf16.msra.mxu1 %v10306_v12 }
 0x5a1   : > { %9171 = vmatmul.mubr.bf16.vlgmr.msra.gmra.mxu1 %v12685_v3  ;;  %v8914_v36 = vpop.f32.mrf.mxu1 }
 0x5a2   : > { %v8915_v28 = vadd.f32 %v8914_v36, %v8871_v20  ;;  %v5412_v36 = vld [vmem:[#allocation3 + $0x78] sm:$0xff] }
 0x5a3   : > { %v8916_v22 = vpop.f32.mrf.mxu1 }
 0x5a4   : > { %v8917_v30 = vadd.f32 %v8916_v22, %v8873_v41  ;;  %v8958_v45 = vadd.f32 %v8957_v47, %v8915_v28 }
 0x5a5   : > { %v8918_v10 = vpop.f32.mrf.mxu1 }
 0x5a6   : > { %v8919_v48 = vadd.f32 %v8918_v10, %v8875_v13  ;;  %v8960_v3 = vadd.f32 %v8959_v31, %v8917_v30 }
 0x5a7   : > { %v8920_v32 = vpop.f32.mrf.mxu1 }
 0x5a8   : > { %v8921_v63 = vadd.f32 %v8920_v32, %v8877_v52  ;;  %v8962_v46 = vadd.f32 %v8961_v54, %v8919_v48 }
 0x5aa   : > { %v8964_v18 = vadd.f32 %v8963_v19, %v8921_v63 }
 0x5b7   : > { %v9043_v27 = vpop.f32.mrf.mxu0 }
 0x5b9   : > { %v9045_v40 = vpop.f32.mrf.mxu0 }
 0x5bb   : > { %v9047_v55 = vpop.f32.mrf.mxu0 }
 0x5bd   : > { %v9049_v37 = vpop.f32.mrf.mxu0 }
 0x5e1   : > { %v9000_v9 = vpop.f32.mrf.mxu1 }
 0x5e2   : > { %v9001_v51 = vadd.f32 %v9000_v9, %v8958_v45 }
 0x5e3   : > { %v9002_v16 = vpop.f32.mrf.mxu1 }
 0x5e4   : > { %v9185_v21 = vadd.f32 %v9001_v51, %v5401_v35  ;;  %v9003_v38 = vadd.f32 %v9002_v16, %v8960_v3 }
 0x5e5   : > { %v9004_v14 = vpop.f32.mrf.mxu1 }
 0x5e6   : > { %9201 = vst [vmem:[#allocation3 + $0x20] sm:$0xff] %v9185_v21  ;;  %v9186_v25 = vadd.f32 %v9003_v38, %v5402_v33  ;;  %v9005_v50 = vadd.f32 %v9004_v14, %v8962_v46 }
 0x5e7   : > { %v9006_v23 = vpop.f32.mrf.mxu1 }
 0x5e8   : > { %9202 = vst [vmem:[#allocation3 + $0x28] sm:$0xff] %v9186_v25  ;;  %v9193_v15 = vadd.f32 %v9005_v50, %v5409_v24  ;;  %v9007_v58 = vadd.f32 %v9006_v23, %v8964_v18 }
 0x5ea   : > { %9209 = vst [vmem:[#allocation3 + $0x60] sm:$0xff] %v9193_v15  ;;  %v9194_v53 = vadd.f32 %v9007_v58, %v5410_v57 }
 0x5ec   : > { %9210 = vst [vmem:[#allocation3 + $0x68] sm:$0xff] %v9194_v53 }
 0x5f7   : > { %v9129_v29 = vpop.f32.mrf.mxu0 }
 0x5f9   : > { %v9131_v2 = vpop.f32.mrf.mxu0 }
 0x5fb   : > { %v9133_v44 = vpop.f32.mrf.mxu0 }
 0x5fd   : > { %v9135_v17 = vpop.f32.mrf.mxu0 }
 0x621   : > { %v9086_v59 = vpop.f32.mrf.mxu1 }
 0x622   : > { %v9087_v4 = vadd.f32 %v9086_v59, %v9043_v27 }
 0x623   : > { %v9088_v60 = vpop.f32.mrf.mxu1 }
 0x624   : > { %v9089_v34 = vadd.f32 %v9088_v60, %v9045_v40  ;;  %v9130_v26 = vadd.f32 %v9129_v29, %v9087_v4 }
 0x625   : > { %v9090_v0 = vpop.f32.mrf.mxu1 }
 0x626   : > { %v9091_v7 = vadd.f32 %v9090_v0, %v9047_v55  ;;  %v9132_v8 = vadd.f32 %v9131_v2, %v9089_v34 }
 0x627   : > { %v9092_v5 = vpop.f32.mrf.mxu1 }
 0x628   : > { %v9093_v42 = vadd.f32 %v9092_v5, %v9049_v37  ;;  %v9134_v6 = vadd.f32 %v9133_v44, %v9091_v7 }
 0x62a   : > { %v9136_v13 = vadd.f32 %v9135_v17, %v9093_v42 }
 0x661   : > { %v9172_v49 = vpop.f32.mrf.mxu1 }
 0x662   : > { %v9173_v43 = vadd.f32 %v9172_v49, %v9130_v26 }
 0x663   : > { %v9174_v61 = vpop.f32.mrf.mxu1 }
 0x664   : > { %v9187_v39 = vadd.f32 %v9173_v43, %v5403_v56  ;;  %v9175_v11 = vadd.f32 %v9174_v61, %v9132_v8 }
 0x665   : > { %v9176_v12 = vpop.f32.mrf.mxu1 }
 0x666   : > { %9203 = vst [vmem:[#allocation3 + $0x30] sm:$0xff] %v9187_v39  ;;  %v9188_v20 = vadd.f32 %v9175_v11, %v5404_v62  ;;  %v9177_v41 = vadd.f32 %v9176_v12, %v9134_v6 }
 0x667   : > { %v9178_v52 = vpop.f32.mrf.mxu1 }
 0x668   : > { %9204 = vst [vmem:[#allocation3 + $0x38] sm:$0xff] %v9188_v20  ;;  %v9195_v22 = vadd.f32 %v9177_v41, %v5411_v1  ;;  %v9179_v47 = vadd.f32 %v9178_v52, %v9136_v13 }
 0x66a   : > { %9211 = vst [vmem:[#allocation3 + $0x70] sm:$0xff] %v9195_v22  ;;  %v9196_v10 = vadd.f32 %v9179_v47, %v5412_v36 }
 0x66c   : > { %9212 = vst [vmem:[#allocation3 + $0x78] sm:$0xff] %v9196_v10 }
 0x66d   : > { %10466 = shalt.err (!%p10463_p5)
}
 0x66e   : > { %s10522_s6 = smov 1024   ;;  %s10523_s23 = smov 64  }
 0x66f   : > { %10371 = dma.vmem_to_hbm [thread:$0]  (%p13043_p12), %s9224_s28, 2048, %s13078_s5, [#allocation4], %s10522_s6, %s10522_s6, %s10523_s23  }
 0x670   : > { %10498 = dma.done.wait (%p13043_p12), [#allocation4], 2048  }
 0x671   : > { %10500 = vsyncadd (%p13043_p12), [#allocation4], 4294965248 }
 0x672 PF: > { %s16_s22 = sadd.s32 1, %s10519_s22   ;;  %s13080_s18 = smov %s10507_s19 }
 0x673   : > { %p13_p6 = scmp.ge.s32.totalorder %s16_s22, 6   ;;  %s13081_s19 = smov %s10590_s27 }
 0x674   : > { %s13082_s20 = smov %s10515_s21  ;;  %s13083_s21 = smov %s13085_s24 }
 0x675   :  { %15 = sbr.rel (!%p13_p6) target bundleno = 3 (0x3), region = 109 }
 0x67a   :  { %9239 = vsyncpa [#allocation4], 1 }
 0x67b   :  { %9241 = vsyncpa [#allocation4 + $0x1], 1 }

</bundles_post_ra>
